<compile_context>
chip_gen: v7x
topology: tpu7x:2x2x1
jax: 0.10.0
libtpu: 0.0.40
codegen_flags: <defaults>
</compile_context>

<pallas_src>
import jax
import jax.numpy as jnp
from jax.experimental import pallas as pl
from jax.experimental.pallas import tpu as pltpu

D_IN = 12363
D_H1 = 1000
D_H1_PAD = 1024          # lane-dense padding of the 1000-wide hidden layer
D_H2 = 128
D_H3 = 64
N_HEADS = 24
HEAD_PAD = 128           # lane-dense padding of the 24-wide head output

TK = 6272                # fc1 reduction tile (K axis)
TN = 512                 # fc1 output tile (N axis) -> 2 tiles (parallel on v7x)
K_PAD = 12544            # = 2*TK = 128*98  (min 128-multiple is 12416; 1% extra)
K_TILES = K_PAD // TK    # 2
N_TILES = D_H1_PAD // TN  # 2


# ----------------------------- Kernel 1: fc1 --------------------------------
def _fc1_kernel(x_ref, w_ref, b_ref, o_ref):
    # x_ref, w_ref: bf16 tiles; b_ref, o_ref: fp32.
    k = pl.program_id(1)

    @pl.when(k == 0)
    def _():
        o_ref[...] = jnp.zeros_like(o_ref)

    # Output block is resident across the K axis (its index_map ignores k),
    # so accumulate straight into it (fp32 accumulation on the MXU).
    o_ref[...] += jnp.dot(
        x_ref[...], w_ref[...], preferred_element_type=jnp.float32
    )

    @pl.when(k == pl.num_programs(1) - 1)
    def _():
        o_ref[...] = jnp.maximum(o_ref[...] + b_ref[...], 0.0)


def fc1_relu(x_padded_bf16, w1p_bf16, b1p):
    """relu(x @ W1 + b1) with pre-padded bf16 weights / fp32 accumulation.

    x_padded_bf16: (B, K_PAD) bf16   w1p_bf16: (K_PAD, D_H1_PAD) bf16
    b1p: (1, D_H1_PAD) fp32
    returns h1_padded: (B, D_H1_PAD) fp32  (cols >= 1000 are zero)
    """
    B = x_padded_bf16.shape[0]
    cost = pl.CostEstimate(
        flops=2 * B * K_PAD * D_H1_PAD,
        transcendentals=0,
        bytes_accessed=(K_PAD * D_H1_PAD * 2      # W1 (bf16)
                        + B * K_PAD * 2            # x  (bf16)
                        + D_H1_PAD * 4             # b1
                        + B * D_H1_PAD * 4),       # out
    )
    return pl.pallas_call(
        _fc1_kernel,
        out_shape=jax.ShapeDtypeStruct((B, D_H1_PAD), jnp.float32),
        grid_spec=pltpu.PrefetchScalarGridSpec(
            num_scalar_prefetch=0,
            grid=(N_TILES, K_TILES),
            in_specs=[
                pl.BlockSpec((B, TK), lambda n, k: (0, k)),
                pl.BlockSpec((TK, TN), lambda n, k: (k, n)),
                pl.BlockSpec((1, TN), lambda n, k: (0, n)),
            ],
            out_specs=pl.BlockSpec((B, TN), lambda n, k: (0, n)),
        ),
        compiler_params=pltpu.CompilerParams(
            dimension_semantics=("parallel", "arbitrary"),
            vmem_limit_bytes=32 * 1024 * 1024,
        ),
        cost_estimate=cost,
    )(x_padded_bf16, w1p_bf16, b1p)


# ------------------------ Kernel 2: fc3 + 24 heads ---------------------------
def _heads_kernel(h1_ref, w3_ref, b3_ref, w4_ref, b4_ref, w5_ref, b5_ref, o_ref):
    # h2 = relu(h1 @ W3 + b3)                           (B, 128)
    h2 = jnp.maximum(
        jnp.dot(h1_ref[...], w3_ref[...], preferred_element_type=jnp.float32)
        + b3_ref[...],
        0.0,
    )
    # u = relu(h2 @ [W4_0 | ... | W4_23] + b4)          (B, 24*64)
    u = jnp.maximum(
        jnp.dot(h2, w4_ref[...], preferred_element_type=jnp.float32)
        + b4_ref[...],
        0.0,
    )
    # out = u @ blockdiag(W5_0..W5_23) + b5, padded to 128 lanes   (B, 128)
    o_ref[...] = (
        jnp.dot(u, w5_ref[...], preferred_element_type=jnp.float32) + b5_ref[...]
    )


def trunk_and_heads(h1, w3p, b3, w4_cat, b4_cat, w5_bd, b5_pad):
    B = h1.shape[0]
    cost = pl.CostEstimate(
        flops=2 * B * (D_H1_PAD * D_H2 + D_H2 * N_HEADS * D_H3
                       + N_HEADS * D_H3 * HEAD_PAD),
        transcendentals=0,
        bytes_accessed=(B * D_H1_PAD * 4 + D_H1_PAD * D_H2 * 4
                        + D_H2 * N_HEADS * D_H3 * 4
                        + N_HEADS * D_H3 * HEAD_PAD * 4
                        + B * HEAD_PAD * 4),
    )
    return pl.pallas_call(
        _heads_kernel,
        out_shape=jax.ShapeDtypeStruct((B, HEAD_PAD), jnp.float32),
        in_specs=[pl.BlockSpec(memory_space=pltpu.MemorySpace.VMEM)] * 7,
        out_specs=pl.BlockSpec(memory_space=pltpu.MemorySpace.VMEM),
        cost_estimate=cost,
    )(h1, w3p, b3, w4_cat, b4_cat, w5_bd, b5_pad)


# ------------------------------ Full forward ---------------------------------
@jax.jit
def net24_forward(x, params):
    # Only the activations are padded/cast per call (cheap); all weight
    # padding / bf16 casting was done once at init.
    x_p = jnp.pad(x, ((0, 0), (0, K_PAD - D_IN))).astype(jnp.bfloat16)
    h1 = fc1_relu(x_p, params["w1p"], params["b1p"])
    out_pad = trunk_and_heads(
        h1,
        params["w3p"],
        params["b3"],
        params["w4_cat"],
        params["b4_cat"],
        params["w5_bd"],
        params["b5_pad"],
    )
    out = out_pad[:, :N_HEADS]
    # Split (B, 24) into the 24 (B, 1) outputs, matching the PyTorch tuple.
    return tuple(out[:, h : h + 1] for h in range(N_HEADS))


# -------------------------- Deterministic params ------------------------------
def init_params(key):
    keys = jax.random.split(key, 8)
    w1 = jax.random.normal(keys[0], (D_IN, D_H1), jnp.float32) * 0.01
    b1 = jax.random.normal(keys[1], (1, D_H1), jnp.float32) * 0.01
    w3 = jax.random.normal(keys[2], (D_H1, D_H2), jnp.float32) * 0.05
    b3 = jax.random.normal(keys[3], (1, D_H2), jnp.float32) * 0.05
    # Per-head weights: fc4h (128 -> 64), fc5h (64 -> 1)
    w4 = jax.random.normal(keys[4], (N_HEADS, D_H2, D_H3), jnp.float32) * 0.05
    b4 = jax.random.normal(keys[5], (N_HEADS, D_H3), jnp.float32) * 0.05
    w5 = jax.random.normal(keys[6], (N_HEADS, D_H3), jnp.float32) * 0.05
    b5 = jax.random.normal(keys[7], (N_HEADS,), jnp.float32) * 0.05

    # --- One-time padding / casting for the kernel path ---
    # W1: (D_IN, 1000) -> (K_PAD, 1024) and cast to bf16 (the dominant stream).
    w1p = jnp.pad(w1, ((0, K_PAD - D_IN), (0, D_H1_PAD - D_H1))).astype(jnp.bfloat16)
    b1p = jnp.pad(b1, ((0, 0), (0, D_H1_PAD - D_H1)))                 # fp32
    # W3 rows padded 1000 -> 1024 so h1_padded @ W3_padded == h1 @ W3.
    w3p = jnp.pad(w3, ((0, D_H1_PAD - D_H1), (0, 0)))

    # Concatenate the 24 head-first layers along the output axis: (128, 24*64)
    w4_cat = jnp.transpose(w4, (1, 0, 2)).reshape(D_H2, N_HEADS * D_H3)
    b4_cat = b4.reshape(1, N_HEADS * D_H3)
    # Block-diagonal second-layer weights, padded to 128 output lanes.
    w5_bd = jnp.zeros((N_HEADS * D_H3, HEAD_PAD), jnp.float32)
    for h in range(N_HEADS):
        w5_bd = w5_bd.at[h * D_H3 : (h + 1) * D_H3, h].set(w5[h])
    b5_pad = jnp.zeros((1, HEAD_PAD), jnp.float32).at[0, :N_HEADS].set(b5)

    params = dict(
        w1p=w1p, b1p=b1p, w3p=w3p, b3=b3,
        w4_cat=w4_cat, b4_cat=b4_cat, w5_bd=w5_bd, b5_pad=b5_pad,
    )
    raw = dict(w1=w1, b1=b1, w3=w3, b3=b3, w4=w4, b4=b4, w5=w5, b5=b5)
    return params, raw


# ------------------------------ Reference (JAX) -------------------------------
def net24_reference(x, raw):
    # Matches the kernel's numerics: fc1 uses bf16 inputs with fp32
    # accumulation; everything downstream is fp32.
    h1 = jnp.maximum(
        jnp.dot(
            x.astype(jnp.bfloat16),
            raw["w1"].astype(jnp.bfloat16),
            preferred_element_type=jnp.float32,
        )
        + raw["b1"],
        0.0,
    )
    h2 = jnp.maximum(h1 @ raw["w3"] + raw["b3"], 0.0)
    outs = []
    for h in range(N_HEADS):
        u = jnp.maximum(h2 @ raw["w4"][h] + raw["b4"][h], 0.0)
        outs.append(u @ raw["w5"][h][:, None] + raw["b5"][h])
    return tuple(outs)


if __name__ == "__main__":
    key = jax.random.PRNGKey(0)
    pkey, xkey = jax.random.split(key)
    params, raw = init_params(pkey)

    B = 16  # multiple of 16 (bf16 sublane pack); feature dim fixed at 12363
    x = jax.random.normal(xkey, (B, D_IN), jnp.float32)

    outs = net24_forward(x, params)
    outs = jax.block_until_ready(outs)

    # Sanity check against a pure-JAX reference with identical bf16 fc1 /
    # fp32-everything-else numerics (only fp32 summation order differs).
    refs = net24_reference(x, raw)
    for o, r in zip(outs, refs):
        assert o.shape == (B, 1)
        assert jnp.allclose(o, r, atol=2e-3, rtol=2e-3)

    print("KERNEL_OK")
</pallas_src>

<mosaic_0001>
module attributes {stable_mosaic.version = 11 : i64} {
  func.func @_fc1_kernel(%arg0: i32, %arg1: i32, %arg2: memref<16x6272xbf16, #tpu.memory_space<vmem>>, %arg3: memref<6272x512xbf16, #tpu.memory_space<vmem>>, %arg4: memref<1x512xf32, #tpu.memory_space<vmem>>, %arg5: memref<16x512xf32, #tpu.memory_space<vmem>>) attributes {dimension_semantics = [#tpu.dimension_semantics<parallel>, #tpu.dimension_semantics<arbitrary>], iteration_bounds = array<i64: 2, 2>, scalar_prefetch = 0 : i64, scratch_operands = 0 : i64, tpu.core_type = #tpu.core_type<tc>, window_params = [{transform_indices = @transform_0, window_bounds = array<i64: 16, 6272>}, {transform_indices = @transform_1, window_bounds = array<i64: 6272, 512>}, {transform_indices = @transform_2, window_bounds = array<i64: 1, 512>}, {transform_indices = @transform_3, window_bounds = array<i64: 16, 512>}]} {
    %c0_i32 = arith.constant 0 : i32
    %0 = arith.cmpi eq, %arg1, %c0_i32 : i32
    %1 = arith.extui %0 : i1 to i32
    %c0_i32_0 = arith.constant 0 : i32
    %2 = arith.cmpi ne, %1, %c0_i32_0 : i32
    scf.if %2 {
      %cst_9 = arith.constant 0.000000e+00 : f32
      %12 = vector.broadcast %cst_9 : f32 to vector<16x512xf32>
      %c0_10 = arith.constant 0 : index
      %c0_11 = arith.constant 0 : index
      %13 = vector.load %arg5[%c0_10, %c0_11] : memref<16x512xf32, #tpu.memory_space<vmem>>, vector<16x512xf32>
      tpu.vector_store %arg5[%c0_10, %c0_11], %12 {strides = array<i32>} : memref<16x512xf32, #tpu.memory_space<vmem>>, vector<16x512xf32>,
    } else {
    }
    %c0 = arith.constant 0 : index
    %c0_1 = arith.constant 0 : index
    %3 = vector.load %arg5[%c0, %c0_1] : memref<16x512xf32, #tpu.memory_space<vmem>>, vector<16x512xf32>
    %c0_2 = arith.constant 0 : index
    %c0_3 = arith.constant 0 : index
    %4 = vector.load %arg2[%c0_2, %c0_3] : memref<16x6272xbf16, #tpu.memory_space<vmem>>, vector<16x6272xbf16>
    %c0_4 = arith.constant 0 : index
    %c0_5 = arith.constant 0 : index
    %5 = vector.load %arg3[%c0_4, %c0_5] : memref<6272x512xbf16, #tpu.memory_space<vmem>>, vector<6272x512xbf16>
    %cst = arith.constant dense<0.000000e+00> : vector<16x512xf32>
    %6 = tpu.matmul %4, %5, %cst {dimension_numbers = #tpu.dot_dimension_numbers<[1], [0], [0], [1], [0, 0, 1, 1], [], []>} : vector<16x6272xbf16>, vector<6272x512xbf16>, vector<16x512xf32> -> vector<16x512xf32>
    %7 = arith.addf %3, %6 : vector<16x512xf32>
    %c0_6 = arith.constant 0 : index
    %c0_7 = arith.constant 0 : index
    %8 = vector.load %arg5[%c0_6, %c0_7] : memref<16x512xf32, #tpu.memory_space<vmem>>, vector<16x512xf32>
    tpu.vector_store %arg5[%c0_6, %c0_7], %7 {strides = array<i32>} : memref<16x512xf32, #tpu.memory_space<vmem>>, vector<16x512xf32>,
    %c1_i32 = arith.constant 1 : i32
    %9 = arith.cmpi eq, %arg1, %c1_i32 : i32
    %10 = arith.extui %9 : i1 to i32
    %c0_i32_8 = arith.constant 0 : i32
    %11 = arith.cmpi ne, %10, %c0_i32_8 : i32
    scf.if %11 {
      %c0_9 = arith.constant 0 : index
      %c0_10 = arith.constant 0 : index
      %12 = vector.load %arg5[%c0_9, %c0_10] : memref<16x512xf32, #tpu.memory_space<vmem>>, vector<16x512xf32>
      %c0_11 = arith.constant 0 : index
      %c0_12 = arith.constant 0 : index
      %13 = vector.load %arg4[%c0_11, %c0_12] : memref<1x512xf32, #tpu.memory_space<vmem>>, vector<1x512xf32>
      %14 = vector.broadcast %13 : vector<1x512xf32> to vector<16x512xf32>
      %15 = arith.addf %12, %14 : vector<16x512xf32>
      %cst_13 = arith.constant 0.000000e+00 : f32
      %16 = vector.broadcast %cst_13 : f32 to vector<16x512xf32>
      %17 = arith.maximumf %15, %16 : vector<16x512xf32>
      %c0_14 = arith.constant 0 : index
      %c0_15 = arith.constant 0 : index
      %18 = vector.load %arg5[%c0_14, %c0_15] : memref<16x512xf32, #tpu.memory_space<vmem>>, vector<16x512xf32>
      tpu.vector_store %arg5[%c0_14, %c0_15], %17 {strides = array<i32>} : memref<16x512xf32, #tpu.memory_space<vmem>>, vector<16x512xf32>,
    } else {
    }
    return
  }
  func.func @transform_0(%arg0: i32, %arg1: i32) -> (i32, i32) {
    %c0_i32 = arith.constant 0 : i32
    %c0_i32_0 = arith.constant 0 : i32
    return %c0_i32, %arg1 : i32, i32
  }
  func.func @transform_1(%arg0: i32, %arg1: i32) -> (i32, i32) {
    %c0_i32 = arith.constant 0 : i32
    return %arg1, %arg0 : i32, i32
  }
  func.func @transform_2(%arg0: i32, %arg1: i32) -> (i32, i32) {
    %c0_i32 = arith.constant 0 : i32
    %c0_i32_0 = arith.constant 0 : i32
    return %c0_i32, %arg0 : i32, i32
  }
  func.func @transform_3(%arg0: i32, %arg1: i32) -> (i32, i32) {
    %c0_i32 = arith.constant 0 : i32
    %c0_i32_0 = arith.constant 0 : i32
    return %c0_i32, %arg0 : i32, i32
  }
}

module attributes {stable_mosaic.version = 11 : i64} {
  func.func @_heads_kernel(%arg0: memref<16x1024xf32, #tpu.memory_space<vmem>>, %arg1: memref<1024x128xf32, #tpu.memory_space<vmem>>, %arg2: memref<1x128xf32, #tpu.memory_space<vmem>>, %arg3: memref<128x1536xf32, #tpu.memory_space<vmem>>, %arg4: memref<1x1536xf32, #tpu.memory_space<vmem>>, %arg5: memref<1536x128xf32, #tpu.memory_space<vmem>>, %arg6: memref<1x128xf32, #tpu.memory_space<vmem>>, %arg7: memref<16x128xf32, #tpu.memory_space<vmem>>) attributes {dimension_semantics = [], scalar_prefetch = 0 : i64, scratch_operands = 0 : i64, tpu.core_type = #tpu.core_type<tc>} {
    %c0 = arith.constant 0 : index
    %c0_0 = arith.constant 0 : index
    %0 = vector.load %arg0[%c0, %c0_0] : memref<16x1024xf32, #tpu.memory_space<vmem>>, vector<16x1024xf32>
    %c0_1 = arith.constant 0 : index
    %c0_2 = arith.constant 0 : index
    %1 = vector.load %arg1[%c0_1, %c0_2] : memref<1024x128xf32, #tpu.memory_space<vmem>>, vector<1024x128xf32>
    %cst = arith.constant dense<0.000000e+00> : vector<16x128xf32>
    %2 = tpu.matmul %0, %1, %cst {dimension_numbers = #tpu.dot_dimension_numbers<[1], [0], [0], [1], [0, 0, 1, 1], [], []>} : vector<16x1024xf32>, vector<1024x128xf32>, vector<16x128xf32> -> vector<16x128xf32>
    %c0_3 = arith.constant 0 : index
    %c0_4 = arith.constant 0 : index
    %3 = vector.load %arg2[%c0_3, %c0_4] : memref<1x128xf32, #tpu.memory_space<vmem>>, vector<1x128xf32>
    %4 = vector.broadcast %3 : vector<1x128xf32> to vector<16x128xf32>
    %5 = arith.addf %2, %4 : vector<16x128xf32>
    %cst_5 = arith.constant 0.000000e+00 : f32
    %6 = vector.broadcast %cst_5 : f32 to vector<16x128xf32>
    %7 = arith.maximumf %5, %6 : vector<16x128xf32>
    %c0_6 = arith.constant 0 : index
    %c0_7 = arith.constant 0 : index
    %8 = vector.load %arg3[%c0_6, %c0_7] : memref<128x1536xf32, #tpu.memory_space<vmem>>, vector<128x1536xf32>
    %cst_8 = arith.constant dense<0.000000e+00> : vector<16x1536xf32>
    %9 = tpu.matmul %7, %8, %cst_8 {dimension_numbers = #tpu.dot_dimension_numbers<[1], [0], [0], [1], [0, 0, 1, 1], [], []>} : vector<16x128xf32>, vector<128x1536xf32>, vector<16x1536xf32> -> vector<16x1536xf32>
    %c0_9 = arith.constant 0 : index
    %c0_10 = arith.constant 0 : index
    %10 = vector.load %arg4[%c0_9, %c0_10] : memref<1x1536xf32, #tpu.memory_space<vmem>>, vector<1x1536xf32>
    %11 = vector.broadcast %10 : vector<1x1536xf32> to vector<16x1536xf32>
    %12 = arith.addf %9, %11 : vector<16x1536xf32>
    %cst_11 = arith.constant 0.000000e+00 : f32
    %13 = vector.broadcast %cst_11 : f32 to vector<16x1536xf32>
    %14 = arith.maximumf %12, %13 : vector<16x1536xf32>
    %c0_12 = arith.constant 0 : index
    %c0_13 = arith.constant 0 : index
    %15 = vector.load %arg5[%c0_12, %c0_13] : memref<1536x128xf32, #tpu.memory_space<vmem>>, vector<1536x128xf32>
    %cst_14 = arith.constant dense<0.000000e+00> : vector<16x128xf32>
    %16 = tpu.matmul %14, %15, %cst_14 {dimension_numbers = #tpu.dot_dimension_numbers<[1], [0], [0], [1], [0, 0, 1, 1], [], []>} : vector<16x1536xf32>, vector<1536x128xf32>, vector<16x128xf32> -> vector<16x128xf32>
    %c0_15 = arith.constant 0 : index
    %c0_16 = arith.constant 0 : index
    %17 = vector.load %arg6[%c0_15, %c0_16] : memref<1x128xf32, #tpu.memory_space<vmem>>, vector<1x128xf32>
    %18 = vector.broadcast %17 : vector<1x128xf32> to vector<16x128xf32>
    %19 = arith.addf %16, %18 : vector<16x128xf32>
    %c0_17 = arith.constant 0 : index
    %c0_18 = arith.constant 0 : index
    %20 = vector.load %arg7[%c0_17, %c0_18] : memref<16x128xf32, #tpu.memory_space<vmem>>, vector<16x128xf32>
    tpu.vector_store %arg7[%c0_17, %c0_18], %19 {strides = array<i32>} : memref<16x128xf32, #tpu.memory_space<vmem>>, vector<16x128xf32>,
    return
  }
}

</mosaic_0001>

<bundles_post_ra>
// kernel: net24_forward.3
= control target key start
LH: loop header
LB: loop body
LE: loop exit
PB: predicated region body
PF: predicated region fallthrough
CT: control target
= control target key end

     0   :  { %s4478_s1 = inlined_call_operand.vmem [shape: f32[1024,128], index: 1, kind: input, shape index: {}]   ;;  %s4479_s0 = inlined_call_operand.vmem [shape: f32[16,1024], index: 0, kind: input, shape index: {}]   ;;  %s4480_s3 = inlined_call_operand.vmem [shape: f32[128,1536], index: 3, kind: input, shape index: {}]   ;;  %s4481_s2 = inlined_call_operand.vmem [shape: f32[1,128], index: 2, kind: input, shape index: {}]   ;;  %s4482_s5 = inlined_call_operand.vmem [shape: f32[1536,128], index: 5, kind: input, shape index: {}]   ;;  %s4483_s4 = inlined_call_operand.vmem [shape: f32[1,1536], index: 4, kind: input, shape index: {}]   ;;  %s4484_s6 = inlined_call_operand.vmem [shape: f32[1,128], index: 6, kind: input, shape index: {}]   ;;  %s4485_s7 = inlined_call_operand.vmem [shape: f32[16,128], index: 7, kind: output, shape index: {}]  }
   0x1   :  { %v58_v0 = vld [vmem:[%s4478_s1 + $0x80] sm:$0xff]  ;;  %v59_v1 = vld [vmem:[%s4478_s1 + $0x88] sm:$0xff]  ;;  %v60_v11 = vld [vmem:[%s4478_s1 + $0x90] sm:$0xff] }
   0x2   :  { %v42_v2 = vld [vmem:[%s4478_s1] sm:$0xff]  ;;  %v2258_v3 = vpack.c.bf16 %v59_v1, %v58_v0  ;;  %v43_v4 = vld [vmem:[%s4478_s1 + $0x8] sm:$0xff]  ;;  %v61_v13 = vld [vmem:[%s4478_s1 + $0x98] sm:$0xff] }
   0x3   :  { %v90_v5 = vld [vmem:[%s4478_s1 + $0x180] sm:$0xff]  ;;  %v91_v6 = vld [vmem:[%s4478_s1 + $0x188] sm:$0xff]  ;;  %v2260_v7 = vpack.c.bf16 %v43_v4, %v42_v2  ;;  %v44_v14 = vld [vmem:[%s4478_s1 + $0x10] sm:$0xff]  ;;  %v2262_v16 = vpack.c.bf16 %v61_v13, %v60_v11 }
   0x4   :  { %v2290_v8 = vpack.c.bf16 %v91_v6, %v90_v5  ;;  %v74_v9 = vld [vmem:[%s4478_s1 + $0x100] sm:$0xff]  ;;  %v75_v10 = vld [vmem:[%s4478_s1 + $0x108] sm:$0xff]  ;;  %2259 = vmatprep.subr.bf16.mxu0 %v2258_v3  ;;  %v45_v15 = vld [vmem:[%s4478_s1 + $0x18] sm:$0xff] }
   0x5   :  { %v2292_v12 = vpack.c.bf16 %v75_v10, %v74_v9  ;;  %2261 = vmatpush3.bf16.msra.mxu0 %v2260_v7  ;;  %v2264_v17 = vpack.c.bf16 %v45_v15, %v44_v14  ;;  %v92_v18 = vld [vmem:[%s4478_s1 + $0x190] sm:$0xff]  ;;  %v93_v19 = vld [vmem:[%s4478_s1 + $0x198] sm:$0xff]  ;;  %v62_v23 = vld [vmem:[%s4478_s1 + $0xa0] sm:$0xff] }
   0x6   :  { %2291 = vmatprep.subr.bf16.mxu1 %v2290_v8  ;;  %v76_v20 = vld [vmem:[%s4478_s1 + $0x110] sm:$0xff]  ;;  %v2294_v21 = vpack.c.bf16 %v93_v19, %v92_v18  ;;  %v77_v22 = vld [vmem:[%s4478_s1 + $0x118] sm:$0xff]  ;;  %v63_v24 = vld [vmem:[%s4478_s1 + $0xa8] sm:$0xff]  ;;  %2263 = vmatprep.subr.bf16.mxu0 %v2262_v16 }
   0x7   :  { %2293 = vmatpush3.bf16.msra.mxu1 %v2292_v12  ;;  %v2296_v25 = vpack.c.bf16 %v77_v22, %v76_v20  ;;  %v2266_v26 = vpack.c.bf16 %v63_v24, %v62_v23  ;;  %v46_v27 = vld [vmem:[%s4478_s1 + $0x20] sm:$0xff]  ;;  %v47_v28 = vld [vmem:[%s4478_s1 + $0x28] sm:$0xff]  ;;  %v64_v35 = vld [vmem:[%s4478_s1 + $0xb0] sm:$0xff] }
   0x8   :  { %v94_v29 = vld [vmem:[%s4478_s1 + $0x1a0] sm:$0xff]  ;;  %2295 = vmatprep.subr.bf16.mxu1 %v2294_v21  ;;  %v95_v30 = vld [vmem:[%s4478_s1 + $0x1a8] sm:$0xff]  ;;  %v2268_v33 = vpack.c.bf16 %v47_v28, %v46_v27  ;;  %v65_v36 = vld [vmem:[%s4478_s1 + $0xb8] sm:$0xff] }
   0x9   :  { %v78_v31 = vld [vmem:[%s4478_s1 + $0x120] sm:$0xff]  ;;  %v79_v32 = vld [vmem:[%s4478_s1 + $0x128] sm:$0xff]  ;;  %2265 = vmatpush3.bf16.msra.mxu0 %v2264_v17  ;;  %v2298_v34 = vpack.c.bf16 %v95_v30, %v94_v29  ;;  %v48_v37 = vld [vmem:[%s4478_s1 + $0x30] sm:$0xff]  ;;  %v2270_v39 = vpack.c.bf16 %v65_v36, %v64_v35 }
   0xa   :  { %2267 = vmatprep.subr.bf16.mxu0 %v2266_v26  ;;  %v2300_v38 = vpack.c.bf16 %v79_v32, %v78_v31  ;;  %v49_v40 = vld [vmem:[%s4478_s1 + $0x38] sm:$0xff]  ;;  %v96_v41 = vld [vmem:[%s4478_s1 + $0x1b0] sm:$0xff]  ;;  %v66_v46 = vld [vmem:[%s4478_s1 + $0xc0] sm:$0xff] }
   0xb   :  { %2297 = vmatpush3.bf16.msra.mxu1 %v2296_v25  ;;  %v97_v42 = vld [vmem:[%s4478_s1 + $0x1b8] sm:$0xff]  ;;  %v80_v44 = vld [vmem:[%s4478_s1 + $0x130] sm:$0xff]  ;;  %v67_v47 = vld [vmem:[%s4478_s1 + $0xc8] sm:$0xff]  ;;  %v2272_v48 = vpack.c.bf16 %v49_v40, %v48_v37 }
   0xc   :  { %2299 = vmatprep.subr.bf16.mxu1 %v2298_v34  ;;  %v2302_v43 = vpack.c.bf16 %v97_v42, %v96_v41  ;;  %v81_v45 = vld [vmem:[%s4478_s1 + $0x138] sm:$0xff]  ;;  %v98_v49 = vld [vmem:[%s4478_s1 + $0x1c0] sm:$0xff]  ;;  %v99_v50 = vld [vmem:[%s4478_s1 + $0x1c8] sm:$0xff]  ;;  %v2274_v52 = vpack.c.bf16 %v67_v47, %v66_v46 }
   0xd   :  { %2269 = vmatpush3.bf16.msra.mxu0 %v2268_v33  ;;  %v2304_v51 = vpack.c.bf16 %v81_v45, %v80_v44  ;;  %v50_v53 = vld [vmem:[%s4478_s1 + $0x40] sm:$0xff]  ;;  %v51_v54 = vld [vmem:[%s4478_s1 + $0x48] sm:$0xff]  ;;  %v2306_v56 = vpack.c.bf16 %v99_v50, %v98_v49  ;;  %v68_v58 = vld [vmem:[%s4478_s1 + $0xd0] sm:$0xff] }
   0xe   :  { %2271 = vmatprep.subr.bf16.mxu0 %v2270_v39  ;;  %v82_v55 = vld [vmem:[%s4478_s1 + $0x140] sm:$0xff]  ;;  %v83_v57 = vld [vmem:[%s4478_s1 + $0x148] sm:$0xff]  ;;  %v69_v59 = vld [vmem:[%s4478_s1 + $0xd8] sm:$0xff]  ;;  %v2276_v62 = vpack.c.bf16 %v51_v54, %v50_v53 }
   0xf   :  { %2301 = vmatpush3.bf16.msra.mxu1 %v2300_v38  ;;  %v100_v60 = vld [vmem:[%s4478_s1 + $0x1d0] sm:$0xff]  ;;  %v101_v61 = vld [vmem:[%s4478_s1 + $0x1d8] sm:$0xff]  ;;  %v2308_v63 = vpack.c.bf16 %v83_v57, %v82_v55  ;;  %v2278_v0 = vpack.c.bf16 %v69_v59, %v68_v58  ;;  %v70_v6 = vld [vmem:[%s4478_s1 + $0xe0] sm:$0xff] }
  0x10   :  { %2303 = vmatprep.subr.bf16.mxu1 %v2302_v43  ;;  %v52_v1 = vld [vmem:[%s4478_s1 + $0x50] sm:$0xff]  ;;  %v53_v2 = vld [vmem:[%s4478_s1 + $0x58] sm:$0xff]  ;;  %v2310_v4 = vpack.c.bf16 %v101_v61, %v100_v60  ;;  %v71_v7 = vld [vmem:[%s4478_s1 + $0xe8] sm:$0xff] }
  0x11   :  { %2273 = vmatpush3.bf16.msra.mxu0 %v2272_v48  ;;  %v84_v3 = vld [vmem:[%s4478_s1 + $0x150] sm:$0xff]  ;;  %v85_v5 = vld [vmem:[%s4478_s1 + $0x158] sm:$0xff]  ;;  %v102_v8 = vld [vmem:[%s4478_s1 + $0x1e0] sm:$0xff]  ;;  %v2280_v10 = vpack.c.bf16 %v53_v2, %v52_v1  ;;  %v2282_v14 = vpack.c.bf16 %v71_v7, %v70_v6 }
  0x12   :  { %2275 = vmatprep.subr.bf16.mxu0 %v2274_v52  ;;  %v103_v9 = vld [vmem:[%s4478_s1 + $0x1e8] sm:$0xff]  ;;  %v54_v11 = vld [vmem:[%s4478_s1 + $0x60] sm:$0xff]  ;;  %v2312_v13 = vpack.c.bf16 %v85_v5, %v84_v3  ;;  %v72_v19 = vld [vmem:[%s4478_s1 + $0xf0] sm:$0xff] }
  0x13   :  { %2305 = vmatpush3.bf16.msra.mxu1 %v2304_v51  ;;  %v55_v12 = vld [vmem:[%s4478_s1 + $0x68] sm:$0xff]  ;;  %v86_v15 = vld [vmem:[%s4478_s1 + $0x160] sm:$0xff]  ;;  %v2314_v18 = vpack.c.bf16 %v103_v9, %v102_v8  ;;  %v73_v20 = vld [vmem:[%s4478_s1 + $0xf8] sm:$0xff] }
  0x14   :  { %2307 = vmatprep.subr.bf16.mxu1 %v2306_v56  ;;  %v87_v16 = vld [vmem:[%s4478_s1 + $0x168] sm:$0xff]  ;;  %v29_v21 = vld [vmem:[%s4479_s0 + $0x18] sm:$0xff]  ;;  %v104_v22 = vld [vmem:[%s4478_s1 + $0x1f0] sm:$0xff]  ;;  %v2284_v24 = vpack.c.bf16 %v55_v12, %v54_v11  ;;  %v2286_v26 = vpack.c.bf16 %v73_v20, %v72_v19 }
  0x15   :  { %2277 = vmatpush3.bf16.msra.mxu0 %v2276_v62  ;;  %v27_v17 = vld [vmem:[%s4479_s0 + $0x8] sm:$0xff]  ;;  %v105_v23 = vld [vmem:[%s4478_s1 + $0x1f8] sm:$0xff]  ;;  %316 = vmatprep.mubr.f32.mxu1 %v29_v21  ;;  %v2316_v25 = vpack.c.bf16 %v87_v16, %v86_v15  ;;  %v56_v27 = vld [vmem:[%s4478_s1 + $0x70] sm:$0xff] }
  0x16   :  { %2279 = vmatprep.subr.bf16.mxu0 %v2278_v0  ;;  %241 = vmatprep.mubr.f32.mxu0 %v27_v17  ;;  %v57_v28 = vld [vmem:[%s4478_s1 + $0x78] sm:$0xff]  ;;  %v88_v29 = vld [vmem:[%s4478_s1 + $0x170] sm:$0xff]  ;;  %v2318_v30 = vpack.c.bf16 %v105_v23, %v104_v22  ;;  %v122_v32 = vld [vmem:[%s4478_s1 + $0x280] sm:$0xff] }
  0x17   :  { %2309 = vmatpush3.bf16.msra.mxu1 %v2308_v63  ;;  %v89_v31 = vld [vmem:[%s4478_s1 + $0x178] sm:$0xff]  ;;  %v123_v33 = vld [vmem:[%s4478_s1 + $0x288] sm:$0xff]  ;;  %v154_v34 = vld [vmem:[%s4478_s1 + $0x380] sm:$0xff]  ;;  %v2288_v36 = vpack.c.bf16 %v57_v28, %v56_v27 }
  0x18   :  { %2311 = vmatprep.subr.bf16.mxu1 %v2310_v4  ;;  %v155_v35 = vld [vmem:[%s4478_s1 + $0x388] sm:$0xff]  ;;  %v2320_v37 = vpack.c.bf16 %v89_v31, %v88_v29  ;;  %v2322_v38 = vpack.c.bf16 %v123_v33, %v122_v32  ;;  %v106_v39 = vld [vmem:[%s4478_s1 + $0x200] sm:$0xff]  ;;  %v124_v44 = vld [vmem:[%s4478_s1 + $0x290] sm:$0xff] }
  0x19   :  { %2281 = vmatpush3.bf16.msra.mxu0 %v2280_v10  ;;  %v107_v40 = vld [vmem:[%s4478_s1 + $0x208] sm:$0xff]  ;;  %v138_v41 = vld [vmem:[%s4478_s1 + $0x300] sm:$0xff]  ;;  %v2354_v42 = vpack.c.bf16 %v155_v35, %v154_v34  ;;  %v125_v45 = vld [vmem:[%s4478_s1 + $0x298] sm:$0xff] }
  0x1a   :  { %2283 = vmatprep.subr.bf16.mxu0 %v2282_v14  ;;  %v139_v43 = vld [vmem:[%s4478_s1 + $0x308] sm:$0xff]  ;;  %v156_v46 = vld [vmem:[%s4478_s1 + $0x390] sm:$0xff]  ;;  %v157_v47 = vld [vmem:[%s4478_s1 + $0x398] sm:$0xff]  ;;  %v2324_v49 = vpack.c.bf16 %v107_v40, %v106_v39  ;;  %v2326_v52 = vpack.c.bf16 %v125_v45, %v124_v44 }
  0x1b   :  { %2313 = vmatpush3.bf16.msra.mxu1 %v2312_v13  ;;  %v26_v48 = vld [vmem:[%s4479_s0] sm:$0xff]  ;;  %v28_v50 = vld [vmem:[%s4479_s0 + $0x10] sm:$0xff]  ;;  %v2356_v51 = vpack.c.bf16 %v139_v43, %v138_v41  ;;  %v109_v54 = vld [vmem:[%s4478_s1 + $0x218] sm:$0xff]  ;;  %v2358_v56 = vpack.c.bf16 %v157_v47, %v156_v46 }
  0x1c   :  { %2315 = vmatprep.subr.bf16.mxu1 %v2314_v18  ;;  %v108_v53 = vld [vmem:[%s4478_s1 + $0x210] sm:$0xff]  ;;  %v141_v57 = vld [vmem:[%s4478_s1 + $0x318] sm:$0xff]  ;;  %v126_v58 = vld [vmem:[%s4478_s1 + $0x2a0] sm:$0xff] }
  0x1d   :  { %2285 = vmatpush3.bf16.msra.mxu0 %v2284_v24  ;;  %v140_v55 = vld [vmem:[%s4478_s1 + $0x310] sm:$0xff]  ;;  %v127_v59 = vld [vmem:[%s4478_s1 + $0x2a8] sm:$0xff]  ;;  %v158_v60 = vld [vmem:[%s4478_s1 + $0x3a0] sm:$0xff]  ;;  %v2328_v62 = vpack.c.bf16 %v109_v54, %v108_v53 }
  0x1e   :  { %2287 = vmatprep.subr.bf16.mxu0 %v2286_v26  ;;  %v159_v61 = vld [vmem:[%s4478_s1 + $0x3a8] sm:$0xff]  ;;  %v2360_v63 = vpack.c.bf16 %v141_v57, %v140_v55  ;;  %v2330_v0 = vpack.c.bf16 %v127_v59, %v126_v58  ;;  %v110_v1 = vld [vmem:[%s4478_s1 + $0x220] sm:$0xff]  ;;  %v128_v6 = vld [vmem:[%s4478_s1 + $0x2b0] sm:$0xff] }
  0x1f   :  { %2317 = vmatpush3.bf16.msra.mxu1 %v2316_v25  ;;  %v111_v2 = vld [vmem:[%s4478_s1 + $0x228] sm:$0xff]  ;;  %v142_v3 = vld [vmem:[%s4478_s1 + $0x320] sm:$0xff]  ;;  %v2362_v4 = vpack.c.bf16 %v159_v61, %v158_v60  ;;  %v129_v7 = vld [vmem:[%s4478_s1 + $0x2b8] sm:$0xff] }
  0x20   :  { %2319 = vmatprep.subr.bf16.mxu1 %v2318_v30  ;;  %v143_v5 = vld [vmem:[%s4478_s1 + $0x328] sm:$0xff]  ;;  %v160_v8 = vld [vmem:[%s4478_s1 + $0x3b0] sm:$0xff]  ;;  %v161_v9 = vld [vmem:[%s4478_s1 + $0x3b8] sm:$0xff]  ;;  %v2332_v10 = vpack.c.bf16 %v111_v2, %v110_v1  ;;  %v2334_v15 = vpack.c.bf16 %v129_v7, %v128_v6 }
  0x21   :  { %2289 = vmatpush3.bf16.msra.mxu0 %v2288_v36  ;;  %v112_v11 = vld [vmem:[%s4478_s1 + $0x230] sm:$0xff]  ;;  %v113_v12 = vld [vmem:[%s4478_s1 + $0x238] sm:$0xff]  ;;  %v35_v13 = vld [vmem:[%s4479_s0 + $0x48] sm:$0xff]  ;;  %v2364_v14 = vpack.c.bf16 %v143_v5, %v142_v3  ;;  %v2366_v19 = vpack.c.bf16 %v161_v9, %v160_v8 }
  0x22   :  { %2323 = vmatprep.subr.bf16.mxu0 %v2322_v38  ;;  %v144_v16 = vld [vmem:[%s4478_s1 + $0x330] sm:$0xff]  ;;  %v145_v17 = vld [vmem:[%s4478_s1 + $0x338] sm:$0xff]  ;;  %v34_v18 = vld [vmem:[%s4479_s0 + $0x40] sm:$0xff]  ;;  %v2336_v26 = vpack.c.bf16 %v113_v12, %v112_v11 }
  0x23   :  { %2321 = vmatpush3.bf16.msra.mxu1 %v2320_v37  ;;  %v130_v20 = vld [vmem:[%s4478_s1 + $0x2c0] sm:$0xff]  ;;  %v131_v21 = vld [vmem:[%s4478_s1 + $0x2c8] sm:$0xff]  ;;  %v37_v22 = vld [vmem:[%s4479_s0 + $0x58] sm:$0xff]  ;;  %v2368_v29 = vpack.c.bf16 %v145_v17, %v144_v16 }
  0x24   :  { %2355 = vmatprep.subr.bf16.mxu1 %v2354_v42  ;;  %242 = vmatmul.mubr.f32.vlgmr.msra.gmra.mrb[0].mxu0 %v26_v48  ;;  %v162_v23 = vld [vmem:[%s4478_s1 + $0x3c0] sm:$0xff]  ;;  %v163_v24 = vld [vmem:[%s4478_s1 + $0x3c8] sm:$0xff]  ;;  %v36_v25 = vld [vmem:[%s4479_s0 + $0x50] sm:$0xff]  ;;  %v2338_v30 = vpack.c.bf16 %v131_v21, %v130_v20 }
  0x25   :  { %2325 = vmatpush3.bf16.msra.mxu0 %v2324_v49  ;;  %246 = vmatprep.mubr.f32.mxu0 %v35_v13  ;;  %v114_v27 = vld [vmem:[%s4478_s1 + $0x240] sm:$0xff]  ;;  %v115_v28 = vld [vmem:[%s4478_s1 + $0x248] sm:$0xff]  ;;  %v2370_v34 = vpack.c.bf16 %v163_v24, %v162_v23  ;;  %v132_v35 = vld [vmem:[%s4478_s1 + $0x2d0] sm:$0xff] }
  0x26   :  { %317 = vmatmul.mubr.f32.vlgmr.msra.gmra.mrb[0].mxu1 %v28_v50  ;;  %2327 = vmatprep.subr.bf16.mxu0 %v2326_v52  ;;  %v146_v31 = vld [vmem:[%s4478_s1 + $0x340] sm:$0xff]  ;;  %v147_v32 = vld [vmem:[%s4478_s1 + $0x348] sm:$0xff]  ;;  %v133_v36 = vld [vmem:[%s4478_s1 + $0x2d8] sm:$0xff]  ;;  %v2340_v40 = vpack.c.bf16 %v115_v28, %v114_v27 }
  0x27   :  { %2357 = vmatpush3.bf16.msra.mxu1 %v2356_v51  ;;  %321 = vmatprep.mubr.f32.mxu1 %v37_v22  ;;  %v31_v33 = vld [vmem:[%s4479_s0 + $0x28] sm:$0xff]  ;;  %v33_v37 = vld [vmem:[%s4479_s0 + $0x38] sm:$0xff]  ;;  %v164_v38 = vld [vmem:[%s4478_s1 + $0x3d0] sm:$0xff]  ;;  %v2372_v41 = vpack.c.bf16 %v147_v32, %v146_v31  ;;  %v2342_v42 = vpack.c.bf16 %v133_v36, %v132_v35 }
  0x28   :  { %2359 = vmatprep.subr.bf16.mxu1 %v2358_v56  ;;  %247 = vmatmul.mubr.f32.gmra.mrb[2].mxu0 %v34_v18  ;;  %v165_v39 = vld [vmem:[%s4478_s1 + $0x3d8] sm:$0xff]  ;;  %v116_v43 = vld [vmem:[%s4478_s1 + $0x250] sm:$0xff]  ;;  %v134_v48 = vld [vmem:[%s4478_s1 + $0x2e0] sm:$0xff] }
  0x29   :  { %2329 = vmatpush3.bf16.msra.mxu0 %v2328_v62  ;;  %391 = vmatprep.mubr.f32.mxu0 %v31_v33  ;;  %v117_v44 = vld [vmem:[%s4478_s1 + $0x258] sm:$0xff]  ;;  %v148_v45 = vld [vmem:[%s4478_s1 + $0x350] sm:$0xff]  ;;  %v2374_v46 = vpack.c.bf16 %v165_v39, %v164_v38  ;;  %v135_v49 = vld [vmem:[%s4478_s1 + $0x2e8] sm:$0xff] }
  0x2a   :  { %2331 = vmatprep.subr.bf16.mxu0 %v2330_v0  ;;  %322 = vmatmul.mubr.f32.gmra.mrb[2].mxu1 %v36_v25  ;;  %v149_v47 = vld [vmem:[%s4478_s1 + $0x358] sm:$0xff]  ;;  %v166_v50 = vld [vmem:[%s4478_s1 + $0x3e0] sm:$0xff]  ;;  %v167_v51 = vld [vmem:[%s4478_s1 + $0x3e8] sm:$0xff]  ;;  %v2344_v52 = vpack.c.bf16 %v117_v44, %v116_v43  ;;  %v2346_v54 = vpack.c.bf16 %v135_v49, %v134_v48 }
  0x2b   :  { %2361 = vmatpush3.bf16.msra.mxu1 %v2360_v63  ;;  %466 = vmatprep.mubr.f32.mxu1 %v33_v37  ;;  %v2376_v53 = vpack.c.bf16 %v149_v47, %v148_v45  ;;  %v118_v55 = vld [vmem:[%s4478_s1 + $0x260] sm:$0xff]  ;;  %v119_v56 = vld [vmem:[%s4478_s1 + $0x268] sm:$0xff]  ;;  %v2378_v58 = vpack.c.bf16 %v167_v51, %v166_v50  ;;  %v136_v60 = vld [vmem:[%s4478_s1 + $0x2f0] sm:$0xff] }
  0x2c   :  { %2363 = vmatprep.subr.bf16.mxu1 %v2362_v4  ;;  %v150_v57 = vld [vmem:[%s4478_s1 + $0x360] sm:$0xff]  ;;  %v151_v59 = vld [vmem:[%s4478_s1 + $0x368] sm:$0xff]  ;;  %v137_v61 = vld [vmem:[%s4478_s1 + $0x2f8] sm:$0xff]  ;;  %v2348_v0 = vpack.c.bf16 %v119_v56, %v118_v55 }
  0x2d   :  { %2333 = vmatpush3.bf16.msra.mxu0 %v2332_v10  ;;  %v168_v62 = vld [vmem:[%s4478_s1 + $0x3f0] sm:$0xff]  ;;  %v169_v63 = vld [vmem:[%s4478_s1 + $0x3f8] sm:$0xff]  ;;  %v2380_v1 = vpack.c.bf16 %v151_v59, %v150_v57  ;;  %v2350_v2 = vpack.c.bf16 %v137_v61, %v136_v60  ;;  %v30_v10 = vld [vmem:[%s4479_s0 + $0x20] sm:$0xff] }
  0x2e   :  { %2335 = vmatprep.subr.bf16.mxu0 %v2334_v15  ;;  %v120_v3 = vld [vmem:[%s4478_s1 + $0x270] sm:$0xff]  ;;  %v121_v4 = vld [vmem:[%s4478_s1 + $0x278] sm:$0xff]  ;;  %v2382_v5 = vpack.c.bf16 %v169_v63, %v168_v62  ;;  %v39_v12 = vld [vmem:[%s4479_s0 + $0x68] sm:$0xff] }
  0x2f   :  { %2365 = vmatpush3.bf16.msra.mxu1 %v2364_v14  ;;  %v152_v6 = vld [vmem:[%s4478_s1 + $0x370] sm:$0xff]  ;;  %v153_v7 = vld [vmem:[%s4478_s1 + $0x378] sm:$0xff]  ;;  %v2352_v8 = vpack.c.bf16 %v121_v4, %v120_v3  ;;  %v38_v14 = vld [vmem:[%s4479_s0 + $0x60] sm:$0xff] }
  0x30   :  { %2367 = vmatprep.subr.bf16.mxu1 %v2366_v19  ;;  %v2384_v9 = vpack.c.bf16 %v153_v7, %v152_v6  ;;  %v32_v11 = vld [vmem:[%s4479_s0 + $0x30] sm:$0xff]  ;;  %v41_v13 = vld [vmem:[%s4479_s0 + $0x78] sm:$0xff]  ;;  %v480_v16 = vld [vmem:[%s4480_s3 + $0x8] sm:$0xff] }
  0x31   :  { %2337 = vmatpush3.bf16.msra.mxu0 %v2336_v26  ;;  %v40_v15 = vld [vmem:[%s4479_s0 + $0x70] sm:$0xff]  ;;  %v492_v17 = vld [vmem:[%s4480_s3 + $0x68] sm:$0xff]  ;;  %v482_v18 = vld [vmem:[%s4480_s3 + $0x18] sm:$0xff] }
  0x32   :  { %2339 = vmatprep.subr.bf16.mxu0 %v2338_v30  ;;  %v2386_v19 = vpack.c.bf16 %v492_v17, %v480_v16  ;;  %v494_v20 = vld [vmem:[%s4480_s3 + $0x78] sm:$0xff]  ;;  %v479_v21 = vld [vmem:[%s4480_s3] sm:$0xff]  ;;  %v481_v25 = vld [vmem:[%s4480_s3 + $0x10] sm:$0xff] }
  0x33   :  { %2369 = vmatpush3.bf16.msra.mxu1 %v2368_v29  ;;  %v491_v22 = vld [vmem:[%s4480_s3 + $0x60] sm:$0xff]  ;;  %v2418_v23 = vpack.c.bf16 %v494_v20, %v482_v18  ;;  %v493_v26 = vld [vmem:[%s4480_s3 + $0x70] sm:$0xff]  ;;  %v504_v27 = vld [vmem:[%s4480_s3 + $0xc8] sm:$0xff] }
  0x34   :  { %2371 = vmatprep.subr.bf16.mxu1 %v2370_v34  ;;  %v2388_v24 = vpack.c.bf16 %v491_v22, %v479_v21  ;;  %v2420_v28 = vpack.c.bf16 %v493_v26, %v481_v25  ;;  %v516_v29 = vld [vmem:[%s4480_s3 + $0x128] sm:$0xff]  ;;  %v506_v30 = vld [vmem:[%s4480_s3 + $0xd8] sm:$0xff]  ;;  %v503_v34 = vld [vmem:[%s4480_s3 + $0xc0] sm:$0xff] }
  0x35   :  { %2341 = vmatpush3.bf16.msra.mxu0 %v2340_v40  ;;  %v518_v31 = vld [vmem:[%s4480_s3 + $0x138] sm:$0xff]  ;;  %v2390_v32 = vpack.c.bf16 %v516_v29, %v504_v27  ;;  %v515_v35 = vld [vmem:[%s4480_s3 + $0x120] sm:$0xff]  ;;  %v505_v36 = vld [vmem:[%s4480_s3 + $0xd0] sm:$0xff] }
  0x36   :  { %2343 = vmatprep.subr.bf16.mxu0 %v2342_v42  ;;  %v2422_v33 = vpack.c.bf16 %v518_v31, %v506_v30  ;;  %v2392_v37 = vpack.c.bf16 %v515_v35, %v503_v34  ;;  %v517_v38 = vld [vmem:[%s4480_s3 + $0x130] sm:$0xff]  ;;  %v528_v39 = vld [vmem:[%s4480_s3 + $0x188] sm:$0xff]  ;;  %v530_v43 = vld [vmem:[%s4480_s3 + $0x198] sm:$0xff] }
  0x37   :  { %2373 = vmatpush3.bf16.msra.mxu1 %v2372_v41  ;;  %v540_v40 = vld [vmem:[%s4480_s3 + $0x1e8] sm:$0xff]  ;;  %v2424_v41 = vpack.c.bf16 %v517_v38, %v505_v36  ;;  %v542_v44 = vld [vmem:[%s4480_s3 + $0x1f8] sm:$0xff]  ;;  %v527_v45 = vld [vmem:[%s4480_s3 + $0x180] sm:$0xff] }
  0x38   :  { %2375 = vmatprep.subr.bf16.mxu1 %v2374_v46  ;;  %v2394_v42 = vpack.c.bf16 %v540_v40, %v528_v39  ;;  %v2426_v46 = vpack.c.bf16 %v542_v44, %v530_v43  ;;  %v539_v47 = vld [vmem:[%s4480_s3 + $0x1e0] sm:$0xff]  ;;  %v529_v48 = vld [vmem:[%s4480_s3 + $0x190] sm:$0xff]  ;;  %v552_v51 = vld [vmem:[%s4480_s3 + $0x248] sm:$0xff] }
  0x39   :  { %2345 = vmatpush3.bf16.msra.mxu0 %v2344_v52  ;;  %v541_v49 = vld [vmem:[%s4480_s3 + $0x1f0] sm:$0xff]  ;;  %v2396_v50 = vpack.c.bf16 %v539_v47, %v527_v45  ;;  %v564_v52 = vld [vmem:[%s4480_s3 + $0x2a8] sm:$0xff]  ;;  %v566_v56 = vld [vmem:[%s4480_s3 + $0x2b8] sm:$0xff] }
  0x3a   :  { %2347 = vmatprep.subr.bf16.mxu0 %v2346_v54  ;;  %v2428_v54 = vpack.c.bf16 %v541_v49, %v529_v48  ;;  %v2398_v55 = vpack.c.bf16 %v564_v52, %v552_v51  ;;  %v551_v57 = vld [vmem:[%s4480_s3 + $0x240] sm:$0xff]  ;;  %v553_v60 = vld [vmem:[%s4480_s3 + $0x250] sm:$0xff]  ;;  %v576_v62 = vld [vmem:[%s4480_s3 + $0x308] sm:$0xff] }
  0x3b   :  { %2377 = vmatpush3.bf16.msra.mxu1 %v2376_v53  ;;  %v554_v53 = vld [vmem:[%s4480_s3 + $0x258] sm:$0xff]  ;;  %v565_v61 = vld [vmem:[%s4480_s3 + $0x2b0] sm:$0xff]  ;;  %v588_v63 = vld [vmem:[%s4480_s3 + $0x368] sm:$0xff] }
  0x3c   :  { %2379 = vmatprep.subr.bf16.mxu1 %v2378_v58  ;;  %v563_v58 = vld [vmem:[%s4480_s3 + $0x2a0] sm:$0xff]  ;;  %v2430_v59 = vpack.c.bf16 %v566_v56, %v554_v53  ;;  %v2432_v3 = vpack.c.bf16 %v565_v61, %v553_v60  ;;  %v2402_v4 = vpack.c.bf16 %v588_v63, %v576_v62  ;;  %v577_v7 = vld [vmem:[%s4480_s3 + $0x310] sm:$0xff]  ;;  %v636_v25 = vld [vmem:[%s4480_s3 + $0x4e8] sm:$0xff] }
  0x3d   :  { %2349 = vmatpush3.bf16.msra.mxu0 %v2348_v0  ;;  %v578_v0 = vld [vmem:[%s4480_s3 + $0x318] sm:$0xff]  ;;  %v587_v6 = vld [vmem:[%s4480_s3 + $0x360] sm:$0xff]  ;;  %v601_v20 = vld [vmem:[%s4480_s3 + $0x3d0] sm:$0xff] }
  0x3e   :  { %2351 = vmatprep.subr.bf16.mxu0 %v2350_v2  ;;  %v2400_v2 = vpack.c.bf16 %v563_v58, %v551_v57  ;;  %v599_v17 = vld [vmem:[%s4480_s3 + $0x3c0] sm:$0xff]  ;;  %v613_v21 = vld [vmem:[%s4480_s3 + $0x430] sm:$0xff]  ;;  %v626_v26 = vld [vmem:[%s4480_s3 + $0x498] sm:$0xff] }
  0x3f   :  { %2381 = vmatpush3.bf16.msra.mxu1 %v2380_v1  ;;  %v590_v1 = vld [vmem:[%s4480_s3 + $0x378] sm:$0xff]  ;;  %v611_v18 = vld [vmem:[%s4480_s3 + $0x420] sm:$0xff]  ;;  %v637_v34 = vld [vmem:[%s4480_s3 + $0x4f0] sm:$0xff] }
  0x40   :  { %2383 = vmatprep.subr.bf16.mxu1 %v2382_v5  ;;  %v575_v5 = vld [vmem:[%s4480_s3 + $0x300] sm:$0xff]  ;;  %v2408_v22 = vpack.c.bf16 %v611_v18, %v599_v17  ;;  %v648_v36 = vld [vmem:[%s4480_s3 + $0x548] sm:$0xff]  ;;  %v650_v38 = vld [vmem:[%s4480_s3 + $0x558] sm:$0xff] }
  0x41   :  { %2353 = vmatpush3.bf16.msra.mxu0 %v2352_v8  ;;  %v2434_v8 = vpack.c.bf16 %v590_v1, %v578_v0  ;;  %v623_v29 = vld [vmem:[%s4480_s3 + $0x480] sm:$0xff]  ;;  %v662_v40 = vld [vmem:[%s4480_s3 + $0x5b8] sm:$0xff]  ;;  %v649_v45 = vld [vmem:[%s4480_s3 + $0x550] sm:$0xff] }
  0x42   :  { %2387 = vmatprep.subr.bf16.mxu0 %v2386_v19  ;;  %v635_v30 = vld [vmem:[%s4480_s3 + $0x4e0] sm:$0xff]  ;;  %v2446_v43 = vpack.c.bf16 %v662_v40, %v650_v38  ;;  %v484_v48 = vld [vmem:[%s4480_s3 + $0x28] sm:$0xff]  ;;  %v498_v52 = vld [vmem:[%s4480_s3 + $0x98] sm:$0xff] }
  0x43   :  { %2385 = vmatpush3.bf16.msra.mxu1 %v2384_v9  ;;  %v589_v9 = vld [vmem:[%s4480_s3 + $0x370] sm:$0xff]  ;;  %v496_v49 = vld [vmem:[%s4480_s3 + $0x88] sm:$0xff]  ;;  %v1876_v56 = vld [vmem:[%s4481_s2] ss:$0 sm:$0xff] }
  0x44   :  { %392 = vmatmul.mubr.f32.vlgmr.msra.gmra.mrb[4].mxu0 %v30_v10  ;;  %2419 = vmatprep.subr.bf16.mxu1 %v2418_v23  ;;  %v600_v10 = vld [vmem:[%s4480_s3 + $0x3c8] sm:$0xff]  ;;  %v2440_v23 = vpack.c.bf16 %v613_v21, %v601_v20  ;;  %v2450_v51 = vpack.c.bf16 %v496_v49, %v484_v48  ;;  %v495_v17 = vld [vmem:[%s4480_s3 + $0x80] sm:$0xff]  ;;  %v485_v18 = vld [vmem:[%s4480_s3 + $0x30] sm:$0xff] }
  0x45   :  { %396 = vmatprep.mubr.f32.mxu0 %v39_v12  ;;  %2389 = vmatpush1.bf16.msra.mxu0 %v2388_v24  ;;  %v602_v12 = vld [vmem:[%s4480_s3 + $0x3d8] sm:$0xff]  ;;  %v624_v24 = vld [vmem:[%s4480_s3 + $0x488] sm:$0xff]  ;;  %v543_v48 = vld [vmem:[%s4480_s3 + $0x200] sm:$0xff] }
  0x46   :  { %467 = vmatmul.mubr.f32.vlgmr.msra.gmra.mrb[4].mxu1 %v32_v11  ;;  %2391 = vmatprep.subr.bf16.mxu0 %v2390_v32  ;;  %v612_v11 = vld [vmem:[%s4480_s3 + $0x428] sm:$0xff]  ;;  %v2410_v27 = vpack.c.bf16 %v636_v25, %v624_v24  ;;  %v2412_v32 = vpack.c.bf16 %v635_v30, %v623_v29 }
  0x47   :  { %471 = vmatprep.mubr.f32.mxu1 %v41_v13  ;;  %2421 = vmatpush1.bf16.msra.mxu1 %v2420_v28  ;;  %v614_v13 = vld [vmem:[%s4480_s3 + $0x438] sm:$0xff]  ;;  %v2406_v16 = vpack.c.bf16 %v612_v11, %v600_v10  ;;  %v532_v38 = vld [vmem:[%s4480_s3 + $0x1a8] sm:$0xff] }
  0x48   :  { %397 = vmatmul.mubr.f32.gmra.mrb[6].mxu0 %v38_v14  ;;  %2423 = vmatprep.subr.bf16.mxu1 %v2422_v33  ;;  %v2404_v14 = vpack.c.bf16 %v587_v6, %v575_v5  ;;  %v2438_v19 = vpack.c.bf16 %v614_v13, %v602_v12  ;;  %v638_v28 = vld [vmem:[%s4480_s3 + $0x4f8] sm:$0xff]  ;;  %v625_v33 = vld [vmem:[%s4480_s3 + $0x490] sm:$0xff] }
  0x49   :  { %2393 = vmatpush1.bf16.msra.mxu0 %v2392_v37  ;;  %v2442_v31 = vpack.c.bf16 %v638_v28, %v626_v26  ;;  %v2444_v35 = vpack.c.bf16 %v637_v34, %v625_v33  ;;  %v660_v37 = vld [vmem:[%s4480_s3 + $0x5a8] sm:$0xff]  ;;  %v522_v28 = vld [vmem:[%s4480_s3 + $0x158] sm:$0xff]  ;;  %v519_v33 = vld [vmem:[%s4480_s3 + $0x140] sm:$0xff] }
  0x4a   :  { %472 = vmatmul.mubr.f32.gmra.mrb[6].mxu1 %v40_v15  ;;  %2395 = vmatprep.subr.bf16.mxu0 %v2394_v42  ;;  %v2436_v15 = vpack.c.bf16 %v589_v9, %v577_v7  ;;  %v2414_v39 = vpack.c.bf16 %v660_v37, %v648_v36  ;;  %v659_v42 = vld [vmem:[%s4480_s3 + $0x5a0] sm:$0xff]  ;;  %v520_v26 = vld [vmem:[%s4480_s3 + $0x148] sm:$0xff]  ;;  %v509_v36 = vld [vmem:[%s4480_s3 + $0xf0] sm:$0xff] }
  0x4b   :  { %2425 = vmatpush1.bf16.msra.mxu1 %v2424_v41  ;;  %v647_v41 = vld [vmem:[%s4480_s3 + $0x540] sm:$0xff]  ;;  %v521_v37 = vld [vmem:[%s4480_s3 + $0x150] sm:$0xff] }
  0x4c   :  { %2427 = vmatprep.subr.bf16.mxu1 %v2426_v46  ;;  %v2416_v44 = vpack.c.bf16 %v659_v42, %v647_v41  ;;  %v661_v46 = vld [vmem:[%s4480_s3 + $0x5b0] sm:$0xff]  ;;  %v544_v41 = vld [vmem:[%s4480_s3 + $0x208] sm:$0xff]  ;;  %v534_v42 = vld [vmem:[%s4480_s3 + $0x1b8] sm:$0xff] }
  0x4d   :  { %2397 = vmatpush1.bf16.msra.mxu0 %v2396_v50  ;;  %v2448_v47 = vpack.c.bf16 %v661_v46, %v649_v45  ;;  %v486_v50 = vld [vmem:[%s4480_s3 + $0x38] sm:$0xff]  ;;  %v2488_v46 = vpack.c.bf16 %v521_v37, %v509_v36 }
  0x4e   :  { %2399 = vmatprep.subr.bf16.mxu0 %v2398_v55  ;;  %v2482_v53 = vpack.c.bf16 %v498_v52, %v486_v50  ;;  %v2458_v50 = vpack.c.bf16 %v544_v41, %v532_v38  ;;  %v533_v52 = vld [vmem:[%s4480_s3 + $0x1b0] sm:$0xff]  ;;  %v664_v41 = vld [vmem:[%s4480_s3 + $0x5c8] sm:$0xff] }
  0x4f   :  { %2429 = vmatpush1.bf16.msra.mxu1 %v2428_v54  ;;  %v2771_v54 = vmov 0.0   ;;  %v629_v38 = vld [vmem:[%s4480_s3 + $0x4b0] sm:$0xff] }
  0x50   :  { %2431 = vmatprep.subr.bf16.mxu1 %v2430_v59  ;;  %799 = vmatprep.mubr.f32.mxu0 %v2771_v54 }
  0x51   :  { %2401 = vmatpush1.bf16.msra.mxu0 %v2400_v2  ;;  %876 = vmatprep.mubr.f32.mxu1 %v2771_v54 }
  0x52   :  { %2403 = vmatprep.subr.bf16.mxu0 %v2402_v4 }
  0x53   :  { %2433 = vmatpush1.bf16.msra.mxu1 %v2432_v3 }
  0x54   :  { %2435 = vmatprep.subr.bf16.mxu1 %v2434_v8 }
  0x55   :  { %2405 = vmatpush1.bf16.msra.mxu0 %v2404_v14  ;;  %v483_v14 = vld [vmem:[%s4480_s3 + $0x20] sm:$0xff] }
  0x56   :  { %2407 = vmatprep.subr.bf16.mxu0 %v2406_v16  ;;  %v2452_v30 = vpack.c.bf16 %v495_v17, %v483_v14  ;;  %v593_v14 = vld [vmem:[%s4480_s3 + $0x390] sm:$0xff]  ;;  %v606_v17 = vld [vmem:[%s4480_s3 + $0x3f8] sm:$0xff] }
  0x57   :  { %2437 = vmatpush1.bf16.msra.mxu1 %v2436_v15 }
  0x58   :  { %2439 = vmatprep.subr.bf16.mxu1 %v2438_v19  ;;  %v497_v19 = vld [vmem:[%s4480_s3 + $0x90] sm:$0xff] }
  0x59   :  { %2409 = vmatpush1.bf16.msra.mxu0 %v2408_v22  ;;  %v508_v22 = vld [vmem:[%s4480_s3 + $0xe8] sm:$0xff] }
  0x5a   :  { %2411 = vmatprep.subr.bf16.mxu0 %v2410_v27  ;;  %v510_v27 = vld [vmem:[%s4480_s3 + $0xf8] sm:$0xff] }
  0x5b   :  { %2441 = vmatpush1.bf16.msra.mxu1 %v2440_v23  ;;  %v2486_v40 = vpack.c.bf16 %v522_v28, %v510_v27  ;;  %v628_v27 = vld [vmem:[%s4480_s3 + $0x4a8] sm:$0xff] }
  0x5c   :  { %2443 = vmatprep.subr.bf16.mxu1 %v2442_v31  ;;  %v2484_v31 = vpack.c.bf16 %v497_v19, %v485_v18  ;;  %v618_v18 = vld [vmem:[%s4480_s3 + $0x458] sm:$0xff]  ;;  %v640_v28 = vld [vmem:[%s4480_s3 + $0x508] sm:$0xff] }
  0x5d   :  { %2413 = vmatpush1.bf16.msra.mxu0 %v2412_v32  ;;  %v507_v32 = vld [vmem:[%s4480_s3 + $0xe0] sm:$0xff]  ;;  %v2474_v36 = vpack.c.bf16 %v640_v28, %v628_v27  ;;  %v572_v27 = vld [vmem:[%s4480_s3 + $0x2e8] sm:$0xff]  ;;  %v562_v28 = vld [vmem:[%s4480_s3 + $0x298] sm:$0xff] }
  0x5e   :  { %2415 = vmatprep.subr.bf16.mxu0 %v2414_v39  ;;  %v2454_v39 = vpack.c.bf16 %v520_v26, %v508_v22  ;;  %v2456_v45 = vpack.c.bf16 %v519_v33, %v507_v32  ;;  %v615_v22 = vld [vmem:[%s4480_s3 + $0x440] sm:$0xff]  ;;  %v617_v26 = vld [vmem:[%s4480_s3 + $0x450] sm:$0xff] }
  0x5f   :  { %2445 = vmatpush1.bf16.msra.mxu1 %v2444_v35  ;;  %v627_v33 = vld [vmem:[%s4480_s3 + $0x4a0] sm:$0xff] }
  0x60   :  { %2447 = vmatprep.subr.bf16.mxu1 %v2446_v43  ;;  %v546_v43 = vld [vmem:[%s4480_s3 + $0x218] sm:$0xff] }
  0x61   :  { %2417 = vmatpush1.bf16.msra.mxu0 %v2416_v44 }
  0x62   :  { %2451 = vmatprep.subr.bf16.mxu0 %v2450_v51  ;;  %v2490_v51 = vpack.c.bf16 %v546_v43, %v534_v42  ;;  %v654_v42 = vld [vmem:[%s4480_s3 + $0x578] sm:$0xff] }
  0x63   :  { %2449 = vmatpush1.bf16.msra.mxu1 %v2448_v47  ;;  %v531_v47 = vld [vmem:[%s4480_s3 + $0x1a0] sm:$0xff]  ;;  %v666_v43 = vld [vmem:[%s4480_s3 + $0x5d8] sm:$0xff] }
  0x64   :  { %2483 = vmatprep.subr.bf16.mxu1 %v2482_v53  ;;  %v545_v53 = vld [vmem:[%s4480_s3 + $0x210] sm:$0xff] }
  0xf7   :  { %v1910_v55 = vpop.f32.mrb[0].mxu0 }
  0xf8   :  { %v1911_v57 = vpop.f32.mrb[1].mxu0 }
  0xf9   :  { %v1948_v58 = vpop.f32.mrb[0].mxu1  ;;  %v1912_v59 = vadd.f32 %v1911_v57, %v1910_v55  ;;  %v556_v55 = vld [vmem:[%s4480_s3 + $0x268] sm:$0xff]  ;;  %v558_v57 = vld [vmem:[%s4480_s3 + $0x278] sm:$0xff] }
  0xfa   :  { %v1949_v60 = vpop.f32.mrb[1].mxu1 }
  0xfb   :  { %v1950_v61 = vadd.f32 %v1949_v60, %v1948_v58  ;;  %v244_v62 = vadd.f32 %v1912_v59, %v1876_v56  ;;  %v1913_v0 = vpop.f32.mrb[2].mxu0  ;;  %v570_v58 = vld [vmem:[%s4480_s3 + $0x2d8] sm:$0xff]  ;;  %v2460_v59 = vpack.c.bf16 %v543_v48, %v531_v47  ;;  %v2492_v60 = vpack.c.bf16 %v545_v53, %v533_v52  ;;  %v663_v47 = vld [vmem:[%s4480_s3 + $0x5c0] sm:$0xff]  ;;  %v665_v52 = vld [vmem:[%s4480_s3 + $0x5d0] sm:$0xff] }
  0xfc   :  { %v1914_v1 = vpop.f32.mrb[3].mxu0  ;;  %v488_v53 = vld [vmem:[%s4480_s3 + $0x48] sm:$0xff] }
  0xfd   :  { %v319_v63 = vadd.f32 %v1950_v61, %v244_v62  ;;  %v1951_v2 = vpop.f32.mrb[2].mxu1  ;;  %v1915_v3 = vadd.f32 %v1914_v1, %v1913_v0  ;;  %v555_v61 = vld [vmem:[%s4480_s3 + $0x260] sm:$0xff]  ;;  %v2494_v0 = vpack.c.bf16 %v570_v58, %v558_v57  ;;  %v557_v1 = vld [vmem:[%s4480_s3 + $0x270] sm:$0xff]  ;;  %v502_v57 = vld [vmem:[%s4480_s3 + $0xb8] sm:$0xff] }
  0xfe   :  { %v1952_v4 = vpop.f32.mrb[3].mxu1  ;;  %v567_v62 = vld [vmem:[%s4480_s3 + $0x2c0] sm:$0xff] }
  0xff   :  { %v1953_v5 = vadd.f32 %v1952_v4, %v1951_v2  ;;  %v249_v6 = vadd.f32 %v1915_v3, %v1876_v56  ;;  %v568_v56 = vld [vmem:[%s4480_s3 + $0x2c8] sm:$0xff]  ;;  %v569_v2 = vld [vmem:[%s4480_s3 + $0x2d0] sm:$0xff] }
 0x100   :  { %v580_v3 = vld [vmem:[%s4480_s3 + $0x328] sm:$0xff] }
 0x101   :  { %v324_v7 = vadd.f32 %v1953_v5, %v249_v6  ;;  %v592_v4 = vld [vmem:[%s4480_s3 + $0x388] sm:$0xff]  ;;  %v582_v5 = vld [vmem:[%s4480_s3 + $0x338] sm:$0xff] }
 0x102   :  { %v594_v6 = vld [vmem:[%s4480_s3 + $0x398] sm:$0xff] }
 0x117   :  { %v1986_v8 = vpop.f32.mrb[4].mxu0 }
 0x118   :  { %v1987_v9 = vpop.f32.mrb[5].mxu0 }
 0x119   :  { %v2024_v10 = vpop.f32.mrb[4].mxu1  ;;  %v1988_v11 = vadd.f32 %v1987_v9, %v1986_v8  ;;  %v2496_v8 = vpack.c.bf16 %v569_v2, %v557_v1  ;;  %v579_v9 = vld [vmem:[%s4480_s3 + $0x320] sm:$0xff]  ;;  %v501_v1 = vld [vmem:[%s4480_s3 + $0xb0] sm:$0xff]  ;;  %v512_v2 = vld [vmem:[%s4480_s3 + $0x108] sm:$0xff] }
 0x11a   :  { %v2025_v12 = vpop.f32.mrb[5].mxu1 }
 0x11b   :  { %v2026_v13 = vadd.f32 %v2025_v12, %v2024_v10  ;;  %v394_v15 = vadd.f32 %v1988_v11, %v319_v63  ;;  %v1989_v16 = vpop.f32.mrb[6].mxu0  ;;  %v2462_v63 = vpack.c.bf16 %v568_v56, %v556_v55  ;;  %v591_v10 = vld [vmem:[%s4480_s3 + $0x380] sm:$0xff]  ;;  %v2466_v11 = vpack.c.bf16 %v592_v4, %v580_v3  ;;  %v500_v55 = vld [vmem:[%s4480_s3 + $0xa8] sm:$0xff]  ;;  %v490_v56 = vld [vmem:[%s4480_s3 + $0x58] sm:$0xff] }
 0x11c   :  { %v1990_v20 = vpop.f32.mrb[7].mxu0  ;;  %v2498_v12 = vpack.c.bf16 %v594_v6, %v582_v5  ;;  %v2468_v19 = vpack.c.bf16 %v591_v10, %v579_v9  ;;  %v524_v3 = vld [vmem:[%s4480_s3 + $0x168] sm:$0xff]  ;;  %v514_v4 = vld [vmem:[%s4480_s3 + $0x118] sm:$0xff]  ;;  %v523_v9 = vld [vmem:[%s4480_s3 + $0x160] sm:$0xff] }
 0x11d   :  { %v2027_v21 = vpop.f32.mrb[6].mxu1  ;;  %v469_v23 = vadd.f32 %v2026_v13, %v394_v15  ;;  %v1991_v24 = vadd.f32 %v1990_v20, %v1989_v16  ;;  %v581_v13 = vld [vmem:[%s4480_s3 + $0x330] sm:$0xff]  ;;  %v604_v15 = vld [vmem:[%s4480_s3 + $0x3e8] sm:$0xff]  ;;  %v526_v5 = vld [vmem:[%s4480_s3 + $0x178] sm:$0xff] }
 0x11e   :  { %v2028_v25 = vpop.f32.mrb[7].mxu1  ;;  %v616_v16 = vld [vmem:[%s4480_s3 + $0x448] sm:$0xff]  ;;  %v2500_v20 = vpack.c.bf16 %v593_v14, %v581_v13  ;;  %v513_v10 = vld [vmem:[%s4480_s3 + $0x110] sm:$0xff]  ;;  %v2518_v13 = vpack.c.bf16 %v524_v3, %v512_v2  ;;  %v2550_v14 = vpack.c.bf16 %v526_v5, %v514_v4  ;;  %v634_v3 = vld [vmem:[%s4480_s3 + $0x4d8] sm:$0xff] }
 0x11f   :  { %v2029_v29 = vadd.f32 %v2028_v25, %v2027_v21  ;;  %v3483_v34 = vmax.f32 %v469_v23, 0.0  ;;  %v399_v35 = vadd.f32 %v1991_v24, %v324_v7  ;;  %v2464_v7 = vpack.c.bf16 %v567_v62, %v555_v61  ;;  %v603_v21 = vld [vmem:[%s4480_s3 + $0x3e0] sm:$0xff]  ;;  %v605_v25 = vld [vmem:[%s4480_s3 + $0x3f0] sm:$0xff]  ;;  %v644_v2 = vld [vmem:[%s4480_s3 + $0x528] sm:$0xff] }
 0x120   :  { %v2470_v23 = vpack.c.bf16 %v616_v16, %v604_v15  ;;  %v2502_v24 = vpack.c.bf16 %v618_v18, %v606_v17  ;;  %v2504_v32 = vpack.c.bf16 %v617_v26, %v605_v25  ;;  %v2514_v61 = vpack.c.bf16 %v500_v55, %v488_v53  ;;  %v548_v15 = vld [vmem:[%s4480_s3 + $0x228] sm:$0xff]  ;;  %v538_v16 = vld [vmem:[%s4480_s3 + $0x1d8] sm:$0xff]  ;;  %v549_v25 = vld [vmem:[%s4480_s3 + $0x230] sm:$0xff] }
 0x121   :  { %v474_v44 = vadd.f32 %v2029_v29, %v399_v35  ;;  %800 = vmatmul.mubr.f32.vlgmr.msra.gmra.mrb[8].mxu0 %v3483_v34  ;;  %877 = vmatmul.mubr.f32.vlgmr.msra.gmra.mrb[8].mxu1 %v3483_v34  ;;  %v630_v29 = vld [vmem:[%s4480_s3 + $0x4b8] sm:$0xff]  ;;  %v639_v35 = vld [vmem:[%s4480_s3 + $0x500] sm:$0xff]  ;;  %v2546_v62 = vpack.c.bf16 %v502_v57, %v490_v56  ;;  %v560_v26 = vld [vmem:[%s4480_s3 + $0x288] sm:$0xff] }
 0x122   :  { %2453 = vmatpush1.bf16.msra.mxu0 %v2452_v30  ;;  %2485 = vmatpush1.bf16.msra.mxu1 %v2484_v31  ;;  %v642_v30 = vld [vmem:[%s4480_s3 + $0x518] sm:$0xff]  ;;  %v2472_v31 = vpack.c.bf16 %v615_v22, %v603_v21  ;;  %v547_v21 = vld [vmem:[%s4480_s3 + $0x220] sm:$0xff]  ;;  %v620_v53 = vld [vmem:[%s4480_s3 + $0x468] sm:$0xff] }
 0x123   :  { %v3511_v49 = vmax.f32 %v474_v44, 0.0  ;;  %805 = vmatprep.mubr.f32.mxu0 %v2771_v54  ;;  %882 = vmatprep.mubr.f32.mxu1 %v2771_v54  ;;  %v2506_v37 = vpack.c.bf16 %v642_v30, %v630_v29  ;;  %v2476_v44 = vpack.c.bf16 %v639_v35, %v627_v33  ;;  %v550_v17 = vld [vmem:[%s4480_s3 + $0x238] sm:$0xff]  ;;  %v571_v33 = vld [vmem:[%s4480_s3 + $0x2e0] sm:$0xff]  ;;  %v2526_v35 = vpack.c.bf16 %v572_v27, %v560_v26  ;;  %v1238_v26 = vld [vmem:[%s4482_s5 + $0x88] sm:$0xff] }
 0x124   :  { %2455 = vmatprep.subr.bf16.mxu0 %v2454_v39  ;;  %2487 = vmatprep.subr.bf16.mxu1 %v2486_v40  ;;  %v641_v39 = vld [vmem:[%s4480_s3 + $0x510] sm:$0xff]  ;;  %v652_v40 = vld [vmem:[%s4480_s3 + $0x568] sm:$0xff]  ;;  %v574_v29 = vld [vmem:[%s4480_s3 + $0x2f8] sm:$0xff] }
 0x125   :  { %806 = vmatmul.mubr.f32.gmra.mrb[10].mxu0 %v3511_v49  ;;  %883 = vmatmul.mubr.f32.gmra.mrb[10].mxu1 %v3511_v49  ;;  %v2478_v48 = vpack.c.bf16 %v664_v41, %v652_v40  ;;  %v596_v40 = vld [vmem:[%s4480_s3 + $0x3a8] sm:$0xff]  ;;  %v586_v41 = vld [vmem:[%s4480_s3 + $0x358] sm:$0xff]  ;;  %v1269_v27 = vld [vmem:[%s4482_s5 + $0x180] sm:$0xff] }
 0x126   :  { %2457 = vmatpush1.bf16.msra.mxu0 %v2456_v45  ;;  %2489 = vmatpush1.bf16.msra.mxu1 %v2488_v46  ;;  %v2508_v45 = vpack.c.bf16 %v641_v39, %v629_v38  ;;  %v651_v46 = vld [vmem:[%s4480_s3 + $0x560] sm:$0xff]  ;;  %v573_v38 = vld [vmem:[%s4480_s3 + $0x2f0] sm:$0xff]  ;;  %v584_v39 = vld [vmem:[%s4480_s3 + $0x348] sm:$0xff] }
 0x127   :  { %2459 = vmatprep.subr.bf16.mxu0 %v2458_v50  ;;  %2491 = vmatprep.subr.bf16.mxu1 %v2490_v51  ;;  %v2510_v50 = vpack.c.bf16 %v666_v43, %v654_v42  ;;  %v653_v51 = vld [vmem:[%s4480_s3 + $0x570] sm:$0xff]  ;;  %v2480_v58 = vpack.c.bf16 %v663_v47, %v651_v46  ;;  %v598_v42 = vld [vmem:[%s4480_s3 + $0x3b8] sm:$0xff]  ;;  %v595_v46 = vld [vmem:[%s4480_s3 + $0x3a0] sm:$0xff]  ;;  %v2530_v47 = vpack.c.bf16 %v596_v40, %v584_v39 }
 0x128   :  { %953 = vmatprep.mubr.f32.mxu0 %v2771_v54  ;;  %1030 = vmatprep.mubr.f32.mxu1 %v2771_v54  ;;  %v610_v55 = vld [vmem:[%s4480_s3 + $0x418] sm:$0xff]  ;;  %v1271_v40 = vld [vmem:[%s4482_s5 + $0x190] sm:$0xff] }
 0x129   :  { %v622_v56 = vld [vmem:[%s4480_s3 + $0x478] sm:$0xff] }
 0x12a   :  { %2461 = vmatpush1.bf16.msra.mxu0 %v2460_v59  ;;  %2493 = vmatpush1.bf16.msra.mxu1 %v2492_v60  ;;  %v2512_v59 = vpack.c.bf16 %v665_v52, %v653_v51  ;;  %v487_v60 = vld [vmem:[%s4480_s3 + $0x40] sm:$0xff]  ;;  %v597_v51 = vld [vmem:[%s4480_s3 + $0x3b0] sm:$0xff]  ;;  %v608_v52 = vld [vmem:[%s4480_s3 + $0x408] sm:$0xff] }
 0x12b   :  { %2463 = vmatprep.subr.bf16.mxu0 %v2462_v63  ;;  %2495 = vmatprep.subr.bf16.mxu1 %v2494_v0  ;;  %v499_v63 = vld [vmem:[%s4480_s3 + $0xa0] sm:$0xff]  ;;  %v489_v0 = vld [vmem:[%s4480_s3 + $0x50] sm:$0xff]  ;;  %v646_v4 = vld [vmem:[%s4480_s3 + $0x538] sm:$0xff] }
 0x12c   :  { %v2516_v6 = vpack.c.bf16 %v499_v63, %v487_v60  ;;  %v619_v60 = vld [vmem:[%s4480_s3 + $0x460] sm:$0xff]  ;;  %v609_v63 = vld [vmem:[%s4480_s3 + $0x410] sm:$0xff]  ;;  %v1240_v39 = vld [vmem:[%s4482_s5 + $0x98] sm:$0xff] }
 0x12e   :  { %2465 = vmatpush1.bf16.msra.mxu0 %v2464_v7  ;;  %2497 = vmatpush1.bf16.msra.mxu1 %v2496_v8  ;;  %v2548_v7 = vpack.c.bf16 %v501_v1, %v489_v0  ;;  %v511_v8 = vld [vmem:[%s4480_s3 + $0x100] sm:$0xff]  ;;  %v621_v0 = vld [vmem:[%s4480_s3 + $0x470] sm:$0xff]  ;;  %v632_v1 = vld [vmem:[%s4480_s3 + $0x4c8] sm:$0xff] }
 0x12f   :  { %2467 = vmatprep.subr.bf16.mxu0 %v2466_v11  ;;  %2499 = vmatprep.subr.bf16.mxu1 %v2498_v12  ;;  %v525_v11 = vld [vmem:[%s4480_s3 + $0x170] sm:$0xff]  ;;  %v536_v12 = vld [vmem:[%s4480_s3 + $0x1c8] sm:$0xff]  ;;  %v2520_v18 = vpack.c.bf16 %v523_v9, %v511_v8  ;;  %v643_v8 = vld [vmem:[%s4480_s3 + $0x520] sm:$0xff]  ;;  %v2538_v9 = vpack.c.bf16 %v644_v2, %v632_v1 }
 0x130   :  { %v2522_v22 = vpack.c.bf16 %v548_v15, %v536_v12  ;;  %v645_v12 = vld [vmem:[%s4480_s3 + $0x530] sm:$0xff]  ;;  %v658_v15 = vld [vmem:[%s4480_s3 + $0x598] sm:$0xff] }
 0x131   :  { %v1276_v1 = vld [vmem:[%s4482_s5 + $0x1b8] sm:$0xff] }
 0x132   :  { %2469 = vmatpush1.bf16.msra.mxu0 %v2468_v19  ;;  %2501 = vmatpush1.bf16.msra.mxu1 %v2500_v20  ;;  %v2552_v19 = vpack.c.bf16 %v525_v11, %v513_v10  ;;  %v535_v20 = vld [vmem:[%s4480_s3 + $0x1c0] sm:$0xff]  ;;  %v2570_v10 = vpack.c.bf16 %v646_v4, %v634_v3  ;;  %v633_v11 = vld [vmem:[%s4480_s3 + $0x4d0] sm:$0xff]  ;;  %v1228_v4 = vld [vmem:[%s4482_s5 + $0x38] sm:$0xff] }
 0x133   :  { %2471 = vmatprep.subr.bf16.mxu0 %v2470_v23  ;;  %2503 = vmatprep.subr.bf16.mxu1 %v2502_v24  ;;  %v2554_v23 = vpack.c.bf16 %v550_v17, %v538_v16  ;;  %v537_v24 = vld [vmem:[%s4480_s3 + $0x1d0] sm:$0xff]  ;;  %v2524_v30 = vpack.c.bf16 %v547_v21, %v535_v20  ;;  %v670_v16 = vld [vmem:[%s4480_s3 + $0x5f8] sm:$0xff]  ;;  %v667_v20 = vld [vmem:[%s4480_s3 + $0x5e0] sm:$0xff] }
 0x136   :  { %2473 = vmatpush1.bf16.msra.mxu0 %v2472_v31  ;;  %2505 = vmatpush1.bf16.msra.mxu1 %v2504_v32  ;;  %v2556_v31 = vpack.c.bf16 %v549_v25, %v537_v24  ;;  %v559_v32 = vld [vmem:[%s4480_s3 + $0x280] sm:$0xff]  ;;  %v669_v24 = vld [vmem:[%s4480_s3 + $0x5f0] sm:$0xff] }
 0x137   :  { %2475 = vmatprep.subr.bf16.mxu0 %v2474_v36  ;;  %2507 = vmatprep.subr.bf16.mxu1 %v2506_v37  ;;  %v2558_v36 = vpack.c.bf16 %v574_v29, %v562_v28  ;;  %v561_v37 = vld [vmem:[%s4480_s3 + $0x290] sm:$0xff]  ;;  %v2528_v43 = vpack.c.bf16 %v571_v33, %v559_v32  ;;  %v1237_v25 = vld [vmem:[%s4482_s5 + $0x80] sm:$0xff]  ;;  %v1270_v28 = vld [vmem:[%s4482_s5 + $0x188] sm:$0xff] }
 0x138   :  { %v2610_v32 = vpack.c.bf16 %v1270_v28, %v1269_v27  ;;  %v1221_v33 = vld [vmem:[%s4482_s5] sm:$0xff]  ;;  %v1231_v27 = vld [vmem:[%s4482_s5 + $0x50] sm:$0xff]  ;;  %v1232_v28 = vld [vmem:[%s4482_s5 + $0x58] sm:$0xff] }
 0x13a   :  { %2477 = vmatpush1.bf16.msra.mxu0 %v2476_v44  ;;  %2509 = vmatpush1.bf16.msra.mxu1 %v2508_v45  ;;  %v2560_v44 = vpack.c.bf16 %v573_v38, %v561_v37  ;;  %v583_v45 = vld [vmem:[%s4480_s3 + $0x340] sm:$0xff]  ;;  %v1254_v37 = vld [vmem:[%s4482_s5 + $0x108] sm:$0xff]  ;;  %v1239_v38 = vld [vmem:[%s4482_s5 + $0x90] sm:$0xff] }
 0x13b   :  { %2479 = vmatprep.subr.bf16.mxu0 %v2478_v48  ;;  %2511 = vmatprep.subr.bf16.mxu1 %v2510_v50  ;;  %v2562_v48 = vpack.c.bf16 %v598_v42, %v586_v41  ;;  %v585_v50 = vld [vmem:[%s4480_s3 + $0x350] sm:$0xff]  ;;  %v2532_v57 = vpack.c.bf16 %v595_v46, %v583_v45  ;;  %v1272_v41 = vld [vmem:[%s4482_s5 + $0x198] sm:$0xff]  ;;  %v2582_v46 = vpack.c.bf16 %v1240_v39, %v1239_v38 }
 0x13c   :  { %v1224_v45 = vld [vmem:[%s4482_s5 + $0x18] sm:$0xff]  ;;  %v2600_v38 = vpack.c.bf16 %v1232_v28, %v1231_v27 }
 0x13d   :  { %v1304_v28 = vld [vmem:[%s4482_s5 + $0x298] sm:$0xff] }
 0x13e   :  { %2481 = vmatpush1.bf16.msra.mxu0 %v2480_v58  ;;  %2513 = vmatpush1.bf16.msra.mxu1 %v2512_v59  ;;  %v2564_v58 = vpack.c.bf16 %v597_v51, %v585_v50  ;;  %v607_v59 = vld [vmem:[%s4480_s3 + $0x400] sm:$0xff]  ;;  %v1256_v50 = vld [vmem:[%s4482_s5 + $0x118] sm:$0xff] }
 0x13f   :  { %2515 = vmatprep.subr.bf16.mxu0 %v2514_v61  ;;  %2547 = vmatprep.subr.bf16.mxu1 %v2546_v62  ;;  %v2534_v61 = vpack.c.bf16 %v620_v53, %v608_v52  ;;  %v2566_v62 = vpack.c.bf16 %v622_v56, %v610_v55  ;;  %v2536_v5 = vpack.c.bf16 %v619_v60, %v607_v59  ;;  %v1241_v51 = vld [vmem:[%s4482_s5 + $0xa0] sm:$0xff]  ;;  %v1242_v52 = vld [vmem:[%s4482_s5 + $0xa8] sm:$0xff] }
 0x140   :  { %v1273_v53 = vld [vmem:[%s4482_s5 + $0x1a0] sm:$0xff]  ;;  %v1274_v55 = vld [vmem:[%s4482_s5 + $0x1a8] sm:$0xff]  ;;  %v2586_v59 = vpack.c.bf16 %v1242_v52, %v1241_v51 }
 0x141   :  { %954 = vmatmul.mubr.f32.vlgmr.msra.gmra.mrb[12].mxu0 %v3483_v34  ;;  %1031 = vmatmul.mubr.f32.vlgmr.msra.gmra.mrb[12].mxu1 %v3483_v34  ;;  %v2618_v60 = vpack.c.bf16 %v1274_v55, %v1273_v53  ;;  %v1235_v53 = vld [vmem:[%s4482_s5 + $0x70] sm:$0xff]  ;;  %v1236_v55 = vld [vmem:[%s4482_s5 + $0x78] sm:$0xff] }
 0x142   :  { %2517 = vmatpush1.bf16.msra.mxu0 %v2516_v6  ;;  %2549 = vmatpush1.bf16.msra.mxu1 %v2548_v7  ;;  %v2568_v6 = vpack.c.bf16 %v621_v0, %v609_v63  ;;  %v631_v7 = vld [vmem:[%s4480_s3 + $0x4c0] sm:$0xff]  ;;  %v1244_v63 = vld [vmem:[%s4482_s5 + $0xb8] sm:$0xff]  ;;  %v1275_v0 = vld [vmem:[%s4482_s5 + $0x1b0] sm:$0xff] }
 0x143   :  { %959 = vmatprep.mubr.f32.mxu0 %v2771_v54  ;;  %1036 = vmatprep.mubr.f32.mxu1 %v2771_v54  ;;  %v2540_v17 = vpack.c.bf16 %v643_v8, %v631_v7  ;;  %v1259_v7 = vld [vmem:[%s4482_s5 + $0x130] sm:$0xff]  ;;  %v1260_v8 = vld [vmem:[%s4482_s5 + $0x138] sm:$0xff] }
 0x144   :  { %2519 = vmatprep.subr.bf16.mxu0 %v2518_v13  ;;  %2551 = vmatprep.subr.bf16.mxu1 %v2550_v14  ;;  %v656_v13 = vld [vmem:[%s4480_s3 + $0x588] sm:$0xff] }
 0x145   :  { %960 = vmatmul.mubr.f32.gmra.mrb[14].mxu0 %v3511_v49  ;;  %1037 = vmatmul.mubr.f32.gmra.mrb[14].mxu1 %v3511_v49  ;;  %v668_v14 = vld [vmem:[%s4480_s3 + $0x5e8] sm:$0xff] }
 0x146   :  { %2521 = vmatpush1.bf16.msra.mxu0 %v2520_v18  ;;  %2553 = vmatpush1.bf16.msra.mxu1 %v2552_v19  ;;  %v2572_v18 = vpack.c.bf16 %v645_v12, %v633_v11  ;;  %v655_v19 = vld [vmem:[%s4480_s3 + $0x580] sm:$0xff]  ;;  %v2542_v21 = vpack.c.bf16 %v668_v14, %v656_v13  ;;  %v1278_v12 = vld [vmem:[%s4482_s5 + $0x1c8] sm:$0xff]  ;;  %v2624_v14 = vpack.c.bf16 %v1260_v8, %v1259_v7 }
 0x147   :  { %2523 = vmatprep.subr.bf16.mxu0 %v2522_v22  ;;  %2555 = vmatprep.subr.bf16.mxu1 %v2554_v23  ;;  %v2574_v22 = vpack.c.bf16 %v670_v16, %v658_v15  ;;  %v657_v23 = vld [vmem:[%s4480_s3 + $0x590] sm:$0xff]  ;;  %v2544_v29 = vpack.c.bf16 %v667_v20, %v655_v19  ;;  %v1277_v11 = vld [vmem:[%s4482_s5 + $0x1c0] sm:$0xff]  ;;  %v1230_v16 = vld [vmem:[%s4482_s5 + $0x48] sm:$0xff] }
 0x148   :  { %1107 = vmatprep.mubr.f32.mxu0 %v2771_v54  ;;  %1184 = vmatprep.mubr.f32.mxu1 %v2771_v54  ;;  %v1229_v15 = vld [vmem:[%s4482_s5 + $0x40] sm:$0xff]  ;;  %v1262_v20 = vld [vmem:[%s4482_s5 + $0x148] sm:$0xff] }
 0x149   :  { %v1261_v19 = vld [vmem:[%s4482_s5 + $0x140] sm:$0xff] }
 0x14a   :  { %2525 = vmatpush1.bf16.msra.mxu0 %v2524_v30  ;;  %2557 = vmatpush1.bf16.msra.mxu1 %v2556_v31  ;;  %v2576_v30 = vpack.c.bf16 %v669_v24, %v657_v23  ;;  %v2578_v31 = vpack.c.bf16 %v1238_v26, %v1237_v25  ;;  %v1279_v23 = vld [vmem:[%s4482_s5 + $0x1d0] sm:$0xff]  ;;  %v1280_v24 = vld [vmem:[%s4482_s5 + $0x1d8] sm:$0xff]  ;;  %v2596_v25 = vpack.c.bf16 %v1230_v16, %v1229_v15 }
 0x14b   :  { %2527 = vmatprep.subr.bf16.mxu0 %v2526_v35  ;;  %2559 = vmatprep.subr.bf16.mxu1 %v2558_v36  ;;  %v1222_v35 = vld [vmem:[%s4482_s5 + $0x8] sm:$0xff]  ;;  %v1253_v36 = vld [vmem:[%s4482_s5 + $0x100] sm:$0xff]  ;;  %v2628_v26 = vpack.c.bf16 %v1262_v20, %v1261_v19 }
 0x14c   :  { %v2580_v42 = vpack.c.bf16 %v1222_v35, %v1221_v33  ;;  %v1249_v33 = vld [vmem:[%s4482_s5 + $0xe0] sm:$0xff]  ;;  %v1250_v35 = vld [vmem:[%s4482_s5 + $0xe8] sm:$0xff] }
 0x14e   :  { %2529 = vmatpush1.bf16.msra.mxu0 %v2528_v43  ;;  %2561 = vmatpush1.bf16.msra.mxu1 %v2560_v44  ;;  %v2612_v43 = vpack.c.bf16 %v1254_v37, %v1253_v36  ;;  %v1223_v44 = vld [vmem:[%s4482_s5 + $0x10] sm:$0xff]  ;;  %v1281_v36 = vld [vmem:[%s4482_s5 + $0x1e0] sm:$0xff]  ;;  %v1282_v37 = vld [vmem:[%s4482_s5 + $0x1e8] sm:$0xff] }
 0x14f   :  { %2531 = vmatprep.subr.bf16.mxu0 %v2530_v47  ;;  %2563 = vmatprep.subr.bf16.mxu1 %v2562_v48  ;;  %v2614_v47 = vpack.c.bf16 %v1272_v41, %v1271_v40  ;;  %v1255_v48 = vld [vmem:[%s4482_s5 + $0x110] sm:$0xff]  ;;  %v2584_v56 = vpack.c.bf16 %v1224_v45, %v1223_v44  ;;  %v1233_v40 = vld [vmem:[%s4482_s5 + $0x60] sm:$0xff]  ;;  %v1234_v41 = vld [vmem:[%s4482_s5 + $0x68] sm:$0xff] }
 0x150   :  { %v1265_v44 = vld [vmem:[%s4482_s5 + $0x160] sm:$0xff]  ;;  %v1266_v45 = vld [vmem:[%s4482_s5 + $0x168] sm:$0xff]  ;;  %v2604_v51 = vpack.c.bf16 %v1234_v41, %v1233_v40 }
 0x151   :  { %v2636_v52 = vpack.c.bf16 %v1266_v45, %v1265_v44  ;;  %v1319_v44 = vld [vmem:[%s4482_s5 + $0x310] sm:$0xff] }
 0x152   :  { %2533 = vmatpush1.bf16.msra.mxu0 %v2532_v57  ;;  %2565 = vmatpush1.bf16.msra.mxu1 %v2564_v58  ;;  %v1225_v57 = vld [vmem:[%s4482_s5 + $0x20] sm:$0xff]  ;;  %v1226_v58 = vld [vmem:[%s4482_s5 + $0x28] sm:$0xff] }
 0x153   :  { %2535 = vmatprep.subr.bf16.mxu0 %v2534_v61  ;;  %2567 = vmatprep.subr.bf16.mxu1 %v2566_v62  ;;  %v1258_v61 = vld [vmem:[%s4482_s5 + $0x128] sm:$0xff]  ;;  %v1243_v62 = vld [vmem:[%s4482_s5 + $0xb0] sm:$0xff]  ;;  %v2588_v2 = vpack.c.bf16 %v1226_v58, %v1225_v57  ;;  %v1268_v58 = vld [vmem:[%s4482_s5 + $0x178] sm:$0xff] }
 0x154   :  { %v1267_v57 = vld [vmem:[%s4482_s5 + $0x170] sm:$0xff] }
 0x156   :  { %2537 = vmatpush1.bf16.msra.mxu0 %v2536_v5  ;;  %2569 = vmatpush1.bf16.msra.mxu1 %v2568_v6  ;;  %v2590_v5 = vpack.c.bf16 %v1244_v63, %v1243_v62  ;;  %v2622_v6 = vpack.c.bf16 %v1276_v1, %v1275_v0  ;;  %v2608_v62 = vpack.c.bf16 %v1236_v55, %v1235_v53  ;;  %v1305_v53 = vld [vmem:[%s4482_s5 + $0x2a0] sm:$0xff] }
 0x157   :  { %2539 = vmatprep.subr.bf16.mxu0 %v2538_v9  ;;  %2571 = vmatprep.subr.bf16.mxu1 %v2570_v10  ;;  %v1245_v9 = vld [vmem:[%s4482_s5 + $0xc0] sm:$0xff]  ;;  %v1246_v10 = vld [vmem:[%s4482_s5 + $0xc8] sm:$0xff]  ;;  %v2640_v63 = vpack.c.bf16 %v1268_v58, %v1267_v57 }
 0x158   :  { %v1337_v57 = vld [vmem:[%s4482_s5 + $0x3a0] sm:$0xff]  ;;  %v1338_v58 = vld [vmem:[%s4482_s5 + $0x3a8] sm:$0xff] }
 0x15a   :  { %2541 = vmatpush1.bf16.msra.mxu0 %v2540_v17  ;;  %2573 = vmatpush1.bf16.msra.mxu1 %v2572_v18  ;;  %v2594_v17 = vpack.c.bf16 %v1246_v10, %v1245_v9  ;;  %v2626_v18 = vpack.c.bf16 %v1278_v12, %v1277_v11  ;;  %v4075_v12 = vld [vmem:[%s4483_s4] sm:$0xff] }
 0x15b   :  { %2543 = vmatprep.subr.bf16.mxu0 %v2542_v21  ;;  %2575 = vmatprep.subr.bf16.mxu1 %v2574_v22  ;;  %v1247_v21 = vld [vmem:[%s4482_s5 + $0xd0] sm:$0xff]  ;;  %v1248_v22 = vld [vmem:[%s4482_s5 + $0xd8] sm:$0xff] }
 0x15e   :  { %2545 = vmatpush1.bf16.msra.mxu0 %v2544_v29  ;;  %2577 = vmatpush1.bf16.msra.mxu1 %v2576_v30  ;;  %v2598_v29 = vpack.c.bf16 %v1248_v22, %v1247_v21  ;;  %v2630_v30 = vpack.c.bf16 %v1280_v24, %v1279_v23  ;;  %v1317_v21 = vld [vmem:[%s4482_s5 + $0x300] sm:$0xff]  ;;  %v1318_v22 = vld [vmem:[%s4482_s5 + $0x308] sm:$0xff]  ;;  %v1303_v23 = vld [vmem:[%s4482_s5 + $0x290] sm:$0xff] }
 0x15f   :  { %2579 = vmatprep.subr.bf16.mxu0 %v2578_v31  ;;  %2611 = vmatprep.subr.bf16.mxu1 %v2610_v32  ;;  %v1263_v31 = vld [vmem:[%s4482_s5 + $0x150] sm:$0xff]  ;;  %v1264_v32 = vld [vmem:[%s4482_s5 + $0x158] sm:$0xff]  ;;  %v2646_v41 = vpack.c.bf16 %v1304_v28, %v1303_v23  ;;  %v1309_v23 = vld [vmem:[%s4482_s5 + $0x2c0] sm:$0xff] }
 0x160   :  { %v2632_v39 = vpack.c.bf16 %v1264_v32, %v1263_v31 }
 0x161   :  { %1108 = vmatmul.mubr.f32.vlgmr.msra.gmra.mrb[16].mxu0 %v3483_v34  ;;  %1185 = vmatmul.mubr.f32.vlgmr.msra.gmra.mrb[16].mxu1 %v3483_v34  ;;  %v2616_v34 = vpack.c.bf16 %v1256_v50, %v1255_v48  ;;  %v1283_v48 = vld [vmem:[%s4482_s5 + $0x1f0] sm:$0xff]  ;;  %v1284_v50 = vld [vmem:[%s4482_s5 + $0x1f8] sm:$0xff] }
 0x162   :  { %1113 = vmatprep.mubr.f32.mxu0 %v2771_v54  ;;  %1190 = vmatprep.mubr.f32.mxu1 %v2771_v54  ;;  %v1257_v54 = vld [vmem:[%s4482_s5 + $0x120] sm:$0xff] }
 0x163   :  { %2581 = vmatpush3.bf16.msra.mxu0 %v2580_v42  ;;  %2613 = vmatpush3.bf16.msra.mxu1 %v2612_v43  ;;  %v2620_v3 = vpack.c.bf16 %v1258_v61, %v1257_v54  ;;  %v2602_v42 = vpack.c.bf16 %v1250_v35, %v1249_v33  ;;  %v2634_v43 = vpack.c.bf16 %v1282_v37, %v1281_v36  ;;  %v1333_v54 = vld [vmem:[%s4482_s5 + $0x380] sm:$0xff]  ;;  %v1334_v61 = vld [vmem:[%s4482_s5 + $0x388] sm:$0xff]  ;;  %v1287_v36 = vld [vmem:[%s4482_s5 + $0x210] sm:$0xff] }
 0x164   :  { %2583 = vmatprep.subr.bf16.mxu0 %v2582_v46  ;;  %2615 = vmatprep.subr.bf16.mxu1 %v2614_v47  ;;  %v1251_v46 = vld [vmem:[%s4482_s5 + $0xf0] sm:$0xff]  ;;  %v1252_v47 = vld [vmem:[%s4482_s5 + $0xf8] sm:$0xff]  ;;  %v2674_v1 = vpack.c.bf16 %v1334_v61, %v1333_v54  ;;  %v2676_v35 = vpack.c.bf16 %v1318_v22, %v1317_v21 }
 0x165   :  { %1114 = vmatmul.mubr.f32.gmra.mrb[18].mxu0 %v3511_v49  ;;  %1191 = vmatmul.mubr.f32.gmra.mrb[18].mxu1 %v3511_v49  ;;  %v1227_v49 = vld [vmem:[%s4482_s5 + $0x30] sm:$0xff]  ;;  %v1324_v22 = vld [vmem:[%s4482_s5 + $0x338] sm:$0xff] }
 0x166   :  { %v2592_v13 = vpack.c.bf16 %v1228_v4, %v1227_v49  ;;  %v1323_v21 = vld [vmem:[%s4482_s5 + $0x330] sm:$0xff] }
 0x167   :  { %2585 = vmatpush3.bf16.msra.mxu0 %v2584_v56  ;;  %2617 = vmatpush3.bf16.msra.mxu1 %v2616_v34  ;;  %v2606_v56 = vpack.c.bf16 %v1252_v47, %v1251_v46  ;;  %v2638_v34 = vpack.c.bf16 %v1284_v50, %v1283_v48  ;;  %v2688_v28 = vpack.c.bf16 %v1324_v22, %v1323_v21  ;;  %v1397_v22 = vld [vmem:[%s4482_s5 + $0x580] sm:$0xff] }
 0x168   :  { %2587 = vmatprep.subr.bf16.mxu0 %v2586_v59  ;;  %2619 = vmatprep.subr.bf16.mxu1 %v2618_v60  ;;  %v1301_v59 = vld [vmem:[%s4482_s5 + $0x280] sm:$0xff]  ;;  %v1302_v60 = vld [vmem:[%s4482_s5 + $0x288] sm:$0xff] }
 0x169   :  { %v2642_v0 = vpack.c.bf16 %v1302_v60, %v1301_v59 }
 0x16b   :  { %2589 = vmatpush3.bf16.msra.mxu0 %v2588_v2  ;;  %2621 = vmatpush3.bf16.msra.mxu1 %v2620_v3  ;;  %v675_v2 = vlaneseq }
 0x16c   :  { %2591 = vmatprep.subr.bf16.mxu0 %v2590_v5  ;;  %2623 = vmatprep.subr.bf16.mxu1 %v2622_v6  ;;  %v672_v5 = vld [vmem:[%s4483_s4 + $0x8] sm:$0xf] }
 0x16d   :  { %v4055_v3 = vshrl.u32 %v675_v2, 7 }
 0x16f   :  { %2593 = vmatpush3.bf16.msra.mxu0 %v2592_v13  ;;  %2625 = vmatpush3.bf16.msra.mxu1 %v2624_v14  ;;  %v677_v49 = vsub.s32 0, %v4055_v3  ;;  %v685_v4 = vsub.s32 2, %v4055_v3  ;;  %v681_v6 = vsub.s32 1, %v4055_v3  ;;  %v689_v7 = vsub.s32 3, %v4055_v3 }
 0x170   :  { %2595 = vmatprep.subr.bf16.mxu0 %v2594_v17  ;;  %2627 = vmatprep.subr.bf16.mxu1 %v2626_v18  ;;  %v1285_v17 = vld [vmem:[%s4482_s5 + $0x200] sm:$0xff]  ;;  %v1286_v18 = vld [vmem:[%s4482_s5 + $0x208] sm:$0xff] }
 0x171   :  { %v4064_v8 = vrot.slane %v672_v5, %v677_v49  ;;  %v4066_v9 = vrot.slane %v672_v5, %v685_v4  ;;  %v4068_v10 = vrot.slane %v672_v5, %v681_v6  ;;  %v4070_v11 = vrot.slane %v672_v5, %v689_v7  ;;  %v1322_v5 = vld [vmem:[%s4482_s5 + $0x328] sm:$0xff] }
 0x172   :  { %v678_v13 = vrot.slane %v4075_v12, %v677_v49  ;;  %v686_v14 = vrot.slane %v4075_v12, %v685_v4  ;;  %v682_v15 = vrot.slane %v4075_v12, %v681_v6  ;;  %v690_v16 = vrot.slane %v4075_v12, %v689_v7  ;;  %v1321_v4 = vld [vmem:[%s4482_s5 + $0x320] sm:$0xff]  ;;  %v1307_v6 = vld [vmem:[%s4482_s5 + $0x2b0] sm:$0xff]  ;;  %v1308_v7 = vld [vmem:[%s4482_s5 + $0x2b8] sm:$0xff] }
 0x173   :  { %2597 = vmatpush3.bf16.msra.mxu0 %v2596_v25  ;;  %2629 = vmatpush3.bf16.msra.mxu1 %v2628_v26  ;;  %v2644_v33 = vpack.c.bf16 %v1286_v18, %v1285_v17  ;;  %v2682_v49 = vpack.c.bf16 %v1338_v58, %v1337_v57  ;;  %v1291_v17 = vld [vmem:[%s4482_s5 + $0x230] sm:$0xff]  ;;  %v1292_v18 = vld [vmem:[%s4482_s5 + $0x238] sm:$0xff]  ;;  %v1298_v57 = vld [vmem:[%s4482_s5 + $0x268] sm:$0xff] }
 0x174   :  { %2599 = vmatprep.subr.bf16.mxu0 %v2598_v29  ;;  %2631 = vmatprep.subr.bf16.mxu1 %v2630_v30  ;;  %v1335_v29 = vld [vmem:[%s4482_s5 + $0x390] sm:$0xff]  ;;  %v1336_v30 = vld [vmem:[%s4482_s5 + $0x398] sm:$0xff] }
 0x177   :  { %2601 = vmatpush3.bf16.msra.mxu0 %v2600_v38  ;;  %2633 = vmatpush3.bf16.msra.mxu1 %v2632_v39 }
 0x178   :  { %2603 = vmatprep.subr.bf16.mxu0 %v2602_v42  ;;  %2635 = vmatprep.subr.bf16.mxu1 %v2634_v43  ;;  %v2678_v42 = vpack.c.bf16 %v1336_v30, %v1335_v29  ;;  %v1288_v43 = vld [vmem:[%s4482_s5 + $0x218] sm:$0xff]  ;;  %v1293_v29 = vld [vmem:[%s4482_s5 + $0x240] sm:$0xff]  ;;  %v1294_v30 = vld [vmem:[%s4482_s5 + $0x248] sm:$0xff] }
 0x179   :  { %v2648_v54 = vpack.c.bf16 %v1288_v43, %v1287_v36  ;;  %v1311_v36 = vld [vmem:[%s4482_s5 + $0x2d0] sm:$0xff]  ;;  %v1296_v43 = vld [vmem:[%s4482_s5 + $0x258] sm:$0xff] }
 0x17b   :  { %2605 = vmatpush3.bf16.msra.mxu0 %v2604_v51  ;;  %2637 = vmatpush3.bf16.msra.mxu1 %v2636_v52  ;;  %v1320_v52 = vld [vmem:[%s4482_s5 + $0x318] sm:$0xff] }
 0x17c   :  { %2607 = vmatprep.subr.bf16.mxu0 %v2606_v56  ;;  %2639 = vmatprep.subr.bf16.mxu1 %v2638_v34  ;;  %v1306_v34 = vld [vmem:[%s4482_s5 + $0x2a8] sm:$0xff]  ;;  %v2680_v61 = vpack.c.bf16 %v1320_v52, %v1319_v44 }
 0x17d   :  { %v2650_v2 = vpack.c.bf16 %v1306_v34, %v1305_v53  ;;  %v1346_v52 = vld [vmem:[%s4482_s5 + $0x3e8] sm:$0xff]  ;;  %v1297_v34 = vld [vmem:[%s4482_s5 + $0x260] sm:$0xff] }
 0x17f   :  { %2609 = vmatpush3.bf16.msra.mxu0 %v2608_v62  ;;  %2641 = vmatpush3.bf16.msra.mxu1 %v2640_v63  ;;  %v1289_v62 = vld [vmem:[%s4482_s5 + $0x220] sm:$0xff]  ;;  %v1290_v63 = vld [vmem:[%s4482_s5 + $0x228] sm:$0xff] }
 0x180   :  { %2643 = vmatprep.subr.bf16.mxu0 %v2642_v0  ;;  %2675 = vmatprep.subr.bf16.mxu1 %v2674_v1 }
 0x1f4   :  { %v801_v19 = vpop.f32.mrb[8].mxu0  ;;  %v878_v20 = vpop.f32.mrb[8].mxu1 }
 0x1f5   :  { %v802_v24 = vadd.f32 %v801_v19, %v678_v13  ;;  %v879_v25 = vadd.f32 %v878_v20, %v686_v14  ;;  %v803_v26 = vpop.f32.mrb[9].mxu0  ;;  %v880_v27 = vpop.f32.mrb[9].mxu1  ;;  %v2654_v19 = vpack.c.bf16 %v1308_v7, %v1307_v6  ;;  %v1300_v7 = vld [vmem:[%s4482_s5 + $0x278] sm:$0xff] }
 0x1f6   :  { %v804_v31 = vadd.f32 %v803_v26, %v682_v15  ;;  %v881_v32 = vadd.f32 %v880_v27, %v690_v16  ;;  %v1342_v26 = vld [vmem:[%s4482_s5 + $0x3c8] sm:$0xff]  ;;  %v2656_v27 = vpack.c.bf16 %v1292_v18, %v1291_v17  ;;  %v1332_v17 = vld [vmem:[%s4482_s5 + $0x378] sm:$0xff]  ;;  %v1365_v18 = vld [vmem:[%s4482_s5 + $0x480] sm:$0xff] }
 0x1f7   :  { %v1197_v45 = vmax.f32 %v802_v24, 0.0  ;;  %v1199_v46 = vmax.f32 %v879_v25, 0.0  ;;  %v1310_v24 = vld [vmem:[%s4482_s5 + $0x2c8] sm:$0xff]  ;;  %v1341_v25 = vld [vmem:[%s4482_s5 + $0x3c0] sm:$0xff] }
 0x1f8   :  { %v1198_v37 = vmax.f32 %v804_v31, 0.0  ;;  %v1200_v38 = vmax.f32 %v881_v32, 0.0  ;;  %v807_v39 = vpop.f32.mrb[10].mxu0  ;;  %v884_v40 = vpop.f32.mrb[10].mxu1  ;;  %v2658_v31 = vpack.c.bf16 %v1310_v24, %v1309_v23  ;;  %v2690_v32 = vpack.c.bf16 %v1342_v26, %v1341_v25  ;;  %v1398_v23 = vld [vmem:[%s4482_s5 + $0x588] sm:$0xff]  ;;  %v1349_v24 = vld [vmem:[%s4482_s5 + $0x400] sm:$0xff] }
 0x1f9   :  { %v808_v47 = vadd.f32 %v807_v39, %v678_v13  ;;  %v885_v48 = vadd.f32 %v884_v40, %v686_v14  ;;  %v809_v50 = vpop.f32.mrb[11].mxu0  ;;  %v886_v51 = vpop.f32.mrb[11].mxu1  ;;  %v1339_v13 = vld [vmem:[%s4482_s5 + $0x3b0] sm:$0xff]  ;;  %v1340_v14 = vld [vmem:[%s4482_s5 + $0x3b8] sm:$0xff]  ;;  %v2660_v40 = vpack.c.bf16 %v1294_v30, %v1293_v29  ;;  %v1350_v25 = vld [vmem:[%s4482_s5 + $0x408] sm:$0xff] }
 0x1fa   :  { %v810_v55 = vadd.f32 %v809_v50, %v682_v15  ;;  %v887_v56 = vadd.f32 %v886_v51, %v690_v16  ;;  %1484 = vmatprep.mubr.f32.mxu0 %v1198_v37  ;;  %1559 = vmatprep.mubr.f32.mxu1 %v1200_v38  ;;  %v2652_v15 = vpack.c.bf16 %v1290_v63, %v1289_v62  ;;  %v1312_v37 = vld [vmem:[%s4482_s5 + $0x2d8] sm:$0xff]  ;;  %v1343_v38 = vld [vmem:[%s4482_s5 + $0x3d0] sm:$0xff]  ;;  %v1314_v50 = vld [vmem:[%s4482_s5 + $0x2e8] sm:$0xff]  ;;  %v697_v63 = vsub.s32 5, %v4055_v3 }
 0x1fb   :  { %1485 = vmatmul.mubr.f32.vlgmr.msra.gmra.mrb[20].mxu0 %v1197_v45  ;;  %1560 = vmatmul.mubr.f32.vlgmr.msra.gmra.mrb[20].mxu1 %v1199_v46  ;;  %v1209_v0 = vmax.f32 %v808_v47, 0.0  ;;  %v1211_v1 = vmax.f32 %v885_v48, 0.0  ;;  %v2684_v16 = vpack.c.bf16 %v1322_v5, %v1321_v4  ;;  %v2686_v20 = vpack.c.bf16 %v1340_v14, %v1339_v13  ;;  %v1344_v39 = vld [vmem:[%s4482_s5 + $0x3d8] sm:$0xff]  ;;  %v1327_v46 = vld [vmem:[%s4482_s5 + $0x350] sm:$0xff]  ;;  %v1313_v48 = vld [vmem:[%s4482_s5 + $0x2e0] sm:$0xff] }
 0x1fc   :  { %v1210_v59 = vmax.f32 %v810_v55, 0.0  ;;  %v1212_v60 = vmax.f32 %v887_v56, 0.0  ;;  %2645 = vmatpush3.bf16.msra.mxu0 %v2644_v33  ;;  %2677 = vmatpush3.bf16.msra.mxu1 %v2676_v35  ;;  %v1325_v33 = vld [vmem:[%s4482_s5 + $0x340] sm:$0xff]  ;;  %v1326_v35 = vld [vmem:[%s4482_s5 + $0x348] sm:$0xff]  ;;  %v2662_v44 = vpack.c.bf16 %v1312_v37, %v1311_v36  ;;  %v2694_v45 = vpack.c.bf16 %v1344_v39, %v1343_v38  ;;  %v1328_v47 = vld [vmem:[%s4482_s5 + $0x358] sm:$0xff] }
 0x1fd   :  { %2647 = vmatprep.subr.bf16.mxu0 %v2646_v41  ;;  %2679 = vmatprep.subr.bf16.mxu1 %v2678_v42  ;;  %v2692_v41 = vpack.c.bf16 %v1326_v35, %v1325_v33  ;;  %v1295_v42 = vld [vmem:[%s4482_s5 + $0x250] sm:$0xff]  ;;  %v1345_v51 = vld [vmem:[%s4482_s5 + $0x3e0] sm:$0xff]  ;;  %v2696_v55 = vpack.c.bf16 %v1328_v47, %v1327_v46  ;;  %v693_v56 = vsub.s32 4, %v4055_v3  ;;  %v2666_v58 = vpack.c.bf16 %v1314_v50, %v1313_v48  ;;  %v1368_v39 = vld [vmem:[%s4482_s5 + $0x498] sm:$0xff] }
 0x1fe   :  { %1489 = vmatprep.mubr.f32.mxu0 %v1210_v59  ;;  %1564 = vmatprep.mubr.f32.mxu1 %v1212_v60  ;;  %v2664_v53 = vpack.c.bf16 %v1296_v43, %v1295_v42  ;;  %v2698_v59 = vpack.c.bf16 %v1346_v52, %v1345_v51  ;;  %v701_v60 = vsub.s32 6, %v4055_v3  ;;  %v1315_v62 = vld [vmem:[%s4482_s5 + $0x2f0] sm:$0xff]  ;;  %v2668_v5 = vpack.c.bf16 %v1298_v57, %v1297_v34  ;;  %v1381_v30 = vld [vmem:[%s4482_s5 + $0x500] sm:$0xff] }
 0x1ff   :  { %1490 = vmatmul.mubr.f32.gmra.mrb[22].mxu0 %v1209_v0  ;;  %1565 = vmatmul.mubr.f32.gmra.mrb[22].mxu1 %v1211_v1  ;;  %v705_v0 = vsub.s32 7, %v4055_v3  ;;  %v1316_v1 = vld [vmem:[%s4482_s5 + $0x2f8] sm:$0xff]  ;;  %v694_v4 = vrot.slane %v4075_v12, %v693_v56  ;;  %v1299_v3 = vld [vmem:[%s4482_s5 + $0x270] sm:$0xff]  ;;  %v2738_v38 = vpack.c.bf16 %v1398_v23, %v1397_v22 }
 0x200   :  { %2649 = vmatpush3.bf16.msra.mxu0 %v2648_v54  ;;  %2681 = vmatpush3.bf16.msra.mxu1 %v2680_v61  ;;  %v1329_v54 = vld [vmem:[%s4482_s5 + $0x360] sm:$0xff]  ;;  %v1330_v61 = vld [vmem:[%s4482_s5 + $0x368] sm:$0xff]  ;;  %v1331_v13 = vld [vmem:[%s4482_s5 + $0x370] sm:$0xff]  ;;  %v702_v14 = vrot.slane %v4075_v12, %v701_v60 }
 0x201   :  { %2651 = vmatprep.subr.bf16.mxu0 %v2650_v2  ;;  %2683 = vmatprep.subr.bf16.mxu1 %v2682_v49  ;;  %v1347_v2 = vld [vmem:[%s4482_s5 + $0x3f0] sm:$0xff]  ;;  %v1348_v49 = vld [vmem:[%s4482_s5 + $0x3f8] sm:$0xff]  ;;  %v2700_v6 = vpack.c.bf16 %v1330_v61, %v1329_v54  ;;  %v706_v21 = vrot.slane %v4075_v12, %v705_v0 }
 0x202   :  { %v1351_v46 = vld [vmem:[%s4482_s5 + $0x410] sm:$0xff]  ;;  %v1384_v61 = vld [vmem:[%s4482_s5 + $0x518] sm:$0xff] }
 0x203   :  { %v1383_v56 = vld [vmem:[%s4482_s5 + $0x510] sm:$0xff]  ;;  %v1404_v23 = vld [vmem:[%s4482_s5 + $0x5b8] sm:$0xff] }
 0x204   :  { %2653 = vmatpush3.bf16.msra.mxu0 %v2652_v15  ;;  %2685 = vmatpush3.bf16.msra.mxu1 %v2684_v16  ;;  %v2670_v15 = vpack.c.bf16 %v1316_v1, %v1315_v62  ;;  %v2702_v16 = vpack.c.bf16 %v1348_v49, %v1347_v2  ;;  %v1369_v62 = vld [vmem:[%s4482_s5 + $0x4a0] sm:$0xff]  ;;  %v1370_v1 = vld [vmem:[%s4482_s5 + $0x4a8] sm:$0xff]  ;;  %v1403_v22 = vld [vmem:[%s4482_s5 + $0x5b0] sm:$0xff] }
 0x205   :  { %2655 = vmatprep.subr.bf16.mxu0 %v2654_v19  ;;  %2687 = vmatprep.subr.bf16.mxu1 %v2686_v20  ;;  %v1366_v19 = vld [vmem:[%s4482_s5 + $0x488] sm:$0xff]  ;;  %v698_v20 = vrot.slane %v4075_v12, %v697_v63  ;;  %v2672_v12 = vpack.c.bf16 %v1300_v7, %v1299_v3  ;;  %v1401_v2 = vld [vmem:[%s4482_s5 + $0x5a0] sm:$0xff]  ;;  %v2744_v3 = vpack.c.bf16 %v1384_v61, %v1383_v56  ;;  %v1391_v56 = vld [vmem:[%s4482_s5 + $0x550] sm:$0xff] }
 0x206   :  { %v2706_v29 = vpack.c.bf16 %v1366_v19, %v1365_v18  ;;  %v1402_v49 = vld [vmem:[%s4482_s5 + $0x5a8] sm:$0xff]  ;;  %v1353_v7 = vld [vmem:[%s4482_s5 + $0x420] sm:$0xff] }
 0x207   :  { %v1385_v18 = vld [vmem:[%s4482_s5 + $0x520] sm:$0xff]  ;;  %v1386_v19 = vld [vmem:[%s4482_s5 + $0x528] sm:$0xff] }
 0x208   :  { %2657 = vmatpush3.bf16.msra.mxu0 %v2656_v27  ;;  %2689 = vmatpush3.bf16.msra.mxu1 %v2688_v28  ;;  %v2704_v28 = vpack.c.bf16 %v1332_v17, %v1331_v13  ;;  %v1354_v13 = vld [vmem:[%s4482_s5 + $0x428] sm:$0xff]  ;;  %v2746_v17 = vpack.c.bf16 %v1402_v49, %v1401_v2  ;;  %v1393_v2 = vld [vmem:[%s4482_s5 + $0x560] sm:$0xff] }
 0x209   :  { %2659 = vmatprep.subr.bf16.mxu0 %v2658_v31  ;;  %2691 = vmatprep.subr.bf16.mxu1 %v2690_v32  ;;  %v1382_v31 = vld [vmem:[%s4482_s5 + $0x508] sm:$0xff]  ;;  %v1367_v32 = vld [vmem:[%s4482_s5 + $0x490] sm:$0xff] }
 0x20a   :  { %v2710_v52 = vpack.c.bf16 %v1368_v39, %v1367_v32  ;;  %v1374_v32 = vld [vmem:[%s4482_s5 + $0x4c8] sm:$0xff] }
 0x20b   :  { %v1358_v39 = vld [vmem:[%s4482_s5 + $0x448] sm:$0xff] }
 0x20c   :  { %2661 = vmatpush3.bf16.msra.mxu0 %v2660_v40  ;;  %2693 = vmatpush3.bf16.msra.mxu1 %v2692_v41  ;;  %v1399_v40 = vld [vmem:[%s4482_s5 + $0x590] sm:$0xff]  ;;  %v1400_v41 = vld [vmem:[%s4482_s5 + $0x598] sm:$0xff]  ;;  %v1394_v49 = vld [vmem:[%s4482_s5 + $0x568] sm:$0xff] }
 0x20d   :  { %2663 = vmatprep.subr.bf16.mxu0 %v2662_v44  ;;  %2695 = vmatprep.subr.bf16.mxu1 %v2694_v45  ;;  %v2708_v44 = vpack.c.bf16 %v1350_v25, %v1349_v24  ;;  %v2740_v45 = vpack.c.bf16 %v1382_v31, %v1381_v30  ;;  %v2716_v24 = vpack.c.bf16 %v1354_v13, %v1353_v7  ;;  %v1388_v30 = vld [vmem:[%s4482_s5 + $0x538] sm:$0xff]  ;;  %v1373_v31 = vld [vmem:[%s4482_s5 + $0x4c0] sm:$0xff] }
 0x20e   :  { %v2748_v25 = vpack.c.bf16 %v1386_v19, %v1385_v18  ;;  %v2764_v13 = vpack.c.bf16 %v1394_v49, %v1393_v2  ;;  %v1395_v18 = vld [vmem:[%s4482_s5 + $0x570] sm:$0xff]  ;;  %v1396_v19 = vld [vmem:[%s4482_s5 + $0x578] sm:$0xff] }
 0x210   :  { %2665 = vmatpush3.bf16.msra.mxu0 %v2664_v53  ;;  %2697 = vmatpush3.bf16.msra.mxu1 %v2696_v55  ;;  %v2742_v53 = vpack.c.bf16 %v1400_v41, %v1399_v40  ;;  %v1352_v55 = vld [vmem:[%s4482_s5 + $0x418] sm:$0xff]  ;;  %v2722_v40 = vpack.c.bf16 %v1374_v32, %v1373_v31 }
 0x211   :  { %2667 = vmatprep.subr.bf16.mxu0 %v2666_v58  ;;  %2699 = vmatprep.subr.bf16.mxu1 %v2698_v59 }
 0x214   :  { %v955_v26 = vpop.f32.mrb[12].mxu0  ;;  %v1032_v27 = vpop.f32.mrb[12].mxu1  ;;  %2669 = vmatpush3.bf16.msra.mxu0 %v2668_v5  ;;  %2701 = vmatpush3.bf16.msra.mxu1 %v2700_v6  ;;  %v2712_v6 = vpack.c.bf16 %v1352_v55, %v1351_v46  ;;  %v1407_v46 = vld [vmem:[%s4482_s5 + $0x5d0] sm:$0xff] }
 0x215   :  { %v956_v33 = vadd.f32 %v955_v26, %v694_v4  ;;  %v1033_v35 = vadd.f32 %v1032_v27, %v702_v14  ;;  %v957_v36 = vpop.f32.mrb[13].mxu0  ;;  %v1034_v37 = vpop.f32.mrb[13].mxu1  ;;  %2671 = vmatprep.subr.bf16.mxu0 %v2670_v15  ;;  %2703 = vmatprep.subr.bf16.mxu1 %v2702_v16  ;;  %v2714_v16 = vpack.c.bf16 %v1370_v1, %v1369_v62  ;;  %v1355_v26 = vld [vmem:[%s4482_s5 + $0x430] sm:$0xff]  ;;  %v1356_v27 = vld [vmem:[%s4482_s5 + $0x438] sm:$0xff]  ;;  %v1361_v62 = vld [vmem:[%s4482_s5 + $0x460] sm:$0xff] }
 0x216   :  { %v958_v42 = vadd.f32 %v957_v36, %v698_v20  ;;  %v1035_v43 = vadd.f32 %v1034_v37, %v706_v21  ;;  %v2720_v36 = vpack.c.bf16 %v1356_v27, %v1355_v26 }
 0x217   :  { %v1201_v34 = vmax.f32 %v956_v33, 0.0  ;;  %v1203_v57 = vmax.f32 %v1033_v35, 0.0  ;;  %v1405_v33 = vld [vmem:[%s4482_s5 + $0x5c0] sm:$0xff]  ;;  %v1406_v35 = vld [vmem:[%s4482_s5 + $0x5c8] sm:$0xff] }
 0x218   :  { %v1202_v47 = vmax.f32 %v958_v42, 0.0  ;;  %v1204_v48 = vmax.f32 %v1035_v43, 0.0  ;;  %v961_v50 = vpop.f32.mrb[14].mxu0  ;;  %v1038_v51 = vpop.f32.mrb[14].mxu1  ;;  %2673 = vmatpush3.bf16.msra.mxu0 %v2672_v12  ;;  %2705 = vmatpush3.bf16.msra.mxu1 %v2704_v28  ;;  %v2750_v28 = vpack.c.bf16 %v1404_v23, %v1403_v22  ;;  %v2754_v41 = vpack.c.bf16 %v1406_v35, %v1405_v33  ;;  %v1389_v42 = vld [vmem:[%s4482_s5 + $0x540] sm:$0xff]  ;;  %v1390_v43 = vld [vmem:[%s4482_s5 + $0x548] sm:$0xff] }
 0x219   :  { %v962_v58 = vadd.f32 %v961_v50, %v694_v4  ;;  %v1039_v59 = vadd.f32 %v1038_v51, %v702_v14  ;;  %v963_v60 = vpop.f32.mrb[15].mxu0  ;;  %v1040_v54 = vpop.f32.mrb[15].mxu1  ;;  %2707 = vmatprep.subr.bf16.mxu0 %v2706_v29  ;;  %2739 = vmatprep.subr.bf16.mxu1 %v2738_v38  ;;  %v1387_v29 = vld [vmem:[%s4482_s5 + $0x530] sm:$0xff]  ;;  %v1357_v38 = vld [vmem:[%s4482_s5 + $0x440] sm:$0xff]  ;;  %v2756_v50 = vpack.c.bf16 %v1390_v43, %v1389_v42 }
 0x21a   :  { %v964_v63 = vadd.f32 %v963_v60, %v698_v20  ;;  %v1041_v0 = vadd.f32 %v1040_v54, %v706_v21  ;;  %1634 = vmatprep.mubr.f32.mxu0 %v1202_v47  ;;  %1709 = vmatprep.mubr.f32.mxu1 %v1204_v48  ;;  %v1371_v20 = vld [vmem:[%s4482_s5 + $0x4b0] sm:$0xff]  ;;  %v1372_v21 = vld [vmem:[%s4482_s5 + $0x4b8] sm:$0xff]  ;;  %v2752_v37 = vpack.c.bf16 %v1388_v30, %v1387_v29  ;;  %v1410_v60 = vld [vmem:[%s4482_s5 + $0x5e8] sm:$0xff] }
 0x21b   :  { %1635 = vmatmul.mubr.f32.vlgmr.msra.gmra.mrb[24].mxu0 %v1201_v34  ;;  %1710 = vmatmul.mubr.f32.vlgmr.msra.gmra.mrb[24].mxu1 %v1203_v57  ;;  %v1213_v14 = vmax.f32 %v962_v58, 0.0  ;;  %v1215_v15 = vmax.f32 %v1039_v59, 0.0  ;;  %v2718_v12 = vpack.c.bf16 %v1372_v21, %v1371_v20  ;;  %v1408_v47 = vld [vmem:[%s4482_s5 + $0x5d8] sm:$0xff]  ;;  %v2724_v48 = vpack.c.bf16 %v1358_v39, %v1357_v38  ;;  %v1359_v51 = vld [vmem:[%s4482_s5 + $0x450] sm:$0xff]  ;;  %v1377_v57 = vld [vmem:[%s4482_s5 + $0x4e0] sm:$0xff] }
 0x21c   :  { %v1214_v4 = vmax.f32 %v964_v63, 0.0  ;;  %v1216_v5 = vmax.f32 %v1041_v0, 0.0  ;;  %2709 = vmatpush3.bf16.msra.mxu0 %v2708_v44  ;;  %2741 = vmatpush3.bf16.msra.mxu1 %v2740_v45  ;;  %v1375_v44 = vld [vmem:[%s4482_s5 + $0x4d0] sm:$0xff]  ;;  %v1376_v45 = vld [vmem:[%s4482_s5 + $0x4d8] sm:$0xff]  ;;  %v2758_v55 = vpack.c.bf16 %v1408_v47, %v1407_v46  ;;  %v1378_v58 = vld [vmem:[%s4482_s5 + $0x4e8] sm:$0xff]  ;;  %v2768_v23 = vpack.c.bf16 %v1396_v19, %v1395_v18 }
 0x21d   :  { %2711 = vmatprep.subr.bf16.mxu0 %v2710_v52  ;;  %2743 = vmatprep.subr.bf16.mxu1 %v2742_v53  ;;  %v1360_v52 = vld [vmem:[%s4482_s5 + $0x458] sm:$0xff]  ;;  %v2726_v53 = vpack.c.bf16 %v1376_v45, %v1375_v44  ;;  %v1409_v59 = vld [vmem:[%s4482_s5 + $0x5e0] sm:$0xff]  ;;  %v1362_v63 = vld [vmem:[%s4482_s5 + $0x468] sm:$0xff]  ;;  %v2730_v0 = vpack.c.bf16 %v1378_v58, %v1377_v57 }
 0x21e   :  { %1639 = vmatprep.mubr.f32.mxu0 %v1214_v4  ;;  %1714 = vmatprep.mubr.f32.mxu1 %v1216_v5  ;;  %v1392_v34 = vld [vmem:[%s4482_s5 + $0x558] sm:$0xff]  ;;  %v2728_v54 = vpack.c.bf16 %v1360_v52, %v1359_v51  ;;  %v2762_v1 = vpack.c.bf16 %v1410_v60, %v1409_v59  ;;  %v1379_v4 = vld [vmem:[%s4482_s5 + $0x4f0] sm:$0xff]  ;;  %v2732_v7 = vpack.c.bf16 %v1362_v63, %v1361_v62 }
 0x21f   :  { %1640 = vmatmul.mubr.f32.gmra.mrb[26].mxu0 %v1213_v14  ;;  %1715 = vmatmul.mubr.f32.gmra.mrb[26].mxu1 %v1215_v15  ;;  %v2760_v61 = vpack.c.bf16 %v1392_v34, %v1391_v56  ;;  %v1380_v5 = vld [vmem:[%s4482_s5 + $0x4f8] sm:$0xff]  ;;  %v1363_v14 = vld [vmem:[%s4482_s5 + $0x470] sm:$0xff] }
 0x220   :  { %2713 = vmatpush3.bf16.msra.mxu0 %v2712_v6  ;;  %2745 = vmatpush3.bf16.msra.mxu1 %v2744_v3  ;;  %v1411_v6 = vld [vmem:[%s4482_s5 + $0x5f0] sm:$0xff]  ;;  %v1412_v3 = vld [vmem:[%s4482_s5 + $0x5f8] sm:$0xff]  ;;  %v2734_v15 = vpack.c.bf16 %v1380_v5, %v1379_v4 }
 0x221   :  { %2715 = vmatprep.subr.bf16.mxu0 %v2714_v16  ;;  %2747 = vmatprep.subr.bf16.mxu1 %v2746_v17  ;;  %v2766_v16 = vpack.c.bf16 %v1412_v3, %v1411_v6  ;;  %v1364_v17 = vld [vmem:[%s4482_s5 + $0x478] sm:$0xff] }
 0x222   :  { %v2736_v22 = vpack.c.bf16 %v1364_v17, %v1363_v14 }
 0x224   :  { %2717 = vmatpush3.bf16.msra.mxu0 %v2716_v24  ;;  %2749 = vmatpush3.bf16.msra.mxu1 %v2748_v25 }
 0x225   :  { %2719 = vmatprep.subr.bf16.mxu0 %v2718_v12  ;;  %2751 = vmatprep.subr.bf16.mxu1 %v2750_v28 }
 0x228   :  { %2721 = vmatpush3.bf16.msra.mxu0 %v2720_v36  ;;  %2753 = vmatpush3.bf16.msra.mxu1 %v2752_v37 }
 0x229   :  { %2723 = vmatprep.subr.bf16.mxu0 %v2722_v40  ;;  %2755 = vmatprep.subr.bf16.mxu1 %v2754_v41 }
 0x22c   :  { %2725 = vmatpush3.bf16.msra.mxu0 %v2724_v48  ;;  %2757 = vmatpush3.bf16.msra.mxu1 %v2756_v50 }
 0x22d   :  { %2727 = vmatprep.subr.bf16.mxu0 %v2726_v53  ;;  %2759 = vmatprep.subr.bf16.mxu1 %v2758_v55 }
 0x230   :  { %2729 = vmatpush3.bf16.msra.mxu0 %v2728_v54  ;;  %2761 = vmatpush3.bf16.msra.mxu1 %v2760_v61 }
 0x231   :  { %2731 = vmatprep.subr.bf16.mxu0 %v2730_v0  ;;  %2763 = vmatprep.subr.bf16.mxu1 %v2762_v1 }
 0x234   :  { %v1109_v20 = vpop.f32.mrb[16].mxu0  ;;  %v1186_v21 = vpop.f32.mrb[16].mxu1  ;;  %2733 = vmatpush3.bf16.msra.mxu0 %v2732_v7  ;;  %2765 = vmatpush3.bf16.msra.mxu1 %v2764_v13 }
 0x235   :  { %v1110_v24 = vadd.f32 %v1109_v20, %v4064_v8  ;;  %v1187_v25 = vadd.f32 %v1186_v21, %v4066_v9  ;;  %v1111_v26 = vpop.f32.mrb[17].mxu0  ;;  %v1188_v27 = vpop.f32.mrb[17].mxu1  ;;  %2735 = vmatprep.subr.bf16.mxu0 %v2734_v15  ;;  %2767 = vmatprep.subr.bf16.mxu1 %v2766_v16 }
 0x236   :  { %v1112_v12 = vadd.f32 %v1111_v26, %v4068_v10  ;;  %v1189_v28 = vadd.f32 %v1188_v27, %v4070_v11 }
 0x237   :  { %v1205_v33 = vmax.f32 %v1110_v24, 0.0  ;;  %v1207_v35 = vmax.f32 %v1187_v25, 0.0 }
 0x238   :  { %v1206_v29 = vmax.f32 %v1112_v12, 0.0  ;;  %v1208_v30 = vmax.f32 %v1189_v28, 0.0  ;;  %v1115_v31 = vpop.f32.mrb[18].mxu0  ;;  %v1192_v32 = vpop.f32.mrb[18].mxu1  ;;  %2737 = vmatpush3.bf16.msra.mxu0 %v2736_v22  ;;  %2769 = vmatpush3.bf16.msra.mxu1 %v2768_v23 }
 0x239   :  { %v1116_v36 = vadd.f32 %v1115_v31, %v4064_v8  ;;  %v1193_v37 = vadd.f32 %v1192_v32, %v4066_v9  ;;  %v1117_v38 = vpop.f32.mrb[19].mxu0  ;;  %v1194_v39 = vpop.f32.mrb[19].mxu1 }
 0x23a   :  { %v1118_v40 = vadd.f32 %v1117_v38, %v4068_v10  ;;  %v1195_v41 = vadd.f32 %v1194_v39, %v4070_v11  ;;  %1784 = vmatprep.mubr.f32.mxu0 %v1206_v29  ;;  %1859 = vmatprep.mubr.f32.mxu1 %v1208_v30  ;;  %v1877_v10 = vld [vmem:[%s4484_s6] ss:$0 sm:$0xff] }
 0x23b   :  { %1785 = vmatmul.mubr.f32.vlgmr.msra.gmra.mrb[28].mxu0 %v1205_v33  ;;  %1860 = vmatmul.mubr.f32.vlgmr.msra.gmra.mrb[28].mxu1 %v1207_v35  ;;  %v1217_v44 = vmax.f32 %v1116_v36, 0.0  ;;  %v1219_v45 = vmax.f32 %v1193_v37, 0.0 }
 0x23c   :  { %v1218_v42 = vmax.f32 %v1118_v40, 0.0  ;;  %v1220_v43 = vmax.f32 %v1195_v41, 0.0 }
 0x23e   :  { %1789 = vmatprep.mubr.f32.mxu0 %v1218_v42  ;;  %1864 = vmatprep.mubr.f32.mxu1 %v1220_v43 }
 0x23f   :  { %1790 = vmatmul.mubr.f32.gmra.mrb[30].mxu0 %v1217_v44  ;;  %1865 = vmatmul.mubr.f32.gmra.mrb[30].mxu1 %v1219_v45 }
 0x2ce   :  { %v2062_v8 = vpop.f32.mrb[20].mxu0  ;;  %v2100_v9 = vpop.f32.mrb[20].mxu1 }
 0x2cf   :  { %v2063_v46 = vpop.f32.mrb[21].mxu0  ;;  %v2101_v11 = vpop.f32.mrb[21].mxu1 }
 0x2d0   :  { %v2064_v47 = vadd.f32 %v2063_v46, %v2062_v8  ;;  %v2102_v48 = vadd.f32 %v2101_v11, %v2100_v9 }
 0x2d2   :  { %v1487_v50 = vadd.f32 %v2064_v47, %v1877_v10  ;;  %v2065_v51 = vpop.f32.mrb[22].mxu0  ;;  %v2103_v52 = vpop.f32.mrb[22].mxu1 }
 0x2d3   :  { %v2066_v53 = vpop.f32.mrb[23].mxu0  ;;  %v2104_v55 = vpop.f32.mrb[23].mxu1 }
 0x2d4   :  { %v1562_v56 = vadd.f32 %v2102_v48, %v1487_v50  ;;  %v2067_v34 = vadd.f32 %v2066_v53, %v2065_v51  ;;  %v2105_v57 = vadd.f32 %v2104_v55, %v2103_v52 }
 0x2d6   :  { %v1492_v58 = vadd.f32 %v2067_v34, %v1877_v10 }
 0x2d8   :  { %v1567_v59 = vadd.f32 %v2105_v57, %v1492_v58 }
 0x2ee   :  { %v2138_v60 = vpop.f32.mrb[24].mxu0  ;;  %v2176_v54 = vpop.f32.mrb[24].mxu1 }
 0x2ef   :  { %v2139_v61 = vpop.f32.mrb[25].mxu0  ;;  %v2177_v62 = vpop.f32.mrb[25].mxu1 }
 0x2f0   :  { %v2140_v63 = vadd.f32 %v2139_v61, %v2138_v60  ;;  %v2178_v0 = vadd.f32 %v2177_v62, %v2176_v54 }
 0x2f2   :  { %v1637_v1 = vadd.f32 %v2140_v63, %v1562_v56  ;;  %v2141_v2 = vpop.f32.mrb[26].mxu0  ;;  %v2179_v49 = vpop.f32.mrb[26].mxu1 }
 0x2f3   :  { %v2142_v4 = vpop.f32.mrb[27].mxu0  ;;  %v2180_v5 = vpop.f32.mrb[27].mxu1 }
 0x2f4   :  { %v1712_v6 = vadd.f32 %v2178_v0, %v1637_v1  ;;  %v2143_v3 = vadd.f32 %v2142_v4, %v2141_v2  ;;  %v2181_v7 = vadd.f32 %v2180_v5, %v2179_v49 }
 0x2f6   :  { %v1642_v13 = vadd.f32 %v2143_v3, %v1567_v59 }
 0x2f8   :  { %v1717_v14 = vadd.f32 %v2181_v7, %v1642_v13 }
 0x30e   :  { %v2214_v15 = vpop.f32.mrb[28].mxu0  ;;  %v2252_v16 = vpop.f32.mrb[28].mxu1 }
 0x30f   :  { %v2215_v17 = vpop.f32.mrb[29].mxu0  ;;  %v2253_v18 = vpop.f32.mrb[29].mxu1 }
 0x310   :  { %v2216_v19 = vadd.f32 %v2215_v17, %v2214_v15  ;;  %v2254_v20 = vadd.f32 %v2253_v18, %v2252_v16 }
 0x312   :  { %v1787_v21 = vadd.f32 %v2216_v19, %v1712_v6  ;;  %v2217_v22 = vpop.f32.mrb[30].mxu0  ;;  %v2255_v23 = vpop.f32.mrb[30].mxu1 }
 0x313   :  { %v2218_v24 = vpop.f32.mrb[31].mxu0  ;;  %v2256_v25 = vpop.f32.mrb[31].mxu1 }
 0x314   :  { %v1862_v26 = vadd.f32 %v2254_v20, %v1787_v21  ;;  %v2219_v27 = vadd.f32 %v2218_v24, %v2217_v22  ;;  %v2257_v12 = vadd.f32 %v2256_v25, %v2255_v23 }
 0x316   :  { %1870 = vst [vmem:[%s4485_s7] sm:$0xff] %v1862_v26  ;;  %v1792_v28 = vadd.f32 %v2219_v27, %v1717_v14 }
 0x318   :  { %v1867_v29 = vadd.f32 %v2257_v12, %v1792_v28 }
 0x31a   :  { %1871 = vst [vmem:[%s4485_s7 + $0x8] sm:$0xff] %v1867_v29 }

// kernel: net24_forward.2
= control target key start
LH: loop header
LB: loop body
LE: loop exit
PB: predicated region body
PF: predicated region fallthrough
CT: control target
= control target key end

     0   :  { %s19122_s0 = inlined_call_operand.vmem [shape: bf16[16,12544], index: 0, kind: input, shape index: {}]   ;;  %s19123_s1 = inlined_call_operand.hbm [shape: bf16[12544,1024], index: 1, kind: input, shape index: {}]   ;;  %s19124_s2 = inlined_call_operand.hbm [shape: f32[1,1024], index: 2, kind: input, shape index: {}]   ;;  %s19125_s3 = inlined_call_operand.vmem [shape: f32[16,1024], index: 3, kind: output, shape index: {}]  }
   0x1   :  { %19133 = sst [smem:[#allocation18_spill]] %s19122_s0 }
   0x2   :  { %19134 = sst [smem:[#allocation19_spill]] %s19123_s1 }
   0x3   :  { %8 = vsyncpa [#allocation4], 0 }
   0x4   :  { %10 = vsyncpa [#allocation4 + $0x1], 0 }
   0x5   :  { %11 = vsyncpa [#allocation6], 0 }
   0x6   :  { %13 = vsyncpa [#allocation6 + $0x1], 0  ;;  %s17078_s12 = smov 0   ;;  %s17080_s13 = smov 0  }
   0x7   :  { %s17082_s14 = smov 0   ;;  %s17084_s15 = smov 0  }
   0x8   :  { %s17086_s16 = smov 0   ;;  %s17088_s17 = smov 0  }
   0x9   :  { %s17090_s18 = smov 0   ;;  %s17092_s19 = smov 0  }
   0xa   :  { %s17094_s20 = smov 0   ;;  %s17096_s21 = smov 0  }
   0xb   :  { %s17098_s22 = smov 0   ;;  %s17100_s23 = smov 0  }
   0xc   :  { %s17102_s24 = smov 0  }
   0xd LB: > { %19135 = sst [smem:[#allocation10_spill]] %s17021_s17  ;;  %s12503_s25 = sadd.s32 4294967295, %s17049_s24   ;;  %s17049_s24 = sphi %s17102_s24, %s19_s24   ;;  %s17045_s23 = sphi %s17100_s23, %s19171_s23   ;;  %s17041_s22 = sphi %s17098_s22, %s19161_s22   ;;  %s17037_s21 = sphi %s17096_s21, %s19170_s21   ;;  %s17033_s20 = sphi %s17094_s20, %s19160_s20   ;;  %s17029_s19 = sphi %s17092_s19, %s19159_s19   ;;  %s17025_s18 = sphi %s17090_s18, %s19158_s18   ;;  %s17021_s17 = sphi %s17088_s17, %s19169_s17   ;;  %s17017_s16 = sphi %s17086_s16, %s19168_s16   ;;  %s17013_s15 = sphi %s17084_s15, %s19167_s15   ;;  %s17009_s14 = sphi %s17082_s14, %s19166_s14   ;;  %s17005_s13 = sphi %s17080_s13, %s19165_s13   ;;  %s17001_s12 = sphi %s17078_s12, %s19164_s12  }
   0xe   : > { %19136 = sst [smem:[#allocation11_spill]] %s17029_s19  ;;  %s28_s26 = sadd.s32 1, %s17041_s22 }
   0xf   : > { %19137 = sst [smem:[#allocation12_spill]] %s17041_s22  ;;  %p29_p0 = scmp.ge.s32.totalorder %s28_s26, 2 }
  0x10   : > { %s31_s27 = sadd.s32 1, %s17045_s23  ;;  %s38_s28 = sadd.s32 1, %s17029_s19 }
  0x11   : > { %p45_p1 = scmp.ne.s32.totalorder %s17029_s19, %s17025_s18  ;;  %s19173_s26 = smov (%p29_p0, %s28_s26), 0 }
  0x12   : > { %19138 = sst [smem:[#allocation13_spill]] %s19173_s26  ;;  %s19175_s27 = smov (!%p29_p0, %s31_s27), %s17045_s23 }
  0x13   : > { %s35_s29 = ssub.s32 %s17041_s22, %s19173_s26  ;;  %p46_p2 = scmp.eq.s32.totalorder %s17049_s24, 0 }
  0x14   : > { %p33_p3 = scmp.ge.s32.totalorder %s19175_s27, 2  ;;  %p36_p4 = scmp.eq.s32.totalorder %s35_s29, 0 }
  0x15   : > { %p17157_p5 = por %p46_p2, %p45_p1  ;;  %s66_s4 = sadd.s32 1, %s17021_s17 }
  0x16   : > { %s19177_s27 = smov (%p33_p3, %s19175_s27), 0  ;;  %p73_p6 = scmp.ne.s32.totalorder %s17021_s17, %s17017_s16 }
  0x17   : > { %19140 = sst [smem:[#allocation14_spill]] %s19177_s27  ;;  %s62_s6 = ssub.s32 %s17045_s23, %s19177_s27 }
  0x18   : > { %s17165_s5 = scalar_select %p36_p4, %s17029_s19, %s38_s28  }
  0x19   : > { %s63_s7 = sor.u32 %s62_s6, %s35_s29  ;;  %p79_p7 = scmp.ne.s32.totalorder %s17017_s16, %s17013_s15 }
  0x1a   : > { %19141 = sst [smem:[#allocation15_spill]] %s17165_s5  ;;  %p64_p8 = scmp.eq.s32.totalorder %s63_s7, 0 }
  0x1b   : > { %p17175_p9 = por %p73_p6, %p46_p2  ;;  %p80_p10 = scmp.eq.s32.totalorder %s12503_s25, 0 }
  0x1c   : > { %p90_p11 = scmp.eq.s32.totalorder %s62_s6, 0  ;;  %s92_s11 = sadd.s32 1, %s17009_s14 }
  0x1d   : > { %s17182_s9 = scalar_select %p64_p8, %s17021_s17, %s66_s4  }
  0x1e   : > { %p17184_p12 = por %p80_p10, %p79_p7  ;;  %p99_p13 = scmp.ne.s32.totalorder %s17009_s14, %s17005_s13 }
  0x1f   : > { %19143 = sst [smem:[#allocation16_spill]] %s17182_s9  ;;  %p105_p0 = scmp.ne.s32.totalorder %s17005_s13, %s17001_s12 }
  0x20   : > { %s19144_s10 = scalar_select %p17184_p12, 1, 0 }
  0x21   : > { %s17190_s28 = scalar_select %p90_p11, %s17009_s14, %s92_s11  }
  0x22   : > { %p129_p1 = scmp.eq.s32.totalorder %s12503_s25, 3  ;;  %p17200_p3 = por %p99_p13, %p46_p2 }
  0x23   : > { %19145 = sst [smem:[#allocation17_spill]] %s17190_s28  ;;  %p17204_p4 = por %p105_p0, %p80_p10 }
  0x24   : > { %p17208_p6 = por %p129_p1, %p99_p13  ;;  %p12506_p7 = scmp.ge.s32.totalorder %s17049_s24, 4 }
  0x25   : > { %s19147_s29 = scalar_select %p17204_p4, 1, 0 }
  0x26   : > { %s19148_s4 = scalar_select %p17208_p6, 1, 0 }
  0x27   : > { %151 = sbr.rel (%p12506_p7) target bundleno = 136 (0x88), region = 16 }
  0x2e   : > { %154 = sbr.rel (!%p17157_p5) target bundleno = 80 (0x50), region = 20  ;;  %s156_s12 = sand.u32 (%p17157_p5), 1, %s17029_s19  }
  0x2f   : > { %s14145_s25 = smul.u32 (%p17157_p5), 196, %s17041_s22  ;;  %s19149_s0 = sld [smem:[#allocation18_spill]] (%p17157_p5) }
  0x30   : > { %s14341_s6 = smul.u32 (%p17157_p5), 392, %s156_s12 }
  0x32   : > { %s17225_s30 = scalar_lea.vmem (%p17157_p5), [#allocation2], %s14341_s6 }
  0x35   : > { %s17220_s27 = scalar_lea.vmem %s19149_s0, %s14145_s25 }
  0x36   : > { %v176_v0 = vld [vmem:[%s17220_s27] sm:$0xff]  ;;  %v178_v1 = vld [vmem:[%s17220_s27 + $0x8] sm:$0xff]  ;;  %v180_v2 = vld [vmem:[%s17220_s27 + $0x10] sm:$0xff] }
  0x37   : > { %177 = vst [vmem:[%s17225_s30] sm:$0xff] %v176_v0  ;;  %179 = vst [vmem:[%s17225_s30 + $0x8] sm:$0xff] %v178_v1  ;;  %v182_v3 = vld [vmem:[%s17220_s27 + $0x18] sm:$0xff]  ;;  %v184_v4 = vld [vmem:[%s17220_s27 + $0x20] sm:$0xff] }
  0x38   : > { %181 = vst [vmem:[%s17225_s30 + $0x10] sm:$0xff] %v180_v2  ;;  %v186_v5 = vld [vmem:[%s17220_s27 + $0x28] sm:$0xff]  ;;  %183 = vst [vmem:[%s17225_s30 + $0x18] sm:$0xff] %v182_v3  ;;  %v188_v6 = vld [vmem:[%s17220_s27 + $0x30] sm:$0xff] }
  0x39   : > { %185 = vst [vmem:[%s17225_s30 + $0x20] sm:$0xff] %v184_v4  ;;  %187 = vst [vmem:[%s17225_s30 + $0x28] sm:$0xff] %v186_v5  ;;  %v190_v7 = vld [vmem:[%s17220_s27 + $0x38] sm:$0xff]  ;;  %v192_v8 = vld [vmem:[%s17220_s27 + $0x40] sm:$0xff] }
  0x3a   : > { %189 = vst [vmem:[%s17225_s30 + $0x30] sm:$0xff] %v188_v6  ;;  %191 = vst [vmem:[%s17225_s30 + $0x38] sm:$0xff] %v190_v7  ;;  %v194_v9 = vld [vmem:[%s17220_s27 + $0x48] sm:$0xff]  ;;  %v196_v10 = vld [vmem:[%s17220_s27 + $0x50] sm:$0xff] }
  0x3b   : > { %193 = vst [vmem:[%s17225_s30 + $0x40] sm:$0xff] %v192_v8  ;;  %v198_v11 = vld [vmem:[%s17220_s27 + $0x58] sm:$0xff]  ;;  %195 = vst [vmem:[%s17225_s30 + $0x48] sm:$0xff] %v194_v9  ;;  %v200_v12 = vld [vmem:[%s17220_s27 + $0x60] sm:$0xff] }
  0x3c   : > { %197 = vst [vmem:[%s17225_s30 + $0x50] sm:$0xff] %v196_v10  ;;  %199 = vst [vmem:[%s17225_s30 + $0x58] sm:$0xff] %v198_v11  ;;  %v202_v13 = vld [vmem:[%s17220_s27 + $0x68] sm:$0xff]  ;;  %v204_v14 = vld [vmem:[%s17220_s27 + $0x70] sm:$0xff] }
  0x3d   : > { %201 = vst [vmem:[%s17225_s30 + $0x60] sm:$0xff] %v200_v12  ;;  %203 = vst [vmem:[%s17225_s30 + $0x68] sm:$0xff] %v202_v13  ;;  %v206_v15 = vld [vmem:[%s17220_s27 + $0x78] sm:$0xff]  ;;  %v208_v16 = vld [vmem:[%s17220_s27 + $0x80] sm:$0xff] }
  0x3e   : > { %205 = vst [vmem:[%s17225_s30 + $0x70] sm:$0xff] %v204_v14  ;;  %v210_v17 = vld [vmem:[%s17220_s27 + $0x88] sm:$0xff]  ;;  %207 = vst [vmem:[%s17225_s30 + $0x78] sm:$0xff] %v206_v15  ;;  %v212_v18 = vld [vmem:[%s17220_s27 + $0x90] sm:$0xff] }
  0x3f   : > { %209 = vst [vmem:[%s17225_s30 + $0x80] sm:$0xff] %v208_v16  ;;  %211 = vst [vmem:[%s17225_s30 + $0x88] sm:$0xff] %v210_v17  ;;  %v214_v19 = vld [vmem:[%s17220_s27 + $0x98] sm:$0xff]  ;;  %v216_v20 = vld [vmem:[%s17220_s27 + $0xa0] sm:$0xff] }
  0x40   : > { %213 = vst [vmem:[%s17225_s30 + $0x90] sm:$0xff] %v212_v18  ;;  %215 = vst [vmem:[%s17225_s30 + $0x98] sm:$0xff] %v214_v19  ;;  %v218_v21 = vld [vmem:[%s17220_s27 + $0xa8] sm:$0xff]  ;;  %v220_v22 = vld [vmem:[%s17220_s27 + $0xb0] sm:$0xff] }
  0x41   : > { %217 = vst [vmem:[%s17225_s30 + $0xa0] sm:$0xff] %v216_v20  ;;  %v222_v23 = vld [vmem:[%s17220_s27 + $0xb8] sm:$0xff]  ;;  %219 = vst [vmem:[%s17225_s30 + $0xa8] sm:$0xff] %v218_v21  ;;  %v224_v24 = vld [vmem:[%s17220_s27 + $0x188] sm:$0xff] }
  0x42   : > { %221 = vst [vmem:[%s17225_s30 + $0xb0] sm:$0xff] %v220_v22  ;;  %223 = vst [vmem:[%s17225_s30 + $0xb8] sm:$0xff] %v222_v23  ;;  %v226_v25 = vld [vmem:[%s17220_s27 + $0x190] sm:$0xff]  ;;  %v228_v26 = vld [vmem:[%s17220_s27 + $0x198] sm:$0xff] }
  0x43   : > { %225 = vst [vmem:[%s17225_s30 + $0xc4] sm:$0xff] %v224_v24  ;;  %227 = vst [vmem:[%s17225_s30 + $0xcc] sm:$0xff] %v226_v25  ;;  %v230_v27 = vld [vmem:[%s17220_s27 + $0x1a0] sm:$0xff]  ;;  %v232_v28 = vld [vmem:[%s17220_s27 + $0x1a8] sm:$0xff] }
  0x44   : > { %229 = vst [vmem:[%s17225_s30 + $0xd4] sm:$0xff] %v228_v26  ;;  %v234_v29 = vld [vmem:[%s17220_s27 + $0x1b0] sm:$0xff]  ;;  %231 = vst [vmem:[%s17225_s30 + $0xdc] sm:$0xff] %v230_v27  ;;  %v236_v30 = vld [vmem:[%s17220_s27 + $0x1b8] sm:$0xff] }
  0x45   : > { %233 = vst [vmem:[%s17225_s30 + $0xe4] sm:$0xff] %v232_v28  ;;  %235 = vst [vmem:[%s17225_s30 + $0xec] sm:$0xff] %v234_v29  ;;  %v238_v31 = vld [vmem:[%s17220_s27 + $0x1c0] sm:$0xff]  ;;  %v240_v32 = vld [vmem:[%s17220_s27 + $0x1c8] sm:$0xff] }
  0x46   : > { %237 = vst [vmem:[%s17225_s30 + $0xf4] sm:$0xff] %v236_v30  ;;  %239 = vst [vmem:[%s17225_s30 + $0xfc] sm:$0xff] %v238_v31  ;;  %v242_v33 = vld [vmem:[%s17220_s27 + $0x1d0] sm:$0xff]  ;;  %v244_v34 = vld [vmem:[%s17220_s27 + $0x1d8] sm:$0xff] }
  0x47   : > { %241 = vst [vmem:[%s17225_s30 + $0x104] sm:$0xff] %v240_v32  ;;  %v246_v35 = vld [vmem:[%s17220_s27 + $0x1e0] sm:$0xff]  ;;  %243 = vst [vmem:[%s17225_s30 + $0x10c] sm:$0xff] %v242_v33  ;;  %v248_v36 = vld [vmem:[%s17220_s27 + $0x1e8] sm:$0xff] }
  0x48   : > { %245 = vst [vmem:[%s17225_s30 + $0x114] sm:$0xff] %v244_v34  ;;  %247 = vst [vmem:[%s17225_s30 + $0x11c] sm:$0xff] %v246_v35  ;;  %v250_v37 = vld [vmem:[%s17220_s27 + $0x1f0] sm:$0xff]  ;;  %v252_v38 = vld [vmem:[%s17220_s27 + $0x1f8] sm:$0xff] }
  0x49   : > { %249 = vst [vmem:[%s17225_s30 + $0x124] sm:$0xff] %v248_v36  ;;  %251 = vst [vmem:[%s17225_s30 + $0x12c] sm:$0xff] %v250_v37  ;;  %v254_v39 = vld [vmem:[%s17220_s27 + $0x200] sm:$0xff]  ;;  %v256_v40 = vld [vmem:[%s17220_s27 + $0x208] sm:$0xff] }
  0x4a   : > { %253 = vst [vmem:[%s17225_s30 + $0x134] sm:$0xff] %v252_v38  ;;  %v258_v41 = vld [vmem:[%s17220_s27 + $0x210] sm:$0xff]  ;;  %255 = vst [vmem:[%s17225_s30 + $0x13c] sm:$0xff] %v254_v39  ;;  %v260_v42 = vld [vmem:[%s17220_s27 + $0x218] sm:$0xff] }
  0x4b   : > { %257 = vst [vmem:[%s17225_s30 + $0x144] sm:$0xff] %v256_v40  ;;  %259 = vst [vmem:[%s17225_s30 + $0x14c] sm:$0xff] %v258_v41  ;;  %v262_v43 = vld [vmem:[%s17220_s27 + $0x220] sm:$0xff]  ;;  %v264_v44 = vld [vmem:[%s17220_s27 + $0x228] sm:$0xff] }
  0x4c   : > { %261 = vst [vmem:[%s17225_s30 + $0x154] sm:$0xff] %v260_v42  ;;  %263 = vst [vmem:[%s17225_s30 + $0x15c] sm:$0xff] %v262_v43  ;;  %v266_v45 = vld [vmem:[%s17220_s27 + $0x230] sm:$0xff]  ;;  %v268_v46 = vld [vmem:[%s17220_s27 + $0x238] sm:$0xff] }
  0x4d   : > { %265 = vst [vmem:[%s17225_s30 + $0x164] sm:$0xff] %v264_v44  ;;  %v270_v47 = vld [vmem:[%s17220_s27 + $0x240] sm:$0xff]  ;;  %267 = vst [vmem:[%s17225_s30 + $0x16c] sm:$0xff] %v266_v45  ;;  %v12510_v49 = vld [vmem:[%s17220_s27 + $0x248] sm:$0xf] }
  0x4e   : > { %269 = vst [vmem:[%s17225_s30 + $0x174] sm:$0xff] %v268_v46  ;;  %271 = vst [vmem:[%s17225_s30 + $0x17c] sm:$0xff] %v270_v47  ;;  %v12508_v48 = vld [vmem:[%s17220_s27 + $0xc0] sm:$0xf] }
  0x4f   : > { %12509 = vst [vmem:[%s17225_s30 + $0xc0] sm:$0xf] %v12508_v48  ;;  %12511 = vst [vmem:[%s17225_s30 + $0x184] sm:$0xf] %v12510_v49 }
  0x50 PF: > { %s289_s12 = sand.u32 1, %s17021_s17   ;;  %s12512_s25 = sshll.u32 %s17045_s23, 2 }
  0x51   : > { %s14342_s6 = smul.u32 12544, %s289_s12  ;;  %s19150_s1 = sld [smem:[#allocation19_spill]] }
  0x52   : > { %s14146_s7 = smul.u32 6272, %s17041_s22  ;;  %s17334_s30 = scalar_lea.sflag [#allocation4], %s289_s12 }
  0x53   : > { %s293_s0 = scalar_lea.vmem [#allocation3], %s14342_s6 }
  0x54   : > { %s300_s11 = sadd.s32 %s14146_s7, %s12512_s25  ;;  %s303_s26 = sshll.u32 %s293_s0, 4  ;;  %s17327_s26 = int_to_ptr.vmem [resolvable:$true] %s303_s26 }
  0x55   : > { %s12514_s5 = sshll.u32 %s300_s11, 6 }
  0x57   : > { %s17332_s27 = scalar_lea.hbm %s19150_s1, %s12514_s5  ;;  %s16887_s6 = scalar_lea.hbm %s19150_s1, 802816 }
  0x58   : > { %s16883_s17 = scalar_lea.hbm %s17332_s27, 200704  ;;  %p16888_p10 = scmp.lt.u32.totalorder %s17332_s27, %s19150_s1 }
  0x59   : > { %p16884_p2 = scmp.ne.s32.totalorder %s17332_s27, %s16883_s17  ;;  %p16889_p11 = scmp.lt.u32.totalorder %s16887_s6, %s16883_s17 }
  0x5a   : > { %p16891_p0 = scmp.lt.u32.totalorder %s16883_s17, %s17332_s27 }
  0x5b   : > { %p16885_p5 = pnand %p16884_p2, %p17175_p9  ;;  %p16890_p13 = por %p16889_p11, %p16888_p10 }
  0x5d   : > { %p16886_p8 = pneg %p16885_p5  ;;  %p16892_p1 = por %p16891_p0, %p16890_p13 }
  0x5f   : > { %p16893_p7 = pnand %p16892_p1, %p16886_p8 }
  0x61   : > { %16896 = shalt.err (!%p16893_p7)
}
  0x62   : > { %s16897_s19 = scalar_lea.vmem %s17327_s26, 200704  ;;  %s17051_s5 = smov [#allocation3]  }
  0x63   : > { %p16898_p2 = scmp.ne.s32.totalorder %s17327_s26, %s16897_s19  ;;  %s16901_s9 = sshll.u32 %s17051_s5, 4  ;;  %s16902_s9 = int_to_ptr.vmem [resolvable:$false] %s16901_s9 }
  0x64   : > { %s16903_s12 = scalar_lea.vmem %s16902_s9, 401408  ;;  %p16904_p4 = scmp.lt.s32.totalorder %s17327_s26, %s16902_s9 }
  0x65   : > { %p16899_p5 = pnand %p16898_p2, %p17175_p9  ;;  %p16905_p12 = scmp.lt.s32.totalorder %s16903_s12, %s16897_s19 }
  0x67   : > { %p16900_p6 = pneg %p16899_p5  ;;  %p16906_p10 = por %p16905_p12, %p16904_p4 }
  0x69   : > { %p16907_p11 = pnand %p16906_p10, %p16900_p6 }
  0x6b   : > { %16910 = shalt.err (!%p16907_p11)
}
  0x6c   : > { %s17052_s17 = smov 512   ;;  %s17053_s0 = smov 256  }
  0x6d   : > { %s17054_s25 = smov 16   ;;  %s313_s6 = sand.u32 1, %s17009_s14  }
  0x6e   : > { %14345 = dma.hbm_to_vmem [thread:$0]  (%p17175_p9), %s17332_s27, 200704, %s17327_s26, %s17334_s30, %s17052_s17, %s17053_s0, %s17054_s25  }
  0x6f   : > { %s14147_s7 = sshll.u32 %s17045_s23, 6  ;;  %s12515_s11 = sshll.u32 %s313_s6, 2 }
  0x70   : > { %s17363_s9 = scalar_lea.hbm %s19124_s2, %s14147_s7  ;;  %s317_s12 = scalar_lea.vmem [#allocation5], %s12515_s11 }
  0x71   : > { %s325_s1 = sshll.u32 %s317_s12, 4  ;;  %s314_s22 = scalar_lea.sflag [#allocation6], %s313_s6  ;;  %s326_s1 = int_to_ptr.vmem [resolvable:$true] %s325_s1 }
  0x72   : > { %s16911_s28 = scalar_lea.hbm %s17363_s9, 64  ;;  %s16915_s27 = scalar_lea.hbm %s19124_s2, 128 }
  0x73   : > { %p16912_p12 = scmp.ne.s32.totalorder %s17363_s9, %s16911_s28  ;;  %p16916_p6 = scmp.lt.u32.totalorder %s17363_s9, %s19124_s2 }
  0x74   : > { %p16917_p8 = scmp.lt.u32.totalorder %s16915_s27, %s16911_s28  ;;  %p16919_p0 = scmp.lt.u32.totalorder %s16911_s28, %s17363_s9 }
  0x75   : > { %p16913_p9 = pnand %p16912_p12, %p17200_p3 }
  0x76   : > { %p16918_p13 = por %p16917_p8, %p16916_p6 }
  0x77   : > { %p16914_p4 = pneg %p16913_p9 }
  0x78   : > { %p16920_p1 = por %p16919_p0, %p16918_p13 }
  0x7a   : > { %p16921_p7 = pnand %p16920_p1, %p16914_p4 }
  0x7c   : > { %16924 = shalt.err (!%p16921_p7)
}
  0x7d   : > { %s16925_s0 = scalar_lea.vmem %s326_s1, 64  ;;  %s17055_s25 = smov [#allocation5]  }
  0x7e   : > { %p16926_p2 = scmp.ne.s32.totalorder %s326_s1, %s16925_s0  ;;  %s16929_s6 = sshll.u32 %s17055_s25, 4  ;;  %s16930_s6 = int_to_ptr.vmem [resolvable:$false] %s16929_s6 }
  0x7f   : > { %s16931_s7 = scalar_lea.vmem %s16930_s6, 128  ;;  %p16932_p11 = scmp.lt.s32.totalorder %s326_s1, %s16930_s6 }
  0x80   : > { %p16927_p5 = pnand %p16926_p2, %p17200_p3  ;;  %p16933_p12 = scmp.lt.s32.totalorder %s16931_s7, %s16925_s0 }
  0x82   : > { %p16928_p10 = pneg %p16927_p5  ;;  %p16934_p9 = por %p16933_p12, %p16932_p11 }
  0x84   : > { %p16935_p6 = pnand %p16934_p9, %p16928_p10 }
  0x86   : > { %16938 = shalt.err (!%p16935_p6)
}
  0x87   : > { %14346 = dma.hbm_to_vmem [thread:$0]  (%p17200_p3), %s17363_s9, 64, %s326_s1, %s314_s22  }
  0x88 PF: > { %p12518_p4 = scmp.ge.s32.totalorder %s17049_s24, 1  ;;  %p330_p8 = scmp.lt.s32.totalorder %s17049_s24, 5 }
  0x8a   : > { %p331_p13 = pnand %p12518_p4, %p330_p8 }
  0x8b   : > { %s337_s28 = sand.u32 (!%p331_p13), 1, %s17025_s18   ;;  %s343_s11 = sand.u32 (!%p331_p13), 1, %s17017_s16  }
  0x8c   : > { %334 = sbr.rel (%p331_p13) target bundleno = 1969 (0x7b1), region = 54  ;;  %s344_s26 = scalar_lea.sflag (!%p331_p13), [#allocation4], %s343_s11 }
  0x8d   : > { %s14343_s5 = smul.u32 (!%p331_p13), 392, %s337_s28  ;;  %p19151_p3 = scmp.ne.s32.totalorder (!%p331_p13), %s19144_s10, 0 }
  0x8e   : > { %s14344_s19 = smul.u32 (!%p331_p13), 12544, %s343_s11 }
  0x8f   : > { %s17386_s12 = scalar_lea.vmem (!%p331_p13), [#allocation2], %s14343_s5 }
  0x90   : > { %s17388_s15 = scalar_lea.vmem (!%p331_p13), [#allocation3], %s14344_s19 }
  0x93   : > { %16992 = dma.done.wait (%p19151_p3), %s344_s26, 200704  }
  0x94   : > { %16994 = vsyncadd (%p19151_p3), %s344_s26, 4294766592  ;;  %s352_s1 = sand.u32 1, %s17005_s13   ;;  %p19152_p0 = scmp.ne.s32.totalorder %s19147_s29, 0 }
  0x95   : > { %s12519_s22 = sshll.u32 %s352_s1, 2  ;;  %s353_s9 = scalar_lea.sflag [#allocation6], %s352_s1 }
  0x96   : > { %s17395_s8 = scalar_lea.vmem [#allocation5], %s12519_s22 }
  0x97   : > { %16996 = dma.done.wait (%p19152_p0), %s353_s9, 64  }
  0x98   : > { %16998 = vsyncadd (%p19152_p0), %s353_s9, 4294967232  ;;  %s12520_s18 = sshll.u32 %s352_s1, 6  ;;  %p12521_p1 = scmp.ne.s32.totalorder %s17033_s20, 0 }
  0x99   : > { %s17401_s27 = scalar_lea.vmem [#allocation7], %s12520_s18  ;;  %v17056_v50 = vmov (!%p12521_p1), 0.0  }
  0x9a   : > { %396 = sbr.rel (%p12521_p1) target bundleno = 161 (0xa1), region = 70  ;;  %397 = vst [vmem:[%s17401_s27] sm:$0xff] (!%p12521_p1), %v17056_v50  ;;  %398 = vst [vmem:[%s17401_s27 + $0x8] sm:$0xff] (!%p12521_p1), %v17056_v50 }
  0x9b   : > { %399 = vst [vmem:[%s17401_s27 + $0x10] sm:$0xff] (!%p12521_p1), %v17056_v50  ;;  %400 = vst [vmem:[%s17401_s27 + $0x18] sm:$0xff] (!%p12521_p1), %v17056_v50 }
  0x9c   : > { %401 = vst [vmem:[%s17401_s27 + $0x20] sm:$0xff] (!%p12521_p1), %v17056_v50  ;;  %402 = vst [vmem:[%s17401_s27 + $0x28] sm:$0xff] (!%p12521_p1), %v17056_v50 }
  0x9d   : > { %403 = vst [vmem:[%s17401_s27 + $0x30] sm:$0xff] (!%p12521_p1), %v17056_v50  ;;  %404 = vst [vmem:[%s17401_s27 + $0x38] sm:$0xff] (!%p12521_p1), %v17056_v50 }
  0xa1 PF: > { %v14458_v51 = vld [vmem:[%s17388_s15 + $0x4] ss:$16 sps:$4 sm:$0xff]   ;;  %v14460_v52 = vld [vmem:[%s17388_s15 + $0xc] ss:$16 sps:$4 sm:$0xff]   ;;  %v14462_v53 = vld [vmem:[%s17388_s15] ss:$16 sps:$4 sm:$0xff]  }
  0xa2   : > { %10117 = vmatprep.subr.bf16.mxu0 %v14458_v51  ;;  %v14463_v54 = vld [vmem:[%s17388_s15 + $0x8] ss:$16 sps:$4 sm:$0xff]   ;;  %11192 = vmatprep.subr.bf16.mxu1 %v14460_v52  ;;  %v14464_v55 = vld [vmem:[%s17388_s15 + $0x24] ss:$16 sps:$4 sm:$0xff]   ;;  %v14466_v56 = vld [vmem:[%s17388_s15 + $0x2c] ss:$16 sps:$4 sm:$0xff]  }
  0xa3   : > { %10118 = vmatpush1.bf16.msra.mxu0 %v14462_v53  ;;  %11193 = vmatpush1.bf16.msra.mxu1 %v14463_v54  ;;  %v14468_v57 = vld [vmem:[%s17388_s15 + $0x20] ss:$16 sps:$4 sm:$0xff]   ;;  %v14469_v58 = vld [vmem:[%s17388_s15 + $0x28] ss:$16 sps:$4 sm:$0xff]   ;;  %v14470_v59 = vld [vmem:[%s17388_s15 + $0x44] ss:$16 sps:$4 sm:$0xff]  }
  0xa4   : > { %10119 = vmatprep.subr.bf16.mxu0 %v14464_v55  ;;  %11194 = vmatprep.subr.bf16.mxu1 %v14466_v56  ;;  %v14472_v60 = vld [vmem:[%s17388_s15 + $0x4c] ss:$16 sps:$4 sm:$0xff]   ;;  %v14474_v61 = vld [vmem:[%s17388_s15 + $0x40] ss:$16 sps:$4 sm:$0xff]   ;;  %v14475_v62 = vld [vmem:[%s17388_s15 + $0x48] ss:$16 sps:$4 sm:$0xff]  }
  0xa5   : > { %v14476_v63 = vld [vmem:[%s17388_s15 + $0x64] ss:$16 sps:$4 sm:$0xff]   ;;  %v14478_v0 = vld [vmem:[%s17388_s15 + $0x6c] ss:$16 sps:$4 sm:$0xff]   ;;  %v14480_v1 = vld [vmem:[%s17388_s15 + $0x60] ss:$16 sps:$4 sm:$0xff]  }
  0xa6   : > { %v14481_v2 = vld [vmem:[%s17388_s15 + $0x68] ss:$16 sps:$4 sm:$0xff]   ;;  %v14482_v3 = vld [vmem:[%s17388_s15 + $0x84] ss:$16 sps:$4 sm:$0xff]   ;;  %v14484_v4 = vld [vmem:[%s17388_s15 + $0x8c] ss:$16 sps:$4 sm:$0xff]  }
  0xa7   : > { %10120 = vmatpush1.bf16.msra.mxu0 %v14468_v57  ;;  %11195 = vmatpush1.bf16.msra.mxu1 %v14469_v58  ;;  %v14486_v5 = vld [vmem:[%s17388_s15 + $0x80] ss:$16 sps:$4 sm:$0xff]   ;;  %v14487_v6 = vld [vmem:[%s17388_s15 + $0x88] ss:$16 sps:$4 sm:$0xff]   ;;  %v14488_v7 = vld [vmem:[%s17388_s15 + $0xa4] ss:$16 sps:$4 sm:$0xff]  }
  0xa8   : > { %10121 = vmatprep.subr.bf16.mxu0 %v14470_v59  ;;  %11196 = vmatprep.subr.bf16.mxu1 %v14472_v60  ;;  %v14490_v8 = vld [vmem:[%s17388_s15 + $0xac] ss:$16 sps:$4 sm:$0xff]   ;;  %v14492_v9 = vld [vmem:[%s17388_s15 + $0xa0] ss:$16 sps:$4 sm:$0xff]   ;;  %v14493_v10 = vld [vmem:[%s17388_s15 + $0xa8] ss:$16 sps:$4 sm:$0xff]  }
  0xa9   : > { %v14494_v11 = vld [vmem:[%s17388_s15 + $0xc4] ss:$16 sps:$4 sm:$0xff]   ;;  %v14496_v12 = vld [vmem:[%s17388_s15 + $0xcc] ss:$16 sps:$4 sm:$0xff]   ;;  %v14498_v13 = vld [vmem:[%s17388_s15 + $0xc0] ss:$16 sps:$4 sm:$0xff]  }
  0xaa   : > { %v14499_v14 = vld [vmem:[%s17388_s15 + $0xc8] ss:$16 sps:$4 sm:$0xff]   ;;  %v14500_v15 = vld [vmem:[%s17388_s15 + $0xe4] ss:$16 sps:$4 sm:$0xff]   ;;  %v14502_v16 = vld [vmem:[%s17388_s15 + $0xec] ss:$16 sps:$4 sm:$0xff]  }
  0xab   : > { %10122 = vmatpush1.bf16.msra.mxu0 %v14474_v61  ;;  %11197 = vmatpush1.bf16.msra.mxu1 %v14475_v62  ;;  %v14504_v17 = vld [vmem:[%s17388_s15 + $0xe0] ss:$16 sps:$4 sm:$0xff]   ;;  %v14505_v18 = vld [vmem:[%s17388_s15 + $0xe8] ss:$16 sps:$4 sm:$0xff]   ;;  %v14506_v19 = vld [vmem:[%s17388_s15 + $0x104] ss:$16 sps:$4 sm:$0xff]  }
  0xac   : > { %10123 = vmatprep.subr.bf16.mxu0 %v14476_v63  ;;  %11198 = vmatprep.subr.bf16.mxu1 %v14478_v0  ;;  %v14508_v20 = vld [vmem:[%s17388_s15 + $0x10c] ss:$16 sps:$4 sm:$0xff]   ;;  %v14510_v21 = vld [vmem:[%s17388_s15 + $0x100] ss:$16 sps:$4 sm:$0xff]   ;;  %v14511_v22 = vld [vmem:[%s17388_s15 + $0x108] ss:$16 sps:$4 sm:$0xff]  }
  0xad   : > { %v14512_v23 = vld [vmem:[%s17388_s15 + $0x124] ss:$16 sps:$4 sm:$0xff]   ;;  %v14514_v24 = vld [vmem:[%s17388_s15 + $0x12c] ss:$16 sps:$4 sm:$0xff]   ;;  %v14516_v25 = vld [vmem:[%s17388_s15 + $0x120] ss:$16 sps:$4 sm:$0xff]  }
  0xae   : > { %v14517_v26 = vld [vmem:[%s17388_s15 + $0x128] ss:$16 sps:$4 sm:$0xff]   ;;  %v14518_v27 = vld [vmem:[%s17388_s15 + $0x144] ss:$16 sps:$4 sm:$0xff]   ;;  %v14520_v28 = vld [vmem:[%s17388_s15 + $0x14c] ss:$16 sps:$4 sm:$0xff]  }
  0xaf   : > { %10124 = vmatpush1.bf16.msra.mxu0 %v14480_v1  ;;  %11199 = vmatpush1.bf16.msra.mxu1 %v14481_v2  ;;  %v14522_v29 = vld [vmem:[%s17388_s15 + $0x140] ss:$16 sps:$4 sm:$0xff]   ;;  %v14523_v30 = vld [vmem:[%s17388_s15 + $0x148] ss:$16 sps:$4 sm:$0xff]   ;;  %v14524_v31 = vld [vmem:[%s17388_s15 + $0x164] ss:$16 sps:$4 sm:$0xff]  }
  0xb0   : > { %10125 = vmatprep.subr.bf16.mxu0 %v14482_v3  ;;  %11200 = vmatprep.subr.bf16.mxu1 %v14484_v4  ;;  %v14526_v32 = vld [vmem:[%s17388_s15 + $0x16c] ss:$16 sps:$4 sm:$0xff]   ;;  %v14528_v33 = vld [vmem:[%s17388_s15 + $0x160] ss:$16 sps:$4 sm:$0xff]   ;;  %v14529_v34 = vld [vmem:[%s17388_s15 + $0x168] ss:$16 sps:$4 sm:$0xff]  }
  0xb1   : > { %v14556_v35 = vld [vmem:[%s17386_s12 + $0x4] ss:$196 sps:$4 sm:$0xff]   ;;  %p14139_p7 = scmp.ne.s32.totalorder %s17033_s20, 1 }
  0xb2   : > { %v14530_v36 = vld [vmem:[%s17388_s15 + $0x184] ss:$16 sps:$4 sm:$0xff]   ;;  %v14532_v37 = vld [vmem:[%s17388_s15 + $0x18c] ss:$16 sps:$4 sm:$0xff]   ;;  %10149 = vmatprep.mubr.bf16.mxu0 %v14556_v35  ;;  %11224 = vmatprep.mubr.bf16.mxu1 %v14556_v35  ;;  %v14534_v38 = vld [vmem:[%s17388_s15 + $0x180] ss:$16 sps:$4 sm:$0xff]  }
  0xb3   : > { %10126 = vmatpush1.bf16.msra.mxu0 %v14486_v5  ;;  %11201 = vmatpush1.bf16.msra.mxu1 %v14487_v6  ;;  %v14535_v39 = vld [vmem:[%s17388_s15 + $0x188] ss:$16 sps:$4 sm:$0xff]   ;;  %v14536_v40 = vld [vmem:[%s17388_s15 + $0x1a4] ss:$16 sps:$4 sm:$0xff]   ;;  %v14538_v41 = vld [vmem:[%s17388_s15 + $0x1ac] ss:$16 sps:$4 sm:$0xff]  }
  0xb4   : > { %10127 = vmatprep.subr.bf16.mxu0 %v14488_v7  ;;  %11202 = vmatprep.subr.bf16.mxu1 %v14490_v8  ;;  %v14540_v42 = vld [vmem:[%s17388_s15 + $0x1a0] ss:$16 sps:$4 sm:$0xff]   ;;  %v14541_v43 = vld [vmem:[%s17388_s15 + $0x1a8] ss:$16 sps:$4 sm:$0xff]   ;;  %v14542_v44 = vld [vmem:[%s17388_s15 + $0x1c4] ss:$16 sps:$4 sm:$0xff]  }
  0xb5   : > { %v14544_v45 = vld [vmem:[%s17388_s15 + $0x1cc] ss:$16 sps:$4 sm:$0xff]   ;;  %v14546_v46 = vld [vmem:[%s17388_s15 + $0x1c0] ss:$16 sps:$4 sm:$0xff]   ;;  %v14547_v47 = vld [vmem:[%s17388_s15 + $0x1c8] ss:$16 sps:$4 sm:$0xff]  }
  0xb6   : > { %v14548_v48 = vld [vmem:[%s17388_s15 + $0x1e4] ss:$16 sps:$4 sm:$0xff]   ;;  %v14550_v49 = vld [vmem:[%s17388_s15 + $0x1ec] ss:$16 sps:$4 sm:$0xff]   ;;  %v14552_v50 = vld [vmem:[%s17388_s15 + $0x1e0] ss:$16 sps:$4 sm:$0xff]  }
  0xb7   : > { %10128 = vmatpush1.bf16.msra.mxu0 %v14492_v9  ;;  %11203 = vmatpush1.bf16.msra.mxu1 %v14493_v10  ;;  %v14553_v51 = vld [vmem:[%s17388_s15 + $0x1e8] ss:$16 sps:$4 sm:$0xff]   ;;  %v14559_v52 = vld [vmem:[%s17388_s15 + $0x204] ss:$16 sps:$4 sm:$0xff]   ;;  %v14562_v53 = vld [vmem:[%s17388_s15 + $0x20c] ss:$16 sps:$4 sm:$0xff]  }
  0xb8   : > { %10129 = vmatprep.subr.bf16.mxu0 %v14494_v11  ;;  %11204 = vmatprep.subr.bf16.mxu1 %v14496_v12  ;;  %v14554_v54 = vld [vmem:[%s17386_s12] ss:$196 sps:$4 sm:$0xff]  }
  0xb9   : > { %v14557_v55 = vld [vmem:[%s17388_s15 + $0x200] ss:$16 sps:$4 sm:$0xff]   ;;  %v14560_v56 = vld [vmem:[%s17388_s15 + $0x208] ss:$16 sps:$4 sm:$0xff]   ;;  %v14565_v57 = vld [vmem:[%s17388_s15 + $0x224] ss:$16 sps:$4 sm:$0xff]  }
  0xba   : > { %v14568_v58 = vld [vmem:[%s17388_s15 + $0x22c] ss:$16 sps:$4 sm:$0xff]   ;;  %v14563_v59 = vld [vmem:[%s17388_s15 + $0x220] ss:$16 sps:$4 sm:$0xff]   ;;  %v14566_v60 = vld [vmem:[%s17388_s15 + $0x228] ss:$16 sps:$4 sm:$0xff]  }
  0xbb   : > { %10130 = vmatpush1.bf16.msra.mxu0 %v14498_v13  ;;  %11205 = vmatpush1.bf16.msra.mxu1 %v14499_v14  ;;  %v14571_v61 = vld [vmem:[%s17388_s15 + $0x244] ss:$16 sps:$4 sm:$0xff]   ;;  %v14574_v62 = vld [vmem:[%s17388_s15 + $0x24c] ss:$16 sps:$4 sm:$0xff]   ;;  %v14569_v63 = vld [vmem:[%s17388_s15 + $0x240] ss:$16 sps:$4 sm:$0xff]  }
  0xbc   : > { %10131 = vmatprep.subr.bf16.mxu0 %v14500_v15  ;;  %11206 = vmatprep.subr.bf16.mxu1 %v14502_v16  ;;  %v14572_v0 = vld [vmem:[%s17388_s15 + $0x248] ss:$16 sps:$4 sm:$0xff]   ;;  %v14577_v1 = vld [vmem:[%s17388_s15 + $0x264] ss:$16 sps:$4 sm:$0xff]   ;;  %v14580_v2 = vld [vmem:[%s17388_s15 + $0x26c] ss:$16 sps:$4 sm:$0xff]  }
  0xbd   : > { %v14575_v3 = vld [vmem:[%s17388_s15 + $0x260] ss:$16 sps:$4 sm:$0xff]   ;;  %v14578_v4 = vld [vmem:[%s17388_s15 + $0x268] ss:$16 sps:$4 sm:$0xff]   ;;  %v14583_v5 = vld [vmem:[%s17388_s15 + $0x284] ss:$16 sps:$4 sm:$0xff]  }
  0xbe   : > { %v14586_v6 = vld [vmem:[%s17388_s15 + $0x28c] ss:$16 sps:$4 sm:$0xff]   ;;  %v14581_v7 = vld [vmem:[%s17388_s15 + $0x280] ss:$16 sps:$4 sm:$0xff]   ;;  %v14584_v8 = vld [vmem:[%s17388_s15 + $0x288] ss:$16 sps:$4 sm:$0xff]  }
  0xbf   : > { %10132 = vmatpush1.bf16.msra.mxu0 %v14504_v17  ;;  %11207 = vmatpush1.bf16.msra.mxu1 %v14505_v18  ;;  %v14589_v9 = vld [vmem:[%s17388_s15 + $0x2a4] ss:$16 sps:$4 sm:$0xff]   ;;  %v14592_v10 = vld [vmem:[%s17388_s15 + $0x2ac] ss:$16 sps:$4 sm:$0xff]   ;;  %v14587_v11 = vld [vmem:[%s17388_s15 + $0x2a0] ss:$16 sps:$4 sm:$0xff]  }
  0xc0   : > { %10133 = vmatprep.subr.bf16.mxu0 %v14506_v19  ;;  %11208 = vmatprep.subr.bf16.mxu1 %v14508_v20  ;;  %v14590_v12 = vld [vmem:[%s17388_s15 + $0x2a8] ss:$16 sps:$4 sm:$0xff]   ;;  %v14595_v13 = vld [vmem:[%s17388_s15 + $0x2c4] ss:$16 sps:$4 sm:$0xff]   ;;  %v14598_v14 = vld [vmem:[%s17388_s15 + $0x2cc] ss:$16 sps:$4 sm:$0xff]  }
  0xc1   : > { %v14593_v15 = vld [vmem:[%s17388_s15 + $0x2c0] ss:$16 sps:$4 sm:$0xff]   ;;  %v14596_v16 = vld [vmem:[%s17388_s15 + $0x2c8] ss:$16 sps:$4 sm:$0xff]   ;;  %v14601_v18 = vld [vmem:[%s17388_s15 + $0x2e4] ss:$16 sps:$4 sm:$0xff]  }
  0xc2   : > { %v14655_v17 = vld [vmem:[%s17386_s12 + $0xc] ss:$196 sps:$4 sm:$0xff]  }
  0xc3   : > { %10134 = vmatpush1.bf16.msra.mxu0 %v14510_v21  ;;  %11209 = vmatpush1.bf16.msra.mxu1 %v14511_v22  ;;  %v14604_v19 = vld [vmem:[%s17388_s15 + $0x2ec] ss:$16 sps:$4 sm:$0xff]   ;;  %v14599_v20 = vld [vmem:[%s17388_s15 + $0x2e0] ss:$16 sps:$4 sm:$0xff]   ;;  %v14602_v21 = vld [vmem:[%s17388_s15 + $0x2e8] ss:$16 sps:$4 sm:$0xff]  }
  0xc4   : > { %10135 = vmatprep.subr.bf16.mxu0 %v14512_v23  ;;  %11210 = vmatprep.subr.bf16.mxu1 %v14514_v24  ;;  %v14607_v22 = vld [vmem:[%s17388_s15 + $0x304] ss:$16 sps:$4 sm:$0xff]   ;;  %v14610_v23 = vld [vmem:[%s17388_s15 + $0x30c] ss:$16 sps:$4 sm:$0xff]   ;;  %v14605_v24 = vld [vmem:[%s17388_s15 + $0x300] ss:$16 sps:$4 sm:$0xff]  }
  0xc5   : > { %v14628_v35 = vld [vmem:[%s17388_s15 + $0x36c] ss:$16 sps:$4 sm:$0xff]  }
  0xc7   : > { %10136 = vmatpush1.bf16.msra.mxu0 %v14516_v25  ;;  %11211 = vmatpush1.bf16.msra.mxu1 %v14517_v26  ;;  %v14608_v25 = vld [vmem:[%s17388_s15 + $0x308] ss:$16 sps:$4 sm:$0xff]   ;;  %v14613_v26 = vld [vmem:[%s17388_s15 + $0x324] ss:$16 sps:$4 sm:$0xff]  }
  0xc8   : > { %10137 = vmatprep.subr.bf16.mxu0 %v14518_v27  ;;  %11212 = vmatprep.subr.bf16.mxu1 %v14520_v28  ;;  %v14616_v27 = vld [vmem:[%s17388_s15 + $0x32c] ss:$16 sps:$4 sm:$0xff]   ;;  %v14611_v28 = vld [vmem:[%s17388_s15 + $0x320] ss:$16 sps:$4 sm:$0xff]  }
  0xcb   : > { %10138 = vmatpush1.bf16.msra.mxu0 %v14522_v29  ;;  %11213 = vmatpush1.bf16.msra.mxu1 %v14523_v30  ;;  %v14614_v29 = vld [vmem:[%s17388_s15 + $0x328] ss:$16 sps:$4 sm:$0xff]   ;;  %v14619_v30 = vld [vmem:[%s17388_s15 + $0x344] ss:$16 sps:$4 sm:$0xff]  }
  0xcc   : > { %10139 = vmatprep.subr.bf16.mxu0 %v14524_v31  ;;  %11214 = vmatprep.subr.bf16.mxu1 %v14526_v32  ;;  %v14622_v31 = vld [vmem:[%s17388_s15 + $0x34c] ss:$16 sps:$4 sm:$0xff]   ;;  %v14617_v32 = vld [vmem:[%s17388_s15 + $0x340] ss:$16 sps:$4 sm:$0xff]  }
  0xcf   : > { %10140 = vmatpush1.bf16.msra.mxu0 %v14528_v33  ;;  %11215 = vmatpush1.bf16.msra.mxu1 %v14529_v34  ;;  %v14620_v33 = vld [vmem:[%s17388_s15 + $0x348] ss:$16 sps:$4 sm:$0xff]   ;;  %v14625_v34 = vld [vmem:[%s17388_s15 + $0x364] ss:$16 sps:$4 sm:$0xff]  }
  0xd0   : > { %10141 = vmatprep.subr.bf16.mxu0 %v14530_v36  ;;  %11216 = vmatprep.subr.bf16.mxu1 %v14532_v37  ;;  %v14623_v36 = vld [vmem:[%s17388_s15 + $0x360] ss:$16 sps:$4 sm:$0xff]   ;;  %v14626_v37 = vld [vmem:[%s17388_s15 + $0x368] ss:$16 sps:$4 sm:$0xff]  }
  0xd3   : > { %10142 = vmatpush1.bf16.msra.mxu0 %v14534_v38  ;;  %11217 = vmatpush1.bf16.msra.mxu1 %v14535_v39  ;;  %v14631_v38 = vld [vmem:[%s17388_s15 + $0x384] ss:$16 sps:$4 sm:$0xff]   ;;  %v14634_v39 = vld [vmem:[%s17388_s15 + $0x38c] ss:$16 sps:$4 sm:$0xff]  }
  0xd4   : > { %10143 = vmatprep.subr.bf16.mxu0 %v14536_v40  ;;  %11218 = vmatprep.subr.bf16.mxu1 %v14538_v41  ;;  %v14629_v40 = vld [vmem:[%s17388_s15 + $0x380] ss:$16 sps:$4 sm:$0xff]   ;;  %v14632_v41 = vld [vmem:[%s17388_s15 + $0x388] ss:$16 sps:$4 sm:$0xff]  }
  0xd7   : > { %10144 = vmatpush1.bf16.msra.mxu0 %v14540_v42  ;;  %11219 = vmatpush1.bf16.msra.mxu1 %v14541_v43  ;;  %v14637_v42 = vld [vmem:[%s17388_s15 + $0x3a4] ss:$16 sps:$4 sm:$0xff]   ;;  %v14640_v43 = vld [vmem:[%s17388_s15 + $0x3ac] ss:$16 sps:$4 sm:$0xff]  }
  0xd8   : > { %10145 = vmatprep.subr.bf16.mxu0 %v14542_v44  ;;  %11220 = vmatprep.subr.bf16.mxu1 %v14544_v45  ;;  %v14635_v44 = vld [vmem:[%s17388_s15 + $0x3a0] ss:$16 sps:$4 sm:$0xff]   ;;  %v14638_v45 = vld [vmem:[%s17388_s15 + $0x3a8] ss:$16 sps:$4 sm:$0xff]  }
  0xdb   : > { %10146 = vmatpush1.bf16.msra.mxu0 %v14546_v46  ;;  %11221 = vmatpush1.bf16.msra.mxu1 %v14547_v47  ;;  %v14643_v46 = vld [vmem:[%s17388_s15 + $0x3c4] ss:$16 sps:$4 sm:$0xff]   ;;  %v14646_v47 = vld [vmem:[%s17388_s15 + $0x3cc] ss:$16 sps:$4 sm:$0xff]  }
  0xdc   : > { %10147 = vmatprep.subr.bf16.mxu0 %v14548_v48  ;;  %11222 = vmatprep.subr.bf16.mxu1 %v14550_v49  ;;  %v14641_v48 = vld [vmem:[%s17388_s15 + $0x3c0] ss:$16 sps:$4 sm:$0xff]   ;;  %v14644_v49 = vld [vmem:[%s17388_s15 + $0x3c8] ss:$16 sps:$4 sm:$0xff]  }
  0xdf   : > { %10148 = vmatpush1.bf16.msra.mxu0 %v14552_v50  ;;  %11223 = vmatpush1.bf16.msra.mxu1 %v14553_v51  ;;  %v14649_v50 = vld [vmem:[%s17388_s15 + $0x3e4] ss:$16 sps:$4 sm:$0xff]   ;;  %v14652_v51 = vld [vmem:[%s17388_s15 + $0x3ec] ss:$16 sps:$4 sm:$0xff]  }
  0xe0   : > { %10160 = vmatprep.subr.bf16.mxu0 %v14559_v52  ;;  %11235 = vmatprep.subr.bf16.mxu1 %v14562_v53  ;;  %v14647_v52 = vld [vmem:[%s17388_s15 + $0x3e0] ss:$16 sps:$4 sm:$0xff]   ;;  %v14650_v53 = vld [vmem:[%s17388_s15 + $0x3e8] ss:$16 sps:$4 sm:$0xff]  }
  0xe2   : > { %10150 = vmatmul.mubr.bf16.vlgmr.msra.gmra.mrb[0].mxu0 %v14554_v54  ;;  %11225 = vmatmul.mubr.bf16.vlgmr.msra.gmra.mrb[0].mxu1 %v14554_v54  ;;  %v14658_v54 = vld [vmem:[%s17388_s15 + $0x404] ss:$16 sps:$4 sm:$0xff]  }
  0xe3   : > { %10161 = vmatpush1.bf16.msra.mxu0 %v14557_v55  ;;  %11236 = vmatpush1.bf16.msra.mxu1 %v14560_v56  ;;  %v14661_v55 = vld [vmem:[%s17388_s15 + $0x40c] ss:$16 sps:$4 sm:$0xff]  }
  0xe4   : > { %10162 = vmatprep.subr.bf16.mxu0 %v14565_v57  ;;  %11237 = vmatprep.subr.bf16.mxu1 %v14568_v58  ;;  %v14653_v56 = vld [vmem:[%s17386_s12 + $0x8] ss:$196 sps:$4 sm:$0xff]  }
  0xe5   : > { %10192 = vmatprep.mubr.bf16.mxu0 %v14655_v17  ;;  %11267 = vmatprep.mubr.bf16.mxu1 %v14655_v17  ;;  %v14656_v57 = vld [vmem:[%s17388_s15 + $0x400] ss:$16 sps:$4 sm:$0xff]   ;;  %v14659_v58 = vld [vmem:[%s17388_s15 + $0x408] ss:$16 sps:$4 sm:$0xff]   ;;  %v14697_v17 = vld [vmem:[%s17388_s15 + $0x4cc] ss:$16 sps:$4 sm:$0xff]  }
  0xe7   : > { %10163 = vmatpush1.bf16.msra.mxu0 %v14563_v59  ;;  %11238 = vmatpush1.bf16.msra.mxu1 %v14566_v60  ;;  %v14664_v59 = vld [vmem:[%s17388_s15 + $0x424] ss:$16 sps:$4 sm:$0xff]   ;;  %v14667_v60 = vld [vmem:[%s17388_s15 + $0x42c] ss:$16 sps:$4 sm:$0xff]  }
  0xe8   : > { %10164 = vmatprep.subr.bf16.mxu0 %v14571_v61  ;;  %11239 = vmatprep.subr.bf16.mxu1 %v14574_v62  ;;  %v14662_v61 = vld [vmem:[%s17388_s15 + $0x420] ss:$16 sps:$4 sm:$0xff]   ;;  %v14665_v62 = vld [vmem:[%s17388_s15 + $0x428] ss:$16 sps:$4 sm:$0xff]  }
  0xeb   : > { %10165 = vmatpush1.bf16.msra.mxu0 %v14569_v63  ;;  %11240 = vmatpush1.bf16.msra.mxu1 %v14572_v0  ;;  %v14754_v63 = vld [vmem:[%s17386_s12 + $0x14] ss:$196 sps:$4 sm:$0xff]  }
  0xec   : > { %10166 = vmatprep.subr.bf16.mxu0 %v14577_v1  ;;  %11241 = vmatprep.subr.bf16.mxu1 %v14580_v2  ;;  %v14670_v0 = vld [vmem:[%s17388_s15 + $0x444] ss:$16 sps:$4 sm:$0xff]   ;;  %v14673_v1 = vld [vmem:[%s17388_s15 + $0x44c] ss:$16 sps:$4 sm:$0xff]   ;;  %v14668_v2 = vld [vmem:[%s17388_s15 + $0x440] ss:$16 sps:$4 sm:$0xff]  }
  0xef   : > { %10167 = vmatpush1.bf16.msra.mxu0 %v14575_v3  ;;  %11242 = vmatpush1.bf16.msra.mxu1 %v14578_v4  ;;  %v14671_v3 = vld [vmem:[%s17388_s15 + $0x448] ss:$16 sps:$4 sm:$0xff]   ;;  %v14676_v4 = vld [vmem:[%s17388_s15 + $0x464] ss:$16 sps:$4 sm:$0xff]  }
  0xf0   : > { %10168 = vmatprep.subr.bf16.mxu0 %v14583_v5  ;;  %11243 = vmatprep.subr.bf16.mxu1 %v14586_v6  ;;  %v14679_v5 = vld [vmem:[%s17388_s15 + $0x46c] ss:$16 sps:$4 sm:$0xff]   ;;  %v14674_v6 = vld [vmem:[%s17388_s15 + $0x460] ss:$16 sps:$4 sm:$0xff]  }
  0xf3   : > { %10169 = vmatpush1.bf16.msra.mxu0 %v14581_v7  ;;  %11244 = vmatpush1.bf16.msra.mxu1 %v14584_v8  ;;  %v14677_v7 = vld [vmem:[%s17388_s15 + $0x468] ss:$16 sps:$4 sm:$0xff]   ;;  %v14682_v8 = vld [vmem:[%s17388_s15 + $0x484] ss:$16 sps:$4 sm:$0xff]  }
  0xf4   : > { %10170 = vmatprep.subr.bf16.mxu0 %v14589_v9  ;;  %11245 = vmatprep.subr.bf16.mxu1 %v14592_v10  ;;  %v14685_v9 = vld [vmem:[%s17388_s15 + $0x48c] ss:$16 sps:$4 sm:$0xff]   ;;  %v14680_v10 = vld [vmem:[%s17388_s15 + $0x480] ss:$16 sps:$4 sm:$0xff]  }
  0xf7   : > { %10171 = vmatpush1.bf16.msra.mxu0 %v14587_v11  ;;  %11246 = vmatpush1.bf16.msra.mxu1 %v14590_v12  ;;  %v14683_v11 = vld [vmem:[%s17388_s15 + $0x488] ss:$16 sps:$4 sm:$0xff]   ;;  %v14688_v12 = vld [vmem:[%s17388_s15 + $0x4a4] ss:$16 sps:$4 sm:$0xff]  }
  0xf8   : > { %10172 = vmatprep.subr.bf16.mxu0 %v14595_v13  ;;  %11247 = vmatprep.subr.bf16.mxu1 %v14598_v14  ;;  %v14691_v13 = vld [vmem:[%s17388_s15 + $0x4ac] ss:$16 sps:$4 sm:$0xff]   ;;  %v14686_v14 = vld [vmem:[%s17388_s15 + $0x4a0] ss:$16 sps:$4 sm:$0xff]  }
  0xfb   : > { %10173 = vmatpush1.bf16.msra.mxu0 %v14593_v15  ;;  %11248 = vmatpush1.bf16.msra.mxu1 %v14596_v16  ;;  %v14689_v15 = vld [vmem:[%s17388_s15 + $0x4a8] ss:$16 sps:$4 sm:$0xff]   ;;  %v14694_v16 = vld [vmem:[%s17388_s15 + $0x4c4] ss:$16 sps:$4 sm:$0xff]  }
  0xfc   : > { %10174 = vmatprep.subr.bf16.mxu0 %v14601_v18  ;;  %11249 = vmatprep.subr.bf16.mxu1 %v14604_v19  ;;  %v14692_v18 = vld [vmem:[%s17388_s15 + $0x4c0] ss:$16 sps:$4 sm:$0xff]   ;;  %v14695_v19 = vld [vmem:[%s17388_s15 + $0x4c8] ss:$16 sps:$4 sm:$0xff]  }
  0xff   : > { %10175 = vmatpush1.bf16.msra.mxu0 %v14599_v20  ;;  %11250 = vmatpush1.bf16.msra.mxu1 %v14602_v21  ;;  %v14700_v20 = vld [vmem:[%s17388_s15 + $0x4e4] ss:$16 sps:$4 sm:$0xff]   ;;  %v14703_v21 = vld [vmem:[%s17388_s15 + $0x4ec] ss:$16 sps:$4 sm:$0xff]  }
 0x100   : > { %10176 = vmatprep.subr.bf16.mxu0 %v14607_v22  ;;  %11251 = vmatprep.subr.bf16.mxu1 %v14610_v23  ;;  %v14698_v22 = vld [vmem:[%s17388_s15 + $0x4e0] ss:$16 sps:$4 sm:$0xff]   ;;  %v14701_v23 = vld [vmem:[%s17388_s15 + $0x4e8] ss:$16 sps:$4 sm:$0xff]  }
 0x103   : > { %10177 = vmatpush1.bf16.msra.mxu0 %v14605_v24  ;;  %11252 = vmatpush1.bf16.msra.mxu1 %v14608_v25  ;;  %v14706_v24 = vld [vmem:[%s17388_s15 + $0x504] ss:$16 sps:$4 sm:$0xff]   ;;  %v14709_v25 = vld [vmem:[%s17388_s15 + $0x50c] ss:$16 sps:$4 sm:$0xff]  }
 0x104   : > { %10178 = vmatprep.subr.bf16.mxu0 %v14613_v26  ;;  %11253 = vmatprep.subr.bf16.mxu1 %v14616_v27  ;;  %v14704_v26 = vld [vmem:[%s17388_s15 + $0x500] ss:$16 sps:$4 sm:$0xff]   ;;  %v14707_v27 = vld [vmem:[%s17388_s15 + $0x508] ss:$16 sps:$4 sm:$0xff]  }
 0x107   : > { %10179 = vmatpush1.bf16.msra.mxu0 %v14611_v28  ;;  %11254 = vmatpush1.bf16.msra.mxu1 %v14614_v29  ;;  %v14712_v28 = vld [vmem:[%s17388_s15 + $0x524] ss:$16 sps:$4 sm:$0xff]   ;;  %v14715_v29 = vld [vmem:[%s17388_s15 + $0x52c] ss:$16 sps:$4 sm:$0xff]  }
 0x108   : > { %10180 = vmatprep.subr.bf16.mxu0 %v14619_v30  ;;  %11255 = vmatprep.subr.bf16.mxu1 %v14622_v31  ;;  %v14710_v30 = vld [vmem:[%s17388_s15 + $0x520] ss:$16 sps:$4 sm:$0xff]   ;;  %v14713_v31 = vld [vmem:[%s17388_s15 + $0x528] ss:$16 sps:$4 sm:$0xff]  }
 0x10b   : > { %10181 = vmatpush1.bf16.msra.mxu0 %v14617_v32  ;;  %11256 = vmatpush1.bf16.msra.mxu1 %v14620_v33  ;;  %v14718_v32 = vld [vmem:[%s17388_s15 + $0x544] ss:$16 sps:$4 sm:$0xff]   ;;  %v14721_v33 = vld [vmem:[%s17388_s15 + $0x54c] ss:$16 sps:$4 sm:$0xff]  }
 0x10c   : > { %10182 = vmatprep.subr.bf16.mxu0 %v14625_v34  ;;  %11257 = vmatprep.subr.bf16.mxu1 %v14628_v35  ;;  %v14716_v34 = vld [vmem:[%s17388_s15 + $0x540] ss:$16 sps:$4 sm:$0xff]   ;;  %v14719_v35 = vld [vmem:[%s17388_s15 + $0x548] ss:$16 sps:$4 sm:$0xff]  }
 0x10f   : > { %10183 = vmatpush1.bf16.msra.mxu0 %v14623_v36  ;;  %11258 = vmatpush1.bf16.msra.mxu1 %v14626_v37  ;;  %v14724_v36 = vld [vmem:[%s17388_s15 + $0x564] ss:$16 sps:$4 sm:$0xff]   ;;  %v14727_v37 = vld [vmem:[%s17388_s15 + $0x56c] ss:$16 sps:$4 sm:$0xff]  }
 0x110   : > { %10184 = vmatprep.subr.bf16.mxu0 %v14631_v38  ;;  %11259 = vmatprep.subr.bf16.mxu1 %v14634_v39  ;;  %v14722_v38 = vld [vmem:[%s17388_s15 + $0x560] ss:$16 sps:$4 sm:$0xff]   ;;  %v14725_v39 = vld [vmem:[%s17388_s15 + $0x568] ss:$16 sps:$4 sm:$0xff]  }
 0x113   : > { %10185 = vmatpush1.bf16.msra.mxu0 %v14629_v40  ;;  %11260 = vmatpush1.bf16.msra.mxu1 %v14632_v41  ;;  %v14730_v40 = vld [vmem:[%s17388_s15 + $0x584] ss:$16 sps:$4 sm:$0xff]   ;;  %v14733_v41 = vld [vmem:[%s17388_s15 + $0x58c] ss:$16 sps:$4 sm:$0xff]  }
 0x114   : > { %10186 = vmatprep.subr.bf16.mxu0 %v14637_v42  ;;  %11261 = vmatprep.subr.bf16.mxu1 %v14640_v43  ;;  %v14728_v42 = vld [vmem:[%s17388_s15 + $0x580] ss:$16 sps:$4 sm:$0xff]   ;;  %v14731_v43 = vld [vmem:[%s17388_s15 + $0x588] ss:$16 sps:$4 sm:$0xff]  }
 0x117   : > { %10187 = vmatpush1.bf16.msra.mxu0 %v14635_v44  ;;  %11262 = vmatpush1.bf16.msra.mxu1 %v14638_v45  ;;  %v14736_v44 = vld [vmem:[%s17388_s15 + $0x5a4] ss:$16 sps:$4 sm:$0xff]   ;;  %v14739_v45 = vld [vmem:[%s17388_s15 + $0x5ac] ss:$16 sps:$4 sm:$0xff]  }
 0x118   : > { %10188 = vmatprep.subr.bf16.mxu0 %v14643_v46  ;;  %11263 = vmatprep.subr.bf16.mxu1 %v14646_v47  ;;  %v14734_v46 = vld [vmem:[%s17388_s15 + $0x5a0] ss:$16 sps:$4 sm:$0xff]   ;;  %v14737_v47 = vld [vmem:[%s17388_s15 + $0x5a8] ss:$16 sps:$4 sm:$0xff]  }
 0x11b   : > { %10189 = vmatpush1.bf16.msra.mxu0 %v14641_v48  ;;  %11264 = vmatpush1.bf16.msra.mxu1 %v14644_v49  ;;  %v14742_v48 = vld [vmem:[%s17388_s15 + $0x5c4] ss:$16 sps:$4 sm:$0xff]   ;;  %v14745_v49 = vld [vmem:[%s17388_s15 + $0x5cc] ss:$16 sps:$4 sm:$0xff]  }
 0x11c   : > { %10190 = vmatprep.subr.bf16.mxu0 %v14649_v50  ;;  %11265 = vmatprep.subr.bf16.mxu1 %v14652_v51  ;;  %v14740_v50 = vld [vmem:[%s17388_s15 + $0x5c0] ss:$16 sps:$4 sm:$0xff]   ;;  %v14743_v51 = vld [vmem:[%s17388_s15 + $0x5c8] ss:$16 sps:$4 sm:$0xff]  }
 0x11f   : > { %10191 = vmatpush1.bf16.msra.mxu0 %v14647_v52  ;;  %11266 = vmatpush1.bf16.msra.mxu1 %v14650_v53  ;;  %v14748_v52 = vld [vmem:[%s17388_s15 + $0x5e4] ss:$16 sps:$4 sm:$0xff]   ;;  %v14751_v53 = vld [vmem:[%s17388_s15 + $0x5ec] ss:$16 sps:$4 sm:$0xff]  }
 0x120   : > { %10203 = vmatprep.subr.bf16.mxu0 %v14658_v54  ;;  %11278 = vmatprep.subr.bf16.mxu1 %v14661_v55  ;;  %v14746_v54 = vld [vmem:[%s17388_s15 + $0x5e0] ss:$16 sps:$4 sm:$0xff]   ;;  %v14749_v55 = vld [vmem:[%s17388_s15 + $0x5e8] ss:$16 sps:$4 sm:$0xff]  }
 0x122   : > { %10193 = vmatmul.mubr.bf16.vlgmr.msra.gmra.mrb[0].mxu0 %v14653_v56  ;;  %11268 = vmatmul.mubr.bf16.vlgmr.msra.gmra.mrb[0].mxu1 %v14653_v56  ;;  %v14757_v56 = vld [vmem:[%s17388_s15 + $0x604] ss:$16 sps:$4 sm:$0xff]  }
 0x123   : > { %10204 = vmatpush1.bf16.msra.mxu0 %v14656_v57  ;;  %11279 = vmatpush1.bf16.msra.mxu1 %v14659_v58  ;;  %v14760_v57 = vld [vmem:[%s17388_s15 + $0x60c] ss:$16 sps:$4 sm:$0xff]  }
 0x124   : > { %10205 = vmatprep.subr.bf16.mxu0 %v14664_v59  ;;  %11280 = vmatprep.subr.bf16.mxu1 %v14667_v60  ;;  %v14752_v58 = vld [vmem:[%s17386_s12 + $0x10] ss:$196 sps:$4 sm:$0xff]  }
 0x125   : > { %10235 = vmatprep.mubr.bf16.mxu0 %v14754_v63  ;;  %11310 = vmatprep.mubr.bf16.mxu1 %v14754_v63  ;;  %v14755_v59 = vld [vmem:[%s17388_s15 + $0x600] ss:$16 sps:$4 sm:$0xff]   ;;  %v14758_v60 = vld [vmem:[%s17388_s15 + $0x608] ss:$16 sps:$4 sm:$0xff]  }
 0x126   : > { %v14853_v63 = vld [vmem:[%s17386_s12 + $0x1c] ss:$196 sps:$4 sm:$0xff]  }
 0x127   : > { %10206 = vmatpush1.bf16.msra.mxu0 %v14662_v61  ;;  %11281 = vmatpush1.bf16.msra.mxu1 %v14665_v62  ;;  %v14763_v61 = vld [vmem:[%s17388_s15 + $0x624] ss:$16 sps:$4 sm:$0xff]   ;;  %v14766_v62 = vld [vmem:[%s17388_s15 + $0x62c] ss:$16 sps:$4 sm:$0xff]  }
 0x128   : > { %10207 = vmatprep.subr.bf16.mxu0 %v14670_v0  ;;  %11282 = vmatprep.subr.bf16.mxu1 %v14673_v1  ;;  %v14761_v0 = vld [vmem:[%s17388_s15 + $0x620] ss:$16 sps:$4 sm:$0xff]   ;;  %v14764_v1 = vld [vmem:[%s17388_s15 + $0x628] ss:$16 sps:$4 sm:$0xff]  }
 0x12b   : > { %10208 = vmatpush1.bf16.msra.mxu0 %v14668_v2  ;;  %11283 = vmatpush1.bf16.msra.mxu1 %v14671_v3  ;;  %v14769_v2 = vld [vmem:[%s17388_s15 + $0x644] ss:$16 sps:$4 sm:$0xff]   ;;  %v14772_v3 = vld [vmem:[%s17388_s15 + $0x64c] ss:$16 sps:$4 sm:$0xff]  }
 0x12c   : > { %10209 = vmatprep.subr.bf16.mxu0 %v14676_v4  ;;  %11284 = vmatprep.subr.bf16.mxu1 %v14679_v5  ;;  %v14767_v4 = vld [vmem:[%s17388_s15 + $0x640] ss:$16 sps:$4 sm:$0xff]   ;;  %v14770_v5 = vld [vmem:[%s17388_s15 + $0x648] ss:$16 sps:$4 sm:$0xff]  }
 0x12f   : > { %10210 = vmatpush1.bf16.msra.mxu0 %v14674_v6  ;;  %11285 = vmatpush1.bf16.msra.mxu1 %v14677_v7  ;;  %v14775_v6 = vld [vmem:[%s17388_s15 + $0x664] ss:$16 sps:$4 sm:$0xff]   ;;  %v14778_v7 = vld [vmem:[%s17388_s15 + $0x66c] ss:$16 sps:$4 sm:$0xff]  }
 0x130   : > { %10211 = vmatprep.subr.bf16.mxu0 %v14682_v8  ;;  %11286 = vmatprep.subr.bf16.mxu1 %v14685_v9  ;;  %v14773_v8 = vld [vmem:[%s17388_s15 + $0x660] ss:$16 sps:$4 sm:$0xff]   ;;  %v14776_v9 = vld [vmem:[%s17388_s15 + $0x668] ss:$16 sps:$4 sm:$0xff]  }
 0x133   : > { %10212 = vmatpush1.bf16.msra.mxu0 %v14680_v10  ;;  %11287 = vmatpush1.bf16.msra.mxu1 %v14683_v11  ;;  %v14781_v10 = vld [vmem:[%s17388_s15 + $0x684] ss:$16 sps:$4 sm:$0xff]   ;;  %v14784_v11 = vld [vmem:[%s17388_s15 + $0x68c] ss:$16 sps:$4 sm:$0xff]  }
 0x134   : > { %10213 = vmatprep.subr.bf16.mxu0 %v14688_v12  ;;  %11288 = vmatprep.subr.bf16.mxu1 %v14691_v13  ;;  %v14779_v12 = vld [vmem:[%s17388_s15 + $0x680] ss:$16 sps:$4 sm:$0xff]   ;;  %v14782_v13 = vld [vmem:[%s17388_s15 + $0x688] ss:$16 sps:$4 sm:$0xff]  }
 0x137   : > { %10214 = vmatpush1.bf16.msra.mxu0 %v14686_v14  ;;  %11289 = vmatpush1.bf16.msra.mxu1 %v14689_v15  ;;  %v14787_v14 = vld [vmem:[%s17388_s15 + $0x6a4] ss:$16 sps:$4 sm:$0xff]   ;;  %v14790_v15 = vld [vmem:[%s17388_s15 + $0x6ac] ss:$16 sps:$4 sm:$0xff]  }
 0x138   : > { %10215 = vmatprep.subr.bf16.mxu0 %v14694_v16  ;;  %11290 = vmatprep.subr.bf16.mxu1 %v14697_v17  ;;  %v14785_v16 = vld [vmem:[%s17388_s15 + $0x6a0] ss:$16 sps:$4 sm:$0xff]   ;;  %v14788_v17 = vld [vmem:[%s17388_s15 + $0x6a8] ss:$16 sps:$4 sm:$0xff]  }
 0x13b   : > { %10216 = vmatpush1.bf16.msra.mxu0 %v14692_v18  ;;  %11291 = vmatpush1.bf16.msra.mxu1 %v14695_v19  ;;  %v14793_v18 = vld [vmem:[%s17388_s15 + $0x6c4] ss:$16 sps:$4 sm:$0xff]   ;;  %v14796_v19 = vld [vmem:[%s17388_s15 + $0x6cc] ss:$16 sps:$4 sm:$0xff]  }
 0x13c   : > { %10217 = vmatprep.subr.bf16.mxu0 %v14700_v20  ;;  %11292 = vmatprep.subr.bf16.mxu1 %v14703_v21  ;;  %v14791_v20 = vld [vmem:[%s17388_s15 + $0x6c0] ss:$16 sps:$4 sm:$0xff]   ;;  %v14794_v21 = vld [vmem:[%s17388_s15 + $0x6c8] ss:$16 sps:$4 sm:$0xff]  }
 0x13f   : > { %10218 = vmatpush1.bf16.msra.mxu0 %v14698_v22  ;;  %11293 = vmatpush1.bf16.msra.mxu1 %v14701_v23  ;;  %v14799_v22 = vld [vmem:[%s17388_s15 + $0x6e4] ss:$16 sps:$4 sm:$0xff]   ;;  %v14802_v23 = vld [vmem:[%s17388_s15 + $0x6ec] ss:$16 sps:$4 sm:$0xff]  }
 0x140   : > { %10219 = vmatprep.subr.bf16.mxu0 %v14706_v24  ;;  %11294 = vmatprep.subr.bf16.mxu1 %v14709_v25  ;;  %v14797_v24 = vld [vmem:[%s17388_s15 + $0x6e0] ss:$16 sps:$4 sm:$0xff]   ;;  %v14800_v25 = vld [vmem:[%s17388_s15 + $0x6e8] ss:$16 sps:$4 sm:$0xff]  }
 0x143   : > { %10220 = vmatpush1.bf16.msra.mxu0 %v14704_v26  ;;  %11295 = vmatpush1.bf16.msra.mxu1 %v14707_v27  ;;  %v14805_v26 = vld [vmem:[%s17388_s15 + $0x704] ss:$16 sps:$4 sm:$0xff]   ;;  %v14808_v27 = vld [vmem:[%s17388_s15 + $0x70c] ss:$16 sps:$4 sm:$0xff]  }
 0x144   : > { %10221 = vmatprep.subr.bf16.mxu0 %v14712_v28  ;;  %11296 = vmatprep.subr.bf16.mxu1 %v14715_v29  ;;  %v14803_v28 = vld [vmem:[%s17388_s15 + $0x700] ss:$16 sps:$4 sm:$0xff]   ;;  %v14806_v29 = vld [vmem:[%s17388_s15 + $0x708] ss:$16 sps:$4 sm:$0xff]  }
 0x147   : > { %10222 = vmatpush1.bf16.msra.mxu0 %v14710_v30  ;;  %11297 = vmatpush1.bf16.msra.mxu1 %v14713_v31  ;;  %v14811_v30 = vld [vmem:[%s17388_s15 + $0x724] ss:$16 sps:$4 sm:$0xff]   ;;  %v14814_v31 = vld [vmem:[%s17388_s15 + $0x72c] ss:$16 sps:$4 sm:$0xff]  }
 0x148   : > { %10223 = vmatprep.subr.bf16.mxu0 %v14718_v32  ;;  %11298 = vmatprep.subr.bf16.mxu1 %v14721_v33  ;;  %v14809_v32 = vld [vmem:[%s17388_s15 + $0x720] ss:$16 sps:$4 sm:$0xff]   ;;  %v14812_v33 = vld [vmem:[%s17388_s15 + $0x728] ss:$16 sps:$4 sm:$0xff]  }
 0x14b   : > { %10224 = vmatpush1.bf16.msra.mxu0 %v14716_v34  ;;  %11299 = vmatpush1.bf16.msra.mxu1 %v14719_v35  ;;  %v14817_v34 = vld [vmem:[%s17388_s15 + $0x744] ss:$16 sps:$4 sm:$0xff]   ;;  %v14820_v35 = vld [vmem:[%s17388_s15 + $0x74c] ss:$16 sps:$4 sm:$0xff]  }
 0x14c   : > { %10225 = vmatprep.subr.bf16.mxu0 %v14724_v36  ;;  %11300 = vmatprep.subr.bf16.mxu1 %v14727_v37  ;;  %v14815_v36 = vld [vmem:[%s17388_s15 + $0x740] ss:$16 sps:$4 sm:$0xff]   ;;  %v14818_v37 = vld [vmem:[%s17388_s15 + $0x748] ss:$16 sps:$4 sm:$0xff]  }
 0x14f   : > { %10226 = vmatpush1.bf16.msra.mxu0 %v14722_v38  ;;  %11301 = vmatpush1.bf16.msra.mxu1 %v14725_v39  ;;  %v14823_v38 = vld [vmem:[%s17388_s15 + $0x764] ss:$16 sps:$4 sm:$0xff]   ;;  %v14826_v39 = vld [vmem:[%s17388_s15 + $0x76c] ss:$16 sps:$4 sm:$0xff]  }
 0x150   : > { %10227 = vmatprep.subr.bf16.mxu0 %v14730_v40  ;;  %11302 = vmatprep.subr.bf16.mxu1 %v14733_v41  ;;  %v14821_v40 = vld [vmem:[%s17388_s15 + $0x760] ss:$16 sps:$4 sm:$0xff]   ;;  %v14824_v41 = vld [vmem:[%s17388_s15 + $0x768] ss:$16 sps:$4 sm:$0xff]  }
 0x153   : > { %10228 = vmatpush1.bf16.msra.mxu0 %v14728_v42  ;;  %11303 = vmatpush1.bf16.msra.mxu1 %v14731_v43  ;;  %v14829_v42 = vld [vmem:[%s17388_s15 + $0x784] ss:$16 sps:$4 sm:$0xff]   ;;  %v14832_v43 = vld [vmem:[%s17388_s15 + $0x78c] ss:$16 sps:$4 sm:$0xff]  }
 0x154   : > { %10229 = vmatprep.subr.bf16.mxu0 %v14736_v44  ;;  %11304 = vmatprep.subr.bf16.mxu1 %v14739_v45  ;;  %v14827_v44 = vld [vmem:[%s17388_s15 + $0x780] ss:$16 sps:$4 sm:$0xff]   ;;  %v14830_v45 = vld [vmem:[%s17388_s15 + $0x788] ss:$16 sps:$4 sm:$0xff]  }
 0x157   : > { %10230 = vmatpush1.bf16.msra.mxu0 %v14734_v46  ;;  %11305 = vmatpush1.bf16.msra.mxu1 %v14737_v47  ;;  %v14835_v46 = vld [vmem:[%s17388_s15 + $0x7a4] ss:$16 sps:$4 sm:$0xff]   ;;  %v14838_v47 = vld [vmem:[%s17388_s15 + $0x7ac] ss:$16 sps:$4 sm:$0xff]  }
 0x158   : > { %10231 = vmatprep.subr.bf16.mxu0 %v14742_v48  ;;  %11306 = vmatprep.subr.bf16.mxu1 %v14745_v49  ;;  %v14833_v48 = vld [vmem:[%s17388_s15 + $0x7a0] ss:$16 sps:$4 sm:$0xff]   ;;  %v14836_v49 = vld [vmem:[%s17388_s15 + $0x7a8] ss:$16 sps:$4 sm:$0xff]  }
 0x15b   : > { %10232 = vmatpush1.bf16.msra.mxu0 %v14740_v50  ;;  %11307 = vmatpush1.bf16.msra.mxu1 %v14743_v51  ;;  %v14841_v50 = vld [vmem:[%s17388_s15 + $0x7c4] ss:$16 sps:$4 sm:$0xff]   ;;  %v14844_v51 = vld [vmem:[%s17388_s15 + $0x7cc] ss:$16 sps:$4 sm:$0xff]  }
 0x15c   : > { %10233 = vmatprep.subr.bf16.mxu0 %v14748_v52  ;;  %11308 = vmatprep.subr.bf16.mxu1 %v14751_v53  ;;  %v14839_v52 = vld [vmem:[%s17388_s15 + $0x7c0] ss:$16 sps:$4 sm:$0xff]   ;;  %v14842_v53 = vld [vmem:[%s17388_s15 + $0x7c8] ss:$16 sps:$4 sm:$0xff]  }
 0x15f   : > { %10234 = vmatpush1.bf16.msra.mxu0 %v14746_v54  ;;  %11309 = vmatpush1.bf16.msra.mxu1 %v14749_v55  ;;  %v14847_v54 = vld [vmem:[%s17388_s15 + $0x7e4] ss:$16 sps:$4 sm:$0xff]   ;;  %v14850_v55 = vld [vmem:[%s17388_s15 + $0x7ec] ss:$16 sps:$4 sm:$0xff]  }
 0x160   : > { %10246 = vmatprep.subr.bf16.mxu0 %v14757_v56  ;;  %11321 = vmatprep.subr.bf16.mxu1 %v14760_v57  ;;  %v14845_v56 = vld [vmem:[%s17388_s15 + $0x7e0] ss:$16 sps:$4 sm:$0xff]   ;;  %v14848_v57 = vld [vmem:[%s17388_s15 + $0x7e8] ss:$16 sps:$4 sm:$0xff]  }
 0x162   : > { %10236 = vmatmul.mubr.bf16.vlgmr.msra.gmra.mrb[0].mxu0 %v14752_v58  ;;  %11311 = vmatmul.mubr.bf16.vlgmr.msra.gmra.mrb[0].mxu1 %v14752_v58  ;;  %v14856_v58 = vld [vmem:[%s17388_s15 + $0x804] ss:$16 sps:$4 sm:$0xff]  }
 0x163   : > { %10247 = vmatpush1.bf16.msra.mxu0 %v14755_v59  ;;  %11322 = vmatpush1.bf16.msra.mxu1 %v14758_v60  ;;  %v14859_v59 = vld [vmem:[%s17388_s15 + $0x80c] ss:$16 sps:$4 sm:$0xff]  }
 0x164   : > { %10248 = vmatprep.subr.bf16.mxu0 %v14763_v61  ;;  %11323 = vmatprep.subr.bf16.mxu1 %v14766_v62  ;;  %v14851_v60 = vld [vmem:[%s17386_s12 + $0x18] ss:$196 sps:$4 sm:$0xff]  }
 0x165   : > { %10278 = vmatprep.mubr.bf16.mxu0 %v14853_v63  ;;  %11353 = vmatprep.mubr.bf16.mxu1 %v14853_v63  ;;  %v14854_v61 = vld [vmem:[%s17388_s15 + $0x800] ss:$16 sps:$4 sm:$0xff]   ;;  %v14857_v62 = vld [vmem:[%s17388_s15 + $0x808] ss:$16 sps:$4 sm:$0xff]   ;;  %v14862_v63 = vld [vmem:[%s17388_s15 + $0x824] ss:$16 sps:$4 sm:$0xff]  }
 0x167   : > { %10249 = vmatpush1.bf16.msra.mxu0 %v14761_v0  ;;  %11324 = vmatpush1.bf16.msra.mxu1 %v14764_v1  ;;  %v14865_v0 = vld [vmem:[%s17388_s15 + $0x82c] ss:$16 sps:$4 sm:$0xff]  }
 0x168   : > { %10250 = vmatprep.subr.bf16.mxu0 %v14769_v2  ;;  %11325 = vmatprep.subr.bf16.mxu1 %v14772_v3  ;;  %v14952_v1 = vld [vmem:[%s17386_s12 + $0x24] ss:$196 sps:$4 sm:$0xff]  }
 0x169   : > { %v14860_v2 = vld [vmem:[%s17388_s15 + $0x820] ss:$16 sps:$4 sm:$0xff]   ;;  %v14863_v3 = vld [vmem:[%s17388_s15 + $0x828] ss:$16 sps:$4 sm:$0xff]  }
 0x16b   : > { %10251 = vmatpush1.bf16.msra.mxu0 %v14767_v4  ;;  %11326 = vmatpush1.bf16.msra.mxu1 %v14770_v5  ;;  %v14868_v4 = vld [vmem:[%s17388_s15 + $0x844] ss:$16 sps:$4 sm:$0xff]   ;;  %v14871_v5 = vld [vmem:[%s17388_s15 + $0x84c] ss:$16 sps:$4 sm:$0xff]  }
 0x16c   : > { %10252 = vmatprep.subr.bf16.mxu0 %v14775_v6  ;;  %11327 = vmatprep.subr.bf16.mxu1 %v14778_v7  ;;  %v14866_v6 = vld [vmem:[%s17388_s15 + $0x840] ss:$16 sps:$4 sm:$0xff]   ;;  %v14869_v7 = vld [vmem:[%s17388_s15 + $0x848] ss:$16 sps:$4 sm:$0xff]  }
 0x16f   : > { %10253 = vmatpush1.bf16.msra.mxu0 %v14773_v8  ;;  %11328 = vmatpush1.bf16.msra.mxu1 %v14776_v9  ;;  %v14874_v8 = vld [vmem:[%s17388_s15 + $0x864] ss:$16 sps:$4 sm:$0xff]   ;;  %v14877_v9 = vld [vmem:[%s17388_s15 + $0x86c] ss:$16 sps:$4 sm:$0xff]  }
 0x170   : > { %10254 = vmatprep.subr.bf16.mxu0 %v14781_v10  ;;  %11329 = vmatprep.subr.bf16.mxu1 %v14784_v11  ;;  %v14872_v10 = vld [vmem:[%s17388_s15 + $0x860] ss:$16 sps:$4 sm:$0xff]   ;;  %v14875_v11 = vld [vmem:[%s17388_s15 + $0x868] ss:$16 sps:$4 sm:$0xff]  }
 0x173   : > { %10255 = vmatpush1.bf16.msra.mxu0 %v14779_v12  ;;  %11330 = vmatpush1.bf16.msra.mxu1 %v14782_v13  ;;  %v14880_v12 = vld [vmem:[%s17388_s15 + $0x884] ss:$16 sps:$4 sm:$0xff]   ;;  %v14883_v13 = vld [vmem:[%s17388_s15 + $0x88c] ss:$16 sps:$4 sm:$0xff]  }
 0x174   : > { %10256 = vmatprep.subr.bf16.mxu0 %v14787_v14  ;;  %11331 = vmatprep.subr.bf16.mxu1 %v14790_v15  ;;  %v14878_v14 = vld [vmem:[%s17388_s15 + $0x880] ss:$16 sps:$4 sm:$0xff]   ;;  %v14881_v15 = vld [vmem:[%s17388_s15 + $0x888] ss:$16 sps:$4 sm:$0xff]  }
 0x177   : > { %10257 = vmatpush1.bf16.msra.mxu0 %v14785_v16  ;;  %11332 = vmatpush1.bf16.msra.mxu1 %v14788_v17  ;;  %v14886_v16 = vld [vmem:[%s17388_s15 + $0x8a4] ss:$16 sps:$4 sm:$0xff]   ;;  %v14889_v17 = vld [vmem:[%s17388_s15 + $0x8ac] ss:$16 sps:$4 sm:$0xff]  }
 0x178   : > { %10258 = vmatprep.subr.bf16.mxu0 %v14793_v18  ;;  %11333 = vmatprep.subr.bf16.mxu1 %v14796_v19  ;;  %v14884_v18 = vld [vmem:[%s17388_s15 + $0x8a0] ss:$16 sps:$4 sm:$0xff]   ;;  %v14887_v19 = vld [vmem:[%s17388_s15 + $0x8a8] ss:$16 sps:$4 sm:$0xff]  }
 0x17b   : > { %10259 = vmatpush1.bf16.msra.mxu0 %v14791_v20  ;;  %11334 = vmatpush1.bf16.msra.mxu1 %v14794_v21  ;;  %v14892_v20 = vld [vmem:[%s17388_s15 + $0x8c4] ss:$16 sps:$4 sm:$0xff]   ;;  %v14895_v21 = vld [vmem:[%s17388_s15 + $0x8cc] ss:$16 sps:$4 sm:$0xff]  }
 0x17c   : > { %10260 = vmatprep.subr.bf16.mxu0 %v14799_v22  ;;  %11335 = vmatprep.subr.bf16.mxu1 %v14802_v23  ;;  %v14890_v22 = vld [vmem:[%s17388_s15 + $0x8c0] ss:$16 sps:$4 sm:$0xff]   ;;  %v14893_v23 = vld [vmem:[%s17388_s15 + $0x8c8] ss:$16 sps:$4 sm:$0xff]  }
 0x17f   : > { %10261 = vmatpush1.bf16.msra.mxu0 %v14797_v24  ;;  %11336 = vmatpush1.bf16.msra.mxu1 %v14800_v25  ;;  %v14898_v24 = vld [vmem:[%s17388_s15 + $0x8e4] ss:$16 sps:$4 sm:$0xff]   ;;  %v14901_v25 = vld [vmem:[%s17388_s15 + $0x8ec] ss:$16 sps:$4 sm:$0xff]  }
 0x180   : > { %10262 = vmatprep.subr.bf16.mxu0 %v14805_v26  ;;  %11337 = vmatprep.subr.bf16.mxu1 %v14808_v27  ;;  %v14896_v26 = vld [vmem:[%s17388_s15 + $0x8e0] ss:$16 sps:$4 sm:$0xff]   ;;  %v14899_v27 = vld [vmem:[%s17388_s15 + $0x8e8] ss:$16 sps:$4 sm:$0xff]  }
 0x183   : > { %10263 = vmatpush1.bf16.msra.mxu0 %v14803_v28  ;;  %11338 = vmatpush1.bf16.msra.mxu1 %v14806_v29  ;;  %v14904_v28 = vld [vmem:[%s17388_s15 + $0x904] ss:$16 sps:$4 sm:$0xff]   ;;  %v14907_v29 = vld [vmem:[%s17388_s15 + $0x90c] ss:$16 sps:$4 sm:$0xff]  }
 0x184   : > { %10264 = vmatprep.subr.bf16.mxu0 %v14811_v30  ;;  %11339 = vmatprep.subr.bf16.mxu1 %v14814_v31  ;;  %v14902_v30 = vld [vmem:[%s17388_s15 + $0x900] ss:$16 sps:$4 sm:$0xff]   ;;  %v14905_v31 = vld [vmem:[%s17388_s15 + $0x908] ss:$16 sps:$4 sm:$0xff]  }
 0x187   : > { %10265 = vmatpush1.bf16.msra.mxu0 %v14809_v32  ;;  %11340 = vmatpush1.bf16.msra.mxu1 %v14812_v33  ;;  %v14910_v32 = vld [vmem:[%s17388_s15 + $0x924] ss:$16 sps:$4 sm:$0xff]   ;;  %v14913_v33 = vld [vmem:[%s17388_s15 + $0x92c] ss:$16 sps:$4 sm:$0xff]  }
 0x188   : > { %10266 = vmatprep.subr.bf16.mxu0 %v14817_v34  ;;  %11341 = vmatprep.subr.bf16.mxu1 %v14820_v35  ;;  %v14908_v34 = vld [vmem:[%s17388_s15 + $0x920] ss:$16 sps:$4 sm:$0xff]   ;;  %v14911_v35 = vld [vmem:[%s17388_s15 + $0x928] ss:$16 sps:$4 sm:$0xff]  }
 0x18b   : > { %10267 = vmatpush1.bf16.msra.mxu0 %v14815_v36  ;;  %11342 = vmatpush1.bf16.msra.mxu1 %v14818_v37  ;;  %v14916_v36 = vld [vmem:[%s17388_s15 + $0x944] ss:$16 sps:$4 sm:$0xff]   ;;  %v14919_v37 = vld [vmem:[%s17388_s15 + $0x94c] ss:$16 sps:$4 sm:$0xff]  }
 0x18c   : > { %10268 = vmatprep.subr.bf16.mxu0 %v14823_v38  ;;  %11343 = vmatprep.subr.bf16.mxu1 %v14826_v39  ;;  %v14914_v38 = vld [vmem:[%s17388_s15 + $0x940] ss:$16 sps:$4 sm:$0xff]   ;;  %v14917_v39 = vld [vmem:[%s17388_s15 + $0x948] ss:$16 sps:$4 sm:$0xff]  }
 0x18f   : > { %10269 = vmatpush1.bf16.msra.mxu0 %v14821_v40  ;;  %11344 = vmatpush1.bf16.msra.mxu1 %v14824_v41  ;;  %v14922_v40 = vld [vmem:[%s17388_s15 + $0x964] ss:$16 sps:$4 sm:$0xff]   ;;  %v14925_v41 = vld [vmem:[%s17388_s15 + $0x96c] ss:$16 sps:$4 sm:$0xff]  }
 0x190   : > { %10270 = vmatprep.subr.bf16.mxu0 %v14829_v42  ;;  %11345 = vmatprep.subr.bf16.mxu1 %v14832_v43  ;;  %v14920_v42 = vld [vmem:[%s17388_s15 + $0x960] ss:$16 sps:$4 sm:$0xff]   ;;  %v14923_v43 = vld [vmem:[%s17388_s15 + $0x968] ss:$16 sps:$4 sm:$0xff]  }
 0x193   : > { %10271 = vmatpush1.bf16.msra.mxu0 %v14827_v44  ;;  %11346 = vmatpush1.bf16.msra.mxu1 %v14830_v45  ;;  %v14928_v44 = vld [vmem:[%s17388_s15 + $0x984] ss:$16 sps:$4 sm:$0xff]   ;;  %v14931_v45 = vld [vmem:[%s17388_s15 + $0x98c] ss:$16 sps:$4 sm:$0xff]  }
 0x194   : > { %10272 = vmatprep.subr.bf16.mxu0 %v14835_v46  ;;  %11347 = vmatprep.subr.bf16.mxu1 %v14838_v47  ;;  %v14926_v46 = vld [vmem:[%s17388_s15 + $0x980] ss:$16 sps:$4 sm:$0xff]   ;;  %v14929_v47 = vld [vmem:[%s17388_s15 + $0x988] ss:$16 sps:$4 sm:$0xff]  }
 0x197   : > { %10273 = vmatpush1.bf16.msra.mxu0 %v14833_v48  ;;  %11348 = vmatpush1.bf16.msra.mxu1 %v14836_v49  ;;  %v14934_v48 = vld [vmem:[%s17388_s15 + $0x9a4] ss:$16 sps:$4 sm:$0xff]   ;;  %v14937_v49 = vld [vmem:[%s17388_s15 + $0x9ac] ss:$16 sps:$4 sm:$0xff]  }
 0x198   : > { %10274 = vmatprep.subr.bf16.mxu0 %v14841_v50  ;;  %11349 = vmatprep.subr.bf16.mxu1 %v14844_v51  ;;  %v14932_v50 = vld [vmem:[%s17388_s15 + $0x9a0] ss:$16 sps:$4 sm:$0xff]   ;;  %v14935_v51 = vld [vmem:[%s17388_s15 + $0x9a8] ss:$16 sps:$4 sm:$0xff]  }
 0x19b   : > { %10275 = vmatpush1.bf16.msra.mxu0 %v14839_v52  ;;  %11350 = vmatpush1.bf16.msra.mxu1 %v14842_v53  ;;  %v14940_v52 = vld [vmem:[%s17388_s15 + $0x9c4] ss:$16 sps:$4 sm:$0xff]   ;;  %v14943_v53 = vld [vmem:[%s17388_s15 + $0x9cc] ss:$16 sps:$4 sm:$0xff]  }
 0x19c   : > { %10276 = vmatprep.subr.bf16.mxu0 %v14847_v54  ;;  %11351 = vmatprep.subr.bf16.mxu1 %v14850_v55  ;;  %v14938_v54 = vld [vmem:[%s17388_s15 + $0x9c0] ss:$16 sps:$4 sm:$0xff]   ;;  %v14941_v55 = vld [vmem:[%s17388_s15 + $0x9c8] ss:$16 sps:$4 sm:$0xff]  }
 0x19f   : > { %10277 = vmatpush1.bf16.msra.mxu0 %v14845_v56  ;;  %11352 = vmatpush1.bf16.msra.mxu1 %v14848_v57  ;;  %v14946_v56 = vld [vmem:[%s17388_s15 + $0x9e4] ss:$16 sps:$4 sm:$0xff]   ;;  %v14949_v57 = vld [vmem:[%s17388_s15 + $0x9ec] ss:$16 sps:$4 sm:$0xff]  }
 0x1a0   : > { %10289 = vmatprep.subr.bf16.mxu0 %v14856_v58  ;;  %11364 = vmatprep.subr.bf16.mxu1 %v14859_v59  ;;  %v14944_v58 = vld [vmem:[%s17388_s15 + $0x9e0] ss:$16 sps:$4 sm:$0xff]   ;;  %v14947_v59 = vld [vmem:[%s17388_s15 + $0x9e8] ss:$16 sps:$4 sm:$0xff]  }
 0x1a2   : > { %10279 = vmatmul.mubr.bf16.vlgmr.msra.gmra.mrb[0].mxu0 %v14851_v60  ;;  %11354 = vmatmul.mubr.bf16.vlgmr.msra.gmra.mrb[0].mxu1 %v14851_v60  ;;  %v14950_v60 = vld [vmem:[%s17386_s12 + $0x20] ss:$196 sps:$4 sm:$0xff]  }
 0x1a3   : > { %10290 = vmatpush1.bf16.msra.mxu0 %v14854_v61  ;;  %11365 = vmatpush1.bf16.msra.mxu1 %v14857_v62  ;;  %v14955_v61 = vld [vmem:[%s17388_s15 + $0xa04] ss:$16 sps:$4 sm:$0xff]   ;;  %v14958_v62 = vld [vmem:[%s17388_s15 + $0xa0c] ss:$16 sps:$4 sm:$0xff]  }
 0x1a4   : > { %10291 = vmatprep.subr.bf16.mxu0 %v14862_v63  ;;  %11366 = vmatprep.subr.bf16.mxu1 %v14865_v0  ;;  %v14953_v63 = vld [vmem:[%s17388_s15 + $0xa00] ss:$16 sps:$4 sm:$0xff]   ;;  %v14956_v0 = vld [vmem:[%s17388_s15 + $0xa08] ss:$16 sps:$4 sm:$0xff]  }
 0x1a5   : > { %10321 = vmatprep.mubr.bf16.mxu0 %v14952_v1  ;;  %11396 = vmatprep.mubr.bf16.mxu1 %v14952_v1  ;;  %v14961_v1 = vld [vmem:[%s17388_s15 + $0xa24] ss:$16 sps:$4 sm:$0xff]  }
 0x1a7   : > { %10292 = vmatpush1.bf16.msra.mxu0 %v14860_v2  ;;  %11367 = vmatpush1.bf16.msra.mxu1 %v14863_v3  ;;  %v14964_v2 = vld [vmem:[%s17388_s15 + $0xa2c] ss:$16 sps:$4 sm:$0xff]  }
 0x1a8   : > { %10293 = vmatprep.subr.bf16.mxu0 %v14868_v4  ;;  %11368 = vmatprep.subr.bf16.mxu1 %v14871_v5  ;;  %v15051_v3 = vld [vmem:[%s17386_s12 + $0x2c] ss:$196 sps:$4 sm:$0xff]  }
 0x1a9   : > { %v14959_v4 = vld [vmem:[%s17388_s15 + $0xa20] ss:$16 sps:$4 sm:$0xff]   ;;  %v14962_v5 = vld [vmem:[%s17388_s15 + $0xa28] ss:$16 sps:$4 sm:$0xff]  }
 0x1ab   : > { %10294 = vmatpush1.bf16.msra.mxu0 %v14866_v6  ;;  %11369 = vmatpush1.bf16.msra.mxu1 %v14869_v7  ;;  %v14967_v6 = vld [vmem:[%s17388_s15 + $0xa44] ss:$16 sps:$4 sm:$0xff]   ;;  %v14970_v7 = vld [vmem:[%s17388_s15 + $0xa4c] ss:$16 sps:$4 sm:$0xff]  }
 0x1ac   : > { %10295 = vmatprep.subr.bf16.mxu0 %v14874_v8  ;;  %11370 = vmatprep.subr.bf16.mxu1 %v14877_v9  ;;  %v14965_v8 = vld [vmem:[%s17388_s15 + $0xa40] ss:$16 sps:$4 sm:$0xff]   ;;  %v14968_v9 = vld [vmem:[%s17388_s15 + $0xa48] ss:$16 sps:$4 sm:$0xff]  }
 0x1af   : > { %10296 = vmatpush1.bf16.msra.mxu0 %v14872_v10  ;;  %11371 = vmatpush1.bf16.msra.mxu1 %v14875_v11  ;;  %v14973_v10 = vld [vmem:[%s17388_s15 + $0xa64] ss:$16 sps:$4 sm:$0xff]   ;;  %v14976_v11 = vld [vmem:[%s17388_s15 + $0xa6c] ss:$16 sps:$4 sm:$0xff]  }
 0x1b0   : > { %10297 = vmatprep.subr.bf16.mxu0 %v14880_v12  ;;  %11372 = vmatprep.subr.bf16.mxu1 %v14883_v13  ;;  %v14971_v12 = vld [vmem:[%s17388_s15 + $0xa60] ss:$16 sps:$4 sm:$0xff]   ;;  %v14974_v13 = vld [vmem:[%s17388_s15 + $0xa68] ss:$16 sps:$4 sm:$0xff]  }
 0x1b3   : > { %10298 = vmatpush1.bf16.msra.mxu0 %v14878_v14  ;;  %11373 = vmatpush1.bf16.msra.mxu1 %v14881_v15  ;;  %v14979_v14 = vld [vmem:[%s17388_s15 + $0xa84] ss:$16 sps:$4 sm:$0xff]   ;;  %v14982_v15 = vld [vmem:[%s17388_s15 + $0xa8c] ss:$16 sps:$4 sm:$0xff]  }
 0x1b4   : > { %10299 = vmatprep.subr.bf16.mxu0 %v14886_v16  ;;  %11374 = vmatprep.subr.bf16.mxu1 %v14889_v17  ;;  %v14977_v16 = vld [vmem:[%s17388_s15 + $0xa80] ss:$16 sps:$4 sm:$0xff]   ;;  %v14980_v17 = vld [vmem:[%s17388_s15 + $0xa88] ss:$16 sps:$4 sm:$0xff]  }
 0x1b7   : > { %10300 = vmatpush1.bf16.msra.mxu0 %v14884_v18  ;;  %11375 = vmatpush1.bf16.msra.mxu1 %v14887_v19  ;;  %v14985_v18 = vld [vmem:[%s17388_s15 + $0xaa4] ss:$16 sps:$4 sm:$0xff]   ;;  %v14988_v19 = vld [vmem:[%s17388_s15 + $0xaac] ss:$16 sps:$4 sm:$0xff]  }
 0x1b8   : > { %10301 = vmatprep.subr.bf16.mxu0 %v14892_v20  ;;  %11376 = vmatprep.subr.bf16.mxu1 %v14895_v21  ;;  %v14983_v20 = vld [vmem:[%s17388_s15 + $0xaa0] ss:$16 sps:$4 sm:$0xff]   ;;  %v14986_v21 = vld [vmem:[%s17388_s15 + $0xaa8] ss:$16 sps:$4 sm:$0xff]  }
 0x1bb   : > { %10302 = vmatpush1.bf16.msra.mxu0 %v14890_v22  ;;  %11377 = vmatpush1.bf16.msra.mxu1 %v14893_v23  ;;  %v14991_v22 = vld [vmem:[%s17388_s15 + $0xac4] ss:$16 sps:$4 sm:$0xff]   ;;  %v14994_v23 = vld [vmem:[%s17388_s15 + $0xacc] ss:$16 sps:$4 sm:$0xff]  }
 0x1bc   : > { %10303 = vmatprep.subr.bf16.mxu0 %v14898_v24  ;;  %11378 = vmatprep.subr.bf16.mxu1 %v14901_v25  ;;  %v14989_v24 = vld [vmem:[%s17388_s15 + $0xac0] ss:$16 sps:$4 sm:$0xff]   ;;  %v14992_v25 = vld [vmem:[%s17388_s15 + $0xac8] ss:$16 sps:$4 sm:$0xff]  }
 0x1bf   : > { %10304 = vmatpush1.bf16.msra.mxu0 %v14896_v26  ;;  %11379 = vmatpush1.bf16.msra.mxu1 %v14899_v27  ;;  %v14997_v26 = vld [vmem:[%s17388_s15 + $0xae4] ss:$16 sps:$4 sm:$0xff]   ;;  %v15000_v27 = vld [vmem:[%s17388_s15 + $0xaec] ss:$16 sps:$4 sm:$0xff]  }
 0x1c0   : > { %10305 = vmatprep.subr.bf16.mxu0 %v14904_v28  ;;  %11380 = vmatprep.subr.bf16.mxu1 %v14907_v29  ;;  %v14995_v28 = vld [vmem:[%s17388_s15 + $0xae0] ss:$16 sps:$4 sm:$0xff]   ;;  %v14998_v29 = vld [vmem:[%s17388_s15 + $0xae8] ss:$16 sps:$4 sm:$0xff]  }
 0x1c3   : > { %10306 = vmatpush1.bf16.msra.mxu0 %v14902_v30  ;;  %11381 = vmatpush1.bf16.msra.mxu1 %v14905_v31  ;;  %v15003_v30 = vld [vmem:[%s17388_s15 + $0xb04] ss:$16 sps:$4 sm:$0xff]   ;;  %v15006_v31 = vld [vmem:[%s17388_s15 + $0xb0c] ss:$16 sps:$4 sm:$0xff]  }
 0x1c4   : > { %10307 = vmatprep.subr.bf16.mxu0 %v14910_v32  ;;  %11382 = vmatprep.subr.bf16.mxu1 %v14913_v33  ;;  %v15001_v32 = vld [vmem:[%s17388_s15 + $0xb00] ss:$16 sps:$4 sm:$0xff]   ;;  %v15004_v33 = vld [vmem:[%s17388_s15 + $0xb08] ss:$16 sps:$4 sm:$0xff]  }
 0x1c7   : > { %10308 = vmatpush1.bf16.msra.mxu0 %v14908_v34  ;;  %11383 = vmatpush1.bf16.msra.mxu1 %v14911_v35  ;;  %v15009_v34 = vld [vmem:[%s17388_s15 + $0xb24] ss:$16 sps:$4 sm:$0xff]   ;;  %v15012_v35 = vld [vmem:[%s17388_s15 + $0xb2c] ss:$16 sps:$4 sm:$0xff]  }
 0x1c8   : > { %10309 = vmatprep.subr.bf16.mxu0 %v14916_v36  ;;  %11384 = vmatprep.subr.bf16.mxu1 %v14919_v37  ;;  %v15007_v36 = vld [vmem:[%s17388_s15 + $0xb20] ss:$16 sps:$4 sm:$0xff]   ;;  %v15010_v37 = vld [vmem:[%s17388_s15 + $0xb28] ss:$16 sps:$4 sm:$0xff]  }
 0x1cb   : > { %10310 = vmatpush1.bf16.msra.mxu0 %v14914_v38  ;;  %11385 = vmatpush1.bf16.msra.mxu1 %v14917_v39  ;;  %v15015_v38 = vld [vmem:[%s17388_s15 + $0xb44] ss:$16 sps:$4 sm:$0xff]   ;;  %v15018_v39 = vld [vmem:[%s17388_s15 + $0xb4c] ss:$16 sps:$4 sm:$0xff]  }
 0x1cc   : > { %10311 = vmatprep.subr.bf16.mxu0 %v14922_v40  ;;  %11386 = vmatprep.subr.bf16.mxu1 %v14925_v41  ;;  %v15013_v40 = vld [vmem:[%s17388_s15 + $0xb40] ss:$16 sps:$4 sm:$0xff]   ;;  %v15016_v41 = vld [vmem:[%s17388_s15 + $0xb48] ss:$16 sps:$4 sm:$0xff]  }
 0x1cf   : > { %10312 = vmatpush1.bf16.msra.mxu0 %v14920_v42  ;;  %11387 = vmatpush1.bf16.msra.mxu1 %v14923_v43  ;;  %v15021_v42 = vld [vmem:[%s17388_s15 + $0xb64] ss:$16 sps:$4 sm:$0xff]   ;;  %v15024_v43 = vld [vmem:[%s17388_s15 + $0xb6c] ss:$16 sps:$4 sm:$0xff]  }
 0x1d0   : > { %10313 = vmatprep.subr.bf16.mxu0 %v14928_v44  ;;  %11388 = vmatprep.subr.bf16.mxu1 %v14931_v45  ;;  %v15019_v44 = vld [vmem:[%s17388_s15 + $0xb60] ss:$16 sps:$4 sm:$0xff]   ;;  %v15022_v45 = vld [vmem:[%s17388_s15 + $0xb68] ss:$16 sps:$4 sm:$0xff]  }
 0x1d3   : > { %10314 = vmatpush1.bf16.msra.mxu0 %v14926_v46  ;;  %11389 = vmatpush1.bf16.msra.mxu1 %v14929_v47  ;;  %v15027_v46 = vld [vmem:[%s17388_s15 + $0xb84] ss:$16 sps:$4 sm:$0xff]   ;;  %v15030_v47 = vld [vmem:[%s17388_s15 + $0xb8c] ss:$16 sps:$4 sm:$0xff]  }
 0x1d4   : > { %10315 = vmatprep.subr.bf16.mxu0 %v14934_v48  ;;  %11390 = vmatprep.subr.bf16.mxu1 %v14937_v49  ;;  %v15025_v48 = vld [vmem:[%s17388_s15 + $0xb80] ss:$16 sps:$4 sm:$0xff]   ;;  %v15028_v49 = vld [vmem:[%s17388_s15 + $0xb88] ss:$16 sps:$4 sm:$0xff]  }
 0x1d7   : > { %10316 = vmatpush1.bf16.msra.mxu0 %v14932_v50  ;;  %11391 = vmatpush1.bf16.msra.mxu1 %v14935_v51  ;;  %v15033_v50 = vld [vmem:[%s17388_s15 + $0xba4] ss:$16 sps:$4 sm:$0xff]   ;;  %v15036_v51 = vld [vmem:[%s17388_s15 + $0xbac] ss:$16 sps:$4 sm:$0xff]  }
 0x1d8   : > { %10317 = vmatprep.subr.bf16.mxu0 %v14940_v52  ;;  %11392 = vmatprep.subr.bf16.mxu1 %v14943_v53  ;;  %v15031_v52 = vld [vmem:[%s17388_s15 + $0xba0] ss:$16 sps:$4 sm:$0xff]   ;;  %v15034_v53 = vld [vmem:[%s17388_s15 + $0xba8] ss:$16 sps:$4 sm:$0xff]  }
 0x1db   : > { %10318 = vmatpush1.bf16.msra.mxu0 %v14938_v54  ;;  %11393 = vmatpush1.bf16.msra.mxu1 %v14941_v55  ;;  %v15039_v54 = vld [vmem:[%s17388_s15 + $0xbc4] ss:$16 sps:$4 sm:$0xff]   ;;  %v15042_v55 = vld [vmem:[%s17388_s15 + $0xbcc] ss:$16 sps:$4 sm:$0xff]  }
 0x1dc   : > { %10319 = vmatprep.subr.bf16.mxu0 %v14946_v56  ;;  %11394 = vmatprep.subr.bf16.mxu1 %v14949_v57  ;;  %v15037_v56 = vld [vmem:[%s17388_s15 + $0xbc0] ss:$16 sps:$4 sm:$0xff]   ;;  %v15040_v57 = vld [vmem:[%s17388_s15 + $0xbc8] ss:$16 sps:$4 sm:$0xff]  }
 0x1df   : > { %10320 = vmatpush1.bf16.msra.mxu0 %v14944_v58  ;;  %11395 = vmatpush1.bf16.msra.mxu1 %v14947_v59  ;;  %v15045_v58 = vld [vmem:[%s17388_s15 + $0xbe4] ss:$16 sps:$4 sm:$0xff]   ;;  %v15048_v59 = vld [vmem:[%s17388_s15 + $0xbec] ss:$16 sps:$4 sm:$0xff]  }
 0x1e0   : > { %10332 = vmatprep.subr.bf16.mxu0 %v14955_v61  ;;  %11407 = vmatprep.subr.bf16.mxu1 %v14958_v62  ;;  %v15046_v61 = vld [vmem:[%s17388_s15 + $0xbe8] ss:$16 sps:$4 sm:$0xff]  }
 0x1e1   : > { %v15049_v62 = vld [vmem:[%s17386_s12 + $0x28] ss:$196 sps:$4 sm:$0xff]  }
 0x1e2   : > { %10322 = vmatmul.mubr.bf16.vlgmr.msra.gmra.mrb[0].mxu0 %v14950_v60  ;;  %11397 = vmatmul.mubr.bf16.vlgmr.msra.gmra.mrb[0].mxu1 %v14950_v60  ;;  %v15043_v60 = vld [vmem:[%s17388_s15 + $0xbe0] ss:$16 sps:$4 sm:$0xff]  }
 0x1e3   : > { %10333 = vmatpush1.bf16.msra.mxu0 %v14953_v63  ;;  %11408 = vmatpush1.bf16.msra.mxu1 %v14956_v0  ;;  %v15054_v63 = vld [vmem:[%s17388_s15 + $0xc04] ss:$16 sps:$4 sm:$0xff]   ;;  %v15057_v0 = vld [vmem:[%s17388_s15 + $0xc0c] ss:$16 sps:$4 sm:$0xff]  }
 0x1e4   : > { %10334 = vmatprep.subr.bf16.mxu0 %v14961_v1  ;;  %11409 = vmatprep.subr.bf16.mxu1 %v14964_v2  ;;  %v15052_v1 = vld [vmem:[%s17388_s15 + $0xc00] ss:$16 sps:$4 sm:$0xff]   ;;  %v15055_v2 = vld [vmem:[%s17388_s15 + $0xc08] ss:$16 sps:$4 sm:$0xff]  }
 0x1e5   : > { %10364 = vmatprep.mubr.bf16.mxu0 %v15051_v3  ;;  %11439 = vmatprep.mubr.bf16.mxu1 %v15051_v3  ;;  %v15060_v3 = vld [vmem:[%s17388_s15 + $0xc24] ss:$16 sps:$4 sm:$0xff]  }
 0x1e7   : > { %10335 = vmatpush1.bf16.msra.mxu0 %v14959_v4  ;;  %11410 = vmatpush1.bf16.msra.mxu1 %v14962_v5  ;;  %v15063_v4 = vld [vmem:[%s17388_s15 + $0xc2c] ss:$16 sps:$4 sm:$0xff]  }
 0x1e8   : > { %10336 = vmatprep.subr.bf16.mxu0 %v14967_v6  ;;  %11411 = vmatprep.subr.bf16.mxu1 %v14970_v7  ;;  %v15150_v5 = vld [vmem:[%s17386_s12 + $0x34] ss:$196 sps:$4 sm:$0xff]  }
 0x1e9   : > { %v15058_v6 = vld [vmem:[%s17388_s15 + $0xc20] ss:$16 sps:$4 sm:$0xff]   ;;  %v15061_v7 = vld [vmem:[%s17388_s15 + $0xc28] ss:$16 sps:$4 sm:$0xff]  }
 0x1eb   : > { %10337 = vmatpush1.bf16.msra.mxu0 %v14965_v8  ;;  %11412 = vmatpush1.bf16.msra.mxu1 %v14968_v9  ;;  %v15066_v8 = vld [vmem:[%s17388_s15 + $0xc44] ss:$16 sps:$4 sm:$0xff]   ;;  %v15069_v9 = vld [vmem:[%s17388_s15 + $0xc4c] ss:$16 sps:$4 sm:$0xff]  }
 0x1ec   : > { %10338 = vmatprep.subr.bf16.mxu0 %v14973_v10  ;;  %11413 = vmatprep.subr.bf16.mxu1 %v14976_v11  ;;  %v15064_v10 = vld [vmem:[%s17388_s15 + $0xc40] ss:$16 sps:$4 sm:$0xff]   ;;  %v15067_v11 = vld [vmem:[%s17388_s15 + $0xc48] ss:$16 sps:$4 sm:$0xff]  }
 0x1ef   : > { %10339 = vmatpush1.bf16.msra.mxu0 %v14971_v12  ;;  %11414 = vmatpush1.bf16.msra.mxu1 %v14974_v13  ;;  %v15072_v12 = vld [vmem:[%s17388_s15 + $0xc64] ss:$16 sps:$4 sm:$0xff]   ;;  %v15075_v13 = vld [vmem:[%s17388_s15 + $0xc6c] ss:$16 sps:$4 sm:$0xff]  }
 0x1f0   : > { %10340 = vmatprep.subr.bf16.mxu0 %v14979_v14  ;;  %11415 = vmatprep.subr.bf16.mxu1 %v14982_v15  ;;  %v15070_v14 = vld [vmem:[%s17388_s15 + $0xc60] ss:$16 sps:$4 sm:$0xff]   ;;  %v15073_v15 = vld [vmem:[%s17388_s15 + $0xc68] ss:$16 sps:$4 sm:$0xff]  }
 0x1f3   : > { %10341 = vmatpush1.bf16.msra.mxu0 %v14977_v16  ;;  %11416 = vmatpush1.bf16.msra.mxu1 %v14980_v17  ;;  %v15078_v16 = vld [vmem:[%s17388_s15 + $0xc84] ss:$16 sps:$4 sm:$0xff]   ;;  %v15081_v17 = vld [vmem:[%s17388_s15 + $0xc8c] ss:$16 sps:$4 sm:$0xff]  }
 0x1f4   : > { %10342 = vmatprep.subr.bf16.mxu0 %v14985_v18  ;;  %11417 = vmatprep.subr.bf16.mxu1 %v14988_v19  ;;  %v15076_v18 = vld [vmem:[%s17388_s15 + $0xc80] ss:$16 sps:$4 sm:$0xff]   ;;  %v15079_v19 = vld [vmem:[%s17388_s15 + $0xc88] ss:$16 sps:$4 sm:$0xff]  }
 0x1f7   : > { %10343 = vmatpush1.bf16.msra.mxu0 %v14983_v20  ;;  %11418 = vmatpush1.bf16.msra.mxu1 %v14986_v21  ;;  %v15084_v20 = vld [vmem:[%s17388_s15 + $0xca4] ss:$16 sps:$4 sm:$0xff]   ;;  %v15087_v21 = vld [vmem:[%s17388_s15 + $0xcac] ss:$16 sps:$4 sm:$0xff]  }
 0x1f8   : > { %10344 = vmatprep.subr.bf16.mxu0 %v14991_v22  ;;  %11419 = vmatprep.subr.bf16.mxu1 %v14994_v23  ;;  %v15082_v22 = vld [vmem:[%s17388_s15 + $0xca0] ss:$16 sps:$4 sm:$0xff]   ;;  %v15085_v23 = vld [vmem:[%s17388_s15 + $0xca8] ss:$16 sps:$4 sm:$0xff]  }
 0x1fb   : > { %10345 = vmatpush1.bf16.msra.mxu0 %v14989_v24  ;;  %11420 = vmatpush1.bf16.msra.mxu1 %v14992_v25  ;;  %v15090_v24 = vld [vmem:[%s17388_s15 + $0xcc4] ss:$16 sps:$4 sm:$0xff]   ;;  %v15093_v25 = vld [vmem:[%s17388_s15 + $0xccc] ss:$16 sps:$4 sm:$0xff]  }
 0x1fc   : > { %10346 = vmatprep.subr.bf16.mxu0 %v14997_v26  ;;  %11421 = vmatprep.subr.bf16.mxu1 %v15000_v27  ;;  %v15088_v26 = vld [vmem:[%s17388_s15 + $0xcc0] ss:$16 sps:$4 sm:$0xff]   ;;  %v15091_v27 = vld [vmem:[%s17388_s15 + $0xcc8] ss:$16 sps:$4 sm:$0xff]  }
 0x1ff   : > { %10347 = vmatpush1.bf16.msra.mxu0 %v14995_v28  ;;  %11422 = vmatpush1.bf16.msra.mxu1 %v14998_v29  ;;  %v15096_v28 = vld [vmem:[%s17388_s15 + $0xce4] ss:$16 sps:$4 sm:$0xff]   ;;  %v15099_v29 = vld [vmem:[%s17388_s15 + $0xcec] ss:$16 sps:$4 sm:$0xff]  }
 0x200   : > { %10348 = vmatprep.subr.bf16.mxu0 %v15003_v30  ;;  %11423 = vmatprep.subr.bf16.mxu1 %v15006_v31  ;;  %v15094_v30 = vld [vmem:[%s17388_s15 + $0xce0] ss:$16 sps:$4 sm:$0xff]   ;;  %v15097_v31 = vld [vmem:[%s17388_s15 + $0xce8] ss:$16 sps:$4 sm:$0xff]  }
 0x203   : > { %10349 = vmatpush1.bf16.msra.mxu0 %v15001_v32  ;;  %11424 = vmatpush1.bf16.msra.mxu1 %v15004_v33  ;;  %v15102_v32 = vld [vmem:[%s17388_s15 + $0xd04] ss:$16 sps:$4 sm:$0xff]   ;;  %v15105_v33 = vld [vmem:[%s17388_s15 + $0xd0c] ss:$16 sps:$4 sm:$0xff]  }
 0x204   : > { %10350 = vmatprep.subr.bf16.mxu0 %v15009_v34  ;;  %11425 = vmatprep.subr.bf16.mxu1 %v15012_v35  ;;  %v15100_v34 = vld [vmem:[%s17388_s15 + $0xd00] ss:$16 sps:$4 sm:$0xff]   ;;  %v15103_v35 = vld [vmem:[%s17388_s15 + $0xd08] ss:$16 sps:$4 sm:$0xff]  }
 0x207   : > { %10351 = vmatpush1.bf16.msra.mxu0 %v15007_v36  ;;  %11426 = vmatpush1.bf16.msra.mxu1 %v15010_v37  ;;  %v15108_v36 = vld [vmem:[%s17388_s15 + $0xd24] ss:$16 sps:$4 sm:$0xff]   ;;  %v15111_v37 = vld [vmem:[%s17388_s15 + $0xd2c] ss:$16 sps:$4 sm:$0xff]  }
 0x208   : > { %10352 = vmatprep.subr.bf16.mxu0 %v15015_v38  ;;  %11427 = vmatprep.subr.bf16.mxu1 %v15018_v39  ;;  %v15106_v38 = vld [vmem:[%s17388_s15 + $0xd20] ss:$16 sps:$4 sm:$0xff]   ;;  %v15109_v39 = vld [vmem:[%s17388_s15 + $0xd28] ss:$16 sps:$4 sm:$0xff]  }
 0x20b   : > { %10353 = vmatpush1.bf16.msra.mxu0 %v15013_v40  ;;  %11428 = vmatpush1.bf16.msra.mxu1 %v15016_v41  ;;  %v15114_v40 = vld [vmem:[%s17388_s15 + $0xd44] ss:$16 sps:$4 sm:$0xff]   ;;  %v15117_v41 = vld [vmem:[%s17388_s15 + $0xd4c] ss:$16 sps:$4 sm:$0xff]  }
 0x20c   : > { %10354 = vmatprep.subr.bf16.mxu0 %v15021_v42  ;;  %11429 = vmatprep.subr.bf16.mxu1 %v15024_v43  ;;  %v15112_v42 = vld [vmem:[%s17388_s15 + $0xd40] ss:$16 sps:$4 sm:$0xff]   ;;  %v15115_v43 = vld [vmem:[%s17388_s15 + $0xd48] ss:$16 sps:$4 sm:$0xff]  }
 0x20f   : > { %10355 = vmatpush1.bf16.msra.mxu0 %v15019_v44  ;;  %11430 = vmatpush1.bf16.msra.mxu1 %v15022_v45  ;;  %v15120_v44 = vld [vmem:[%s17388_s15 + $0xd64] ss:$16 sps:$4 sm:$0xff]   ;;  %v15123_v45 = vld [vmem:[%s17388_s15 + $0xd6c] ss:$16 sps:$4 sm:$0xff]  }
 0x210   : > { %10356 = vmatprep.subr.bf16.mxu0 %v15027_v46  ;;  %11431 = vmatprep.subr.bf16.mxu1 %v15030_v47  ;;  %v15118_v46 = vld [vmem:[%s17388_s15 + $0xd60] ss:$16 sps:$4 sm:$0xff]   ;;  %v15121_v47 = vld [vmem:[%s17388_s15 + $0xd68] ss:$16 sps:$4 sm:$0xff]  }
 0x213   : > { %10357 = vmatpush1.bf16.msra.mxu0 %v15025_v48  ;;  %11432 = vmatpush1.bf16.msra.mxu1 %v15028_v49  ;;  %v15126_v48 = vld [vmem:[%s17388_s15 + $0xd84] ss:$16 sps:$4 sm:$0xff]   ;;  %v15129_v49 = vld [vmem:[%s17388_s15 + $0xd8c] ss:$16 sps:$4 sm:$0xff]  }
 0x214   : > { %10358 = vmatprep.subr.bf16.mxu0 %v15033_v50  ;;  %11433 = vmatprep.subr.bf16.mxu1 %v15036_v51  ;;  %v15124_v50 = vld [vmem:[%s17388_s15 + $0xd80] ss:$16 sps:$4 sm:$0xff]   ;;  %v15127_v51 = vld [vmem:[%s17388_s15 + $0xd88] ss:$16 sps:$4 sm:$0xff]  }
 0x217   : > { %10359 = vmatpush1.bf16.msra.mxu0 %v15031_v52  ;;  %11434 = vmatpush1.bf16.msra.mxu1 %v15034_v53  ;;  %v15132_v52 = vld [vmem:[%s17388_s15 + $0xda4] ss:$16 sps:$4 sm:$0xff]   ;;  %v15135_v53 = vld [vmem:[%s17388_s15 + $0xdac] ss:$16 sps:$4 sm:$0xff]  }
 0x218   : > { %10360 = vmatprep.subr.bf16.mxu0 %v15039_v54  ;;  %11435 = vmatprep.subr.bf16.mxu1 %v15042_v55  ;;  %v15130_v54 = vld [vmem:[%s17388_s15 + $0xda0] ss:$16 sps:$4 sm:$0xff]   ;;  %v15133_v55 = vld [vmem:[%s17388_s15 + $0xda8] ss:$16 sps:$4 sm:$0xff]  }
 0x21b   : > { %10361 = vmatpush1.bf16.msra.mxu0 %v15037_v56  ;;  %11436 = vmatpush1.bf16.msra.mxu1 %v15040_v57  ;;  %v15138_v56 = vld [vmem:[%s17388_s15 + $0xdc4] ss:$16 sps:$4 sm:$0xff]   ;;  %v15141_v57 = vld [vmem:[%s17388_s15 + $0xdcc] ss:$16 sps:$4 sm:$0xff]  }
 0x21c   : > { %10362 = vmatprep.subr.bf16.mxu0 %v15045_v58  ;;  %11437 = vmatprep.subr.bf16.mxu1 %v15048_v59  ;;  %v15136_v58 = vld [vmem:[%s17388_s15 + $0xdc0] ss:$16 sps:$4 sm:$0xff]   ;;  %v15139_v59 = vld [vmem:[%s17388_s15 + $0xdc8] ss:$16 sps:$4 sm:$0xff]  }
 0x21f   : > { %10363 = vmatpush1.bf16.msra.mxu0 %v15043_v60  ;;  %11438 = vmatpush1.bf16.msra.mxu1 %v15046_v61  ;;  %v15144_v60 = vld [vmem:[%s17388_s15 + $0xde4] ss:$16 sps:$4 sm:$0xff]   ;;  %v15147_v61 = vld [vmem:[%s17388_s15 + $0xdec] ss:$16 sps:$4 sm:$0xff]  }
 0x220   : > { %10375 = vmatprep.subr.bf16.mxu0 %v15054_v63  ;;  %11450 = vmatprep.subr.bf16.mxu1 %v15057_v0  ;;  %v15145_v63 = vld [vmem:[%s17388_s15 + $0xde8] ss:$16 sps:$4 sm:$0xff]  }
 0x221   : > { %v15148_v0 = vld [vmem:[%s17386_s12 + $0x30] ss:$196 sps:$4 sm:$0xff]  }
 0x222   : > { %10365 = vmatmul.mubr.bf16.vlgmr.msra.gmra.mrb[0].mxu0 %v15049_v62  ;;  %11440 = vmatmul.mubr.bf16.vlgmr.msra.gmra.mrb[0].mxu1 %v15049_v62  ;;  %v15142_v62 = vld [vmem:[%s17388_s15 + $0xde0] ss:$16 sps:$4 sm:$0xff]  }
 0x223   : > { %10376 = vmatpush1.bf16.msra.mxu0 %v15052_v1  ;;  %11451 = vmatpush1.bf16.msra.mxu1 %v15055_v2  ;;  %v15153_v1 = vld [vmem:[%s17388_s15 + $0xe04] ss:$16 sps:$4 sm:$0xff]   ;;  %v15156_v2 = vld [vmem:[%s17388_s15 + $0xe0c] ss:$16 sps:$4 sm:$0xff]  }
 0x224   : > { %10377 = vmatprep.subr.bf16.mxu0 %v15060_v3  ;;  %11452 = vmatprep.subr.bf16.mxu1 %v15063_v4  ;;  %v15151_v3 = vld [vmem:[%s17388_s15 + $0xe00] ss:$16 sps:$4 sm:$0xff]   ;;  %v15154_v4 = vld [vmem:[%s17388_s15 + $0xe08] ss:$16 sps:$4 sm:$0xff]  }
 0x225   : > { %10407 = vmatprep.mubr.bf16.mxu0 %v15150_v5  ;;  %11482 = vmatprep.mubr.bf16.mxu1 %v15150_v5  ;;  %v15159_v5 = vld [vmem:[%s17388_s15 + $0xe24] ss:$16 sps:$4 sm:$0xff]  }
 0x227   : > { %10378 = vmatpush1.bf16.msra.mxu0 %v15058_v6  ;;  %11453 = vmatpush1.bf16.msra.mxu1 %v15061_v7  ;;  %v15162_v6 = vld [vmem:[%s17388_s15 + $0xe2c] ss:$16 sps:$4 sm:$0xff]  }
 0x228   : > { %10379 = vmatprep.subr.bf16.mxu0 %v15066_v8  ;;  %11454 = vmatprep.subr.bf16.mxu1 %v15069_v9  ;;  %v15249_v7 = vld [vmem:[%s17386_s12 + $0x3c] ss:$196 sps:$4 sm:$0xff]  }
 0x229   : > { %v15157_v8 = vld [vmem:[%s17388_s15 + $0xe20] ss:$16 sps:$4 sm:$0xff]   ;;  %v15160_v9 = vld [vmem:[%s17388_s15 + $0xe28] ss:$16 sps:$4 sm:$0xff]  }
 0x22b   : > { %10380 = vmatpush1.bf16.msra.mxu0 %v15064_v10  ;;  %11455 = vmatpush1.bf16.msra.mxu1 %v15067_v11  ;;  %v15165_v10 = vld [vmem:[%s17388_s15 + $0xe44] ss:$16 sps:$4 sm:$0xff]   ;;  %v15168_v11 = vld [vmem:[%s17388_s15 + $0xe4c] ss:$16 sps:$4 sm:$0xff]  }
 0x22c   : > { %10381 = vmatprep.subr.bf16.mxu0 %v15072_v12  ;;  %11456 = vmatprep.subr.bf16.mxu1 %v15075_v13  ;;  %v15163_v12 = vld [vmem:[%s17388_s15 + $0xe40] ss:$16 sps:$4 sm:$0xff]   ;;  %v15166_v13 = vld [vmem:[%s17388_s15 + $0xe48] ss:$16 sps:$4 sm:$0xff]  }
 0x22f   : > { %10382 = vmatpush1.bf16.msra.mxu0 %v15070_v14  ;;  %11457 = vmatpush1.bf16.msra.mxu1 %v15073_v15  ;;  %v15171_v14 = vld [vmem:[%s17388_s15 + $0xe64] ss:$16 sps:$4 sm:$0xff]   ;;  %v15174_v15 = vld [vmem:[%s17388_s15 + $0xe6c] ss:$16 sps:$4 sm:$0xff]  }
 0x230   : > { %10383 = vmatprep.subr.bf16.mxu0 %v15078_v16  ;;  %11458 = vmatprep.subr.bf16.mxu1 %v15081_v17  ;;  %v15169_v16 = vld [vmem:[%s17388_s15 + $0xe60] ss:$16 sps:$4 sm:$0xff]   ;;  %v15172_v17 = vld [vmem:[%s17388_s15 + $0xe68] ss:$16 sps:$4 sm:$0xff]  }
 0x233   : > { %10384 = vmatpush1.bf16.msra.mxu0 %v15076_v18  ;;  %11459 = vmatpush1.bf16.msra.mxu1 %v15079_v19  ;;  %v15177_v18 = vld [vmem:[%s17388_s15 + $0xe84] ss:$16 sps:$4 sm:$0xff]   ;;  %v15180_v19 = vld [vmem:[%s17388_s15 + $0xe8c] ss:$16 sps:$4 sm:$0xff]  }
 0x234   : > { %10385 = vmatprep.subr.bf16.mxu0 %v15084_v20  ;;  %11460 = vmatprep.subr.bf16.mxu1 %v15087_v21  ;;  %v15175_v20 = vld [vmem:[%s17388_s15 + $0xe80] ss:$16 sps:$4 sm:$0xff]   ;;  %v15178_v21 = vld [vmem:[%s17388_s15 + $0xe88] ss:$16 sps:$4 sm:$0xff]  }
 0x237   : > { %10386 = vmatpush1.bf16.msra.mxu0 %v15082_v22  ;;  %11461 = vmatpush1.bf16.msra.mxu1 %v15085_v23  ;;  %v15183_v22 = vld [vmem:[%s17388_s15 + $0xea4] ss:$16 sps:$4 sm:$0xff]   ;;  %v15186_v23 = vld [vmem:[%s17388_s15 + $0xeac] ss:$16 sps:$4 sm:$0xff]  }
 0x238   : > { %10387 = vmatprep.subr.bf16.mxu0 %v15090_v24  ;;  %11462 = vmatprep.subr.bf16.mxu1 %v15093_v25  ;;  %v15181_v24 = vld [vmem:[%s17388_s15 + $0xea0] ss:$16 sps:$4 sm:$0xff]   ;;  %v15184_v25 = vld [vmem:[%s17388_s15 + $0xea8] ss:$16 sps:$4 sm:$0xff]  }
 0x23b   : > { %10388 = vmatpush1.bf16.msra.mxu0 %v15088_v26  ;;  %11463 = vmatpush1.bf16.msra.mxu1 %v15091_v27  ;;  %v15189_v26 = vld [vmem:[%s17388_s15 + $0xec4] ss:$16 sps:$4 sm:$0xff]   ;;  %v15192_v27 = vld [vmem:[%s17388_s15 + $0xecc] ss:$16 sps:$4 sm:$0xff]  }
 0x23c   : > { %10389 = vmatprep.subr.bf16.mxu0 %v15096_v28  ;;  %11464 = vmatprep.subr.bf16.mxu1 %v15099_v29  ;;  %v15187_v28 = vld [vmem:[%s17388_s15 + $0xec0] ss:$16 sps:$4 sm:$0xff]   ;;  %v15190_v29 = vld [vmem:[%s17388_s15 + $0xec8] ss:$16 sps:$4 sm:$0xff]  }
 0x23f   : > { %10390 = vmatpush1.bf16.msra.mxu0 %v15094_v30  ;;  %11465 = vmatpush1.bf16.msra.mxu1 %v15097_v31  ;;  %v15195_v30 = vld [vmem:[%s17388_s15 + $0xee4] ss:$16 sps:$4 sm:$0xff]   ;;  %v15198_v31 = vld [vmem:[%s17388_s15 + $0xeec] ss:$16 sps:$4 sm:$0xff]  }
 0x240   : > { %10391 = vmatprep.subr.bf16.mxu0 %v15102_v32  ;;  %11466 = vmatprep.subr.bf16.mxu1 %v15105_v33  ;;  %v15193_v32 = vld [vmem:[%s17388_s15 + $0xee0] ss:$16 sps:$4 sm:$0xff]   ;;  %v15196_v33 = vld [vmem:[%s17388_s15 + $0xee8] ss:$16 sps:$4 sm:$0xff]  }
 0x243   : > { %10392 = vmatpush1.bf16.msra.mxu0 %v15100_v34  ;;  %11467 = vmatpush1.bf16.msra.mxu1 %v15103_v35  ;;  %v15201_v34 = vld [vmem:[%s17388_s15 + $0xf04] ss:$16 sps:$4 sm:$0xff]   ;;  %v15204_v35 = vld [vmem:[%s17388_s15 + $0xf0c] ss:$16 sps:$4 sm:$0xff]  }
 0x244   : > { %10393 = vmatprep.subr.bf16.mxu0 %v15108_v36  ;;  %11468 = vmatprep.subr.bf16.mxu1 %v15111_v37  ;;  %v15199_v36 = vld [vmem:[%s17388_s15 + $0xf00] ss:$16 sps:$4 sm:$0xff]   ;;  %v15202_v37 = vld [vmem:[%s17388_s15 + $0xf08] ss:$16 sps:$4 sm:$0xff]  }
 0x247   : > { %10394 = vmatpush1.bf16.msra.mxu0 %v15106_v38  ;;  %11469 = vmatpush1.bf16.msra.mxu1 %v15109_v39  ;;  %v15207_v38 = vld [vmem:[%s17388_s15 + $0xf24] ss:$16 sps:$4 sm:$0xff]   ;;  %v15210_v39 = vld [vmem:[%s17388_s15 + $0xf2c] ss:$16 sps:$4 sm:$0xff]  }
 0x248   : > { %10395 = vmatprep.subr.bf16.mxu0 %v15114_v40  ;;  %11470 = vmatprep.subr.bf16.mxu1 %v15117_v41  ;;  %v15205_v40 = vld [vmem:[%s17388_s15 + $0xf20] ss:$16 sps:$4 sm:$0xff]   ;;  %v15208_v41 = vld [vmem:[%s17388_s15 + $0xf28] ss:$16 sps:$4 sm:$0xff]  }
 0x24b   : > { %10396 = vmatpush1.bf16.msra.mxu0 %v15112_v42  ;;  %11471 = vmatpush1.bf16.msra.mxu1 %v15115_v43  ;;  %v15213_v42 = vld [vmem:[%s17388_s15 + $0xf44] ss:$16 sps:$4 sm:$0xff]   ;;  %v15216_v43 = vld [vmem:[%s17388_s15 + $0xf4c] ss:$16 sps:$4 sm:$0xff]  }
 0x24c   : > { %10397 = vmatprep.subr.bf16.mxu0 %v15120_v44  ;;  %11472 = vmatprep.subr.bf16.mxu1 %v15123_v45  ;;  %v15211_v44 = vld [vmem:[%s17388_s15 + $0xf40] ss:$16 sps:$4 sm:$0xff]   ;;  %v15214_v45 = vld [vmem:[%s17388_s15 + $0xf48] ss:$16 sps:$4 sm:$0xff]  }
 0x24f   : > { %10398 = vmatpush1.bf16.msra.mxu0 %v15118_v46  ;;  %11473 = vmatpush1.bf16.msra.mxu1 %v15121_v47  ;;  %v15219_v46 = vld [vmem:[%s17388_s15 + $0xf64] ss:$16 sps:$4 sm:$0xff]   ;;  %v15222_v47 = vld [vmem:[%s17388_s15 + $0xf6c] ss:$16 sps:$4 sm:$0xff]  }
 0x250   : > { %10399 = vmatprep.subr.bf16.mxu0 %v15126_v48  ;;  %11474 = vmatprep.subr.bf16.mxu1 %v15129_v49  ;;  %v15217_v48 = vld [vmem:[%s17388_s15 + $0xf60] ss:$16 sps:$4 sm:$0xff]   ;;  %v15220_v49 = vld [vmem:[%s17388_s15 + $0xf68] ss:$16 sps:$4 sm:$0xff]  }
 0x253   : > { %10400 = vmatpush1.bf16.msra.mxu0 %v15124_v50  ;;  %11475 = vmatpush1.bf16.msra.mxu1 %v15127_v51  ;;  %v15225_v50 = vld [vmem:[%s17388_s15 + $0xf84] ss:$16 sps:$4 sm:$0xff]   ;;  %v15228_v51 = vld [vmem:[%s17388_s15 + $0xf8c] ss:$16 sps:$4 sm:$0xff]  }
 0x254   : > { %10401 = vmatprep.subr.bf16.mxu0 %v15132_v52  ;;  %11476 = vmatprep.subr.bf16.mxu1 %v15135_v53  ;;  %v15223_v52 = vld [vmem:[%s17388_s15 + $0xf80] ss:$16 sps:$4 sm:$0xff]   ;;  %v15226_v53 = vld [vmem:[%s17388_s15 + $0xf88] ss:$16 sps:$4 sm:$0xff]  }
 0x257   : > { %10402 = vmatpush1.bf16.msra.mxu0 %v15130_v54  ;;  %11477 = vmatpush1.bf16.msra.mxu1 %v15133_v55  ;;  %v15231_v54 = vld [vmem:[%s17388_s15 + $0xfa4] ss:$16 sps:$4 sm:$0xff]   ;;  %v15234_v55 = vld [vmem:[%s17388_s15 + $0xfac] ss:$16 sps:$4 sm:$0xff]  }
 0x258   : > { %10403 = vmatprep.subr.bf16.mxu0 %v15138_v56  ;;  %11478 = vmatprep.subr.bf16.mxu1 %v15141_v57  ;;  %v15229_v56 = vld [vmem:[%s17388_s15 + $0xfa0] ss:$16 sps:$4 sm:$0xff]   ;;  %v15232_v57 = vld [vmem:[%s17388_s15 + $0xfa8] ss:$16 sps:$4 sm:$0xff]  }
 0x25b   : > { %10404 = vmatpush1.bf16.msra.mxu0 %v15136_v58  ;;  %11479 = vmatpush1.bf16.msra.mxu1 %v15139_v59  ;;  %v15237_v58 = vld [vmem:[%s17388_s15 + $0xfc4] ss:$16 sps:$4 sm:$0xff]   ;;  %v15240_v59 = vld [vmem:[%s17388_s15 + $0xfcc] ss:$16 sps:$4 sm:$0xff]  }
 0x25c   : > { %10405 = vmatprep.subr.bf16.mxu0 %v15144_v60  ;;  %11480 = vmatprep.subr.bf16.mxu1 %v15147_v61  ;;  %v15235_v60 = vld [vmem:[%s17388_s15 + $0xfc0] ss:$16 sps:$4 sm:$0xff]   ;;  %v15238_v61 = vld [vmem:[%s17388_s15 + $0xfc8] ss:$16 sps:$4 sm:$0xff]  }
 0x25f   : > { %10406 = vmatpush1.bf16.msra.mxu0 %v15142_v62  ;;  %11481 = vmatpush1.bf16.msra.mxu1 %v15145_v63  ;;  %v15243_v62 = vld [vmem:[%s17388_s15 + $0xfe4] ss:$16 sps:$4 sm:$0xff]   ;;  %v15246_v63 = vld [vmem:[%s17388_s15 + $0xfec] ss:$16 sps:$4 sm:$0xff]  }
 0x260   : > { %10418 = vmatprep.subr.bf16.mxu0 %v15153_v1  ;;  %11493 = vmatprep.subr.bf16.mxu1 %v15156_v2  ;;  %v15244_v1 = vld [vmem:[%s17388_s15 + $0xfe8] ss:$16 sps:$4 sm:$0xff]  }
 0x261   : > { %v15247_v2 = vld [vmem:[%s17386_s12 + $0x38] ss:$196 sps:$4 sm:$0xff]  }
 0x262   : > { %10408 = vmatmul.mubr.bf16.vlgmr.msra.gmra.mrb[0].mxu0 %v15148_v0  ;;  %11483 = vmatmul.mubr.bf16.vlgmr.msra.gmra.mrb[0].mxu1 %v15148_v0  ;;  %v15241_v0 = vld [vmem:[%s17388_s15 + $0xfe0] ss:$16 sps:$4 sm:$0xff]  }
 0x263   : > { %10419 = vmatpush1.bf16.msra.mxu0 %v15151_v3  ;;  %11494 = vmatpush1.bf16.msra.mxu1 %v15154_v4  ;;  %v15252_v3 = vld [vmem:[%s17388_s15 + $0x1004] ss:$16 sps:$4 sm:$0xff]   ;;  %v15255_v4 = vld [vmem:[%s17388_s15 + $0x100c] ss:$16 sps:$4 sm:$0xff]  }
 0x264   : > { %10420 = vmatprep.subr.bf16.mxu0 %v15159_v5  ;;  %11495 = vmatprep.subr.bf16.mxu1 %v15162_v6  ;;  %v15250_v5 = vld [vmem:[%s17388_s15 + $0x1000] ss:$16 sps:$4 sm:$0xff]   ;;  %v15253_v6 = vld [vmem:[%s17388_s15 + $0x1008] ss:$16 sps:$4 sm:$0xff]  }
 0x265   : > { %10450 = vmatprep.mubr.bf16.mxu0 %v15249_v7  ;;  %11525 = vmatprep.mubr.bf16.mxu1 %v15249_v7  ;;  %v15258_v7 = vld [vmem:[%s17388_s15 + $0x1024] ss:$16 sps:$4 sm:$0xff]  }
 0x267   : > { %10421 = vmatpush1.bf16.msra.mxu0 %v15157_v8  ;;  %11496 = vmatpush1.bf16.msra.mxu1 %v15160_v9  ;;  %v15261_v8 = vld [vmem:[%s17388_s15 + $0x102c] ss:$16 sps:$4 sm:$0xff]  }
 0x268   : > { %10422 = vmatprep.subr.bf16.mxu0 %v15165_v10  ;;  %11497 = vmatprep.subr.bf16.mxu1 %v15168_v11  ;;  %v15348_v9 = vld [vmem:[%s17386_s12 + $0x44] ss:$196 sps:$4 sm:$0xff]  }
 0x269   : > { %v15256_v10 = vld [vmem:[%s17388_s15 + $0x1020] ss:$16 sps:$4 sm:$0xff]   ;;  %v15259_v11 = vld [vmem:[%s17388_s15 + $0x1028] ss:$16 sps:$4 sm:$0xff]  }
 0x26b   : > { %10423 = vmatpush1.bf16.msra.mxu0 %v15163_v12  ;;  %11498 = vmatpush1.bf16.msra.mxu1 %v15166_v13  ;;  %v15264_v12 = vld [vmem:[%s17388_s15 + $0x1044] ss:$16 sps:$4 sm:$0xff]   ;;  %v15267_v13 = vld [vmem:[%s17388_s15 + $0x104c] ss:$16 sps:$4 sm:$0xff]  }
 0x26c   : > { %10424 = vmatprep.subr.bf16.mxu0 %v15171_v14  ;;  %11499 = vmatprep.subr.bf16.mxu1 %v15174_v15  ;;  %v15262_v14 = vld [vmem:[%s17388_s15 + $0x1040] ss:$16 sps:$4 sm:$0xff]   ;;  %v15265_v15 = vld [vmem:[%s17388_s15 + $0x1048] ss:$16 sps:$4 sm:$0xff]  }
 0x26f   : > { %10425 = vmatpush1.bf16.msra.mxu0 %v15169_v16  ;;  %11500 = vmatpush1.bf16.msra.mxu1 %v15172_v17  ;;  %v15270_v16 = vld [vmem:[%s17388_s15 + $0x1064] ss:$16 sps:$4 sm:$0xff]   ;;  %v15273_v17 = vld [vmem:[%s17388_s15 + $0x106c] ss:$16 sps:$4 sm:$0xff]  }
 0x270   : > { %10426 = vmatprep.subr.bf16.mxu0 %v15177_v18  ;;  %11501 = vmatprep.subr.bf16.mxu1 %v15180_v19  ;;  %v15268_v18 = vld [vmem:[%s17388_s15 + $0x1060] ss:$16 sps:$4 sm:$0xff]   ;;  %v15271_v19 = vld [vmem:[%s17388_s15 + $0x1068] ss:$16 sps:$4 sm:$0xff]  }
 0x273   : > { %10427 = vmatpush1.bf16.msra.mxu0 %v15175_v20  ;;  %11502 = vmatpush1.bf16.msra.mxu1 %v15178_v21  ;;  %v15276_v20 = vld [vmem:[%s17388_s15 + $0x1084] ss:$16 sps:$4 sm:$0xff]   ;;  %v15279_v21 = vld [vmem:[%s17388_s15 + $0x108c] ss:$16 sps:$4 sm:$0xff]  }
 0x274   : > { %10428 = vmatprep.subr.bf16.mxu0 %v15183_v22  ;;  %11503 = vmatprep.subr.bf16.mxu1 %v15186_v23  ;;  %v15274_v22 = vld [vmem:[%s17388_s15 + $0x1080] ss:$16 sps:$4 sm:$0xff]   ;;  %v15277_v23 = vld [vmem:[%s17388_s15 + $0x1088] ss:$16 sps:$4 sm:$0xff]  }
 0x277   : > { %10429 = vmatpush1.bf16.msra.mxu0 %v15181_v24  ;;  %11504 = vmatpush1.bf16.msra.mxu1 %v15184_v25  ;;  %v15282_v24 = vld [vmem:[%s17388_s15 + $0x10a4] ss:$16 sps:$4 sm:$0xff]   ;;  %v15285_v25 = vld [vmem:[%s17388_s15 + $0x10ac] ss:$16 sps:$4 sm:$0xff]  }
 0x278   : > { %10430 = vmatprep.subr.bf16.mxu0 %v15189_v26  ;;  %11505 = vmatprep.subr.bf16.mxu1 %v15192_v27  ;;  %v15280_v26 = vld [vmem:[%s17388_s15 + $0x10a0] ss:$16 sps:$4 sm:$0xff]   ;;  %v15283_v27 = vld [vmem:[%s17388_s15 + $0x10a8] ss:$16 sps:$4 sm:$0xff]  }
 0x27b   : > { %10431 = vmatpush1.bf16.msra.mxu0 %v15187_v28  ;;  %11506 = vmatpush1.bf16.msra.mxu1 %v15190_v29  ;;  %v15288_v28 = vld [vmem:[%s17388_s15 + $0x10c4] ss:$16 sps:$4 sm:$0xff]   ;;  %v15291_v29 = vld [vmem:[%s17388_s15 + $0x10cc] ss:$16 sps:$4 sm:$0xff]  }
 0x27c   : > { %10432 = vmatprep.subr.bf16.mxu0 %v15195_v30  ;;  %11507 = vmatprep.subr.bf16.mxu1 %v15198_v31  ;;  %v15286_v30 = vld [vmem:[%s17388_s15 + $0x10c0] ss:$16 sps:$4 sm:$0xff]   ;;  %v15289_v31 = vld [vmem:[%s17388_s15 + $0x10c8] ss:$16 sps:$4 sm:$0xff]  }
 0x27f   : > { %10433 = vmatpush1.bf16.msra.mxu0 %v15193_v32  ;;  %11508 = vmatpush1.bf16.msra.mxu1 %v15196_v33  ;;  %v15294_v32 = vld [vmem:[%s17388_s15 + $0x10e4] ss:$16 sps:$4 sm:$0xff]   ;;  %v15297_v33 = vld [vmem:[%s17388_s15 + $0x10ec] ss:$16 sps:$4 sm:$0xff]  }
 0x280   : > { %10434 = vmatprep.subr.bf16.mxu0 %v15201_v34  ;;  %11509 = vmatprep.subr.bf16.mxu1 %v15204_v35  ;;  %v15292_v34 = vld [vmem:[%s17388_s15 + $0x10e0] ss:$16 sps:$4 sm:$0xff]   ;;  %v15295_v35 = vld [vmem:[%s17388_s15 + $0x10e8] ss:$16 sps:$4 sm:$0xff]  }
 0x283   : > { %10435 = vmatpush1.bf16.msra.mxu0 %v15199_v36  ;;  %11510 = vmatpush1.bf16.msra.mxu1 %v15202_v37  ;;  %v15300_v36 = vld [vmem:[%s17388_s15 + $0x1104] ss:$16 sps:$4 sm:$0xff]   ;;  %v15303_v37 = vld [vmem:[%s17388_s15 + $0x110c] ss:$16 sps:$4 sm:$0xff]  }
 0x284   : > { %10436 = vmatprep.subr.bf16.mxu0 %v15207_v38  ;;  %11511 = vmatprep.subr.bf16.mxu1 %v15210_v39  ;;  %v15298_v38 = vld [vmem:[%s17388_s15 + $0x1100] ss:$16 sps:$4 sm:$0xff]   ;;  %v15301_v39 = vld [vmem:[%s17388_s15 + $0x1108] ss:$16 sps:$4 sm:$0xff]  }
 0x287   : > { %10437 = vmatpush1.bf16.msra.mxu0 %v15205_v40  ;;  %11512 = vmatpush1.bf16.msra.mxu1 %v15208_v41  ;;  %v15306_v40 = vld [vmem:[%s17388_s15 + $0x1124] ss:$16 sps:$4 sm:$0xff]   ;;  %v15309_v41 = vld [vmem:[%s17388_s15 + $0x112c] ss:$16 sps:$4 sm:$0xff]  }
 0x288   : > { %10438 = vmatprep.subr.bf16.mxu0 %v15213_v42  ;;  %11513 = vmatprep.subr.bf16.mxu1 %v15216_v43  ;;  %v15304_v42 = vld [vmem:[%s17388_s15 + $0x1120] ss:$16 sps:$4 sm:$0xff]   ;;  %v15307_v43 = vld [vmem:[%s17388_s15 + $0x1128] ss:$16 sps:$4 sm:$0xff]  }
 0x28b   : > { %10439 = vmatpush1.bf16.msra.mxu0 %v15211_v44  ;;  %11514 = vmatpush1.bf16.msra.mxu1 %v15214_v45  ;;  %v15312_v44 = vld [vmem:[%s17388_s15 + $0x1144] ss:$16 sps:$4 sm:$0xff]   ;;  %v15315_v45 = vld [vmem:[%s17388_s15 + $0x114c] ss:$16 sps:$4 sm:$0xff]  }
 0x28c   : > { %10440 = vmatprep.subr.bf16.mxu0 %v15219_v46  ;;  %11515 = vmatprep.subr.bf16.mxu1 %v15222_v47  ;;  %v15310_v46 = vld [vmem:[%s17388_s15 + $0x1140] ss:$16 sps:$4 sm:$0xff]   ;;  %v15313_v47 = vld [vmem:[%s17388_s15 + $0x1148] ss:$16 sps:$4 sm:$0xff]  }
 0x28f   : > { %10441 = vmatpush1.bf16.msra.mxu0 %v15217_v48  ;;  %11516 = vmatpush1.bf16.msra.mxu1 %v15220_v49  ;;  %v15318_v48 = vld [vmem:[%s17388_s15 + $0x1164] ss:$16 sps:$4 sm:$0xff]   ;;  %v15321_v49 = vld [vmem:[%s17388_s15 + $0x116c] ss:$16 sps:$4 sm:$0xff]  }
 0x290   : > { %10442 = vmatprep.subr.bf16.mxu0 %v15225_v50  ;;  %11517 = vmatprep.subr.bf16.mxu1 %v15228_v51  ;;  %v15316_v50 = vld [vmem:[%s17388_s15 + $0x1160] ss:$16 sps:$4 sm:$0xff]   ;;  %v15319_v51 = vld [vmem:[%s17388_s15 + $0x1168] ss:$16 sps:$4 sm:$0xff]  }
 0x293   : > { %10443 = vmatpush1.bf16.msra.mxu0 %v15223_v52  ;;  %11518 = vmatpush1.bf16.msra.mxu1 %v15226_v53  ;;  %v15324_v52 = vld [vmem:[%s17388_s15 + $0x1184] ss:$16 sps:$4 sm:$0xff]   ;;  %v15327_v53 = vld [vmem:[%s17388_s15 + $0x118c] ss:$16 sps:$4 sm:$0xff]  }
 0x294   : > { %10444 = vmatprep.subr.bf16.mxu0 %v15231_v54  ;;  %11519 = vmatprep.subr.bf16.mxu1 %v15234_v55  ;;  %v15322_v54 = vld [vmem:[%s17388_s15 + $0x1180] ss:$16 sps:$4 sm:$0xff]   ;;  %v15325_v55 = vld [vmem:[%s17388_s15 + $0x1188] ss:$16 sps:$4 sm:$0xff]  }
 0x297   : > { %10445 = vmatpush1.bf16.msra.mxu0 %v15229_v56  ;;  %11520 = vmatpush1.bf16.msra.mxu1 %v15232_v57  ;;  %v15330_v56 = vld [vmem:[%s17388_s15 + $0x11a4] ss:$16 sps:$4 sm:$0xff]   ;;  %v15333_v57 = vld [vmem:[%s17388_s15 + $0x11ac] ss:$16 sps:$4 sm:$0xff]  }
 0x298   : > { %10446 = vmatprep.subr.bf16.mxu0 %v15237_v58  ;;  %11521 = vmatprep.subr.bf16.mxu1 %v15240_v59  ;;  %v15328_v58 = vld [vmem:[%s17388_s15 + $0x11a0] ss:$16 sps:$4 sm:$0xff]   ;;  %v15331_v59 = vld [vmem:[%s17388_s15 + $0x11a8] ss:$16 sps:$4 sm:$0xff]  }
 0x29b   : > { %10447 = vmatpush1.bf16.msra.mxu0 %v15235_v60  ;;  %11522 = vmatpush1.bf16.msra.mxu1 %v15238_v61  ;;  %v15336_v60 = vld [vmem:[%s17388_s15 + $0x11c4] ss:$16 sps:$4 sm:$0xff]   ;;  %v15339_v61 = vld [vmem:[%s17388_s15 + $0x11cc] ss:$16 sps:$4 sm:$0xff]  }
 0x29c   : > { %10448 = vmatprep.subr.bf16.mxu0 %v15243_v62  ;;  %11523 = vmatprep.subr.bf16.mxu1 %v15246_v63  ;;  %v15334_v62 = vld [vmem:[%s17388_s15 + $0x11c0] ss:$16 sps:$4 sm:$0xff]   ;;  %v15337_v63 = vld [vmem:[%s17388_s15 + $0x11c8] ss:$16 sps:$4 sm:$0xff]  }
 0x29f   : > { %10449 = vmatpush1.bf16.msra.mxu0 %v15241_v0  ;;  %11524 = vmatpush1.bf16.msra.mxu1 %v15244_v1  ;;  %v15342_v0 = vld [vmem:[%s17388_s15 + $0x11e4] ss:$16 sps:$4 sm:$0xff]   ;;  %v15345_v1 = vld [vmem:[%s17388_s15 + $0x11ec] ss:$16 sps:$4 sm:$0xff]  }
 0x2a0   : > { %10461 = vmatprep.subr.bf16.mxu0 %v15252_v3  ;;  %11536 = vmatprep.subr.bf16.mxu1 %v15255_v4  ;;  %v15343_v3 = vld [vmem:[%s17388_s15 + $0x11e8] ss:$16 sps:$4 sm:$0xff]  }
 0x2a1   : > { %v15346_v4 = vld [vmem:[%s17386_s12 + $0x40] ss:$196 sps:$4 sm:$0xff]  }
 0x2a2   : > { %10451 = vmatmul.mubr.bf16.vlgmr.msra.gmra.mrb[0].mxu0 %v15247_v2  ;;  %11526 = vmatmul.mubr.bf16.vlgmr.msra.gmra.mrb[0].mxu1 %v15247_v2  ;;  %v15340_v2 = vld [vmem:[%s17388_s15 + $0x11e0] ss:$16 sps:$4 sm:$0xff]  }
 0x2a3   : > { %10462 = vmatpush1.bf16.msra.mxu0 %v15250_v5  ;;  %11537 = vmatpush1.bf16.msra.mxu1 %v15253_v6  ;;  %v15351_v5 = vld [vmem:[%s17388_s15 + $0x1204] ss:$16 sps:$4 sm:$0xff]   ;;  %v15354_v6 = vld [vmem:[%s17388_s15 + $0x120c] ss:$16 sps:$4 sm:$0xff]  }
 0x2a4   : > { %10463 = vmatprep.subr.bf16.mxu0 %v15258_v7  ;;  %11538 = vmatprep.subr.bf16.mxu1 %v15261_v8  ;;  %v15349_v7 = vld [vmem:[%s17388_s15 + $0x1200] ss:$16 sps:$4 sm:$0xff]   ;;  %v15352_v8 = vld [vmem:[%s17388_s15 + $0x1208] ss:$16 sps:$4 sm:$0xff]  }
 0x2a5   : > { %10493 = vmatprep.mubr.bf16.mxu0 %v15348_v9  ;;  %11568 = vmatprep.mubr.bf16.mxu1 %v15348_v9  ;;  %v15357_v9 = vld [vmem:[%s17388_s15 + $0x1224] ss:$16 sps:$4 sm:$0xff]  }
 0x2a7   : > { %10464 = vmatpush1.bf16.msra.mxu0 %v15256_v10  ;;  %11539 = vmatpush1.bf16.msra.mxu1 %v15259_v11  ;;  %v15360_v10 = vld [vmem:[%s17388_s15 + $0x122c] ss:$16 sps:$4 sm:$0xff]  }
 0x2a8   : > { %10465 = vmatprep.subr.bf16.mxu0 %v15264_v12  ;;  %11540 = vmatprep.subr.bf16.mxu1 %v15267_v13  ;;  %v15447_v11 = vld [vmem:[%s17386_s12 + $0x4c] ss:$196 sps:$4 sm:$0xff]  }
 0x2a9   : > { %v15355_v12 = vld [vmem:[%s17388_s15 + $0x1220] ss:$16 sps:$4 sm:$0xff]   ;;  %v15358_v13 = vld [vmem:[%s17388_s15 + $0x1228] ss:$16 sps:$4 sm:$0xff]  }
 0x2ab   : > { %10466 = vmatpush1.bf16.msra.mxu0 %v15262_v14  ;;  %11541 = vmatpush1.bf16.msra.mxu1 %v15265_v15  ;;  %v15363_v14 = vld [vmem:[%s17388_s15 + $0x1244] ss:$16 sps:$4 sm:$0xff]   ;;  %v15366_v15 = vld [vmem:[%s17388_s15 + $0x124c] ss:$16 sps:$4 sm:$0xff]  }
 0x2ac   : > { %10467 = vmatprep.subr.bf16.mxu0 %v15270_v16  ;;  %11542 = vmatprep.subr.bf16.mxu1 %v15273_v17  ;;  %v15361_v16 = vld [vmem:[%s17388_s15 + $0x1240] ss:$16 sps:$4 sm:$0xff]   ;;  %v15364_v17 = vld [vmem:[%s17388_s15 + $0x1248] ss:$16 sps:$4 sm:$0xff]  }
 0x2af   : > { %10468 = vmatpush1.bf16.msra.mxu0 %v15268_v18  ;;  %11543 = vmatpush1.bf16.msra.mxu1 %v15271_v19  ;;  %v15369_v18 = vld [vmem:[%s17388_s15 + $0x1264] ss:$16 sps:$4 sm:$0xff]   ;;  %v15372_v19 = vld [vmem:[%s17388_s15 + $0x126c] ss:$16 sps:$4 sm:$0xff]  }
 0x2b0   : > { %10469 = vmatprep.subr.bf16.mxu0 %v15276_v20  ;;  %11544 = vmatprep.subr.bf16.mxu1 %v15279_v21  ;;  %v15367_v20 = vld [vmem:[%s17388_s15 + $0x1260] ss:$16 sps:$4 sm:$0xff]   ;;  %v15370_v21 = vld [vmem:[%s17388_s15 + $0x1268] ss:$16 sps:$4 sm:$0xff]  }
 0x2b3   : > { %10470 = vmatpush1.bf16.msra.mxu0 %v15274_v22  ;;  %11545 = vmatpush1.bf16.msra.mxu1 %v15277_v23  ;;  %v15375_v22 = vld [vmem:[%s17388_s15 + $0x1284] ss:$16 sps:$4 sm:$0xff]   ;;  %v15378_v23 = vld [vmem:[%s17388_s15 + $0x128c] ss:$16 sps:$4 sm:$0xff]  }
 0x2b4   : > { %10471 = vmatprep.subr.bf16.mxu0 %v15282_v24  ;;  %11546 = vmatprep.subr.bf16.mxu1 %v15285_v25  ;;  %v15373_v24 = vld [vmem:[%s17388_s15 + $0x1280] ss:$16 sps:$4 sm:$0xff]   ;;  %v15376_v25 = vld [vmem:[%s17388_s15 + $0x1288] ss:$16 sps:$4 sm:$0xff]  }
 0x2b7   : > { %10472 = vmatpush1.bf16.msra.mxu0 %v15280_v26  ;;  %11547 = vmatpush1.bf16.msra.mxu1 %v15283_v27  ;;  %v15381_v26 = vld [vmem:[%s17388_s15 + $0x12a4] ss:$16 sps:$4 sm:$0xff]   ;;  %v15384_v27 = vld [vmem:[%s17388_s15 + $0x12ac] ss:$16 sps:$4 sm:$0xff]  }
 0x2b8   : > { %10473 = vmatprep.subr.bf16.mxu0 %v15288_v28  ;;  %11548 = vmatprep.subr.bf16.mxu1 %v15291_v29  ;;  %v15379_v28 = vld [vmem:[%s17388_s15 + $0x12a0] ss:$16 sps:$4 sm:$0xff]   ;;  %v15382_v29 = vld [vmem:[%s17388_s15 + $0x12a8] ss:$16 sps:$4 sm:$0xff]  }
 0x2bb   : > { %10474 = vmatpush1.bf16.msra.mxu0 %v15286_v30  ;;  %11549 = vmatpush1.bf16.msra.mxu1 %v15289_v31  ;;  %v15387_v30 = vld [vmem:[%s17388_s15 + $0x12c4] ss:$16 sps:$4 sm:$0xff]   ;;  %v15390_v31 = vld [vmem:[%s17388_s15 + $0x12cc] ss:$16 sps:$4 sm:$0xff]  }
 0x2bc   : > { %10475 = vmatprep.subr.bf16.mxu0 %v15294_v32  ;;  %11550 = vmatprep.subr.bf16.mxu1 %v15297_v33  ;;  %v15385_v32 = vld [vmem:[%s17388_s15 + $0x12c0] ss:$16 sps:$4 sm:$0xff]   ;;  %v15388_v33 = vld [vmem:[%s17388_s15 + $0x12c8] ss:$16 sps:$4 sm:$0xff]  }
 0x2bf   : > { %10476 = vmatpush1.bf16.msra.mxu0 %v15292_v34  ;;  %11551 = vmatpush1.bf16.msra.mxu1 %v15295_v35  ;;  %v15393_v34 = vld [vmem:[%s17388_s15 + $0x12e4] ss:$16 sps:$4 sm:$0xff]   ;;  %v15396_v35 = vld [vmem:[%s17388_s15 + $0x12ec] ss:$16 sps:$4 sm:$0xff]  }
 0x2c0   : > { %10477 = vmatprep.subr.bf16.mxu0 %v15300_v36  ;;  %11552 = vmatprep.subr.bf16.mxu1 %v15303_v37  ;;  %v15391_v36 = vld [vmem:[%s17388_s15 + $0x12e0] ss:$16 sps:$4 sm:$0xff]   ;;  %v15394_v37 = vld [vmem:[%s17388_s15 + $0x12e8] ss:$16 sps:$4 sm:$0xff]  }
 0x2c3   : > { %10478 = vmatpush1.bf16.msra.mxu0 %v15298_v38  ;;  %11553 = vmatpush1.bf16.msra.mxu1 %v15301_v39  ;;  %v15399_v38 = vld [vmem:[%s17388_s15 + $0x1304] ss:$16 sps:$4 sm:$0xff]   ;;  %v15402_v39 = vld [vmem:[%s17388_s15 + $0x130c] ss:$16 sps:$4 sm:$0xff]  }
 0x2c4   : > { %10479 = vmatprep.subr.bf16.mxu0 %v15306_v40  ;;  %11554 = vmatprep.subr.bf16.mxu1 %v15309_v41  ;;  %v15397_v40 = vld [vmem:[%s17388_s15 + $0x1300] ss:$16 sps:$4 sm:$0xff]   ;;  %v15400_v41 = vld [vmem:[%s17388_s15 + $0x1308] ss:$16 sps:$4 sm:$0xff]  }
 0x2c7   : > { %10480 = vmatpush1.bf16.msra.mxu0 %v15304_v42  ;;  %11555 = vmatpush1.bf16.msra.mxu1 %v15307_v43  ;;  %v15405_v42 = vld [vmem:[%s17388_s15 + $0x1324] ss:$16 sps:$4 sm:$0xff]   ;;  %v15408_v43 = vld [vmem:[%s17388_s15 + $0x132c] ss:$16 sps:$4 sm:$0xff]  }
 0x2c8   : > { %10481 = vmatprep.subr.bf16.mxu0 %v15312_v44  ;;  %11556 = vmatprep.subr.bf16.mxu1 %v15315_v45  ;;  %v15403_v44 = vld [vmem:[%s17388_s15 + $0x1320] ss:$16 sps:$4 sm:$0xff]   ;;  %v15406_v45 = vld [vmem:[%s17388_s15 + $0x1328] ss:$16 sps:$4 sm:$0xff]  }
 0x2cb   : > { %10482 = vmatpush1.bf16.msra.mxu0 %v15310_v46  ;;  %11557 = vmatpush1.bf16.msra.mxu1 %v15313_v47  ;;  %v15411_v46 = vld [vmem:[%s17388_s15 + $0x1344] ss:$16 sps:$4 sm:$0xff]   ;;  %v15414_v47 = vld [vmem:[%s17388_s15 + $0x134c] ss:$16 sps:$4 sm:$0xff]  }
 0x2cc   : > { %10483 = vmatprep.subr.bf16.mxu0 %v15318_v48  ;;  %11558 = vmatprep.subr.bf16.mxu1 %v15321_v49  ;;  %v15409_v48 = vld [vmem:[%s17388_s15 + $0x1340] ss:$16 sps:$4 sm:$0xff]   ;;  %v15412_v49 = vld [vmem:[%s17388_s15 + $0x1348] ss:$16 sps:$4 sm:$0xff]  }
 0x2cf   : > { %10484 = vmatpush1.bf16.msra.mxu0 %v15316_v50  ;;  %11559 = vmatpush1.bf16.msra.mxu1 %v15319_v51  ;;  %v15417_v50 = vld [vmem:[%s17388_s15 + $0x1364] ss:$16 sps:$4 sm:$0xff]   ;;  %v15420_v51 = vld [vmem:[%s17388_s15 + $0x136c] ss:$16 sps:$4 sm:$0xff]  }
 0x2d0   : > { %10485 = vmatprep.subr.bf16.mxu0 %v15324_v52  ;;  %11560 = vmatprep.subr.bf16.mxu1 %v15327_v53  ;;  %v15415_v52 = vld [vmem:[%s17388_s15 + $0x1360] ss:$16 sps:$4 sm:$0xff]   ;;  %v15418_v53 = vld [vmem:[%s17388_s15 + $0x1368] ss:$16 sps:$4 sm:$0xff]  }
 0x2d3   : > { %10486 = vmatpush1.bf16.msra.mxu0 %v15322_v54  ;;  %11561 = vmatpush1.bf16.msra.mxu1 %v15325_v55  ;;  %v15423_v54 = vld [vmem:[%s17388_s15 + $0x1384] ss:$16 sps:$4 sm:$0xff]   ;;  %v15426_v55 = vld [vmem:[%s17388_s15 + $0x138c] ss:$16 sps:$4 sm:$0xff]  }
 0x2d4   : > { %10487 = vmatprep.subr.bf16.mxu0 %v15330_v56  ;;  %11562 = vmatprep.subr.bf16.mxu1 %v15333_v57  ;;  %v15421_v56 = vld [vmem:[%s17388_s15 + $0x1380] ss:$16 sps:$4 sm:$0xff]   ;;  %v15424_v57 = vld [vmem:[%s17388_s15 + $0x1388] ss:$16 sps:$4 sm:$0xff]  }
 0x2d7   : > { %10488 = vmatpush1.bf16.msra.mxu0 %v15328_v58  ;;  %11563 = vmatpush1.bf16.msra.mxu1 %v15331_v59  ;;  %v15429_v58 = vld [vmem:[%s17388_s15 + $0x13a4] ss:$16 sps:$4 sm:$0xff]   ;;  %v15432_v59 = vld [vmem:[%s17388_s15 + $0x13ac] ss:$16 sps:$4 sm:$0xff]  }
 0x2d8   : > { %10489 = vmatprep.subr.bf16.mxu0 %v15336_v60  ;;  %11564 = vmatprep.subr.bf16.mxu1 %v15339_v61  ;;  %v15427_v60 = vld [vmem:[%s17388_s15 + $0x13a0] ss:$16 sps:$4 sm:$0xff]   ;;  %v15430_v61 = vld [vmem:[%s17388_s15 + $0x13a8] ss:$16 sps:$4 sm:$0xff]  }
 0x2db   : > { %10490 = vmatpush1.bf16.msra.mxu0 %v15334_v62  ;;  %11565 = vmatpush1.bf16.msra.mxu1 %v15337_v63  ;;  %v15435_v62 = vld [vmem:[%s17388_s15 + $0x13c4] ss:$16 sps:$4 sm:$0xff]   ;;  %v15438_v63 = vld [vmem:[%s17388_s15 + $0x13cc] ss:$16 sps:$4 sm:$0xff]  }
 0x2dc   : > { %10491 = vmatprep.subr.bf16.mxu0 %v15342_v0  ;;  %11566 = vmatprep.subr.bf16.mxu1 %v15345_v1  ;;  %v15433_v0 = vld [vmem:[%s17388_s15 + $0x13c0] ss:$16 sps:$4 sm:$0xff]   ;;  %v15436_v1 = vld [vmem:[%s17388_s15 + $0x13c8] ss:$16 sps:$4 sm:$0xff]  }
 0x2df   : > { %10492 = vmatpush1.bf16.msra.mxu0 %v15340_v2  ;;  %11567 = vmatpush1.bf16.msra.mxu1 %v15343_v3  ;;  %v15441_v2 = vld [vmem:[%s17388_s15 + $0x13e4] ss:$16 sps:$4 sm:$0xff]   ;;  %v15444_v3 = vld [vmem:[%s17388_s15 + $0x13ec] ss:$16 sps:$4 sm:$0xff]  }
 0x2e0   : > { %10504 = vmatprep.subr.bf16.mxu0 %v15351_v5  ;;  %11579 = vmatprep.subr.bf16.mxu1 %v15354_v6  ;;  %v15442_v5 = vld [vmem:[%s17388_s15 + $0x13e8] ss:$16 sps:$4 sm:$0xff]  }
 0x2e1   : > { %v15445_v6 = vld [vmem:[%s17386_s12 + $0x48] ss:$196 sps:$4 sm:$0xff]  }
 0x2e2   : > { %10494 = vmatmul.mubr.bf16.vlgmr.msra.gmra.mrb[0].mxu0 %v15346_v4  ;;  %11569 = vmatmul.mubr.bf16.vlgmr.msra.gmra.mrb[0].mxu1 %v15346_v4  ;;  %v15439_v4 = vld [vmem:[%s17388_s15 + $0x13e0] ss:$16 sps:$4 sm:$0xff]  }
 0x2e3   : > { %10505 = vmatpush1.bf16.msra.mxu0 %v15349_v7  ;;  %11580 = vmatpush1.bf16.msra.mxu1 %v15352_v8  ;;  %v15450_v7 = vld [vmem:[%s17388_s15 + $0x1404] ss:$16 sps:$4 sm:$0xff]   ;;  %v15453_v8 = vld [vmem:[%s17388_s15 + $0x140c] ss:$16 sps:$4 sm:$0xff]  }
 0x2e4   : > { %10506 = vmatprep.subr.bf16.mxu0 %v15357_v9  ;;  %11581 = vmatprep.subr.bf16.mxu1 %v15360_v10  ;;  %v15448_v9 = vld [vmem:[%s17388_s15 + $0x1400] ss:$16 sps:$4 sm:$0xff]   ;;  %v15451_v10 = vld [vmem:[%s17388_s15 + $0x1408] ss:$16 sps:$4 sm:$0xff]  }
 0x2e5   : > { %10536 = vmatprep.mubr.bf16.mxu0 %v15447_v11  ;;  %11611 = vmatprep.mubr.bf16.mxu1 %v15447_v11  ;;  %v15456_v11 = vld [vmem:[%s17388_s15 + $0x1424] ss:$16 sps:$4 sm:$0xff]  }
 0x2e7   : > { %10507 = vmatpush1.bf16.msra.mxu0 %v15355_v12  ;;  %11582 = vmatpush1.bf16.msra.mxu1 %v15358_v13  ;;  %v15459_v12 = vld [vmem:[%s17388_s15 + $0x142c] ss:$16 sps:$4 sm:$0xff]  }
 0x2e8   : > { %10508 = vmatprep.subr.bf16.mxu0 %v15363_v14  ;;  %11583 = vmatprep.subr.bf16.mxu1 %v15366_v15  ;;  %v15546_v13 = vld [vmem:[%s17386_s12 + $0x54] ss:$196 sps:$4 sm:$0xff]  }
 0x2e9   : > { %v15454_v14 = vld [vmem:[%s17388_s15 + $0x1420] ss:$16 sps:$4 sm:$0xff]   ;;  %v15457_v15 = vld [vmem:[%s17388_s15 + $0x1428] ss:$16 sps:$4 sm:$0xff]  }
 0x2eb   : > { %10509 = vmatpush1.bf16.msra.mxu0 %v15361_v16  ;;  %11584 = vmatpush1.bf16.msra.mxu1 %v15364_v17  ;;  %v15462_v16 = vld [vmem:[%s17388_s15 + $0x1444] ss:$16 sps:$4 sm:$0xff]   ;;  %v15465_v17 = vld [vmem:[%s17388_s15 + $0x144c] ss:$16 sps:$4 sm:$0xff]  }
 0x2ec   : > { %10510 = vmatprep.subr.bf16.mxu0 %v15369_v18  ;;  %11585 = vmatprep.subr.bf16.mxu1 %v15372_v19  ;;  %v15460_v18 = vld [vmem:[%s17388_s15 + $0x1440] ss:$16 sps:$4 sm:$0xff]   ;;  %v15463_v19 = vld [vmem:[%s17388_s15 + $0x1448] ss:$16 sps:$4 sm:$0xff]  }
 0x2ef   : > { %10511 = vmatpush1.bf16.msra.mxu0 %v15367_v20  ;;  %11586 = vmatpush1.bf16.msra.mxu1 %v15370_v21  ;;  %v15468_v20 = vld [vmem:[%s17388_s15 + $0x1464] ss:$16 sps:$4 sm:$0xff]   ;;  %v15471_v21 = vld [vmem:[%s17388_s15 + $0x146c] ss:$16 sps:$4 sm:$0xff]  }
 0x2f0   : > { %10512 = vmatprep.subr.bf16.mxu0 %v15375_v22  ;;  %11587 = vmatprep.subr.bf16.mxu1 %v15378_v23  ;;  %v15466_v22 = vld [vmem:[%s17388_s15 + $0x1460] ss:$16 sps:$4 sm:$0xff]   ;;  %v15469_v23 = vld [vmem:[%s17388_s15 + $0x1468] ss:$16 sps:$4 sm:$0xff]  }
 0x2f3   : > { %10513 = vmatpush1.bf16.msra.mxu0 %v15373_v24  ;;  %11588 = vmatpush1.bf16.msra.mxu1 %v15376_v25  ;;  %v15474_v24 = vld [vmem:[%s17388_s15 + $0x1484] ss:$16 sps:$4 sm:$0xff]   ;;  %v15477_v25 = vld [vmem:[%s17388_s15 + $0x148c] ss:$16 sps:$4 sm:$0xff]  }
 0x2f4   : > { %10514 = vmatprep.subr.bf16.mxu0 %v15381_v26  ;;  %11589 = vmatprep.subr.bf16.mxu1 %v15384_v27  ;;  %v15472_v26 = vld [vmem:[%s17388_s15 + $0x1480] ss:$16 sps:$4 sm:$0xff]   ;;  %v15475_v27 = vld [vmem:[%s17388_s15 + $0x1488] ss:$16 sps:$4 sm:$0xff]  }
 0x2f7   : > { %10515 = vmatpush1.bf16.msra.mxu0 %v15379_v28  ;;  %11590 = vmatpush1.bf16.msra.mxu1 %v15382_v29  ;;  %v15480_v28 = vld [vmem:[%s17388_s15 + $0x14a4] ss:$16 sps:$4 sm:$0xff]   ;;  %v15483_v29 = vld [vmem:[%s17388_s15 + $0x14ac] ss:$16 sps:$4 sm:$0xff]  }
 0x2f8   : > { %10516 = vmatprep.subr.bf16.mxu0 %v15387_v30  ;;  %11591 = vmatprep.subr.bf16.mxu1 %v15390_v31  ;;  %v15478_v30 = vld [vmem:[%s17388_s15 + $0x14a0] ss:$16 sps:$4 sm:$0xff]   ;;  %v15481_v31 = vld [vmem:[%s17388_s15 + $0x14a8] ss:$16 sps:$4 sm:$0xff]  }
 0x2fb   : > { %10517 = vmatpush1.bf16.msra.mxu0 %v15385_v32  ;;  %11592 = vmatpush1.bf16.msra.mxu1 %v15388_v33  ;;  %v15486_v32 = vld [vmem:[%s17388_s15 + $0x14c4] ss:$16 sps:$4 sm:$0xff]   ;;  %v15489_v33 = vld [vmem:[%s17388_s15 + $0x14cc] ss:$16 sps:$4 sm:$0xff]  }
 0x2fc   : > { %10518 = vmatprep.subr.bf16.mxu0 %v15393_v34  ;;  %11593 = vmatprep.subr.bf16.mxu1 %v15396_v35  ;;  %v15484_v34 = vld [vmem:[%s17388_s15 + $0x14c0] ss:$16 sps:$4 sm:$0xff]   ;;  %v15487_v35 = vld [vmem:[%s17388_s15 + $0x14c8] ss:$16 sps:$4 sm:$0xff]  }
 0x2ff   : > { %10519 = vmatpush1.bf16.msra.mxu0 %v15391_v36  ;;  %11594 = vmatpush1.bf16.msra.mxu1 %v15394_v37  ;;  %v15492_v36 = vld [vmem:[%s17388_s15 + $0x14e4] ss:$16 sps:$4 sm:$0xff]   ;;  %v15495_v37 = vld [vmem:[%s17388_s15 + $0x14ec] ss:$16 sps:$4 sm:$0xff]  }
 0x300   : > { %10520 = vmatprep.subr.bf16.mxu0 %v15399_v38  ;;  %11595 = vmatprep.subr.bf16.mxu1 %v15402_v39  ;;  %v15490_v38 = vld [vmem:[%s17388_s15 + $0x14e0] ss:$16 sps:$4 sm:$0xff]   ;;  %v15493_v39 = vld [vmem:[%s17388_s15 + $0x14e8] ss:$16 sps:$4 sm:$0xff]  }
 0x303   : > { %10521 = vmatpush1.bf16.msra.mxu0 %v15397_v40  ;;  %11596 = vmatpush1.bf16.msra.mxu1 %v15400_v41  ;;  %v15498_v40 = vld [vmem:[%s17388_s15 + $0x1504] ss:$16 sps:$4 sm:$0xff]   ;;  %v15501_v41 = vld [vmem:[%s17388_s15 + $0x150c] ss:$16 sps:$4 sm:$0xff]  }
 0x304   : > { %10522 = vmatprep.subr.bf16.mxu0 %v15405_v42  ;;  %11597 = vmatprep.subr.bf16.mxu1 %v15408_v43  ;;  %v15496_v42 = vld [vmem:[%s17388_s15 + $0x1500] ss:$16 sps:$4 sm:$0xff]   ;;  %v15499_v43 = vld [vmem:[%s17388_s15 + $0x1508] ss:$16 sps:$4 sm:$0xff]  }
 0x307   : > { %10523 = vmatpush1.bf16.msra.mxu0 %v15403_v44  ;;  %11598 = vmatpush1.bf16.msra.mxu1 %v15406_v45  ;;  %v15504_v44 = vld [vmem:[%s17388_s15 + $0x1524] ss:$16 sps:$4 sm:$0xff]   ;;  %v15507_v45 = vld [vmem:[%s17388_s15 + $0x152c] ss:$16 sps:$4 sm:$0xff]  }
 0x308   : > { %10524 = vmatprep.subr.bf16.mxu0 %v15411_v46  ;;  %11599 = vmatprep.subr.bf16.mxu1 %v15414_v47  ;;  %v15502_v46 = vld [vmem:[%s17388_s15 + $0x1520] ss:$16 sps:$4 sm:$0xff]   ;;  %v15505_v47 = vld [vmem:[%s17388_s15 + $0x1528] ss:$16 sps:$4 sm:$0xff]  }
 0x30b   : > { %10525 = vmatpush1.bf16.msra.mxu0 %v15409_v48  ;;  %11600 = vmatpush1.bf16.msra.mxu1 %v15412_v49  ;;  %v15510_v48 = vld [vmem:[%s17388_s15 + $0x1544] ss:$16 sps:$4 sm:$0xff]   ;;  %v15513_v49 = vld [vmem:[%s17388_s15 + $0x154c] ss:$16 sps:$4 sm:$0xff]  }
 0x30c   : > { %10526 = vmatprep.subr.bf16.mxu0 %v15417_v50  ;;  %11601 = vmatprep.subr.bf16.mxu1 %v15420_v51  ;;  %v15508_v50 = vld [vmem:[%s17388_s15 + $0x1540] ss:$16 sps:$4 sm:$0xff]   ;;  %v15511_v51 = vld [vmem:[%s17388_s15 + $0x1548] ss:$16 sps:$4 sm:$0xff]  }
 0x30f   : > { %10527 = vmatpush1.bf16.msra.mxu0 %v15415_v52  ;;  %11602 = vmatpush1.bf16.msra.mxu1 %v15418_v53  ;;  %v15516_v52 = vld [vmem:[%s17388_s15 + $0x1564] ss:$16 sps:$4 sm:$0xff]   ;;  %v15519_v53 = vld [vmem:[%s17388_s15 + $0x156c] ss:$16 sps:$4 sm:$0xff]  }
 0x310   : > { %10528 = vmatprep.subr.bf16.mxu0 %v15423_v54  ;;  %11603 = vmatprep.subr.bf16.mxu1 %v15426_v55  ;;  %v15514_v54 = vld [vmem:[%s17388_s15 + $0x1560] ss:$16 sps:$4 sm:$0xff]   ;;  %v15517_v55 = vld [vmem:[%s17388_s15 + $0x1568] ss:$16 sps:$4 sm:$0xff]  }
 0x313   : > { %10529 = vmatpush1.bf16.msra.mxu0 %v15421_v56  ;;  %11604 = vmatpush1.bf16.msra.mxu1 %v15424_v57  ;;  %v15522_v56 = vld [vmem:[%s17388_s15 + $0x1584] ss:$16 sps:$4 sm:$0xff]   ;;  %v15525_v57 = vld [vmem:[%s17388_s15 + $0x158c] ss:$16 sps:$4 sm:$0xff]  }
 0x314   : > { %10530 = vmatprep.subr.bf16.mxu0 %v15429_v58  ;;  %11605 = vmatprep.subr.bf16.mxu1 %v15432_v59  ;;  %v15520_v58 = vld [vmem:[%s17388_s15 + $0x1580] ss:$16 sps:$4 sm:$0xff]   ;;  %v15523_v59 = vld [vmem:[%s17388_s15 + $0x1588] ss:$16 sps:$4 sm:$0xff]  }
 0x317   : > { %10531 = vmatpush1.bf16.msra.mxu0 %v15427_v60  ;;  %11606 = vmatpush1.bf16.msra.mxu1 %v15430_v61  ;;  %v15528_v60 = vld [vmem:[%s17388_s15 + $0x15a4] ss:$16 sps:$4 sm:$0xff]   ;;  %v15531_v61 = vld [vmem:[%s17388_s15 + $0x15ac] ss:$16 sps:$4 sm:$0xff]  }
 0x318   : > { %10532 = vmatprep.subr.bf16.mxu0 %v15435_v62  ;;  %11607 = vmatprep.subr.bf16.mxu1 %v15438_v63  ;;  %v15526_v62 = vld [vmem:[%s17388_s15 + $0x15a0] ss:$16 sps:$4 sm:$0xff]   ;;  %v15529_v63 = vld [vmem:[%s17388_s15 + $0x15a8] ss:$16 sps:$4 sm:$0xff]  }
 0x31b   : > { %10533 = vmatpush1.bf16.msra.mxu0 %v15433_v0  ;;  %11608 = vmatpush1.bf16.msra.mxu1 %v15436_v1  ;;  %v15534_v0 = vld [vmem:[%s17388_s15 + $0x15c4] ss:$16 sps:$4 sm:$0xff]   ;;  %v15537_v1 = vld [vmem:[%s17388_s15 + $0x15cc] ss:$16 sps:$4 sm:$0xff]  }
 0x31c   : > { %10534 = vmatprep.subr.bf16.mxu0 %v15441_v2  ;;  %11609 = vmatprep.subr.bf16.mxu1 %v15444_v3  ;;  %v15532_v2 = vld [vmem:[%s17388_s15 + $0x15c0] ss:$16 sps:$4 sm:$0xff]   ;;  %v15535_v3 = vld [vmem:[%s17388_s15 + $0x15c8] ss:$16 sps:$4 sm:$0xff]  }
 0x31f   : > { %10535 = vmatpush1.bf16.msra.mxu0 %v15439_v4  ;;  %11610 = vmatpush1.bf16.msra.mxu1 %v15442_v5  ;;  %v15540_v4 = vld [vmem:[%s17388_s15 + $0x15e4] ss:$16 sps:$4 sm:$0xff]   ;;  %v15543_v5 = vld [vmem:[%s17388_s15 + $0x15ec] ss:$16 sps:$4 sm:$0xff]  }
 0x320   : > { %10547 = vmatprep.subr.bf16.mxu0 %v15450_v7  ;;  %11622 = vmatprep.subr.bf16.mxu1 %v15453_v8  ;;  %v15541_v7 = vld [vmem:[%s17388_s15 + $0x15e8] ss:$16 sps:$4 sm:$0xff]  }
 0x321   : > { %v15544_v8 = vld [vmem:[%s17386_s12 + $0x50] ss:$196 sps:$4 sm:$0xff]  }
 0x322   : > { %10537 = vmatmul.mubr.bf16.vlgmr.msra.gmra.mrb[0].mxu0 %v15445_v6  ;;  %11612 = vmatmul.mubr.bf16.vlgmr.msra.gmra.mrb[0].mxu1 %v15445_v6  ;;  %v15538_v6 = vld [vmem:[%s17388_s15 + $0x15e0] ss:$16 sps:$4 sm:$0xff]  }
 0x323   : > { %10548 = vmatpush1.bf16.msra.mxu0 %v15448_v9  ;;  %11623 = vmatpush1.bf16.msra.mxu1 %v15451_v10  ;;  %v15549_v9 = vld [vmem:[%s17388_s15 + $0x1604] ss:$16 sps:$4 sm:$0xff]   ;;  %v15552_v10 = vld [vmem:[%s17388_s15 + $0x160c] ss:$16 sps:$4 sm:$0xff]  }
 0x324   : > { %10549 = vmatprep.subr.bf16.mxu0 %v15456_v11  ;;  %11624 = vmatprep.subr.bf16.mxu1 %v15459_v12  ;;  %v15547_v11 = vld [vmem:[%s17388_s15 + $0x1600] ss:$16 sps:$4 sm:$0xff]   ;;  %v15550_v12 = vld [vmem:[%s17388_s15 + $0x1608] ss:$16 sps:$4 sm:$0xff]  }
 0x325   : > { %10579 = vmatprep.mubr.bf16.mxu0 %v15546_v13  ;;  %11654 = vmatprep.mubr.bf16.mxu1 %v15546_v13  ;;  %v15555_v13 = vld [vmem:[%s17388_s15 + $0x1624] ss:$16 sps:$4 sm:$0xff]  }
 0x327   : > { %10550 = vmatpush1.bf16.msra.mxu0 %v15454_v14  ;;  %11625 = vmatpush1.bf16.msra.mxu1 %v15457_v15  ;;  %v15558_v14 = vld [vmem:[%s17388_s15 + $0x162c] ss:$16 sps:$4 sm:$0xff]  }
 0x328   : > { %10551 = vmatprep.subr.bf16.mxu0 %v15462_v16  ;;  %11626 = vmatprep.subr.bf16.mxu1 %v15465_v17  ;;  %v15645_v15 = vld [vmem:[%s17386_s12 + $0x5c] ss:$196 sps:$4 sm:$0xff]  }
 0x329   : > { %v15553_v16 = vld [vmem:[%s17388_s15 + $0x1620] ss:$16 sps:$4 sm:$0xff]   ;;  %v15556_v17 = vld [vmem:[%s17388_s15 + $0x1628] ss:$16 sps:$4 sm:$0xff]  }
 0x32b   : > { %10552 = vmatpush1.bf16.msra.mxu0 %v15460_v18  ;;  %11627 = vmatpush1.bf16.msra.mxu1 %v15463_v19  ;;  %v15561_v18 = vld [vmem:[%s17388_s15 + $0x1644] ss:$16 sps:$4 sm:$0xff]   ;;  %v15564_v19 = vld [vmem:[%s17388_s15 + $0x164c] ss:$16 sps:$4 sm:$0xff]  }
 0x32c   : > { %10553 = vmatprep.subr.bf16.mxu0 %v15468_v20  ;;  %11628 = vmatprep.subr.bf16.mxu1 %v15471_v21  ;;  %v15559_v20 = vld [vmem:[%s17388_s15 + $0x1640] ss:$16 sps:$4 sm:$0xff]   ;;  %v15562_v21 = vld [vmem:[%s17388_s15 + $0x1648] ss:$16 sps:$4 sm:$0xff]  }
 0x32f   : > { %10554 = vmatpush1.bf16.msra.mxu0 %v15466_v22  ;;  %11629 = vmatpush1.bf16.msra.mxu1 %v15469_v23  ;;  %v15567_v22 = vld [vmem:[%s17388_s15 + $0x1664] ss:$16 sps:$4 sm:$0xff]   ;;  %v15570_v23 = vld [vmem:[%s17388_s15 + $0x166c] ss:$16 sps:$4 sm:$0xff]  }
 0x330   : > { %10555 = vmatprep.subr.bf16.mxu0 %v15474_v24  ;;  %11630 = vmatprep.subr.bf16.mxu1 %v15477_v25  ;;  %v15565_v24 = vld [vmem:[%s17388_s15 + $0x1660] ss:$16 sps:$4 sm:$0xff]   ;;  %v15568_v25 = vld [vmem:[%s17388_s15 + $0x1668] ss:$16 sps:$4 sm:$0xff]  }
 0x333   : > { %10556 = vmatpush1.bf16.msra.mxu0 %v15472_v26  ;;  %11631 = vmatpush1.bf16.msra.mxu1 %v15475_v27  ;;  %v15573_v26 = vld [vmem:[%s17388_s15 + $0x1684] ss:$16 sps:$4 sm:$0xff]   ;;  %v15576_v27 = vld [vmem:[%s17388_s15 + $0x168c] ss:$16 sps:$4 sm:$0xff]  }
 0x334   : > { %10557 = vmatprep.subr.bf16.mxu0 %v15480_v28  ;;  %11632 = vmatprep.subr.bf16.mxu1 %v15483_v29  ;;  %v15571_v28 = vld [vmem:[%s17388_s15 + $0x1680] ss:$16 sps:$4 sm:$0xff]   ;;  %v15574_v29 = vld [vmem:[%s17388_s15 + $0x1688] ss:$16 sps:$4 sm:$0xff]  }
 0x337   : > { %10558 = vmatpush1.bf16.msra.mxu0 %v15478_v30  ;;  %11633 = vmatpush1.bf16.msra.mxu1 %v15481_v31  ;;  %v15579_v30 = vld [vmem:[%s17388_s15 + $0x16a4] ss:$16 sps:$4 sm:$0xff]   ;;  %v15582_v31 = vld [vmem:[%s17388_s15 + $0x16ac] ss:$16 sps:$4 sm:$0xff]  }
 0x338   : > { %10559 = vmatprep.subr.bf16.mxu0 %v15486_v32  ;;  %11634 = vmatprep.subr.bf16.mxu1 %v15489_v33  ;;  %v15577_v32 = vld [vmem:[%s17388_s15 + $0x16a0] ss:$16 sps:$4 sm:$0xff]   ;;  %v15580_v33 = vld [vmem:[%s17388_s15 + $0x16a8] ss:$16 sps:$4 sm:$0xff]  }
 0x33b   : > { %10560 = vmatpush1.bf16.msra.mxu0 %v15484_v34  ;;  %11635 = vmatpush1.bf16.msra.mxu1 %v15487_v35  ;;  %v15585_v34 = vld [vmem:[%s17388_s15 + $0x16c4] ss:$16 sps:$4 sm:$0xff]   ;;  %v15588_v35 = vld [vmem:[%s17388_s15 + $0x16cc] ss:$16 sps:$4 sm:$0xff]  }
 0x33c   : > { %10561 = vmatprep.subr.bf16.mxu0 %v15492_v36  ;;  %11636 = vmatprep.subr.bf16.mxu1 %v15495_v37  ;;  %v15583_v36 = vld [vmem:[%s17388_s15 + $0x16c0] ss:$16 sps:$4 sm:$0xff]   ;;  %v15586_v37 = vld [vmem:[%s17388_s15 + $0x16c8] ss:$16 sps:$4 sm:$0xff]  }
 0x33f   : > { %10562 = vmatpush1.bf16.msra.mxu0 %v15490_v38  ;;  %11637 = vmatpush1.bf16.msra.mxu1 %v15493_v39  ;;  %v15591_v38 = vld [vmem:[%s17388_s15 + $0x16e4] ss:$16 sps:$4 sm:$0xff]   ;;  %v15594_v39 = vld [vmem:[%s17388_s15 + $0x16ec] ss:$16 sps:$4 sm:$0xff]  }
 0x340   : > { %10563 = vmatprep.subr.bf16.mxu0 %v15498_v40  ;;  %11638 = vmatprep.subr.bf16.mxu1 %v15501_v41  ;;  %v15589_v40 = vld [vmem:[%s17388_s15 + $0x16e0] ss:$16 sps:$4 sm:$0xff]   ;;  %v15592_v41 = vld [vmem:[%s17388_s15 + $0x16e8] ss:$16 sps:$4 sm:$0xff]  }
 0x343   : > { %10564 = vmatpush1.bf16.msra.mxu0 %v15496_v42  ;;  %11639 = vmatpush1.bf16.msra.mxu1 %v15499_v43  ;;  %v15597_v42 = vld [vmem:[%s17388_s15 + $0x1704] ss:$16 sps:$4 sm:$0xff]   ;;  %v15600_v43 = vld [vmem:[%s17388_s15 + $0x170c] ss:$16 sps:$4 sm:$0xff]  }
 0x344   : > { %10565 = vmatprep.subr.bf16.mxu0 %v15504_v44  ;;  %11640 = vmatprep.subr.bf16.mxu1 %v15507_v45  ;;  %v15595_v44 = vld [vmem:[%s17388_s15 + $0x1700] ss:$16 sps:$4 sm:$0xff]   ;;  %v15598_v45 = vld [vmem:[%s17388_s15 + $0x1708] ss:$16 sps:$4 sm:$0xff]  }
 0x347   : > { %10566 = vmatpush1.bf16.msra.mxu0 %v15502_v46  ;;  %11641 = vmatpush1.bf16.msra.mxu1 %v15505_v47  ;;  %v15603_v46 = vld [vmem:[%s17388_s15 + $0x1724] ss:$16 sps:$4 sm:$0xff]   ;;  %v15606_v47 = vld [vmem:[%s17388_s15 + $0x172c] ss:$16 sps:$4 sm:$0xff]  }
 0x348   : > { %10567 = vmatprep.subr.bf16.mxu0 %v15510_v48  ;;  %11642 = vmatprep.subr.bf16.mxu1 %v15513_v49  ;;  %v15601_v48 = vld [vmem:[%s17388_s15 + $0x1720] ss:$16 sps:$4 sm:$0xff]   ;;  %v15604_v49 = vld [vmem:[%s17388_s15 + $0x1728] ss:$16 sps:$4 sm:$0xff]  }
 0x34b   : > { %10568 = vmatpush1.bf16.msra.mxu0 %v15508_v50  ;;  %11643 = vmatpush1.bf16.msra.mxu1 %v15511_v51  ;;  %v15609_v50 = vld [vmem:[%s17388_s15 + $0x1744] ss:$16 sps:$4 sm:$0xff]   ;;  %v15612_v51 = vld [vmem:[%s17388_s15 + $0x174c] ss:$16 sps:$4 sm:$0xff]  }
 0x34c   : > { %10569 = vmatprep.subr.bf16.mxu0 %v15516_v52  ;;  %11644 = vmatprep.subr.bf16.mxu1 %v15519_v53  ;;  %v15607_v52 = vld [vmem:[%s17388_s15 + $0x1740] ss:$16 sps:$4 sm:$0xff]   ;;  %v15610_v53 = vld [vmem:[%s17388_s15 + $0x1748] ss:$16 sps:$4 sm:$0xff]  }
 0x34f   : > { %10570 = vmatpush1.bf16.msra.mxu0 %v15514_v54  ;;  %11645 = vmatpush1.bf16.msra.mxu1 %v15517_v55  ;;  %v15615_v54 = vld [vmem:[%s17388_s15 + $0x1764] ss:$16 sps:$4 sm:$0xff]   ;;  %v15618_v55 = vld [vmem:[%s17388_s15 + $0x176c] ss:$16 sps:$4 sm:$0xff]  }
 0x350   : > { %10571 = vmatprep.subr.bf16.mxu0 %v15522_v56  ;;  %11646 = vmatprep.subr.bf16.mxu1 %v15525_v57  ;;  %v15613_v56 = vld [vmem:[%s17388_s15 + $0x1760] ss:$16 sps:$4 sm:$0xff]   ;;  %v15616_v57 = vld [vmem:[%s17388_s15 + $0x1768] ss:$16 sps:$4 sm:$0xff]  }
 0x353   : > { %10572 = vmatpush1.bf16.msra.mxu0 %v15520_v58  ;;  %11647 = vmatpush1.bf16.msra.mxu1 %v15523_v59  ;;  %v15621_v58 = vld [vmem:[%s17388_s15 + $0x1784] ss:$16 sps:$4 sm:$0xff]   ;;  %v15624_v59 = vld [vmem:[%s17388_s15 + $0x178c] ss:$16 sps:$4 sm:$0xff]  }
 0x354   : > { %10573 = vmatprep.subr.bf16.mxu0 %v15528_v60  ;;  %11648 = vmatprep.subr.bf16.mxu1 %v15531_v61  ;;  %v15619_v60 = vld [vmem:[%s17388_s15 + $0x1780] ss:$16 sps:$4 sm:$0xff]   ;;  %v15622_v61 = vld [vmem:[%s17388_s15 + $0x1788] ss:$16 sps:$4 sm:$0xff]  }
 0x357   : > { %10574 = vmatpush1.bf16.msra.mxu0 %v15526_v62  ;;  %11649 = vmatpush1.bf16.msra.mxu1 %v15529_v63  ;;  %v15627_v62 = vld [vmem:[%s17388_s15 + $0x17a4] ss:$16 sps:$4 sm:$0xff]   ;;  %v15630_v63 = vld [vmem:[%s17388_s15 + $0x17ac] ss:$16 sps:$4 sm:$0xff]  }
 0x358   : > { %10575 = vmatprep.subr.bf16.mxu0 %v15534_v0  ;;  %11650 = vmatprep.subr.bf16.mxu1 %v15537_v1  ;;  %v15625_v0 = vld [vmem:[%s17388_s15 + $0x17a0] ss:$16 sps:$4 sm:$0xff]   ;;  %v15628_v1 = vld [vmem:[%s17388_s15 + $0x17a8] ss:$16 sps:$4 sm:$0xff]  }
 0x35b   : > { %10576 = vmatpush1.bf16.msra.mxu0 %v15532_v2  ;;  %11651 = vmatpush1.bf16.msra.mxu1 %v15535_v3  ;;  %v15633_v2 = vld [vmem:[%s17388_s15 + $0x17c4] ss:$16 sps:$4 sm:$0xff]   ;;  %v15636_v3 = vld [vmem:[%s17388_s15 + $0x17cc] ss:$16 sps:$4 sm:$0xff]  }
 0x35c   : > { %10577 = vmatprep.subr.bf16.mxu0 %v15540_v4  ;;  %11652 = vmatprep.subr.bf16.mxu1 %v15543_v5  ;;  %v15631_v4 = vld [vmem:[%s17388_s15 + $0x17c0] ss:$16 sps:$4 sm:$0xff]   ;;  %v15634_v5 = vld [vmem:[%s17388_s15 + $0x17c8] ss:$16 sps:$4 sm:$0xff]  }
 0x35f   : > { %10578 = vmatpush1.bf16.msra.mxu0 %v15538_v6  ;;  %11653 = vmatpush1.bf16.msra.mxu1 %v15541_v7  ;;  %v15639_v6 = vld [vmem:[%s17388_s15 + $0x17e4] ss:$16 sps:$4 sm:$0xff]   ;;  %v15642_v7 = vld [vmem:[%s17388_s15 + $0x17ec] ss:$16 sps:$4 sm:$0xff]  }
 0x360   : > { %10590 = vmatprep.subr.bf16.mxu0 %v15549_v9  ;;  %11665 = vmatprep.subr.bf16.mxu1 %v15552_v10  ;;  %v15640_v9 = vld [vmem:[%s17388_s15 + $0x17e8] ss:$16 sps:$4 sm:$0xff]  }
 0x361   : > { %v15643_v10 = vld [vmem:[%s17386_s12 + $0x58] ss:$196 sps:$4 sm:$0xff]  }
 0x362   : > { %10580 = vmatmul.mubr.bf16.vlgmr.msra.gmra.mrb[0].mxu0 %v15544_v8  ;;  %11655 = vmatmul.mubr.bf16.vlgmr.msra.gmra.mrb[0].mxu1 %v15544_v8  ;;  %v15637_v8 = vld [vmem:[%s17388_s15 + $0x17e0] ss:$16 sps:$4 sm:$0xff]  }
 0x363   : > { %10591 = vmatpush1.bf16.msra.mxu0 %v15547_v11  ;;  %11666 = vmatpush1.bf16.msra.mxu1 %v15550_v12  ;;  %v15648_v11 = vld [vmem:[%s17388_s15 + $0x1804] ss:$16 sps:$4 sm:$0xff]   ;;  %v15651_v12 = vld [vmem:[%s17388_s15 + $0x180c] ss:$16 sps:$4 sm:$0xff]  }
 0x364   : > { %10592 = vmatprep.subr.bf16.mxu0 %v15555_v13  ;;  %11667 = vmatprep.subr.bf16.mxu1 %v15558_v14  ;;  %v15646_v13 = vld [vmem:[%s17388_s15 + $0x1800] ss:$16 sps:$4 sm:$0xff]   ;;  %v15649_v14 = vld [vmem:[%s17388_s15 + $0x1808] ss:$16 sps:$4 sm:$0xff]  }
 0x365   : > { %10622 = vmatprep.mubr.bf16.mxu0 %v15645_v15  ;;  %11697 = vmatprep.mubr.bf16.mxu1 %v15645_v15  ;;  %v15654_v15 = vld [vmem:[%s17388_s15 + $0x1824] ss:$16 sps:$4 sm:$0xff]  }
 0x367   : > { %10593 = vmatpush1.bf16.msra.mxu0 %v15553_v16  ;;  %11668 = vmatpush1.bf16.msra.mxu1 %v15556_v17  ;;  %v15657_v16 = vld [vmem:[%s17388_s15 + $0x182c] ss:$16 sps:$4 sm:$0xff]  }
 0x368   : > { %10594 = vmatprep.subr.bf16.mxu0 %v15561_v18  ;;  %11669 = vmatprep.subr.bf16.mxu1 %v15564_v19  ;;  %v15744_v17 = vld [vmem:[%s17386_s12 + $0x64] ss:$196 sps:$4 sm:$0xff]  }
 0x369   : > { %v15652_v18 = vld [vmem:[%s17388_s15 + $0x1820] ss:$16 sps:$4 sm:$0xff]   ;;  %v15655_v19 = vld [vmem:[%s17388_s15 + $0x1828] ss:$16 sps:$4 sm:$0xff]  }
 0x36b   : > { %10595 = vmatpush1.bf16.msra.mxu0 %v15559_v20  ;;  %11670 = vmatpush1.bf16.msra.mxu1 %v15562_v21  ;;  %v15660_v20 = vld [vmem:[%s17388_s15 + $0x1844] ss:$16 sps:$4 sm:$0xff]   ;;  %v15663_v21 = vld [vmem:[%s17388_s15 + $0x184c] ss:$16 sps:$4 sm:$0xff]  }
 0x36c   : > { %10596 = vmatprep.subr.bf16.mxu0 %v15567_v22  ;;  %11671 = vmatprep.subr.bf16.mxu1 %v15570_v23  ;;  %v15658_v22 = vld [vmem:[%s17388_s15 + $0x1840] ss:$16 sps:$4 sm:$0xff]   ;;  %v15661_v23 = vld [vmem:[%s17388_s15 + $0x1848] ss:$16 sps:$4 sm:$0xff]  }
 0x36f   : > { %10597 = vmatpush1.bf16.msra.mxu0 %v15565_v24  ;;  %11672 = vmatpush1.bf16.msra.mxu1 %v15568_v25  ;;  %v15666_v24 = vld [vmem:[%s17388_s15 + $0x1864] ss:$16 sps:$4 sm:$0xff]   ;;  %v15669_v25 = vld [vmem:[%s17388_s15 + $0x186c] ss:$16 sps:$4 sm:$0xff]  }
 0x370   : > { %10598 = vmatprep.subr.bf16.mxu0 %v15573_v26  ;;  %11673 = vmatprep.subr.bf16.mxu1 %v15576_v27  ;;  %v15664_v26 = vld [vmem:[%s17388_s15 + $0x1860] ss:$16 sps:$4 sm:$0xff]   ;;  %v15667_v27 = vld [vmem:[%s17388_s15 + $0x1868] ss:$16 sps:$4 sm:$0xff]  }
 0x373   : > { %10599 = vmatpush1.bf16.msra.mxu0 %v15571_v28  ;;  %11674 = vmatpush1.bf16.msra.mxu1 %v15574_v29  ;;  %v15672_v28 = vld [vmem:[%s17388_s15 + $0x1884] ss:$16 sps:$4 sm:$0xff]   ;;  %v15675_v29 = vld [vmem:[%s17388_s15 + $0x188c] ss:$16 sps:$4 sm:$0xff]  }
 0x374   : > { %10600 = vmatprep.subr.bf16.mxu0 %v15579_v30  ;;  %11675 = vmatprep.subr.bf16.mxu1 %v15582_v31  ;;  %v15670_v30 = vld [vmem:[%s17388_s15 + $0x1880] ss:$16 sps:$4 sm:$0xff]   ;;  %v15673_v31 = vld [vmem:[%s17388_s15 + $0x1888] ss:$16 sps:$4 sm:$0xff]  }
 0x377   : > { %10601 = vmatpush1.bf16.msra.mxu0 %v15577_v32  ;;  %11676 = vmatpush1.bf16.msra.mxu1 %v15580_v33  ;;  %v15678_v32 = vld [vmem:[%s17388_s15 + $0x18a4] ss:$16 sps:$4 sm:$0xff]   ;;  %v15681_v33 = vld [vmem:[%s17388_s15 + $0x18ac] ss:$16 sps:$4 sm:$0xff]  }
 0x378   : > { %10602 = vmatprep.subr.bf16.mxu0 %v15585_v34  ;;  %11677 = vmatprep.subr.bf16.mxu1 %v15588_v35  ;;  %v15676_v34 = vld [vmem:[%s17388_s15 + $0x18a0] ss:$16 sps:$4 sm:$0xff]   ;;  %v15679_v35 = vld [vmem:[%s17388_s15 + $0x18a8] ss:$16 sps:$4 sm:$0xff]  }
 0x37b   : > { %10603 = vmatpush1.bf16.msra.mxu0 %v15583_v36  ;;  %11678 = vmatpush1.bf16.msra.mxu1 %v15586_v37  ;;  %v15684_v36 = vld [vmem:[%s17388_s15 + $0x18c4] ss:$16 sps:$4 sm:$0xff]   ;;  %v15687_v37 = vld [vmem:[%s17388_s15 + $0x18cc] ss:$16 sps:$4 sm:$0xff]  }
 0x37c   : > { %10604 = vmatprep.subr.bf16.mxu0 %v15591_v38  ;;  %11679 = vmatprep.subr.bf16.mxu1 %v15594_v39  ;;  %v15682_v38 = vld [vmem:[%s17388_s15 + $0x18c0] ss:$16 sps:$4 sm:$0xff]   ;;  %v15685_v39 = vld [vmem:[%s17388_s15 + $0x18c8] ss:$16 sps:$4 sm:$0xff]  }
 0x37f   : > { %10605 = vmatpush1.bf16.msra.mxu0 %v15589_v40  ;;  %11680 = vmatpush1.bf16.msra.mxu1 %v15592_v41  ;;  %v15690_v40 = vld [vmem:[%s17388_s15 + $0x18e4] ss:$16 sps:$4 sm:$0xff]   ;;  %v15693_v41 = vld [vmem:[%s17388_s15 + $0x18ec] ss:$16 sps:$4 sm:$0xff]  }
 0x380   : > { %10606 = vmatprep.subr.bf16.mxu0 %v15597_v42  ;;  %11681 = vmatprep.subr.bf16.mxu1 %v15600_v43  ;;  %v15688_v42 = vld [vmem:[%s17388_s15 + $0x18e0] ss:$16 sps:$4 sm:$0xff]   ;;  %v15691_v43 = vld [vmem:[%s17388_s15 + $0x18e8] ss:$16 sps:$4 sm:$0xff]  }
 0x383   : > { %10607 = vmatpush1.bf16.msra.mxu0 %v15595_v44  ;;  %11682 = vmatpush1.bf16.msra.mxu1 %v15598_v45  ;;  %v15696_v44 = vld [vmem:[%s17388_s15 + $0x1904] ss:$16 sps:$4 sm:$0xff]   ;;  %v15699_v45 = vld [vmem:[%s17388_s15 + $0x190c] ss:$16 sps:$4 sm:$0xff]  }
 0x384   : > { %10608 = vmatprep.subr.bf16.mxu0 %v15603_v46  ;;  %11683 = vmatprep.subr.bf16.mxu1 %v15606_v47  ;;  %v15694_v46 = vld [vmem:[%s17388_s15 + $0x1900] ss:$16 sps:$4 sm:$0xff]   ;;  %v15697_v47 = vld [vmem:[%s17388_s15 + $0x1908] ss:$16 sps:$4 sm:$0xff]  }
 0x387   : > { %10609 = vmatpush1.bf16.msra.mxu0 %v15601_v48  ;;  %11684 = vmatpush1.bf16.msra.mxu1 %v15604_v49  ;;  %v15702_v48 = vld [vmem:[%s17388_s15 + $0x1924] ss:$16 sps:$4 sm:$0xff]   ;;  %v15705_v49 = vld [vmem:[%s17388_s15 + $0x192c] ss:$16 sps:$4 sm:$0xff]  }
 0x388   : > { %10610 = vmatprep.subr.bf16.mxu0 %v15609_v50  ;;  %11685 = vmatprep.subr.bf16.mxu1 %v15612_v51  ;;  %v15700_v50 = vld [vmem:[%s17388_s15 + $0x1920] ss:$16 sps:$4 sm:$0xff]   ;;  %v15703_v51 = vld [vmem:[%s17388_s15 + $0x1928] ss:$16 sps:$4 sm:$0xff]  }
 0x38b   : > { %10611 = vmatpush1.bf16.msra.mxu0 %v15607_v52  ;;  %11686 = vmatpush1.bf16.msra.mxu1 %v15610_v53  ;;  %v15708_v52 = vld [vmem:[%s17388_s15 + $0x1944] ss:$16 sps:$4 sm:$0xff]   ;;  %v15711_v53 = vld [vmem:[%s17388_s15 + $0x194c] ss:$16 sps:$4 sm:$0xff]  }
 0x38c   : > { %10612 = vmatprep.subr.bf16.mxu0 %v15615_v54  ;;  %11687 = vmatprep.subr.bf16.mxu1 %v15618_v55  ;;  %v15706_v54 = vld [vmem:[%s17388_s15 + $0x1940] ss:$16 sps:$4 sm:$0xff]   ;;  %v15709_v55 = vld [vmem:[%s17388_s15 + $0x1948] ss:$16 sps:$4 sm:$0xff]  }
 0x38f   : > { %10613 = vmatpush1.bf16.msra.mxu0 %v15613_v56  ;;  %11688 = vmatpush1.bf16.msra.mxu1 %v15616_v57  ;;  %v15714_v56 = vld [vmem:[%s17388_s15 + $0x1964] ss:$16 sps:$4 sm:$0xff]   ;;  %v15717_v57 = vld [vmem:[%s17388_s15 + $0x196c] ss:$16 sps:$4 sm:$0xff]  }
 0x390   : > { %10614 = vmatprep.subr.bf16.mxu0 %v15621_v58  ;;  %11689 = vmatprep.subr.bf16.mxu1 %v15624_v59  ;;  %v15712_v58 = vld [vmem:[%s17388_s15 + $0x1960] ss:$16 sps:$4 sm:$0xff]   ;;  %v15715_v59 = vld [vmem:[%s17388_s15 + $0x1968] ss:$16 sps:$4 sm:$0xff]  }
 0x393   : > { %10615 = vmatpush1.bf16.msra.mxu0 %v15619_v60  ;;  %11690 = vmatpush1.bf16.msra.mxu1 %v15622_v61  ;;  %v15720_v60 = vld [vmem:[%s17388_s15 + $0x1984] ss:$16 sps:$4 sm:$0xff]   ;;  %v15723_v61 = vld [vmem:[%s17388_s15 + $0x198c] ss:$16 sps:$4 sm:$0xff]  }
 0x394   : > { %10616 = vmatprep.subr.bf16.mxu0 %v15627_v62  ;;  %11691 = vmatprep.subr.bf16.mxu1 %v15630_v63  ;;  %v15718_v62 = vld [vmem:[%s17388_s15 + $0x1980] ss:$16 sps:$4 sm:$0xff]   ;;  %v15721_v63 = vld [vmem:[%s17388_s15 + $0x1988] ss:$16 sps:$4 sm:$0xff]  }
 0x397   : > { %10617 = vmatpush1.bf16.msra.mxu0 %v15625_v0  ;;  %11692 = vmatpush1.bf16.msra.mxu1 %v15628_v1  ;;  %v15726_v0 = vld [vmem:[%s17388_s15 + $0x19a4] ss:$16 sps:$4 sm:$0xff]   ;;  %v15729_v1 = vld [vmem:[%s17388_s15 + $0x19ac] ss:$16 sps:$4 sm:$0xff]  }
 0x398   : > { %10618 = vmatprep.subr.bf16.mxu0 %v15633_v2  ;;  %11693 = vmatprep.subr.bf16.mxu1 %v15636_v3  ;;  %v15724_v2 = vld [vmem:[%s17388_s15 + $0x19a0] ss:$16 sps:$4 sm:$0xff]   ;;  %v15727_v3 = vld [vmem:[%s17388_s15 + $0x19a8] ss:$16 sps:$4 sm:$0xff]  }
 0x39b   : > { %10619 = vmatpush1.bf16.msra.mxu0 %v15631_v4  ;;  %11694 = vmatpush1.bf16.msra.mxu1 %v15634_v5  ;;  %v15732_v4 = vld [vmem:[%s17388_s15 + $0x19c4] ss:$16 sps:$4 sm:$0xff]   ;;  %v15735_v5 = vld [vmem:[%s17388_s15 + $0x19cc] ss:$16 sps:$4 sm:$0xff]  }
 0x39c   : > { %10620 = vmatprep.subr.bf16.mxu0 %v15639_v6  ;;  %11695 = vmatprep.subr.bf16.mxu1 %v15642_v7  ;;  %v15730_v6 = vld [vmem:[%s17388_s15 + $0x19c0] ss:$16 sps:$4 sm:$0xff]   ;;  %v15733_v7 = vld [vmem:[%s17388_s15 + $0x19c8] ss:$16 sps:$4 sm:$0xff]  }
 0x39f   : > { %10621 = vmatpush1.bf16.msra.mxu0 %v15637_v8  ;;  %11696 = vmatpush1.bf16.msra.mxu1 %v15640_v9  ;;  %v15738_v8 = vld [vmem:[%s17388_s15 + $0x19e4] ss:$16 sps:$4 sm:$0xff]   ;;  %v15741_v9 = vld [vmem:[%s17388_s15 + $0x19ec] ss:$16 sps:$4 sm:$0xff]  }
 0x3a0   : > { %10633 = vmatprep.subr.bf16.mxu0 %v15648_v11  ;;  %11708 = vmatprep.subr.bf16.mxu1 %v15651_v12  ;;  %v15739_v11 = vld [vmem:[%s17388_s15 + $0x19e8] ss:$16 sps:$4 sm:$0xff]  }
 0x3a1   : > { %v15742_v12 = vld [vmem:[%s17386_s12 + $0x60] ss:$196 sps:$4 sm:$0xff]  }
 0x3a2   : > { %10623 = vmatmul.mubr.bf16.vlgmr.msra.gmra.mrb[0].mxu0 %v15643_v10  ;;  %11698 = vmatmul.mubr.bf16.vlgmr.msra.gmra.mrb[0].mxu1 %v15643_v10  ;;  %v15736_v10 = vld [vmem:[%s17388_s15 + $0x19e0] ss:$16 sps:$4 sm:$0xff]  }
 0x3a3   : > { %10634 = vmatpush1.bf16.msra.mxu0 %v15646_v13  ;;  %11709 = vmatpush1.bf16.msra.mxu1 %v15649_v14  ;;  %v15747_v13 = vld [vmem:[%s17388_s15 + $0x1a04] ss:$16 sps:$4 sm:$0xff]   ;;  %v15750_v14 = vld [vmem:[%s17388_s15 + $0x1a0c] ss:$16 sps:$4 sm:$0xff]  }
 0x3a4   : > { %10635 = vmatprep.subr.bf16.mxu0 %v15654_v15  ;;  %11710 = vmatprep.subr.bf16.mxu1 %v15657_v16  ;;  %v15745_v15 = vld [vmem:[%s17388_s15 + $0x1a00] ss:$16 sps:$4 sm:$0xff]   ;;  %v15748_v16 = vld [vmem:[%s17388_s15 + $0x1a08] ss:$16 sps:$4 sm:$0xff]  }
 0x3a5   : > { %10665 = vmatprep.mubr.bf16.mxu0 %v15744_v17  ;;  %11740 = vmatprep.mubr.bf16.mxu1 %v15744_v17  ;;  %v15753_v17 = vld [vmem:[%s17388_s15 + $0x1a24] ss:$16 sps:$4 sm:$0xff]  }
 0x3a7   : > { %10636 = vmatpush1.bf16.msra.mxu0 %v15652_v18  ;;  %11711 = vmatpush1.bf16.msra.mxu1 %v15655_v19  ;;  %v15756_v18 = vld [vmem:[%s17388_s15 + $0x1a2c] ss:$16 sps:$4 sm:$0xff]  }
 0x3a8   : > { %10637 = vmatprep.subr.bf16.mxu0 %v15660_v20  ;;  %11712 = vmatprep.subr.bf16.mxu1 %v15663_v21  ;;  %v15843_v19 = vld [vmem:[%s17386_s12 + $0x6c] ss:$196 sps:$4 sm:$0xff]  }
 0x3a9   : > { %v15751_v20 = vld [vmem:[%s17388_s15 + $0x1a20] ss:$16 sps:$4 sm:$0xff]   ;;  %v15754_v21 = vld [vmem:[%s17388_s15 + $0x1a28] ss:$16 sps:$4 sm:$0xff]  }
 0x3ab   : > { %10638 = vmatpush1.bf16.msra.mxu0 %v15658_v22  ;;  %11713 = vmatpush1.bf16.msra.mxu1 %v15661_v23  ;;  %v15759_v22 = vld [vmem:[%s17388_s15 + $0x1a44] ss:$16 sps:$4 sm:$0xff]   ;;  %v15762_v23 = vld [vmem:[%s17388_s15 + $0x1a4c] ss:$16 sps:$4 sm:$0xff]  }
 0x3ac   : > { %10639 = vmatprep.subr.bf16.mxu0 %v15666_v24  ;;  %11714 = vmatprep.subr.bf16.mxu1 %v15669_v25  ;;  %v15757_v24 = vld [vmem:[%s17388_s15 + $0x1a40] ss:$16 sps:$4 sm:$0xff]   ;;  %v15760_v25 = vld [vmem:[%s17388_s15 + $0x1a48] ss:$16 sps:$4 sm:$0xff]  }
 0x3af   : > { %10640 = vmatpush1.bf16.msra.mxu0 %v15664_v26  ;;  %11715 = vmatpush1.bf16.msra.mxu1 %v15667_v27  ;;  %v15765_v26 = vld [vmem:[%s17388_s15 + $0x1a64] ss:$16 sps:$4 sm:$0xff]   ;;  %v15768_v27 = vld [vmem:[%s17388_s15 + $0x1a6c] ss:$16 sps:$4 sm:$0xff]  }
 0x3b0   : > { %10641 = vmatprep.subr.bf16.mxu0 %v15672_v28  ;;  %11716 = vmatprep.subr.bf16.mxu1 %v15675_v29  ;;  %v15763_v28 = vld [vmem:[%s17388_s15 + $0x1a60] ss:$16 sps:$4 sm:$0xff]   ;;  %v15766_v29 = vld [vmem:[%s17388_s15 + $0x1a68] ss:$16 sps:$4 sm:$0xff]  }
 0x3b3   : > { %10642 = vmatpush1.bf16.msra.mxu0 %v15670_v30  ;;  %11717 = vmatpush1.bf16.msra.mxu1 %v15673_v31  ;;  %v15771_v30 = vld [vmem:[%s17388_s15 + $0x1a84] ss:$16 sps:$4 sm:$0xff]   ;;  %v15774_v31 = vld [vmem:[%s17388_s15 + $0x1a8c] ss:$16 sps:$4 sm:$0xff]  }
 0x3b4   : > { %10643 = vmatprep.subr.bf16.mxu0 %v15678_v32  ;;  %11718 = vmatprep.subr.bf16.mxu1 %v15681_v33  ;;  %v15769_v32 = vld [vmem:[%s17388_s15 + $0x1a80] ss:$16 sps:$4 sm:$0xff]   ;;  %v15772_v33 = vld [vmem:[%s17388_s15 + $0x1a88] ss:$16 sps:$4 sm:$0xff]  }
 0x3b7   : > { %10644 = vmatpush1.bf16.msra.mxu0 %v15676_v34  ;;  %11719 = vmatpush1.bf16.msra.mxu1 %v15679_v35  ;;  %v15777_v34 = vld [vmem:[%s17388_s15 + $0x1aa4] ss:$16 sps:$4 sm:$0xff]   ;;  %v15780_v35 = vld [vmem:[%s17388_s15 + $0x1aac] ss:$16 sps:$4 sm:$0xff]  }
 0x3b8   : > { %10645 = vmatprep.subr.bf16.mxu0 %v15684_v36  ;;  %11720 = vmatprep.subr.bf16.mxu1 %v15687_v37  ;;  %v15775_v36 = vld [vmem:[%s17388_s15 + $0x1aa0] ss:$16 sps:$4 sm:$0xff]   ;;  %v15778_v37 = vld [vmem:[%s17388_s15 + $0x1aa8] ss:$16 sps:$4 sm:$0xff]  }
 0x3bb   : > { %10646 = vmatpush1.bf16.msra.mxu0 %v15682_v38  ;;  %11721 = vmatpush1.bf16.msra.mxu1 %v15685_v39  ;;  %v15783_v38 = vld [vmem:[%s17388_s15 + $0x1ac4] ss:$16 sps:$4 sm:$0xff]   ;;  %v15786_v39 = vld [vmem:[%s17388_s15 + $0x1acc] ss:$16 sps:$4 sm:$0xff]  }
 0x3bc   : > { %10647 = vmatprep.subr.bf16.mxu0 %v15690_v40  ;;  %11722 = vmatprep.subr.bf16.mxu1 %v15693_v41  ;;  %v15781_v40 = vld [vmem:[%s17388_s15 + $0x1ac0] ss:$16 sps:$4 sm:$0xff]   ;;  %v15784_v41 = vld [vmem:[%s17388_s15 + $0x1ac8] ss:$16 sps:$4 sm:$0xff]  }
 0x3bf   : > { %10648 = vmatpush1.bf16.msra.mxu0 %v15688_v42  ;;  %11723 = vmatpush1.bf16.msra.mxu1 %v15691_v43  ;;  %v15789_v42 = vld [vmem:[%s17388_s15 + $0x1ae4] ss:$16 sps:$4 sm:$0xff]   ;;  %v15792_v43 = vld [vmem:[%s17388_s15 + $0x1aec] ss:$16 sps:$4 sm:$0xff]  }
 0x3c0   : > { %10649 = vmatprep.subr.bf16.mxu0 %v15696_v44  ;;  %11724 = vmatprep.subr.bf16.mxu1 %v15699_v45  ;;  %v15787_v44 = vld [vmem:[%s17388_s15 + $0x1ae0] ss:$16 sps:$4 sm:$0xff]   ;;  %v15790_v45 = vld [vmem:[%s17388_s15 + $0x1ae8] ss:$16 sps:$4 sm:$0xff]  }
 0x3c3   : > { %10650 = vmatpush1.bf16.msra.mxu0 %v15694_v46  ;;  %11725 = vmatpush1.bf16.msra.mxu1 %v15697_v47  ;;  %v15795_v46 = vld [vmem:[%s17388_s15 + $0x1b04] ss:$16 sps:$4 sm:$0xff]   ;;  %v15798_v47 = vld [vmem:[%s17388_s15 + $0x1b0c] ss:$16 sps:$4 sm:$0xff]  }
 0x3c4   : > { %10651 = vmatprep.subr.bf16.mxu0 %v15702_v48  ;;  %11726 = vmatprep.subr.bf16.mxu1 %v15705_v49  ;;  %v15793_v48 = vld [vmem:[%s17388_s15 + $0x1b00] ss:$16 sps:$4 sm:$0xff]   ;;  %v15796_v49 = vld [vmem:[%s17388_s15 + $0x1b08] ss:$16 sps:$4 sm:$0xff]  }
 0x3c7   : > { %10652 = vmatpush1.bf16.msra.mxu0 %v15700_v50  ;;  %11727 = vmatpush1.bf16.msra.mxu1 %v15703_v51  ;;  %v15801_v50 = vld [vmem:[%s17388_s15 + $0x1b24] ss:$16 sps:$4 sm:$0xff]   ;;  %v15804_v51 = vld [vmem:[%s17388_s15 + $0x1b2c] ss:$16 sps:$4 sm:$0xff]  }
 0x3c8   : > { %10653 = vmatprep.subr.bf16.mxu0 %v15708_v52  ;;  %11728 = vmatprep.subr.bf16.mxu1 %v15711_v53  ;;  %v15799_v52 = vld [vmem:[%s17388_s15 + $0x1b20] ss:$16 sps:$4 sm:$0xff]   ;;  %v15802_v53 = vld [vmem:[%s17388_s15 + $0x1b28] ss:$16 sps:$4 sm:$0xff]  }
 0x3cb   : > { %10654 = vmatpush1.bf16.msra.mxu0 %v15706_v54  ;;  %11729 = vmatpush1.bf16.msra.mxu1 %v15709_v55  ;;  %v15807_v54 = vld [vmem:[%s17388_s15 + $0x1b44] ss:$16 sps:$4 sm:$0xff]   ;;  %v15810_v55 = vld [vmem:[%s17388_s15 + $0x1b4c] ss:$16 sps:$4 sm:$0xff]  }
 0x3cc   : > { %10655 = vmatprep.subr.bf16.mxu0 %v15714_v56  ;;  %11730 = vmatprep.subr.bf16.mxu1 %v15717_v57  ;;  %v15805_v56 = vld [vmem:[%s17388_s15 + $0x1b40] ss:$16 sps:$4 sm:$0xff]   ;;  %v15808_v57 = vld [vmem:[%s17388_s15 + $0x1b48] ss:$16 sps:$4 sm:$0xff]  }
 0x3cf   : > { %10656 = vmatpush1.bf16.msra.mxu0 %v15712_v58  ;;  %11731 = vmatpush1.bf16.msra.mxu1 %v15715_v59  ;;  %v15813_v58 = vld [vmem:[%s17388_s15 + $0x1b64] ss:$16 sps:$4 sm:$0xff]   ;;  %v15816_v59 = vld [vmem:[%s17388_s15 + $0x1b6c] ss:$16 sps:$4 sm:$0xff]  }
 0x3d0   : > { %10657 = vmatprep.subr.bf16.mxu0 %v15720_v60  ;;  %11732 = vmatprep.subr.bf16.mxu1 %v15723_v61  ;;  %v15811_v60 = vld [vmem:[%s17388_s15 + $0x1b60] ss:$16 sps:$4 sm:$0xff]   ;;  %v15814_v61 = vld [vmem:[%s17388_s15 + $0x1b68] ss:$16 sps:$4 sm:$0xff]  }
 0x3d3   : > { %10658 = vmatpush1.bf16.msra.mxu0 %v15718_v62  ;;  %11733 = vmatpush1.bf16.msra.mxu1 %v15721_v63  ;;  %v15819_v62 = vld [vmem:[%s17388_s15 + $0x1b84] ss:$16 sps:$4 sm:$0xff]   ;;  %v15822_v63 = vld [vmem:[%s17388_s15 + $0x1b8c] ss:$16 sps:$4 sm:$0xff]  }
 0x3d4   : > { %10659 = vmatprep.subr.bf16.mxu0 %v15726_v0  ;;  %11734 = vmatprep.subr.bf16.mxu1 %v15729_v1  ;;  %v15817_v0 = vld [vmem:[%s17388_s15 + $0x1b80] ss:$16 sps:$4 sm:$0xff]   ;;  %v15820_v1 = vld [vmem:[%s17388_s15 + $0x1b88] ss:$16 sps:$4 sm:$0xff]  }
 0x3d7   : > { %10660 = vmatpush1.bf16.msra.mxu0 %v15724_v2  ;;  %11735 = vmatpush1.bf16.msra.mxu1 %v15727_v3  ;;  %v15825_v2 = vld [vmem:[%s17388_s15 + $0x1ba4] ss:$16 sps:$4 sm:$0xff]   ;;  %v15828_v3 = vld [vmem:[%s17388_s15 + $0x1bac] ss:$16 sps:$4 sm:$0xff]  }
 0x3d8   : > { %10661 = vmatprep.subr.bf16.mxu0 %v15732_v4  ;;  %11736 = vmatprep.subr.bf16.mxu1 %v15735_v5  ;;  %v15823_v4 = vld [vmem:[%s17388_s15 + $0x1ba0] ss:$16 sps:$4 sm:$0xff]   ;;  %v15826_v5 = vld [vmem:[%s17388_s15 + $0x1ba8] ss:$16 sps:$4 sm:$0xff]  }
 0x3db   : > { %10662 = vmatpush1.bf16.msra.mxu0 %v15730_v6  ;;  %11737 = vmatpush1.bf16.msra.mxu1 %v15733_v7  ;;  %v15831_v6 = vld [vmem:[%s17388_s15 + $0x1bc4] ss:$16 sps:$4 sm:$0xff]   ;;  %v15834_v7 = vld [vmem:[%s17388_s15 + $0x1bcc] ss:$16 sps:$4 sm:$0xff]  }
 0x3dc   : > { %10663 = vmatprep.subr.bf16.mxu0 %v15738_v8  ;;  %11738 = vmatprep.subr.bf16.mxu1 %v15741_v9  ;;  %v15829_v8 = vld [vmem:[%s17388_s15 + $0x1bc0] ss:$16 sps:$4 sm:$0xff]   ;;  %v15832_v9 = vld [vmem:[%s17388_s15 + $0x1bc8] ss:$16 sps:$4 sm:$0xff]  }
 0x3df   : > { %10664 = vmatpush1.bf16.msra.mxu0 %v15736_v10  ;;  %11739 = vmatpush1.bf16.msra.mxu1 %v15739_v11  ;;  %v15837_v10 = vld [vmem:[%s17388_s15 + $0x1be4] ss:$16 sps:$4 sm:$0xff]   ;;  %v15840_v11 = vld [vmem:[%s17388_s15 + $0x1bec] ss:$16 sps:$4 sm:$0xff]  }
 0x3e0   : > { %10676 = vmatprep.subr.bf16.mxu0 %v15747_v13  ;;  %11751 = vmatprep.subr.bf16.mxu1 %v15750_v14  ;;  %v15838_v13 = vld [vmem:[%s17388_s15 + $0x1be8] ss:$16 sps:$4 sm:$0xff]   ;;  %v15846_v14 = vld [vmem:[%s17388_s15 + $0x1c04] ss:$16 sps:$4 sm:$0xff]  }
 0x3e2   : > { %10666 = vmatmul.mubr.bf16.vlgmr.msra.gmra.mrb[0].mxu0 %v15742_v12  ;;  %11741 = vmatmul.mubr.bf16.vlgmr.msra.gmra.mrb[0].mxu1 %v15742_v12  ;;  %v15835_v12 = vld [vmem:[%s17388_s15 + $0x1be0] ss:$16 sps:$4 sm:$0xff]  }
 0x3e3   : > { %10677 = vmatpush1.bf16.msra.mxu0 %v15745_v15  ;;  %11752 = vmatpush1.bf16.msra.mxu1 %v15748_v16  ;;  %v15849_v15 = vld [vmem:[%s17388_s15 + $0x1c0c] ss:$16 sps:$4 sm:$0xff]  }
 0x3e4   : > { %10678 = vmatprep.subr.bf16.mxu0 %v15753_v17  ;;  %11753 = vmatprep.subr.bf16.mxu1 %v15756_v18  ;;  %v15841_v16 = vld [vmem:[%s17386_s12 + $0x68] ss:$196 sps:$4 sm:$0xff]  }
 0x3e5   : > { %10708 = vmatprep.mubr.bf16.mxu0 %v15843_v19  ;;  %11783 = vmatprep.mubr.bf16.mxu1 %v15843_v19  ;;  %v15844_v17 = vld [vmem:[%s17388_s15 + $0x1c00] ss:$16 sps:$4 sm:$0xff]   ;;  %v15847_v18 = vld [vmem:[%s17388_s15 + $0x1c08] ss:$16 sps:$4 sm:$0xff]   ;;  %v15852_v19 = vld [vmem:[%s17388_s15 + $0x1c24] ss:$16 sps:$4 sm:$0xff]  }
 0x3e7   : > { %10679 = vmatpush1.bf16.msra.mxu0 %v15751_v20  ;;  %11754 = vmatpush1.bf16.msra.mxu1 %v15754_v21  ;;  %v15855_v20 = vld [vmem:[%s17388_s15 + $0x1c2c] ss:$16 sps:$4 sm:$0xff]  }
 0x3e8   : > { %10680 = vmatprep.subr.bf16.mxu0 %v15759_v22  ;;  %11755 = vmatprep.subr.bf16.mxu1 %v15762_v23  ;;  %v15942_v21 = vld [vmem:[%s17386_s12 + $0x74] ss:$196 sps:$4 sm:$0xff]  }
 0x3e9   : > { %v15850_v22 = vld [vmem:[%s17388_s15 + $0x1c20] ss:$16 sps:$4 sm:$0xff]   ;;  %v15853_v23 = vld [vmem:[%s17388_s15 + $0x1c28] ss:$16 sps:$4 sm:$0xff]  }
 0x3eb   : > { %10681 = vmatpush1.bf16.msra.mxu0 %v15757_v24  ;;  %11756 = vmatpush1.bf16.msra.mxu1 %v15760_v25  ;;  %v15858_v24 = vld [vmem:[%s17388_s15 + $0x1c44] ss:$16 sps:$4 sm:$0xff]   ;;  %v15861_v25 = vld [vmem:[%s17388_s15 + $0x1c4c] ss:$16 sps:$4 sm:$0xff]  }
 0x3ec   : > { %10682 = vmatprep.subr.bf16.mxu0 %v15765_v26  ;;  %11757 = vmatprep.subr.bf16.mxu1 %v15768_v27  ;;  %v15856_v26 = vld [vmem:[%s17388_s15 + $0x1c40] ss:$16 sps:$4 sm:$0xff]   ;;  %v15859_v27 = vld [vmem:[%s17388_s15 + $0x1c48] ss:$16 sps:$4 sm:$0xff]  }
 0x3ef   : > { %10683 = vmatpush1.bf16.msra.mxu0 %v15763_v28  ;;  %11758 = vmatpush1.bf16.msra.mxu1 %v15766_v29  ;;  %v15864_v28 = vld [vmem:[%s17388_s15 + $0x1c64] ss:$16 sps:$4 sm:$0xff]   ;;  %v15867_v29 = vld [vmem:[%s17388_s15 + $0x1c6c] ss:$16 sps:$4 sm:$0xff]  }
 0x3f0   : > { %10684 = vmatprep.subr.bf16.mxu0 %v15771_v30  ;;  %11759 = vmatprep.subr.bf16.mxu1 %v15774_v31  ;;  %v15862_v30 = vld [vmem:[%s17388_s15 + $0x1c60] ss:$16 sps:$4 sm:$0xff]   ;;  %v15865_v31 = vld [vmem:[%s17388_s15 + $0x1c68] ss:$16 sps:$4 sm:$0xff]  }
 0x3f3   : > { %10685 = vmatpush1.bf16.msra.mxu0 %v15769_v32  ;;  %11760 = vmatpush1.bf16.msra.mxu1 %v15772_v33  ;;  %v15870_v32 = vld [vmem:[%s17388_s15 + $0x1c84] ss:$16 sps:$4 sm:$0xff]   ;;  %v15873_v33 = vld [vmem:[%s17388_s15 + $0x1c8c] ss:$16 sps:$4 sm:$0xff]  }
 0x3f4   : > { %10686 = vmatprep.subr.bf16.mxu0 %v15777_v34  ;;  %11761 = vmatprep.subr.bf16.mxu1 %v15780_v35  ;;  %v15868_v34 = vld [vmem:[%s17388_s15 + $0x1c80] ss:$16 sps:$4 sm:$0xff]   ;;  %v15871_v35 = vld [vmem:[%s17388_s15 + $0x1c88] ss:$16 sps:$4 sm:$0xff]  }
 0x3f7   : > { %10687 = vmatpush1.bf16.msra.mxu0 %v15775_v36  ;;  %11762 = vmatpush1.bf16.msra.mxu1 %v15778_v37  ;;  %v15876_v36 = vld [vmem:[%s17388_s15 + $0x1ca4] ss:$16 sps:$4 sm:$0xff]   ;;  %v15879_v37 = vld [vmem:[%s17388_s15 + $0x1cac] ss:$16 sps:$4 sm:$0xff]  }
 0x3f8   : > { %10688 = vmatprep.subr.bf16.mxu0 %v15783_v38  ;;  %11763 = vmatprep.subr.bf16.mxu1 %v15786_v39  ;;  %v15874_v38 = vld [vmem:[%s17388_s15 + $0x1ca0] ss:$16 sps:$4 sm:$0xff]   ;;  %v15877_v39 = vld [vmem:[%s17388_s15 + $0x1ca8] ss:$16 sps:$4 sm:$0xff]  }
 0x3fb   : > { %10689 = vmatpush1.bf16.msra.mxu0 %v15781_v40  ;;  %11764 = vmatpush1.bf16.msra.mxu1 %v15784_v41  ;;  %v15882_v40 = vld [vmem:[%s17388_s15 + $0x1cc4] ss:$16 sps:$4 sm:$0xff]   ;;  %v15885_v41 = vld [vmem:[%s17388_s15 + $0x1ccc] ss:$16 sps:$4 sm:$0xff]  }
 0x3fc   : > { %10690 = vmatprep.subr.bf16.mxu0 %v15789_v42  ;;  %11765 = vmatprep.subr.bf16.mxu1 %v15792_v43  ;;  %v15880_v42 = vld [vmem:[%s17388_s15 + $0x1cc0] ss:$16 sps:$4 sm:$0xff]   ;;  %v15883_v43 = vld [vmem:[%s17388_s15 + $0x1cc8] ss:$16 sps:$4 sm:$0xff]  }
 0x3ff   : > { %10691 = vmatpush1.bf16.msra.mxu0 %v15787_v44  ;;  %11766 = vmatpush1.bf16.msra.mxu1 %v15790_v45  ;;  %v15888_v44 = vld [vmem:[%s17388_s15 + $0x1ce4] ss:$16 sps:$4 sm:$0xff]   ;;  %v15891_v45 = vld [vmem:[%s17388_s15 + $0x1cec] ss:$16 sps:$4 sm:$0xff]  }
 0x400   : > { %10692 = vmatprep.subr.bf16.mxu0 %v15795_v46  ;;  %11767 = vmatprep.subr.bf16.mxu1 %v15798_v47  ;;  %v15886_v46 = vld [vmem:[%s17388_s15 + $0x1ce0] ss:$16 sps:$4 sm:$0xff]   ;;  %v15889_v47 = vld [vmem:[%s17388_s15 + $0x1ce8] ss:$16 sps:$4 sm:$0xff]  }
 0x403   : > { %10693 = vmatpush1.bf16.msra.mxu0 %v15793_v48  ;;  %11768 = vmatpush1.bf16.msra.mxu1 %v15796_v49  ;;  %v15894_v48 = vld [vmem:[%s17388_s15 + $0x1d04] ss:$16 sps:$4 sm:$0xff]   ;;  %v15897_v49 = vld [vmem:[%s17388_s15 + $0x1d0c] ss:$16 sps:$4 sm:$0xff]  }
 0x404   : > { %10694 = vmatprep.subr.bf16.mxu0 %v15801_v50  ;;  %11769 = vmatprep.subr.bf16.mxu1 %v15804_v51  ;;  %v15892_v50 = vld [vmem:[%s17388_s15 + $0x1d00] ss:$16 sps:$4 sm:$0xff]   ;;  %v15895_v51 = vld [vmem:[%s17388_s15 + $0x1d08] ss:$16 sps:$4 sm:$0xff]  }
 0x407   : > { %10695 = vmatpush1.bf16.msra.mxu0 %v15799_v52  ;;  %11770 = vmatpush1.bf16.msra.mxu1 %v15802_v53  ;;  %v15900_v52 = vld [vmem:[%s17388_s15 + $0x1d24] ss:$16 sps:$4 sm:$0xff]   ;;  %v15903_v53 = vld [vmem:[%s17388_s15 + $0x1d2c] ss:$16 sps:$4 sm:$0xff]  }
 0x408   : > { %10696 = vmatprep.subr.bf16.mxu0 %v15807_v54  ;;  %11771 = vmatprep.subr.bf16.mxu1 %v15810_v55  ;;  %v15898_v54 = vld [vmem:[%s17388_s15 + $0x1d20] ss:$16 sps:$4 sm:$0xff]   ;;  %v15901_v55 = vld [vmem:[%s17388_s15 + $0x1d28] ss:$16 sps:$4 sm:$0xff]  }
 0x40b   : > { %10697 = vmatpush1.bf16.msra.mxu0 %v15805_v56  ;;  %11772 = vmatpush1.bf16.msra.mxu1 %v15808_v57  ;;  %v15906_v56 = vld [vmem:[%s17388_s15 + $0x1d44] ss:$16 sps:$4 sm:$0xff]   ;;  %v15909_v57 = vld [vmem:[%s17388_s15 + $0x1d4c] ss:$16 sps:$4 sm:$0xff]  }
 0x40c   : > { %10698 = vmatprep.subr.bf16.mxu0 %v15813_v58  ;;  %11773 = vmatprep.subr.bf16.mxu1 %v15816_v59  ;;  %v15904_v58 = vld [vmem:[%s17388_s15 + $0x1d40] ss:$16 sps:$4 sm:$0xff]   ;;  %v15907_v59 = vld [vmem:[%s17388_s15 + $0x1d48] ss:$16 sps:$4 sm:$0xff]  }
 0x40f   : > { %10699 = vmatpush1.bf16.msra.mxu0 %v15811_v60  ;;  %11774 = vmatpush1.bf16.msra.mxu1 %v15814_v61  ;;  %v15912_v60 = vld [vmem:[%s17388_s15 + $0x1d64] ss:$16 sps:$4 sm:$0xff]   ;;  %v15915_v61 = vld [vmem:[%s17388_s15 + $0x1d6c] ss:$16 sps:$4 sm:$0xff]  }
 0x410   : > { %10700 = vmatprep.subr.bf16.mxu0 %v15819_v62  ;;  %11775 = vmatprep.subr.bf16.mxu1 %v15822_v63  ;;  %v15910_v62 = vld [vmem:[%s17388_s15 + $0x1d60] ss:$16 sps:$4 sm:$0xff]   ;;  %v15913_v63 = vld [vmem:[%s17388_s15 + $0x1d68] ss:$16 sps:$4 sm:$0xff]  }
 0x413   : > { %10701 = vmatpush1.bf16.msra.mxu0 %v15817_v0  ;;  %11776 = vmatpush1.bf16.msra.mxu1 %v15820_v1  ;;  %v15918_v0 = vld [vmem:[%s17388_s15 + $0x1d84] ss:$16 sps:$4 sm:$0xff]   ;;  %v15921_v1 = vld [vmem:[%s17388_s15 + $0x1d8c] ss:$16 sps:$4 sm:$0xff]  }
 0x414   : > { %10702 = vmatprep.subr.bf16.mxu0 %v15825_v2  ;;  %11777 = vmatprep.subr.bf16.mxu1 %v15828_v3  ;;  %v15916_v2 = vld [vmem:[%s17388_s15 + $0x1d80] ss:$16 sps:$4 sm:$0xff]   ;;  %v15919_v3 = vld [vmem:[%s17388_s15 + $0x1d88] ss:$16 sps:$4 sm:$0xff]  }
 0x417   : > { %10703 = vmatpush1.bf16.msra.mxu0 %v15823_v4  ;;  %11778 = vmatpush1.bf16.msra.mxu1 %v15826_v5  ;;  %v15924_v4 = vld [vmem:[%s17388_s15 + $0x1da4] ss:$16 sps:$4 sm:$0xff]   ;;  %v15927_v5 = vld [vmem:[%s17388_s15 + $0x1dac] ss:$16 sps:$4 sm:$0xff]  }
 0x418   : > { %10704 = vmatprep.subr.bf16.mxu0 %v15831_v6  ;;  %11779 = vmatprep.subr.bf16.mxu1 %v15834_v7  ;;  %v15922_v6 = vld [vmem:[%s17388_s15 + $0x1da0] ss:$16 sps:$4 sm:$0xff]   ;;  %v15925_v7 = vld [vmem:[%s17388_s15 + $0x1da8] ss:$16 sps:$4 sm:$0xff]  }
 0x41b   : > { %10705 = vmatpush1.bf16.msra.mxu0 %v15829_v8  ;;  %11780 = vmatpush1.bf16.msra.mxu1 %v15832_v9  ;;  %v15930_v8 = vld [vmem:[%s17388_s15 + $0x1dc4] ss:$16 sps:$4 sm:$0xff]   ;;  %v15933_v9 = vld [vmem:[%s17388_s15 + $0x1dcc] ss:$16 sps:$4 sm:$0xff]  }
 0x41c   : > { %10706 = vmatprep.subr.bf16.mxu0 %v15837_v10  ;;  %11781 = vmatprep.subr.bf16.mxu1 %v15840_v11  ;;  %v15928_v10 = vld [vmem:[%s17388_s15 + $0x1dc0] ss:$16 sps:$4 sm:$0xff]   ;;  %v15931_v11 = vld [vmem:[%s17388_s15 + $0x1dc8] ss:$16 sps:$4 sm:$0xff]  }
 0x41f   : > { %10707 = vmatpush1.bf16.msra.mxu0 %v15835_v12  ;;  %11782 = vmatpush1.bf16.msra.mxu1 %v15838_v13  ;;  %v15936_v12 = vld [vmem:[%s17388_s15 + $0x1de4] ss:$16 sps:$4 sm:$0xff]   ;;  %v15939_v13 = vld [vmem:[%s17388_s15 + $0x1dec] ss:$16 sps:$4 sm:$0xff]  }
 0x420   : > { %10719 = vmatprep.subr.bf16.mxu0 %v15846_v14  ;;  %11794 = vmatprep.subr.bf16.mxu1 %v15849_v15  ;;  %v15934_v14 = vld [vmem:[%s17388_s15 + $0x1de0] ss:$16 sps:$4 sm:$0xff]   ;;  %v15937_v15 = vld [vmem:[%s17388_s15 + $0x1de8] ss:$16 sps:$4 sm:$0xff]  }
 0x422   : > { %10709 = vmatmul.mubr.bf16.vlgmr.msra.gmra.mrb[0].mxu0 %v15841_v16  ;;  %11784 = vmatmul.mubr.bf16.vlgmr.msra.gmra.mrb[0].mxu1 %v15841_v16  ;;  %v15945_v16 = vld [vmem:[%s17388_s15 + $0x1e04] ss:$16 sps:$4 sm:$0xff]  }
 0x423   : > { %10720 = vmatpush1.bf16.msra.mxu0 %v15844_v17  ;;  %11795 = vmatpush1.bf16.msra.mxu1 %v15847_v18  ;;  %v15948_v17 = vld [vmem:[%s17388_s15 + $0x1e0c] ss:$16 sps:$4 sm:$0xff]  }
 0x424   : > { %10721 = vmatprep.subr.bf16.mxu0 %v15852_v19  ;;  %11796 = vmatprep.subr.bf16.mxu1 %v15855_v20  ;;  %v15940_v18 = vld [vmem:[%s17386_s12 + $0x70] ss:$196 sps:$4 sm:$0xff]  }
 0x425   : > { %10751 = vmatprep.mubr.bf16.mxu0 %v15942_v21  ;;  %11826 = vmatprep.mubr.bf16.mxu1 %v15942_v21  ;;  %v15943_v19 = vld [vmem:[%s17388_s15 + $0x1e00] ss:$16 sps:$4 sm:$0xff]   ;;  %v15946_v20 = vld [vmem:[%s17388_s15 + $0x1e08] ss:$16 sps:$4 sm:$0xff]   ;;  %v15951_v21 = vld [vmem:[%s17388_s15 + $0x1e24] ss:$16 sps:$4 sm:$0xff]  }
 0x427   : > { %10722 = vmatpush1.bf16.msra.mxu0 %v15850_v22  ;;  %11797 = vmatpush1.bf16.msra.mxu1 %v15853_v23  ;;  %v15954_v22 = vld [vmem:[%s17388_s15 + $0x1e2c] ss:$16 sps:$4 sm:$0xff]  }
 0x428   : > { %10723 = vmatprep.subr.bf16.mxu0 %v15858_v24  ;;  %11798 = vmatprep.subr.bf16.mxu1 %v15861_v25  ;;  %v16041_v23 = vld [vmem:[%s17386_s12 + $0x7c] ss:$196 sps:$4 sm:$0xff]  }
 0x429   : > { %v15949_v24 = vld [vmem:[%s17388_s15 + $0x1e20] ss:$16 sps:$4 sm:$0xff]   ;;  %v15952_v25 = vld [vmem:[%s17388_s15 + $0x1e28] ss:$16 sps:$4 sm:$0xff]  }
 0x42b   : > { %10724 = vmatpush1.bf16.msra.mxu0 %v15856_v26  ;;  %11799 = vmatpush1.bf16.msra.mxu1 %v15859_v27  ;;  %v15957_v26 = vld [vmem:[%s17388_s15 + $0x1e44] ss:$16 sps:$4 sm:$0xff]   ;;  %v15960_v27 = vld [vmem:[%s17388_s15 + $0x1e4c] ss:$16 sps:$4 sm:$0xff]  }
 0x42c   : > { %10725 = vmatprep.subr.bf16.mxu0 %v15864_v28  ;;  %11800 = vmatprep.subr.bf16.mxu1 %v15867_v29  ;;  %v15955_v28 = vld [vmem:[%s17388_s15 + $0x1e40] ss:$16 sps:$4 sm:$0xff]   ;;  %v15958_v29 = vld [vmem:[%s17388_s15 + $0x1e48] ss:$16 sps:$4 sm:$0xff]  }
 0x42f   : > { %10726 = vmatpush1.bf16.msra.mxu0 %v15862_v30  ;;  %11801 = vmatpush1.bf16.msra.mxu1 %v15865_v31  ;;  %v15963_v30 = vld [vmem:[%s17388_s15 + $0x1e64] ss:$16 sps:$4 sm:$0xff]   ;;  %v15966_v31 = vld [vmem:[%s17388_s15 + $0x1e6c] ss:$16 sps:$4 sm:$0xff]  }
 0x430   : > { %10727 = vmatprep.subr.bf16.mxu0 %v15870_v32  ;;  %11802 = vmatprep.subr.bf16.mxu1 %v15873_v33  ;;  %v15961_v32 = vld [vmem:[%s17388_s15 + $0x1e60] ss:$16 sps:$4 sm:$0xff]   ;;  %v15964_v33 = vld [vmem:[%s17388_s15 + $0x1e68] ss:$16 sps:$4 sm:$0xff]  }
 0x433   : > { %10728 = vmatpush1.bf16.msra.mxu0 %v15868_v34  ;;  %11803 = vmatpush1.bf16.msra.mxu1 %v15871_v35  ;;  %v15969_v34 = vld [vmem:[%s17388_s15 + $0x1e84] ss:$16 sps:$4 sm:$0xff]   ;;  %v15972_v35 = vld [vmem:[%s17388_s15 + $0x1e8c] ss:$16 sps:$4 sm:$0xff]  }
 0x434   : > { %10729 = vmatprep.subr.bf16.mxu0 %v15876_v36  ;;  %11804 = vmatprep.subr.bf16.mxu1 %v15879_v37  ;;  %v15967_v36 = vld [vmem:[%s17388_s15 + $0x1e80] ss:$16 sps:$4 sm:$0xff]   ;;  %v15970_v37 = vld [vmem:[%s17388_s15 + $0x1e88] ss:$16 sps:$4 sm:$0xff]  }
 0x437   : > { %10730 = vmatpush1.bf16.msra.mxu0 %v15874_v38  ;;  %11805 = vmatpush1.bf16.msra.mxu1 %v15877_v39  ;;  %v15975_v38 = vld [vmem:[%s17388_s15 + $0x1ea4] ss:$16 sps:$4 sm:$0xff]   ;;  %v15978_v39 = vld [vmem:[%s17388_s15 + $0x1eac] ss:$16 sps:$4 sm:$0xff]  }
 0x438   : > { %10731 = vmatprep.subr.bf16.mxu0 %v15882_v40  ;;  %11806 = vmatprep.subr.bf16.mxu1 %v15885_v41  ;;  %v15973_v40 = vld [vmem:[%s17388_s15 + $0x1ea0] ss:$16 sps:$4 sm:$0xff]   ;;  %v15976_v41 = vld [vmem:[%s17388_s15 + $0x1ea8] ss:$16 sps:$4 sm:$0xff]  }
 0x43b   : > { %10732 = vmatpush1.bf16.msra.mxu0 %v15880_v42  ;;  %11807 = vmatpush1.bf16.msra.mxu1 %v15883_v43  ;;  %v15981_v42 = vld [vmem:[%s17388_s15 + $0x1ec4] ss:$16 sps:$4 sm:$0xff]   ;;  %v15984_v43 = vld [vmem:[%s17388_s15 + $0x1ecc] ss:$16 sps:$4 sm:$0xff]  }
 0x43c   : > { %10733 = vmatprep.subr.bf16.mxu0 %v15888_v44  ;;  %11808 = vmatprep.subr.bf16.mxu1 %v15891_v45  ;;  %v15979_v44 = vld [vmem:[%s17388_s15 + $0x1ec0] ss:$16 sps:$4 sm:$0xff]   ;;  %v15982_v45 = vld [vmem:[%s17388_s15 + $0x1ec8] ss:$16 sps:$4 sm:$0xff]  }
 0x43f   : > { %10734 = vmatpush1.bf16.msra.mxu0 %v15886_v46  ;;  %11809 = vmatpush1.bf16.msra.mxu1 %v15889_v47  ;;  %v15987_v46 = vld [vmem:[%s17388_s15 + $0x1ee4] ss:$16 sps:$4 sm:$0xff]   ;;  %v15990_v47 = vld [vmem:[%s17388_s15 + $0x1eec] ss:$16 sps:$4 sm:$0xff]  }
 0x440   : > { %10735 = vmatprep.subr.bf16.mxu0 %v15894_v48  ;;  %11810 = vmatprep.subr.bf16.mxu1 %v15897_v49  ;;  %v15985_v48 = vld [vmem:[%s17388_s15 + $0x1ee0] ss:$16 sps:$4 sm:$0xff]   ;;  %v15988_v49 = vld [vmem:[%s17388_s15 + $0x1ee8] ss:$16 sps:$4 sm:$0xff]  }
 0x443   : > { %10736 = vmatpush1.bf16.msra.mxu0 %v15892_v50  ;;  %11811 = vmatpush1.bf16.msra.mxu1 %v15895_v51  ;;  %v15993_v50 = vld [vmem:[%s17388_s15 + $0x1f04] ss:$16 sps:$4 sm:$0xff]   ;;  %v15996_v51 = vld [vmem:[%s17388_s15 + $0x1f0c] ss:$16 sps:$4 sm:$0xff]  }
 0x444   : > { %10737 = vmatprep.subr.bf16.mxu0 %v15900_v52  ;;  %11812 = vmatprep.subr.bf16.mxu1 %v15903_v53  ;;  %v15991_v52 = vld [vmem:[%s17388_s15 + $0x1f00] ss:$16 sps:$4 sm:$0xff]   ;;  %v15994_v53 = vld [vmem:[%s17388_s15 + $0x1f08] ss:$16 sps:$4 sm:$0xff]  }
 0x447   : > { %10738 = vmatpush1.bf16.msra.mxu0 %v15898_v54  ;;  %11813 = vmatpush1.bf16.msra.mxu1 %v15901_v55  ;;  %v15999_v54 = vld [vmem:[%s17388_s15 + $0x1f24] ss:$16 sps:$4 sm:$0xff]   ;;  %v16002_v55 = vld [vmem:[%s17388_s15 + $0x1f2c] ss:$16 sps:$4 sm:$0xff]  }
 0x448   : > { %10739 = vmatprep.subr.bf16.mxu0 %v15906_v56  ;;  %11814 = vmatprep.subr.bf16.mxu1 %v15909_v57  ;;  %v15997_v56 = vld [vmem:[%s17388_s15 + $0x1f20] ss:$16 sps:$4 sm:$0xff]   ;;  %v16000_v57 = vld [vmem:[%s17388_s15 + $0x1f28] ss:$16 sps:$4 sm:$0xff]  }
 0x44b   : > { %10740 = vmatpush1.bf16.msra.mxu0 %v15904_v58  ;;  %11815 = vmatpush1.bf16.msra.mxu1 %v15907_v59  ;;  %v16005_v58 = vld [vmem:[%s17388_s15 + $0x1f44] ss:$16 sps:$4 sm:$0xff]   ;;  %v16008_v59 = vld [vmem:[%s17388_s15 + $0x1f4c] ss:$16 sps:$4 sm:$0xff]  }
 0x44c   : > { %10741 = vmatprep.subr.bf16.mxu0 %v15912_v60  ;;  %11816 = vmatprep.subr.bf16.mxu1 %v15915_v61  ;;  %v16003_v60 = vld [vmem:[%s17388_s15 + $0x1f40] ss:$16 sps:$4 sm:$0xff]   ;;  %v16006_v61 = vld [vmem:[%s17388_s15 + $0x1f48] ss:$16 sps:$4 sm:$0xff]  }
 0x44f   : > { %10742 = vmatpush1.bf16.msra.mxu0 %v15910_v62  ;;  %11817 = vmatpush1.bf16.msra.mxu1 %v15913_v63  ;;  %v16011_v62 = vld [vmem:[%s17388_s15 + $0x1f64] ss:$16 sps:$4 sm:$0xff]   ;;  %v16014_v63 = vld [vmem:[%s17388_s15 + $0x1f6c] ss:$16 sps:$4 sm:$0xff]  }
 0x450   : > { %10743 = vmatprep.subr.bf16.mxu0 %v15918_v0  ;;  %11818 = vmatprep.subr.bf16.mxu1 %v15921_v1  ;;  %v16009_v0 = vld [vmem:[%s17388_s15 + $0x1f60] ss:$16 sps:$4 sm:$0xff]   ;;  %v16012_v1 = vld [vmem:[%s17388_s15 + $0x1f68] ss:$16 sps:$4 sm:$0xff]  }
 0x453   : > { %10744 = vmatpush1.bf16.msra.mxu0 %v15916_v2  ;;  %11819 = vmatpush1.bf16.msra.mxu1 %v15919_v3  ;;  %v16017_v2 = vld [vmem:[%s17388_s15 + $0x1f84] ss:$16 sps:$4 sm:$0xff]   ;;  %v16020_v3 = vld [vmem:[%s17388_s15 + $0x1f8c] ss:$16 sps:$4 sm:$0xff]  }
 0x454   : > { %10745 = vmatprep.subr.bf16.mxu0 %v15924_v4  ;;  %11820 = vmatprep.subr.bf16.mxu1 %v15927_v5  ;;  %v16015_v4 = vld [vmem:[%s17388_s15 + $0x1f80] ss:$16 sps:$4 sm:$0xff]   ;;  %v16018_v5 = vld [vmem:[%s17388_s15 + $0x1f88] ss:$16 sps:$4 sm:$0xff]  }
 0x457   : > { %10746 = vmatpush1.bf16.msra.mxu0 %v15922_v6  ;;  %11821 = vmatpush1.bf16.msra.mxu1 %v15925_v7  ;;  %v16023_v6 = vld [vmem:[%s17388_s15 + $0x1fa4] ss:$16 sps:$4 sm:$0xff]   ;;  %v16026_v7 = vld [vmem:[%s17388_s15 + $0x1fac] ss:$16 sps:$4 sm:$0xff]  }
 0x458   : > { %10747 = vmatprep.subr.bf16.mxu0 %v15930_v8  ;;  %11822 = vmatprep.subr.bf16.mxu1 %v15933_v9  ;;  %v16021_v8 = vld [vmem:[%s17388_s15 + $0x1fa0] ss:$16 sps:$4 sm:$0xff]   ;;  %v16024_v9 = vld [vmem:[%s17388_s15 + $0x1fa8] ss:$16 sps:$4 sm:$0xff]  }
 0x45b   : > { %10748 = vmatpush1.bf16.msra.mxu0 %v15928_v10  ;;  %11823 = vmatpush1.bf16.msra.mxu1 %v15931_v11  ;;  %v16029_v10 = vld [vmem:[%s17388_s15 + $0x1fc4] ss:$16 sps:$4 sm:$0xff]   ;;  %v16032_v11 = vld [vmem:[%s17388_s15 + $0x1fcc] ss:$16 sps:$4 sm:$0xff]  }
 0x45c   : > { %10749 = vmatprep.subr.bf16.mxu0 %v15936_v12  ;;  %11824 = vmatprep.subr.bf16.mxu1 %v15939_v13  ;;  %v16027_v12 = vld [vmem:[%s17388_s15 + $0x1fc0] ss:$16 sps:$4 sm:$0xff]   ;;  %v16030_v13 = vld [vmem:[%s17388_s15 + $0x1fc8] ss:$16 sps:$4 sm:$0xff]  }
 0x45f   : > { %10750 = vmatpush1.bf16.msra.mxu0 %v15934_v14  ;;  %11825 = vmatpush1.bf16.msra.mxu1 %v15937_v15  ;;  %v16035_v14 = vld [vmem:[%s17388_s15 + $0x1fe4] ss:$16 sps:$4 sm:$0xff]   ;;  %v16038_v15 = vld [vmem:[%s17388_s15 + $0x1fec] ss:$16 sps:$4 sm:$0xff]  }
 0x460   : > { %10762 = vmatprep.subr.bf16.mxu0 %v15945_v16  ;;  %11837 = vmatprep.subr.bf16.mxu1 %v15948_v17  ;;  %v16033_v16 = vld [vmem:[%s17388_s15 + $0x1fe0] ss:$16 sps:$4 sm:$0xff]   ;;  %v16036_v17 = vld [vmem:[%s17388_s15 + $0x1fe8] ss:$16 sps:$4 sm:$0xff]  }
 0x462   : > { %10752 = vmatmul.mubr.bf16.vlgmr.msra.gmra.mrb[0].mxu0 %v15940_v18  ;;  %11827 = vmatmul.mubr.bf16.vlgmr.msra.gmra.mrb[0].mxu1 %v15940_v18  ;;  %v16044_v18 = vld [vmem:[%s17388_s15 + $0x2004] ss:$16 sps:$4 sm:$0xff]  }
 0x463   : > { %10763 = vmatpush1.bf16.msra.mxu0 %v15943_v19  ;;  %11838 = vmatpush1.bf16.msra.mxu1 %v15946_v20  ;;  %v16047_v19 = vld [vmem:[%s17388_s15 + $0x200c] ss:$16 sps:$4 sm:$0xff]  }
 0x464   : > { %10764 = vmatprep.subr.bf16.mxu0 %v15951_v21  ;;  %11839 = vmatprep.subr.bf16.mxu1 %v15954_v22  ;;  %v16039_v20 = vld [vmem:[%s17386_s12 + $0x78] ss:$196 sps:$4 sm:$0xff]  }
 0x465   : > { %10794 = vmatprep.mubr.bf16.mxu0 %v16041_v23  ;;  %11869 = vmatprep.mubr.bf16.mxu1 %v16041_v23  ;;  %v16042_v21 = vld [vmem:[%s17388_s15 + $0x2000] ss:$16 sps:$4 sm:$0xff]   ;;  %v16045_v22 = vld [vmem:[%s17388_s15 + $0x2008] ss:$16 sps:$4 sm:$0xff]   ;;  %v16050_v23 = vld [vmem:[%s17388_s15 + $0x2024] ss:$16 sps:$4 sm:$0xff]  }
 0x467   : > { %10765 = vmatpush1.bf16.msra.mxu0 %v15949_v24  ;;  %11840 = vmatpush1.bf16.msra.mxu1 %v15952_v25  ;;  %v16053_v24 = vld [vmem:[%s17388_s15 + $0x202c] ss:$16 sps:$4 sm:$0xff]  }
 0x468   : > { %10766 = vmatprep.subr.bf16.mxu0 %v15957_v26  ;;  %11841 = vmatprep.subr.bf16.mxu1 %v15960_v27  ;;  %v16140_v25 = vld [vmem:[%s17386_s12 + $0x84] ss:$196 sps:$4 sm:$0xff]  }
 0x469   : > { %v16048_v26 = vld [vmem:[%s17388_s15 + $0x2020] ss:$16 sps:$4 sm:$0xff]   ;;  %v16051_v27 = vld [vmem:[%s17388_s15 + $0x2028] ss:$16 sps:$4 sm:$0xff]  }
 0x46b   : > { %10767 = vmatpush1.bf16.msra.mxu0 %v15955_v28  ;;  %11842 = vmatpush1.bf16.msra.mxu1 %v15958_v29  ;;  %v16056_v28 = vld [vmem:[%s17388_s15 + $0x2044] ss:$16 sps:$4 sm:$0xff]   ;;  %v16059_v29 = vld [vmem:[%s17388_s15 + $0x204c] ss:$16 sps:$4 sm:$0xff]  }
 0x46c   : > { %10768 = vmatprep.subr.bf16.mxu0 %v15963_v30  ;;  %11843 = vmatprep.subr.bf16.mxu1 %v15966_v31  ;;  %v16054_v30 = vld [vmem:[%s17388_s15 + $0x2040] ss:$16 sps:$4 sm:$0xff]   ;;  %v16057_v31 = vld [vmem:[%s17388_s15 + $0x2048] ss:$16 sps:$4 sm:$0xff]  }
 0x46f   : > { %10769 = vmatpush1.bf16.msra.mxu0 %v15961_v32  ;;  %11844 = vmatpush1.bf16.msra.mxu1 %v15964_v33  ;;  %v16062_v32 = vld [vmem:[%s17388_s15 + $0x2064] ss:$16 sps:$4 sm:$0xff]   ;;  %v16065_v33 = vld [vmem:[%s17388_s15 + $0x206c] ss:$16 sps:$4 sm:$0xff]  }
 0x470   : > { %10770 = vmatprep.subr.bf16.mxu0 %v15969_v34  ;;  %11845 = vmatprep.subr.bf16.mxu1 %v15972_v35  ;;  %v16060_v34 = vld [vmem:[%s17388_s15 + $0x2060] ss:$16 sps:$4 sm:$0xff]   ;;  %v16063_v35 = vld [vmem:[%s17388_s15 + $0x2068] ss:$16 sps:$4 sm:$0xff]  }
 0x473   : > { %10771 = vmatpush1.bf16.msra.mxu0 %v15967_v36  ;;  %11846 = vmatpush1.bf16.msra.mxu1 %v15970_v37  ;;  %v16068_v36 = vld [vmem:[%s17388_s15 + $0x2084] ss:$16 sps:$4 sm:$0xff]   ;;  %v16071_v37 = vld [vmem:[%s17388_s15 + $0x208c] ss:$16 sps:$4 sm:$0xff]  }
 0x474   : > { %10772 = vmatprep.subr.bf16.mxu0 %v15975_v38  ;;  %11847 = vmatprep.subr.bf16.mxu1 %v15978_v39  ;;  %v16066_v38 = vld [vmem:[%s17388_s15 + $0x2080] ss:$16 sps:$4 sm:$0xff]   ;;  %v16069_v39 = vld [vmem:[%s17388_s15 + $0x2088] ss:$16 sps:$4 sm:$0xff]  }
 0x477   : > { %10773 = vmatpush1.bf16.msra.mxu0 %v15973_v40  ;;  %11848 = vmatpush1.bf16.msra.mxu1 %v15976_v41  ;;  %v16074_v40 = vld [vmem:[%s17388_s15 + $0x20a4] ss:$16 sps:$4 sm:$0xff]   ;;  %v16077_v41 = vld [vmem:[%s17388_s15 + $0x20ac] ss:$16 sps:$4 sm:$0xff]  }
 0x478   : > { %10774 = vmatprep.subr.bf16.mxu0 %v15981_v42  ;;  %11849 = vmatprep.subr.bf16.mxu1 %v15984_v43  ;;  %v16072_v42 = vld [vmem:[%s17388_s15 + $0x20a0] ss:$16 sps:$4 sm:$0xff]   ;;  %v16075_v43 = vld [vmem:[%s17388_s15 + $0x20a8] ss:$16 sps:$4 sm:$0xff]  }
 0x47b   : > { %10775 = vmatpush1.bf16.msra.mxu0 %v15979_v44  ;;  %11850 = vmatpush1.bf16.msra.mxu1 %v15982_v45  ;;  %v16080_v44 = vld [vmem:[%s17388_s15 + $0x20c4] ss:$16 sps:$4 sm:$0xff]   ;;  %v16083_v45 = vld [vmem:[%s17388_s15 + $0x20cc] ss:$16 sps:$4 sm:$0xff]  }
 0x47c   : > { %10776 = vmatprep.subr.bf16.mxu0 %v15987_v46  ;;  %11851 = vmatprep.subr.bf16.mxu1 %v15990_v47  ;;  %v16078_v46 = vld [vmem:[%s17388_s15 + $0x20c0] ss:$16 sps:$4 sm:$0xff]   ;;  %v16081_v47 = vld [vmem:[%s17388_s15 + $0x20c8] ss:$16 sps:$4 sm:$0xff]  }
 0x47f   : > { %10777 = vmatpush1.bf16.msra.mxu0 %v15985_v48  ;;  %11852 = vmatpush1.bf16.msra.mxu1 %v15988_v49  ;;  %v16086_v48 = vld [vmem:[%s17388_s15 + $0x20e4] ss:$16 sps:$4 sm:$0xff]   ;;  %v16089_v49 = vld [vmem:[%s17388_s15 + $0x20ec] ss:$16 sps:$4 sm:$0xff]  }
 0x480   : > { %10778 = vmatprep.subr.bf16.mxu0 %v15993_v50  ;;  %11853 = vmatprep.subr.bf16.mxu1 %v15996_v51  ;;  %v16084_v50 = vld [vmem:[%s17388_s15 + $0x20e0] ss:$16 sps:$4 sm:$0xff]   ;;  %v16087_v51 = vld [vmem:[%s17388_s15 + $0x20e8] ss:$16 sps:$4 sm:$0xff]  }
 0x483   : > { %10779 = vmatpush1.bf16.msra.mxu0 %v15991_v52  ;;  %11854 = vmatpush1.bf16.msra.mxu1 %v15994_v53  ;;  %v16092_v52 = vld [vmem:[%s17388_s15 + $0x2104] ss:$16 sps:$4 sm:$0xff]   ;;  %v16095_v53 = vld [vmem:[%s17388_s15 + $0x210c] ss:$16 sps:$4 sm:$0xff]  }
 0x484   : > { %10780 = vmatprep.subr.bf16.mxu0 %v15999_v54  ;;  %11855 = vmatprep.subr.bf16.mxu1 %v16002_v55  ;;  %v16090_v54 = vld [vmem:[%s17388_s15 + $0x2100] ss:$16 sps:$4 sm:$0xff]   ;;  %v16093_v55 = vld [vmem:[%s17388_s15 + $0x2108] ss:$16 sps:$4 sm:$0xff]  }
 0x487   : > { %10781 = vmatpush1.bf16.msra.mxu0 %v15997_v56  ;;  %11856 = vmatpush1.bf16.msra.mxu1 %v16000_v57  ;;  %v16098_v56 = vld [vmem:[%s17388_s15 + $0x2124] ss:$16 sps:$4 sm:$0xff]   ;;  %v16101_v57 = vld [vmem:[%s17388_s15 + $0x212c] ss:$16 sps:$4 sm:$0xff]  }
 0x488   : > { %10782 = vmatprep.subr.bf16.mxu0 %v16005_v58  ;;  %11857 = vmatprep.subr.bf16.mxu1 %v16008_v59  ;;  %v16096_v58 = vld [vmem:[%s17388_s15 + $0x2120] ss:$16 sps:$4 sm:$0xff]   ;;  %v16099_v59 = vld [vmem:[%s17388_s15 + $0x2128] ss:$16 sps:$4 sm:$0xff]  }
 0x48b   : > { %10783 = vmatpush1.bf16.msra.mxu0 %v16003_v60  ;;  %11858 = vmatpush1.bf16.msra.mxu1 %v16006_v61  ;;  %v16104_v60 = vld [vmem:[%s17388_s15 + $0x2144] ss:$16 sps:$4 sm:$0xff]   ;;  %v16107_v61 = vld [vmem:[%s17388_s15 + $0x214c] ss:$16 sps:$4 sm:$0xff]  }
 0x48c   : > { %10784 = vmatprep.subr.bf16.mxu0 %v16011_v62  ;;  %11859 = vmatprep.subr.bf16.mxu1 %v16014_v63  ;;  %v16102_v62 = vld [vmem:[%s17388_s15 + $0x2140] ss:$16 sps:$4 sm:$0xff]   ;;  %v16105_v63 = vld [vmem:[%s17388_s15 + $0x2148] ss:$16 sps:$4 sm:$0xff]  }
 0x48f   : > { %10785 = vmatpush1.bf16.msra.mxu0 %v16009_v0  ;;  %11860 = vmatpush1.bf16.msra.mxu1 %v16012_v1  ;;  %v16110_v0 = vld [vmem:[%s17388_s15 + $0x2164] ss:$16 sps:$4 sm:$0xff]   ;;  %v16113_v1 = vld [vmem:[%s17388_s15 + $0x216c] ss:$16 sps:$4 sm:$0xff]  }
 0x490   : > { %10786 = vmatprep.subr.bf16.mxu0 %v16017_v2  ;;  %11861 = vmatprep.subr.bf16.mxu1 %v16020_v3  ;;  %v16108_v2 = vld [vmem:[%s17388_s15 + $0x2160] ss:$16 sps:$4 sm:$0xff]   ;;  %v16111_v3 = vld [vmem:[%s17388_s15 + $0x2168] ss:$16 sps:$4 sm:$0xff]  }
 0x493   : > { %10787 = vmatpush1.bf16.msra.mxu0 %v16015_v4  ;;  %11862 = vmatpush1.bf16.msra.mxu1 %v16018_v5  ;;  %v16116_v4 = vld [vmem:[%s17388_s15 + $0x2184] ss:$16 sps:$4 sm:$0xff]   ;;  %v16119_v5 = vld [vmem:[%s17388_s15 + $0x218c] ss:$16 sps:$4 sm:$0xff]  }
 0x494   : > { %10788 = vmatprep.subr.bf16.mxu0 %v16023_v6  ;;  %11863 = vmatprep.subr.bf16.mxu1 %v16026_v7  ;;  %v16114_v6 = vld [vmem:[%s17388_s15 + $0x2180] ss:$16 sps:$4 sm:$0xff]   ;;  %v16117_v7 = vld [vmem:[%s17388_s15 + $0x2188] ss:$16 sps:$4 sm:$0xff]  }
 0x497   : > { %10789 = vmatpush1.bf16.msra.mxu0 %v16021_v8  ;;  %11864 = vmatpush1.bf16.msra.mxu1 %v16024_v9  ;;  %v16122_v8 = vld [vmem:[%s17388_s15 + $0x21a4] ss:$16 sps:$4 sm:$0xff]   ;;  %v16125_v9 = vld [vmem:[%s17388_s15 + $0x21ac] ss:$16 sps:$4 sm:$0xff]  }
 0x498   : > { %10790 = vmatprep.subr.bf16.mxu0 %v16029_v10  ;;  %11865 = vmatprep.subr.bf16.mxu1 %v16032_v11  ;;  %v16120_v10 = vld [vmem:[%s17388_s15 + $0x21a0] ss:$16 sps:$4 sm:$0xff]   ;;  %v16123_v11 = vld [vmem:[%s17388_s15 + $0x21a8] ss:$16 sps:$4 sm:$0xff]  }
 0x49b   : > { %10791 = vmatpush1.bf16.msra.mxu0 %v16027_v12  ;;  %11866 = vmatpush1.bf16.msra.mxu1 %v16030_v13  ;;  %v16128_v12 = vld [vmem:[%s17388_s15 + $0x21c4] ss:$16 sps:$4 sm:$0xff]   ;;  %v16131_v13 = vld [vmem:[%s17388_s15 + $0x21cc] ss:$16 sps:$4 sm:$0xff]  }
 0x49c   : > { %10792 = vmatprep.subr.bf16.mxu0 %v16035_v14  ;;  %11867 = vmatprep.subr.bf16.mxu1 %v16038_v15  ;;  %v16126_v14 = vld [vmem:[%s17388_s15 + $0x21c0] ss:$16 sps:$4 sm:$0xff]   ;;  %v16129_v15 = vld [vmem:[%s17388_s15 + $0x21c8] ss:$16 sps:$4 sm:$0xff]  }
 0x49f   : > { %10793 = vmatpush1.bf16.msra.mxu0 %v16033_v16  ;;  %11868 = vmatpush1.bf16.msra.mxu1 %v16036_v17  ;;  %v16134_v16 = vld [vmem:[%s17388_s15 + $0x21e4] ss:$16 sps:$4 sm:$0xff]   ;;  %v16137_v17 = vld [vmem:[%s17388_s15 + $0x21ec] ss:$16 sps:$4 sm:$0xff]  }
 0x4a0   : > { %10805 = vmatprep.subr.bf16.mxu0 %v16044_v18  ;;  %11880 = vmatprep.subr.bf16.mxu1 %v16047_v19  ;;  %v16132_v18 = vld [vmem:[%s17388_s15 + $0x21e0] ss:$16 sps:$4 sm:$0xff]   ;;  %v16135_v19 = vld [vmem:[%s17388_s15 + $0x21e8] ss:$16 sps:$4 sm:$0xff]  }
 0x4a2   : > { %10795 = vmatmul.mubr.bf16.vlgmr.msra.gmra.mrb[0].mxu0 %v16039_v20  ;;  %11870 = vmatmul.mubr.bf16.vlgmr.msra.gmra.mrb[0].mxu1 %v16039_v20  ;;  %v16143_v20 = vld [vmem:[%s17388_s15 + $0x2204] ss:$16 sps:$4 sm:$0xff]  }
 0x4a3   : > { %10806 = vmatpush1.bf16.msra.mxu0 %v16042_v21  ;;  %11881 = vmatpush1.bf16.msra.mxu1 %v16045_v22  ;;  %v16146_v21 = vld [vmem:[%s17388_s15 + $0x220c] ss:$16 sps:$4 sm:$0xff]  }
 0x4a4   : > { %10807 = vmatprep.subr.bf16.mxu0 %v16050_v23  ;;  %11882 = vmatprep.subr.bf16.mxu1 %v16053_v24  ;;  %v16138_v22 = vld [vmem:[%s17386_s12 + $0x80] ss:$196 sps:$4 sm:$0xff]  }
 0x4a5   : > { %10837 = vmatprep.mubr.bf16.mxu0 %v16140_v25  ;;  %11912 = vmatprep.mubr.bf16.mxu1 %v16140_v25  ;;  %v16141_v23 = vld [vmem:[%s17388_s15 + $0x2200] ss:$16 sps:$4 sm:$0xff]   ;;  %v16144_v24 = vld [vmem:[%s17388_s15 + $0x2208] ss:$16 sps:$4 sm:$0xff]   ;;  %v16149_v25 = vld [vmem:[%s17388_s15 + $0x2224] ss:$16 sps:$4 sm:$0xff]  }
 0x4a7   : > { %10808 = vmatpush1.bf16.msra.mxu0 %v16048_v26  ;;  %11883 = vmatpush1.bf16.msra.mxu1 %v16051_v27  ;;  %v16152_v26 = vld [vmem:[%s17388_s15 + $0x222c] ss:$16 sps:$4 sm:$0xff]  }
 0x4a8   : > { %10809 = vmatprep.subr.bf16.mxu0 %v16056_v28  ;;  %11884 = vmatprep.subr.bf16.mxu1 %v16059_v29  ;;  %v16239_v27 = vld [vmem:[%s17386_s12 + $0x8c] ss:$196 sps:$4 sm:$0xff]  }
 0x4a9   : > { %v16147_v28 = vld [vmem:[%s17388_s15 + $0x2220] ss:$16 sps:$4 sm:$0xff]   ;;  %v16150_v29 = vld [vmem:[%s17388_s15 + $0x2228] ss:$16 sps:$4 sm:$0xff]  }
 0x4ab   : > { %10810 = vmatpush1.bf16.msra.mxu0 %v16054_v30  ;;  %11885 = vmatpush1.bf16.msra.mxu1 %v16057_v31  ;;  %v16155_v30 = vld [vmem:[%s17388_s15 + $0x2244] ss:$16 sps:$4 sm:$0xff]   ;;  %v16158_v31 = vld [vmem:[%s17388_s15 + $0x224c] ss:$16 sps:$4 sm:$0xff]  }
 0x4ac   : > { %10811 = vmatprep.subr.bf16.mxu0 %v16062_v32  ;;  %11886 = vmatprep.subr.bf16.mxu1 %v16065_v33  ;;  %v16153_v32 = vld [vmem:[%s17388_s15 + $0x2240] ss:$16 sps:$4 sm:$0xff]   ;;  %v16156_v33 = vld [vmem:[%s17388_s15 + $0x2248] ss:$16 sps:$4 sm:$0xff]  }
 0x4af   : > { %10812 = vmatpush1.bf16.msra.mxu0 %v16060_v34  ;;  %11887 = vmatpush1.bf16.msra.mxu1 %v16063_v35  ;;  %v16161_v34 = vld [vmem:[%s17388_s15 + $0x2264] ss:$16 sps:$4 sm:$0xff]   ;;  %v16164_v35 = vld [vmem:[%s17388_s15 + $0x226c] ss:$16 sps:$4 sm:$0xff]  }
 0x4b0   : > { %10813 = vmatprep.subr.bf16.mxu0 %v16068_v36  ;;  %11888 = vmatprep.subr.bf16.mxu1 %v16071_v37  ;;  %v16159_v36 = vld [vmem:[%s17388_s15 + $0x2260] ss:$16 sps:$4 sm:$0xff]   ;;  %v16162_v37 = vld [vmem:[%s17388_s15 + $0x2268] ss:$16 sps:$4 sm:$0xff]  }
 0x4b3   : > { %10814 = vmatpush1.bf16.msra.mxu0 %v16066_v38  ;;  %11889 = vmatpush1.bf16.msra.mxu1 %v16069_v39  ;;  %v16167_v38 = vld [vmem:[%s17388_s15 + $0x2284] ss:$16 sps:$4 sm:$0xff]   ;;  %v16170_v39 = vld [vmem:[%s17388_s15 + $0x228c] ss:$16 sps:$4 sm:$0xff]  }
 0x4b4   : > { %10815 = vmatprep.subr.bf16.mxu0 %v16074_v40  ;;  %11890 = vmatprep.subr.bf16.mxu1 %v16077_v41  ;;  %v16165_v40 = vld [vmem:[%s17388_s15 + $0x2280] ss:$16 sps:$4 sm:$0xff]   ;;  %v16168_v41 = vld [vmem:[%s17388_s15 + $0x2288] ss:$16 sps:$4 sm:$0xff]  }
 0x4b7   : > { %10816 = vmatpush1.bf16.msra.mxu0 %v16072_v42  ;;  %11891 = vmatpush1.bf16.msra.mxu1 %v16075_v43  ;;  %v16173_v42 = vld [vmem:[%s17388_s15 + $0x22a4] ss:$16 sps:$4 sm:$0xff]   ;;  %v16176_v43 = vld [vmem:[%s17388_s15 + $0x22ac] ss:$16 sps:$4 sm:$0xff]  }
 0x4b8   : > { %10817 = vmatprep.subr.bf16.mxu0 %v16080_v44  ;;  %11892 = vmatprep.subr.bf16.mxu1 %v16083_v45  ;;  %v16171_v44 = vld [vmem:[%s17388_s15 + $0x22a0] ss:$16 sps:$4 sm:$0xff]   ;;  %v16174_v45 = vld [vmem:[%s17388_s15 + $0x22a8] ss:$16 sps:$4 sm:$0xff]  }
 0x4bb   : > { %10818 = vmatpush1.bf16.msra.mxu0 %v16078_v46  ;;  %11893 = vmatpush1.bf16.msra.mxu1 %v16081_v47  ;;  %v16179_v46 = vld [vmem:[%s17388_s15 + $0x22c4] ss:$16 sps:$4 sm:$0xff]   ;;  %v16182_v47 = vld [vmem:[%s17388_s15 + $0x22cc] ss:$16 sps:$4 sm:$0xff]  }
 0x4bc   : > { %10819 = vmatprep.subr.bf16.mxu0 %v16086_v48  ;;  %11894 = vmatprep.subr.bf16.mxu1 %v16089_v49  ;;  %v16177_v48 = vld [vmem:[%s17388_s15 + $0x22c0] ss:$16 sps:$4 sm:$0xff]   ;;  %v16180_v49 = vld [vmem:[%s17388_s15 + $0x22c8] ss:$16 sps:$4 sm:$0xff]  }
 0x4bf   : > { %10820 = vmatpush1.bf16.msra.mxu0 %v16084_v50  ;;  %11895 = vmatpush1.bf16.msra.mxu1 %v16087_v51  ;;  %v16185_v50 = vld [vmem:[%s17388_s15 + $0x22e4] ss:$16 sps:$4 sm:$0xff]   ;;  %v16188_v51 = vld [vmem:[%s17388_s15 + $0x22ec] ss:$16 sps:$4 sm:$0xff]  }
 0x4c0   : > { %10821 = vmatprep.subr.bf16.mxu0 %v16092_v52  ;;  %11896 = vmatprep.subr.bf16.mxu1 %v16095_v53  ;;  %v16183_v52 = vld [vmem:[%s17388_s15 + $0x22e0] ss:$16 sps:$4 sm:$0xff]   ;;  %v16186_v53 = vld [vmem:[%s17388_s15 + $0x22e8] ss:$16 sps:$4 sm:$0xff]  }
 0x4c3   : > { %10822 = vmatpush1.bf16.msra.mxu0 %v16090_v54  ;;  %11897 = vmatpush1.bf16.msra.mxu1 %v16093_v55  ;;  %v16191_v54 = vld [vmem:[%s17388_s15 + $0x2304] ss:$16 sps:$4 sm:$0xff]   ;;  %v16194_v55 = vld [vmem:[%s17388_s15 + $0x230c] ss:$16 sps:$4 sm:$0xff]  }
 0x4c4   : > { %10823 = vmatprep.subr.bf16.mxu0 %v16098_v56  ;;  %11898 = vmatprep.subr.bf16.mxu1 %v16101_v57  ;;  %v16189_v56 = vld [vmem:[%s17388_s15 + $0x2300] ss:$16 sps:$4 sm:$0xff]   ;;  %v16192_v57 = vld [vmem:[%s17388_s15 + $0x2308] ss:$16 sps:$4 sm:$0xff]  }
 0x4c7   : > { %10824 = vmatpush1.bf16.msra.mxu0 %v16096_v58  ;;  %11899 = vmatpush1.bf16.msra.mxu1 %v16099_v59  ;;  %v16197_v58 = vld [vmem:[%s17388_s15 + $0x2324] ss:$16 sps:$4 sm:$0xff]   ;;  %v16200_v59 = vld [vmem:[%s17388_s15 + $0x232c] ss:$16 sps:$4 sm:$0xff]  }
 0x4c8   : > { %10825 = vmatprep.subr.bf16.mxu0 %v16104_v60  ;;  %11900 = vmatprep.subr.bf16.mxu1 %v16107_v61  ;;  %v16195_v60 = vld [vmem:[%s17388_s15 + $0x2320] ss:$16 sps:$4 sm:$0xff]   ;;  %v16198_v61 = vld [vmem:[%s17388_s15 + $0x2328] ss:$16 sps:$4 sm:$0xff]  }
 0x4cb   : > { %10826 = vmatpush1.bf16.msra.mxu0 %v16102_v62  ;;  %11901 = vmatpush1.bf16.msra.mxu1 %v16105_v63  ;;  %v16203_v62 = vld [vmem:[%s17388_s15 + $0x2344] ss:$16 sps:$4 sm:$0xff]   ;;  %v16206_v63 = vld [vmem:[%s17388_s15 + $0x234c] ss:$16 sps:$4 sm:$0xff]  }
 0x4cc   : > { %10827 = vmatprep.subr.bf16.mxu0 %v16110_v0  ;;  %11902 = vmatprep.subr.bf16.mxu1 %v16113_v1  ;;  %v16201_v0 = vld [vmem:[%s17388_s15 + $0x2340] ss:$16 sps:$4 sm:$0xff]   ;;  %v16204_v1 = vld [vmem:[%s17388_s15 + $0x2348] ss:$16 sps:$4 sm:$0xff]  }
 0x4cf   : > { %10828 = vmatpush1.bf16.msra.mxu0 %v16108_v2  ;;  %11903 = vmatpush1.bf16.msra.mxu1 %v16111_v3  ;;  %v16209_v2 = vld [vmem:[%s17388_s15 + $0x2364] ss:$16 sps:$4 sm:$0xff]   ;;  %v16212_v3 = vld [vmem:[%s17388_s15 + $0x236c] ss:$16 sps:$4 sm:$0xff]  }
 0x4d0   : > { %10829 = vmatprep.subr.bf16.mxu0 %v16116_v4  ;;  %11904 = vmatprep.subr.bf16.mxu1 %v16119_v5  ;;  %v16207_v4 = vld [vmem:[%s17388_s15 + $0x2360] ss:$16 sps:$4 sm:$0xff]   ;;  %v16210_v5 = vld [vmem:[%s17388_s15 + $0x2368] ss:$16 sps:$4 sm:$0xff]  }
 0x4d3   : > { %10830 = vmatpush1.bf16.msra.mxu0 %v16114_v6  ;;  %11905 = vmatpush1.bf16.msra.mxu1 %v16117_v7  ;;  %v16215_v6 = vld [vmem:[%s17388_s15 + $0x2384] ss:$16 sps:$4 sm:$0xff]   ;;  %v16218_v7 = vld [vmem:[%s17388_s15 + $0x238c] ss:$16 sps:$4 sm:$0xff]  }
 0x4d4   : > { %10831 = vmatprep.subr.bf16.mxu0 %v16122_v8  ;;  %11906 = vmatprep.subr.bf16.mxu1 %v16125_v9  ;;  %v16213_v8 = vld [vmem:[%s17388_s15 + $0x2380] ss:$16 sps:$4 sm:$0xff]   ;;  %v16216_v9 = vld [vmem:[%s17388_s15 + $0x2388] ss:$16 sps:$4 sm:$0xff]  }
 0x4d7   : > { %10832 = vmatpush1.bf16.msra.mxu0 %v16120_v10  ;;  %11907 = vmatpush1.bf16.msra.mxu1 %v16123_v11  ;;  %v16221_v10 = vld [vmem:[%s17388_s15 + $0x23a4] ss:$16 sps:$4 sm:$0xff]   ;;  %v16224_v11 = vld [vmem:[%s17388_s15 + $0x23ac] ss:$16 sps:$4 sm:$0xff]  }
 0x4d8   : > { %10833 = vmatprep.subr.bf16.mxu0 %v16128_v12  ;;  %11908 = vmatprep.subr.bf16.mxu1 %v16131_v13  ;;  %v16219_v12 = vld [vmem:[%s17388_s15 + $0x23a0] ss:$16 sps:$4 sm:$0xff]   ;;  %v16222_v13 = vld [vmem:[%s17388_s15 + $0x23a8] ss:$16 sps:$4 sm:$0xff]  }
 0x4db   : > { %10834 = vmatpush1.bf16.msra.mxu0 %v16126_v14  ;;  %11909 = vmatpush1.bf16.msra.mxu1 %v16129_v15  ;;  %v16227_v14 = vld [vmem:[%s17388_s15 + $0x23c4] ss:$16 sps:$4 sm:$0xff]   ;;  %v16230_v15 = vld [vmem:[%s17388_s15 + $0x23cc] ss:$16 sps:$4 sm:$0xff]  }
 0x4dc   : > { %10835 = vmatprep.subr.bf16.mxu0 %v16134_v16  ;;  %11910 = vmatprep.subr.bf16.mxu1 %v16137_v17  ;;  %v16225_v16 = vld [vmem:[%s17388_s15 + $0x23c0] ss:$16 sps:$4 sm:$0xff]   ;;  %v16228_v17 = vld [vmem:[%s17388_s15 + $0x23c8] ss:$16 sps:$4 sm:$0xff]  }
 0x4df   : > { %10836 = vmatpush1.bf16.msra.mxu0 %v16132_v18  ;;  %11911 = vmatpush1.bf16.msra.mxu1 %v16135_v19  ;;  %v16233_v18 = vld [vmem:[%s17388_s15 + $0x23e4] ss:$16 sps:$4 sm:$0xff]   ;;  %v16236_v19 = vld [vmem:[%s17388_s15 + $0x23ec] ss:$16 sps:$4 sm:$0xff]  }
 0x4e0   : > { %10848 = vmatprep.subr.bf16.mxu0 %v16143_v20  ;;  %11923 = vmatprep.subr.bf16.mxu1 %v16146_v21  ;;  %v16231_v20 = vld [vmem:[%s17388_s15 + $0x23e0] ss:$16 sps:$4 sm:$0xff]   ;;  %v16234_v21 = vld [vmem:[%s17388_s15 + $0x23e8] ss:$16 sps:$4 sm:$0xff]  }
 0x4e2   : > { %10838 = vmatmul.mubr.bf16.vlgmr.msra.gmra.mrb[0].mxu0 %v16138_v22  ;;  %11913 = vmatmul.mubr.bf16.vlgmr.msra.gmra.mrb[0].mxu1 %v16138_v22  ;;  %v16242_v22 = vld [vmem:[%s17388_s15 + $0x2404] ss:$16 sps:$4 sm:$0xff]  }
 0x4e3   : > { %10849 = vmatpush1.bf16.msra.mxu0 %v16141_v23  ;;  %11924 = vmatpush1.bf16.msra.mxu1 %v16144_v24  ;;  %v16245_v23 = vld [vmem:[%s17388_s15 + $0x240c] ss:$16 sps:$4 sm:$0xff]  }
 0x4e4   : > { %10850 = vmatprep.subr.bf16.mxu0 %v16149_v25  ;;  %11925 = vmatprep.subr.bf16.mxu1 %v16152_v26  ;;  %v16237_v24 = vld [vmem:[%s17386_s12 + $0x88] ss:$196 sps:$4 sm:$0xff]  }
 0x4e5   : > { %10880 = vmatprep.mubr.bf16.mxu0 %v16239_v27  ;;  %11955 = vmatprep.mubr.bf16.mxu1 %v16239_v27  ;;  %v16240_v25 = vld [vmem:[%s17388_s15 + $0x2400] ss:$16 sps:$4 sm:$0xff]   ;;  %v16243_v26 = vld [vmem:[%s17388_s15 + $0x2408] ss:$16 sps:$4 sm:$0xff]   ;;  %v16248_v27 = vld [vmem:[%s17388_s15 + $0x2424] ss:$16 sps:$4 sm:$0xff]  }
 0x4e7   : > { %10851 = vmatpush1.bf16.msra.mxu0 %v16147_v28  ;;  %11926 = vmatpush1.bf16.msra.mxu1 %v16150_v29  ;;  %v16251_v28 = vld [vmem:[%s17388_s15 + $0x242c] ss:$16 sps:$4 sm:$0xff]  }
 0x4e8   : > { %10852 = vmatprep.subr.bf16.mxu0 %v16155_v30  ;;  %11927 = vmatprep.subr.bf16.mxu1 %v16158_v31  ;;  %v16338_v29 = vld [vmem:[%s17386_s12 + $0x94] ss:$196 sps:$4 sm:$0xff]  }
 0x4e9   : > { %v16246_v30 = vld [vmem:[%s17388_s15 + $0x2420] ss:$16 sps:$4 sm:$0xff]   ;;  %v16249_v31 = vld [vmem:[%s17388_s15 + $0x2428] ss:$16 sps:$4 sm:$0xff]  }
 0x4eb   : > { %10853 = vmatpush1.bf16.msra.mxu0 %v16153_v32  ;;  %11928 = vmatpush1.bf16.msra.mxu1 %v16156_v33  ;;  %v16254_v32 = vld [vmem:[%s17388_s15 + $0x2444] ss:$16 sps:$4 sm:$0xff]   ;;  %v16257_v33 = vld [vmem:[%s17388_s15 + $0x244c] ss:$16 sps:$4 sm:$0xff]  }
 0x4ec   : > { %10854 = vmatprep.subr.bf16.mxu0 %v16161_v34  ;;  %11929 = vmatprep.subr.bf16.mxu1 %v16164_v35  ;;  %v16252_v34 = vld [vmem:[%s17388_s15 + $0x2440] ss:$16 sps:$4 sm:$0xff]   ;;  %v16255_v35 = vld [vmem:[%s17388_s15 + $0x2448] ss:$16 sps:$4 sm:$0xff]  }
 0x4ef   : > { %10855 = vmatpush1.bf16.msra.mxu0 %v16159_v36  ;;  %11930 = vmatpush1.bf16.msra.mxu1 %v16162_v37  ;;  %v16260_v36 = vld [vmem:[%s17388_s15 + $0x2464] ss:$16 sps:$4 sm:$0xff]   ;;  %v16263_v37 = vld [vmem:[%s17388_s15 + $0x246c] ss:$16 sps:$4 sm:$0xff]  }
 0x4f0   : > { %10856 = vmatprep.subr.bf16.mxu0 %v16167_v38  ;;  %11931 = vmatprep.subr.bf16.mxu1 %v16170_v39  ;;  %v16258_v38 = vld [vmem:[%s17388_s15 + $0x2460] ss:$16 sps:$4 sm:$0xff]   ;;  %v16261_v39 = vld [vmem:[%s17388_s15 + $0x2468] ss:$16 sps:$4 sm:$0xff]  }
 0x4f3   : > { %10857 = vmatpush1.bf16.msra.mxu0 %v16165_v40  ;;  %11932 = vmatpush1.bf16.msra.mxu1 %v16168_v41  ;;  %v16266_v40 = vld [vmem:[%s17388_s15 + $0x2484] ss:$16 sps:$4 sm:$0xff]   ;;  %v16269_v41 = vld [vmem:[%s17388_s15 + $0x248c] ss:$16 sps:$4 sm:$0xff]  }
 0x4f4   : > { %10858 = vmatprep.subr.bf16.mxu0 %v16173_v42  ;;  %11933 = vmatprep.subr.bf16.mxu1 %v16176_v43  ;;  %v16264_v42 = vld [vmem:[%s17388_s15 + $0x2480] ss:$16 sps:$4 sm:$0xff]   ;;  %v16267_v43 = vld [vmem:[%s17388_s15 + $0x2488] ss:$16 sps:$4 sm:$0xff]  }
 0x4f7   : > { %10859 = vmatpush1.bf16.msra.mxu0 %v16171_v44  ;;  %11934 = vmatpush1.bf16.msra.mxu1 %v16174_v45  ;;  %v16272_v44 = vld [vmem:[%s17388_s15 + $0x24a4] ss:$16 sps:$4 sm:$0xff]   ;;  %v16275_v45 = vld [vmem:[%s17388_s15 + $0x24ac] ss:$16 sps:$4 sm:$0xff]  }
 0x4f8   : > { %10860 = vmatprep.subr.bf16.mxu0 %v16179_v46  ;;  %11935 = vmatprep.subr.bf16.mxu1 %v16182_v47  ;;  %v16270_v46 = vld [vmem:[%s17388_s15 + $0x24a0] ss:$16 sps:$4 sm:$0xff]   ;;  %v16273_v47 = vld [vmem:[%s17388_s15 + $0x24a8] ss:$16 sps:$4 sm:$0xff]  }
 0x4fb   : > { %10861 = vmatpush1.bf16.msra.mxu0 %v16177_v48  ;;  %11936 = vmatpush1.bf16.msra.mxu1 %v16180_v49  ;;  %v16278_v48 = vld [vmem:[%s17388_s15 + $0x24c4] ss:$16 sps:$4 sm:$0xff]   ;;  %v16281_v49 = vld [vmem:[%s17388_s15 + $0x24cc] ss:$16 sps:$4 sm:$0xff]  }
 0x4fc   : > { %10862 = vmatprep.subr.bf16.mxu0 %v16185_v50  ;;  %11937 = vmatprep.subr.bf16.mxu1 %v16188_v51  ;;  %v16276_v50 = vld [vmem:[%s17388_s15 + $0x24c0] ss:$16 sps:$4 sm:$0xff]   ;;  %v16279_v51 = vld [vmem:[%s17388_s15 + $0x24c8] ss:$16 sps:$4 sm:$0xff]  }
 0x4ff   : > { %10863 = vmatpush1.bf16.msra.mxu0 %v16183_v52  ;;  %11938 = vmatpush1.bf16.msra.mxu1 %v16186_v53  ;;  %v16284_v52 = vld [vmem:[%s17388_s15 + $0x24e4] ss:$16 sps:$4 sm:$0xff]   ;;  %v16287_v53 = vld [vmem:[%s17388_s15 + $0x24ec] ss:$16 sps:$4 sm:$0xff]  }
 0x500   : > { %10864 = vmatprep.subr.bf16.mxu0 %v16191_v54  ;;  %11939 = vmatprep.subr.bf16.mxu1 %v16194_v55  ;;  %v16282_v54 = vld [vmem:[%s17388_s15 + $0x24e0] ss:$16 sps:$4 sm:$0xff]   ;;  %v16285_v55 = vld [vmem:[%s17388_s15 + $0x24e8] ss:$16 sps:$4 sm:$0xff]  }
 0x503   : > { %10865 = vmatpush1.bf16.msra.mxu0 %v16189_v56  ;;  %11940 = vmatpush1.bf16.msra.mxu1 %v16192_v57  ;;  %v16290_v56 = vld [vmem:[%s17388_s15 + $0x2504] ss:$16 sps:$4 sm:$0xff]   ;;  %v16293_v57 = vld [vmem:[%s17388_s15 + $0x250c] ss:$16 sps:$4 sm:$0xff]  }
 0x504   : > { %10866 = vmatprep.subr.bf16.mxu0 %v16197_v58  ;;  %11941 = vmatprep.subr.bf16.mxu1 %v16200_v59  ;;  %v16288_v58 = vld [vmem:[%s17388_s15 + $0x2500] ss:$16 sps:$4 sm:$0xff]   ;;  %v16291_v59 = vld [vmem:[%s17388_s15 + $0x2508] ss:$16 sps:$4 sm:$0xff]  }
 0x507   : > { %10867 = vmatpush1.bf16.msra.mxu0 %v16195_v60  ;;  %11942 = vmatpush1.bf16.msra.mxu1 %v16198_v61  ;;  %v16296_v60 = vld [vmem:[%s17388_s15 + $0x2524] ss:$16 sps:$4 sm:$0xff]   ;;  %v16299_v61 = vld [vmem:[%s17388_s15 + $0x252c] ss:$16 sps:$4 sm:$0xff]  }
 0x508   : > { %10868 = vmatprep.subr.bf16.mxu0 %v16203_v62  ;;  %11943 = vmatprep.subr.bf16.mxu1 %v16206_v63  ;;  %v16294_v62 = vld [vmem:[%s17388_s15 + $0x2520] ss:$16 sps:$4 sm:$0xff]   ;;  %v16297_v63 = vld [vmem:[%s17388_s15 + $0x2528] ss:$16 sps:$4 sm:$0xff]  }
 0x50b   : > { %10869 = vmatpush1.bf16.msra.mxu0 %v16201_v0  ;;  %11944 = vmatpush1.bf16.msra.mxu1 %v16204_v1  ;;  %v16302_v0 = vld [vmem:[%s17388_s15 + $0x2544] ss:$16 sps:$4 sm:$0xff]   ;;  %v16305_v1 = vld [vmem:[%s17388_s15 + $0x254c] ss:$16 sps:$4 sm:$0xff]  }
 0x50c   : > { %10870 = vmatprep.subr.bf16.mxu0 %v16209_v2  ;;  %11945 = vmatprep.subr.bf16.mxu1 %v16212_v3  ;;  %v16300_v2 = vld [vmem:[%s17388_s15 + $0x2540] ss:$16 sps:$4 sm:$0xff]   ;;  %v16303_v3 = vld [vmem:[%s17388_s15 + $0x2548] ss:$16 sps:$4 sm:$0xff]  }
 0x50f   : > { %10871 = vmatpush1.bf16.msra.mxu0 %v16207_v4  ;;  %11946 = vmatpush1.bf16.msra.mxu1 %v16210_v5  ;;  %v16308_v4 = vld [vmem:[%s17388_s15 + $0x2564] ss:$16 sps:$4 sm:$0xff]   ;;  %v16311_v5 = vld [vmem:[%s17388_s15 + $0x256c] ss:$16 sps:$4 sm:$0xff]  }
 0x510   : > { %10872 = vmatprep.subr.bf16.mxu0 %v16215_v6  ;;  %11947 = vmatprep.subr.bf16.mxu1 %v16218_v7  ;;  %v16306_v6 = vld [vmem:[%s17388_s15 + $0x2560] ss:$16 sps:$4 sm:$0xff]   ;;  %v16309_v7 = vld [vmem:[%s17388_s15 + $0x2568] ss:$16 sps:$4 sm:$0xff]  }
 0x513   : > { %10873 = vmatpush1.bf16.msra.mxu0 %v16213_v8  ;;  %11948 = vmatpush1.bf16.msra.mxu1 %v16216_v9  ;;  %v16314_v8 = vld [vmem:[%s17388_s15 + $0x2584] ss:$16 sps:$4 sm:$0xff]   ;;  %v16317_v9 = vld [vmem:[%s17388_s15 + $0x258c] ss:$16 sps:$4 sm:$0xff]  }
 0x514   : > { %10874 = vmatprep.subr.bf16.mxu0 %v16221_v10  ;;  %11949 = vmatprep.subr.bf16.mxu1 %v16224_v11  ;;  %v16312_v10 = vld [vmem:[%s17388_s15 + $0x2580] ss:$16 sps:$4 sm:$0xff]   ;;  %v16315_v11 = vld [vmem:[%s17388_s15 + $0x2588] ss:$16 sps:$4 sm:$0xff]  }
 0x517   : > { %10875 = vmatpush1.bf16.msra.mxu0 %v16219_v12  ;;  %11950 = vmatpush1.bf16.msra.mxu1 %v16222_v13  ;;  %v16320_v12 = vld [vmem:[%s17388_s15 + $0x25a4] ss:$16 sps:$4 sm:$0xff]   ;;  %v16323_v13 = vld [vmem:[%s17388_s15 + $0x25ac] ss:$16 sps:$4 sm:$0xff]  }
 0x518   : > { %10876 = vmatprep.subr.bf16.mxu0 %v16227_v14  ;;  %11951 = vmatprep.subr.bf16.mxu1 %v16230_v15  ;;  %v16318_v14 = vld [vmem:[%s17388_s15 + $0x25a0] ss:$16 sps:$4 sm:$0xff]   ;;  %v16321_v15 = vld [vmem:[%s17388_s15 + $0x25a8] ss:$16 sps:$4 sm:$0xff]  }
 0x51b   : > { %10877 = vmatpush1.bf16.msra.mxu0 %v16225_v16  ;;  %11952 = vmatpush1.bf16.msra.mxu1 %v16228_v17  ;;  %v16326_v16 = vld [vmem:[%s17388_s15 + $0x25c4] ss:$16 sps:$4 sm:$0xff]   ;;  %v16329_v17 = vld [vmem:[%s17388_s15 + $0x25cc] ss:$16 sps:$4 sm:$0xff]  }
 0x51c   : > { %10878 = vmatprep.subr.bf16.mxu0 %v16233_v18  ;;  %11953 = vmatprep.subr.bf16.mxu1 %v16236_v19  ;;  %v16324_v18 = vld [vmem:[%s17388_s15 + $0x25c0] ss:$16 sps:$4 sm:$0xff]   ;;  %v16327_v19 = vld [vmem:[%s17388_s15 + $0x25c8] ss:$16 sps:$4 sm:$0xff]  }
 0x51f   : > { %10879 = vmatpush1.bf16.msra.mxu0 %v16231_v20  ;;  %11954 = vmatpush1.bf16.msra.mxu1 %v16234_v21  ;;  %v16332_v20 = vld [vmem:[%s17388_s15 + $0x25e4] ss:$16 sps:$4 sm:$0xff]   ;;  %v16335_v21 = vld [vmem:[%s17388_s15 + $0x25ec] ss:$16 sps:$4 sm:$0xff]  }
 0x520   : > { %10891 = vmatprep.subr.bf16.mxu0 %v16242_v22  ;;  %11966 = vmatprep.subr.bf16.mxu1 %v16245_v23  ;;  %v16330_v22 = vld [vmem:[%s17388_s15 + $0x25e0] ss:$16 sps:$4 sm:$0xff]   ;;  %v16333_v23 = vld [vmem:[%s17388_s15 + $0x25e8] ss:$16 sps:$4 sm:$0xff]  }
 0x522   : > { %10881 = vmatmul.mubr.bf16.vlgmr.msra.gmra.mrb[0].mxu0 %v16237_v24  ;;  %11956 = vmatmul.mubr.bf16.vlgmr.msra.gmra.mrb[0].mxu1 %v16237_v24  ;;  %v16341_v24 = vld [vmem:[%s17388_s15 + $0x2604] ss:$16 sps:$4 sm:$0xff]  }
 0x523   : > { %10892 = vmatpush1.bf16.msra.mxu0 %v16240_v25  ;;  %11967 = vmatpush1.bf16.msra.mxu1 %v16243_v26  ;;  %v16344_v25 = vld [vmem:[%s17388_s15 + $0x260c] ss:$16 sps:$4 sm:$0xff]  }
 0x524   : > { %10893 = vmatprep.subr.bf16.mxu0 %v16248_v27  ;;  %11968 = vmatprep.subr.bf16.mxu1 %v16251_v28  ;;  %v16336_v26 = vld [vmem:[%s17386_s12 + $0x90] ss:$196 sps:$4 sm:$0xff]  }
 0x525   : > { %10923 = vmatprep.mubr.bf16.mxu0 %v16338_v29  ;;  %11998 = vmatprep.mubr.bf16.mxu1 %v16338_v29  ;;  %v16339_v27 = vld [vmem:[%s17388_s15 + $0x2600] ss:$16 sps:$4 sm:$0xff]   ;;  %v16342_v28 = vld [vmem:[%s17388_s15 + $0x2608] ss:$16 sps:$4 sm:$0xff]   ;;  %v16347_v29 = vld [vmem:[%s17388_s15 + $0x2624] ss:$16 sps:$4 sm:$0xff]  }
 0x527   : > { %10894 = vmatpush1.bf16.msra.mxu0 %v16246_v30  ;;  %11969 = vmatpush1.bf16.msra.mxu1 %v16249_v31  ;;  %v16350_v30 = vld [vmem:[%s17388_s15 + $0x262c] ss:$16 sps:$4 sm:$0xff]  }
 0x528   : > { %10895 = vmatprep.subr.bf16.mxu0 %v16254_v32  ;;  %11970 = vmatprep.subr.bf16.mxu1 %v16257_v33  ;;  %v16437_v31 = vld [vmem:[%s17386_s12 + $0x9c] ss:$196 sps:$4 sm:$0xff]  }
 0x529   : > { %v16345_v32 = vld [vmem:[%s17388_s15 + $0x2620] ss:$16 sps:$4 sm:$0xff]   ;;  %v16348_v33 = vld [vmem:[%s17388_s15 + $0x2628] ss:$16 sps:$4 sm:$0xff]  }
 0x52b   : > { %10896 = vmatpush1.bf16.msra.mxu0 %v16252_v34  ;;  %11971 = vmatpush1.bf16.msra.mxu1 %v16255_v35  ;;  %v16353_v34 = vld [vmem:[%s17388_s15 + $0x2644] ss:$16 sps:$4 sm:$0xff]   ;;  %v16356_v35 = vld [vmem:[%s17388_s15 + $0x264c] ss:$16 sps:$4 sm:$0xff]  }
 0x52c   : > { %10897 = vmatprep.subr.bf16.mxu0 %v16260_v36  ;;  %11972 = vmatprep.subr.bf16.mxu1 %v16263_v37  ;;  %v16351_v36 = vld [vmem:[%s17388_s15 + $0x2640] ss:$16 sps:$4 sm:$0xff]   ;;  %v16354_v37 = vld [vmem:[%s17388_s15 + $0x2648] ss:$16 sps:$4 sm:$0xff]  }
 0x52f   : > { %10898 = vmatpush1.bf16.msra.mxu0 %v16258_v38  ;;  %11973 = vmatpush1.bf16.msra.mxu1 %v16261_v39  ;;  %v16359_v38 = vld [vmem:[%s17388_s15 + $0x2664] ss:$16 sps:$4 sm:$0xff]   ;;  %v16362_v39 = vld [vmem:[%s17388_s15 + $0x266c] ss:$16 sps:$4 sm:$0xff]  }
 0x530   : > { %10899 = vmatprep.subr.bf16.mxu0 %v16266_v40  ;;  %11974 = vmatprep.subr.bf16.mxu1 %v16269_v41  ;;  %v16357_v40 = vld [vmem:[%s17388_s15 + $0x2660] ss:$16 sps:$4 sm:$0xff]   ;;  %v16360_v41 = vld [vmem:[%s17388_s15 + $0x2668] ss:$16 sps:$4 sm:$0xff]  }
 0x533   : > { %10900 = vmatpush1.bf16.msra.mxu0 %v16264_v42  ;;  %11975 = vmatpush1.bf16.msra.mxu1 %v16267_v43  ;;  %v16365_v42 = vld [vmem:[%s17388_s15 + $0x2684] ss:$16 sps:$4 sm:$0xff]   ;;  %v16368_v43 = vld [vmem:[%s17388_s15 + $0x268c] ss:$16 sps:$4 sm:$0xff]  }
 0x534   : > { %10901 = vmatprep.subr.bf16.mxu0 %v16272_v44  ;;  %11976 = vmatprep.subr.bf16.mxu1 %v16275_v45  ;;  %v16363_v44 = vld [vmem:[%s17388_s15 + $0x2680] ss:$16 sps:$4 sm:$0xff]   ;;  %v16366_v45 = vld [vmem:[%s17388_s15 + $0x2688] ss:$16 sps:$4 sm:$0xff]  }
 0x537   : > { %10902 = vmatpush1.bf16.msra.mxu0 %v16270_v46  ;;  %11977 = vmatpush1.bf16.msra.mxu1 %v16273_v47  ;;  %v16371_v46 = vld [vmem:[%s17388_s15 + $0x26a4] ss:$16 sps:$4 sm:$0xff]   ;;  %v16374_v47 = vld [vmem:[%s17388_s15 + $0x26ac] ss:$16 sps:$4 sm:$0xff]  }
 0x538   : > { %10903 = vmatprep.subr.bf16.mxu0 %v16278_v48  ;;  %11978 = vmatprep.subr.bf16.mxu1 %v16281_v49  ;;  %v16369_v48 = vld [vmem:[%s17388_s15 + $0x26a0] ss:$16 sps:$4 sm:$0xff]   ;;  %v16372_v49 = vld [vmem:[%s17388_s15 + $0x26a8] ss:$16 sps:$4 sm:$0xff]  }
 0x53b   : > { %10904 = vmatpush1.bf16.msra.mxu0 %v16276_v50  ;;  %11979 = vmatpush1.bf16.msra.mxu1 %v16279_v51  ;;  %v16377_v50 = vld [vmem:[%s17388_s15 + $0x26c4] ss:$16 sps:$4 sm:$0xff]   ;;  %v16380_v51 = vld [vmem:[%s17388_s15 + $0x26cc] ss:$16 sps:$4 sm:$0xff]  }
 0x53c   : > { %10905 = vmatprep.subr.bf16.mxu0 %v16284_v52  ;;  %11980 = vmatprep.subr.bf16.mxu1 %v16287_v53  ;;  %v16375_v52 = vld [vmem:[%s17388_s15 + $0x26c0] ss:$16 sps:$4 sm:$0xff]   ;;  %v16378_v53 = vld [vmem:[%s17388_s15 + $0x26c8] ss:$16 sps:$4 sm:$0xff]  }
 0x53f   : > { %10906 = vmatpush1.bf16.msra.mxu0 %v16282_v54  ;;  %11981 = vmatpush1.bf16.msra.mxu1 %v16285_v55  ;;  %v16383_v54 = vld [vmem:[%s17388_s15 + $0x26e4] ss:$16 sps:$4 sm:$0xff]   ;;  %v16386_v55 = vld [vmem:[%s17388_s15 + $0x26ec] ss:$16 sps:$4 sm:$0xff]  }
 0x540   : > { %10907 = vmatprep.subr.bf16.mxu0 %v16290_v56  ;;  %11982 = vmatprep.subr.bf16.mxu1 %v16293_v57  ;;  %v16381_v56 = vld [vmem:[%s17388_s15 + $0x26e0] ss:$16 sps:$4 sm:$0xff]   ;;  %v16384_v57 = vld [vmem:[%s17388_s15 + $0x26e8] ss:$16 sps:$4 sm:$0xff]  }
 0x543   : > { %10908 = vmatpush1.bf16.msra.mxu0 %v16288_v58  ;;  %11983 = vmatpush1.bf16.msra.mxu1 %v16291_v59  ;;  %v16389_v58 = vld [vmem:[%s17388_s15 + $0x2704] ss:$16 sps:$4 sm:$0xff]   ;;  %v16392_v59 = vld [vmem:[%s17388_s15 + $0x270c] ss:$16 sps:$4 sm:$0xff]  }
 0x544   : > { %10909 = vmatprep.subr.bf16.mxu0 %v16296_v60  ;;  %11984 = vmatprep.subr.bf16.mxu1 %v16299_v61  ;;  %v16387_v60 = vld [vmem:[%s17388_s15 + $0x2700] ss:$16 sps:$4 sm:$0xff]   ;;  %v16390_v61 = vld [vmem:[%s17388_s15 + $0x2708] ss:$16 sps:$4 sm:$0xff]  }
 0x547   : > { %10910 = vmatpush1.bf16.msra.mxu0 %v16294_v62  ;;  %11985 = vmatpush1.bf16.msra.mxu1 %v16297_v63  ;;  %v16395_v62 = vld [vmem:[%s17388_s15 + $0x2724] ss:$16 sps:$4 sm:$0xff]   ;;  %v16398_v63 = vld [vmem:[%s17388_s15 + $0x272c] ss:$16 sps:$4 sm:$0xff]  }
 0x548   : > { %10911 = vmatprep.subr.bf16.mxu0 %v16302_v0  ;;  %11986 = vmatprep.subr.bf16.mxu1 %v16305_v1  ;;  %v16393_v0 = vld [vmem:[%s17388_s15 + $0x2720] ss:$16 sps:$4 sm:$0xff]   ;;  %v16396_v1 = vld [vmem:[%s17388_s15 + $0x2728] ss:$16 sps:$4 sm:$0xff]  }
 0x54b   : > { %10912 = vmatpush1.bf16.msra.mxu0 %v16300_v2  ;;  %11987 = vmatpush1.bf16.msra.mxu1 %v16303_v3  ;;  %v16401_v2 = vld [vmem:[%s17388_s15 + $0x2744] ss:$16 sps:$4 sm:$0xff]   ;;  %v16404_v3 = vld [vmem:[%s17388_s15 + $0x274c] ss:$16 sps:$4 sm:$0xff]  }
 0x54c   : > { %10913 = vmatprep.subr.bf16.mxu0 %v16308_v4  ;;  %11988 = vmatprep.subr.bf16.mxu1 %v16311_v5  ;;  %v16399_v4 = vld [vmem:[%s17388_s15 + $0x2740] ss:$16 sps:$4 sm:$0xff]   ;;  %v16402_v5 = vld [vmem:[%s17388_s15 + $0x2748] ss:$16 sps:$4 sm:$0xff]  }
 0x54f   : > { %10914 = vmatpush1.bf16.msra.mxu0 %v16306_v6  ;;  %11989 = vmatpush1.bf16.msra.mxu1 %v16309_v7  ;;  %v16407_v6 = vld [vmem:[%s17388_s15 + $0x2764] ss:$16 sps:$4 sm:$0xff]   ;;  %v16410_v7 = vld [vmem:[%s17388_s15 + $0x276c] ss:$16 sps:$4 sm:$0xff]  }
 0x550   : > { %10915 = vmatprep.subr.bf16.mxu0 %v16314_v8  ;;  %11990 = vmatprep.subr.bf16.mxu1 %v16317_v9  ;;  %v16405_v8 = vld [vmem:[%s17388_s15 + $0x2760] ss:$16 sps:$4 sm:$0xff]   ;;  %v16408_v9 = vld [vmem:[%s17388_s15 + $0x2768] ss:$16 sps:$4 sm:$0xff]  }
 0x553   : > { %10916 = vmatpush1.bf16.msra.mxu0 %v16312_v10  ;;  %11991 = vmatpush1.bf16.msra.mxu1 %v16315_v11  ;;  %v16413_v10 = vld [vmem:[%s17388_s15 + $0x2784] ss:$16 sps:$4 sm:$0xff]   ;;  %v16416_v11 = vld [vmem:[%s17388_s15 + $0x278c] ss:$16 sps:$4 sm:$0xff]  }
 0x554   : > { %10917 = vmatprep.subr.bf16.mxu0 %v16320_v12  ;;  %11992 = vmatprep.subr.bf16.mxu1 %v16323_v13  ;;  %v16411_v12 = vld [vmem:[%s17388_s15 + $0x2780] ss:$16 sps:$4 sm:$0xff]   ;;  %v16414_v13 = vld [vmem:[%s17388_s15 + $0x2788] ss:$16 sps:$4 sm:$0xff]  }
 0x557   : > { %10918 = vmatpush1.bf16.msra.mxu0 %v16318_v14  ;;  %11993 = vmatpush1.bf16.msra.mxu1 %v16321_v15  ;;  %v16419_v14 = vld [vmem:[%s17388_s15 + $0x27a4] ss:$16 sps:$4 sm:$0xff]   ;;  %v16422_v15 = vld [vmem:[%s17388_s15 + $0x27ac] ss:$16 sps:$4 sm:$0xff]  }
 0x558   : > { %10919 = vmatprep.subr.bf16.mxu0 %v16326_v16  ;;  %11994 = vmatprep.subr.bf16.mxu1 %v16329_v17  ;;  %v16417_v16 = vld [vmem:[%s17388_s15 + $0x27a0] ss:$16 sps:$4 sm:$0xff]   ;;  %v16420_v17 = vld [vmem:[%s17388_s15 + $0x27a8] ss:$16 sps:$4 sm:$0xff]  }
 0x55b   : > { %10920 = vmatpush1.bf16.msra.mxu0 %v16324_v18  ;;  %11995 = vmatpush1.bf16.msra.mxu1 %v16327_v19  ;;  %v16425_v18 = vld [vmem:[%s17388_s15 + $0x27c4] ss:$16 sps:$4 sm:$0xff]   ;;  %v16428_v19 = vld [vmem:[%s17388_s15 + $0x27cc] ss:$16 sps:$4 sm:$0xff]  }
 0x55c   : > { %10921 = vmatprep.subr.bf16.mxu0 %v16332_v20  ;;  %11996 = vmatprep.subr.bf16.mxu1 %v16335_v21  ;;  %v16423_v20 = vld [vmem:[%s17388_s15 + $0x27c0] ss:$16 sps:$4 sm:$0xff]   ;;  %v16426_v21 = vld [vmem:[%s17388_s15 + $0x27c8] ss:$16 sps:$4 sm:$0xff]  }
 0x55f   : > { %10922 = vmatpush1.bf16.msra.mxu0 %v16330_v22  ;;  %11997 = vmatpush1.bf16.msra.mxu1 %v16333_v23  ;;  %v16431_v22 = vld [vmem:[%s17388_s15 + $0x27e4] ss:$16 sps:$4 sm:$0xff]   ;;  %v16434_v23 = vld [vmem:[%s17388_s15 + $0x27ec] ss:$16 sps:$4 sm:$0xff]  }
 0x560   : > { %10934 = vmatprep.subr.bf16.mxu0 %v16341_v24  ;;  %12009 = vmatprep.subr.bf16.mxu1 %v16344_v25  ;;  %v16429_v24 = vld [vmem:[%s17388_s15 + $0x27e0] ss:$16 sps:$4 sm:$0xff]   ;;  %v16432_v25 = vld [vmem:[%s17388_s15 + $0x27e8] ss:$16 sps:$4 sm:$0xff]  }
 0x562   : > { %10924 = vmatmul.mubr.bf16.vlgmr.msra.gmra.mrb[0].mxu0 %v16336_v26  ;;  %11999 = vmatmul.mubr.bf16.vlgmr.msra.gmra.mrb[0].mxu1 %v16336_v26  ;;  %v16440_v26 = vld [vmem:[%s17388_s15 + $0x2804] ss:$16 sps:$4 sm:$0xff]  }
 0x563   : > { %10935 = vmatpush1.bf16.msra.mxu0 %v16339_v27  ;;  %12010 = vmatpush1.bf16.msra.mxu1 %v16342_v28  ;;  %v16443_v27 = vld [vmem:[%s17388_s15 + $0x280c] ss:$16 sps:$4 sm:$0xff]  }
 0x564   : > { %10936 = vmatprep.subr.bf16.mxu0 %v16347_v29  ;;  %12011 = vmatprep.subr.bf16.mxu1 %v16350_v30  ;;  %v16435_v28 = vld [vmem:[%s17386_s12 + $0x98] ss:$196 sps:$4 sm:$0xff]  }
 0x565   : > { %10966 = vmatprep.mubr.bf16.mxu0 %v16437_v31  ;;  %12041 = vmatprep.mubr.bf16.mxu1 %v16437_v31  ;;  %v16438_v29 = vld [vmem:[%s17388_s15 + $0x2800] ss:$16 sps:$4 sm:$0xff]   ;;  %v16441_v30 = vld [vmem:[%s17388_s15 + $0x2808] ss:$16 sps:$4 sm:$0xff]   ;;  %v16446_v31 = vld [vmem:[%s17388_s15 + $0x2824] ss:$16 sps:$4 sm:$0xff]  }
 0x567   : > { %10937 = vmatpush1.bf16.msra.mxu0 %v16345_v32  ;;  %12012 = vmatpush1.bf16.msra.mxu1 %v16348_v33  ;;  %v16449_v32 = vld [vmem:[%s17388_s15 + $0x282c] ss:$16 sps:$4 sm:$0xff]  }
 0x568   : > { %10938 = vmatprep.subr.bf16.mxu0 %v16353_v34  ;;  %12013 = vmatprep.subr.bf16.mxu1 %v16356_v35  ;;  %v16536_v33 = vld [vmem:[%s17386_s12 + $0xa4] ss:$196 sps:$4 sm:$0xff]  }
 0x569   : > { %v16444_v34 = vld [vmem:[%s17388_s15 + $0x2820] ss:$16 sps:$4 sm:$0xff]   ;;  %v16447_v35 = vld [vmem:[%s17388_s15 + $0x2828] ss:$16 sps:$4 sm:$0xff]  }
 0x56b   : > { %10939 = vmatpush1.bf16.msra.mxu0 %v16351_v36  ;;  %12014 = vmatpush1.bf16.msra.mxu1 %v16354_v37  ;;  %v16452_v36 = vld [vmem:[%s17388_s15 + $0x2844] ss:$16 sps:$4 sm:$0xff]   ;;  %v16455_v37 = vld [vmem:[%s17388_s15 + $0x284c] ss:$16 sps:$4 sm:$0xff]  }
 0x56c   : > { %10940 = vmatprep.subr.bf16.mxu0 %v16359_v38  ;;  %12015 = vmatprep.subr.bf16.mxu1 %v16362_v39  ;;  %v16450_v38 = vld [vmem:[%s17388_s15 + $0x2840] ss:$16 sps:$4 sm:$0xff]   ;;  %v16453_v39 = vld [vmem:[%s17388_s15 + $0x2848] ss:$16 sps:$4 sm:$0xff]  }
 0x56f   : > { %10941 = vmatpush1.bf16.msra.mxu0 %v16357_v40  ;;  %12016 = vmatpush1.bf16.msra.mxu1 %v16360_v41  ;;  %v16458_v40 = vld [vmem:[%s17388_s15 + $0x2864] ss:$16 sps:$4 sm:$0xff]   ;;  %v16461_v41 = vld [vmem:[%s17388_s15 + $0x286c] ss:$16 sps:$4 sm:$0xff]  }
 0x570   : > { %10942 = vmatprep.subr.bf16.mxu0 %v16365_v42  ;;  %12017 = vmatprep.subr.bf16.mxu1 %v16368_v43  ;;  %v16456_v42 = vld [vmem:[%s17388_s15 + $0x2860] ss:$16 sps:$4 sm:$0xff]   ;;  %v16459_v43 = vld [vmem:[%s17388_s15 + $0x2868] ss:$16 sps:$4 sm:$0xff]  }
 0x573   : > { %10943 = vmatpush1.bf16.msra.mxu0 %v16363_v44  ;;  %12018 = vmatpush1.bf16.msra.mxu1 %v16366_v45  ;;  %v16464_v44 = vld [vmem:[%s17388_s15 + $0x2884] ss:$16 sps:$4 sm:$0xff]   ;;  %v16467_v45 = vld [vmem:[%s17388_s15 + $0x288c] ss:$16 sps:$4 sm:$0xff]  }
 0x574   : > { %10944 = vmatprep.subr.bf16.mxu0 %v16371_v46  ;;  %12019 = vmatprep.subr.bf16.mxu1 %v16374_v47  ;;  %v16462_v46 = vld [vmem:[%s17388_s15 + $0x2880] ss:$16 sps:$4 sm:$0xff]   ;;  %v16465_v47 = vld [vmem:[%s17388_s15 + $0x2888] ss:$16 sps:$4 sm:$0xff]  }
 0x577   : > { %10945 = vmatpush1.bf16.msra.mxu0 %v16369_v48  ;;  %12020 = vmatpush1.bf16.msra.mxu1 %v16372_v49  ;;  %v16470_v48 = vld [vmem:[%s17388_s15 + $0x28a4] ss:$16 sps:$4 sm:$0xff]   ;;  %v16473_v49 = vld [vmem:[%s17388_s15 + $0x28ac] ss:$16 sps:$4 sm:$0xff]  }
 0x578   : > { %10946 = vmatprep.subr.bf16.mxu0 %v16377_v50  ;;  %12021 = vmatprep.subr.bf16.mxu1 %v16380_v51  ;;  %v16468_v50 = vld [vmem:[%s17388_s15 + $0x28a0] ss:$16 sps:$4 sm:$0xff]   ;;  %v16471_v51 = vld [vmem:[%s17388_s15 + $0x28a8] ss:$16 sps:$4 sm:$0xff]  }
 0x57b   : > { %10947 = vmatpush1.bf16.msra.mxu0 %v16375_v52  ;;  %12022 = vmatpush1.bf16.msra.mxu1 %v16378_v53  ;;  %v16476_v52 = vld [vmem:[%s17388_s15 + $0x28c4] ss:$16 sps:$4 sm:$0xff]   ;;  %v16479_v53 = vld [vmem:[%s17388_s15 + $0x28cc] ss:$16 sps:$4 sm:$0xff]  }
 0x57c   : > { %10948 = vmatprep.subr.bf16.mxu0 %v16383_v54  ;;  %12023 = vmatprep.subr.bf16.mxu1 %v16386_v55  ;;  %v16474_v54 = vld [vmem:[%s17388_s15 + $0x28c0] ss:$16 sps:$4 sm:$0xff]   ;;  %v16477_v55 = vld [vmem:[%s17388_s15 + $0x28c8] ss:$16 sps:$4 sm:$0xff]  }
 0x57f   : > { %10949 = vmatpush1.bf16.msra.mxu0 %v16381_v56  ;;  %12024 = vmatpush1.bf16.msra.mxu1 %v16384_v57  ;;  %v16482_v56 = vld [vmem:[%s17388_s15 + $0x28e4] ss:$16 sps:$4 sm:$0xff]   ;;  %v16485_v57 = vld [vmem:[%s17388_s15 + $0x28ec] ss:$16 sps:$4 sm:$0xff]  }
 0x580   : > { %10950 = vmatprep.subr.bf16.mxu0 %v16389_v58  ;;  %12025 = vmatprep.subr.bf16.mxu1 %v16392_v59  ;;  %v16480_v58 = vld [vmem:[%s17388_s15 + $0x28e0] ss:$16 sps:$4 sm:$0xff]   ;;  %v16483_v59 = vld [vmem:[%s17388_s15 + $0x28e8] ss:$16 sps:$4 sm:$0xff]  }
 0x583   : > { %10951 = vmatpush1.bf16.msra.mxu0 %v16387_v60  ;;  %12026 = vmatpush1.bf16.msra.mxu1 %v16390_v61  ;;  %v16488_v60 = vld [vmem:[%s17388_s15 + $0x2904] ss:$16 sps:$4 sm:$0xff]   ;;  %v16491_v61 = vld [vmem:[%s17388_s15 + $0x290c] ss:$16 sps:$4 sm:$0xff]  }
 0x584   : > { %10952 = vmatprep.subr.bf16.mxu0 %v16395_v62  ;;  %12027 = vmatprep.subr.bf16.mxu1 %v16398_v63  ;;  %v16486_v62 = vld [vmem:[%s17388_s15 + $0x2900] ss:$16 sps:$4 sm:$0xff]   ;;  %v16489_v63 = vld [vmem:[%s17388_s15 + $0x2908] ss:$16 sps:$4 sm:$0xff]  }
 0x587   : > { %10953 = vmatpush1.bf16.msra.mxu0 %v16393_v0  ;;  %12028 = vmatpush1.bf16.msra.mxu1 %v16396_v1  ;;  %v16494_v0 = vld [vmem:[%s17388_s15 + $0x2924] ss:$16 sps:$4 sm:$0xff]   ;;  %v16497_v1 = vld [vmem:[%s17388_s15 + $0x292c] ss:$16 sps:$4 sm:$0xff]  }
 0x588   : > { %10954 = vmatprep.subr.bf16.mxu0 %v16401_v2  ;;  %12029 = vmatprep.subr.bf16.mxu1 %v16404_v3  ;;  %v16492_v2 = vld [vmem:[%s17388_s15 + $0x2920] ss:$16 sps:$4 sm:$0xff]   ;;  %v16495_v3 = vld [vmem:[%s17388_s15 + $0x2928] ss:$16 sps:$4 sm:$0xff]  }
 0x58b   : > { %10955 = vmatpush1.bf16.msra.mxu0 %v16399_v4  ;;  %12030 = vmatpush1.bf16.msra.mxu1 %v16402_v5  ;;  %v16500_v4 = vld [vmem:[%s17388_s15 + $0x2944] ss:$16 sps:$4 sm:$0xff]   ;;  %v16503_v5 = vld [vmem:[%s17388_s15 + $0x294c] ss:$16 sps:$4 sm:$0xff]  }
 0x58c   : > { %10956 = vmatprep.subr.bf16.mxu0 %v16407_v6  ;;  %12031 = vmatprep.subr.bf16.mxu1 %v16410_v7  ;;  %v16498_v6 = vld [vmem:[%s17388_s15 + $0x2940] ss:$16 sps:$4 sm:$0xff]   ;;  %v16501_v7 = vld [vmem:[%s17388_s15 + $0x2948] ss:$16 sps:$4 sm:$0xff]  }
 0x58f   : > { %10957 = vmatpush1.bf16.msra.mxu0 %v16405_v8  ;;  %12032 = vmatpush1.bf16.msra.mxu1 %v16408_v9  ;;  %v16506_v8 = vld [vmem:[%s17388_s15 + $0x2964] ss:$16 sps:$4 sm:$0xff]   ;;  %v16509_v9 = vld [vmem:[%s17388_s15 + $0x296c] ss:$16 sps:$4 sm:$0xff]  }
 0x590   : > { %10958 = vmatprep.subr.bf16.mxu0 %v16413_v10  ;;  %12033 = vmatprep.subr.bf16.mxu1 %v16416_v11  ;;  %v16504_v10 = vld [vmem:[%s17388_s15 + $0x2960] ss:$16 sps:$4 sm:$0xff]   ;;  %v16507_v11 = vld [vmem:[%s17388_s15 + $0x2968] ss:$16 sps:$4 sm:$0xff]  }
 0x593   : > { %10959 = vmatpush1.bf16.msra.mxu0 %v16411_v12  ;;  %12034 = vmatpush1.bf16.msra.mxu1 %v16414_v13  ;;  %v16512_v12 = vld [vmem:[%s17388_s15 + $0x2984] ss:$16 sps:$4 sm:$0xff]   ;;  %v16515_v13 = vld [vmem:[%s17388_s15 + $0x298c] ss:$16 sps:$4 sm:$0xff]  }
 0x594   : > { %10960 = vmatprep.subr.bf16.mxu0 %v16419_v14  ;;  %12035 = vmatprep.subr.bf16.mxu1 %v16422_v15  ;;  %v16510_v14 = vld [vmem:[%s17388_s15 + $0x2980] ss:$16 sps:$4 sm:$0xff]   ;;  %v16513_v15 = vld [vmem:[%s17388_s15 + $0x2988] ss:$16 sps:$4 sm:$0xff]  }
 0x597   : > { %10961 = vmatpush1.bf16.msra.mxu0 %v16417_v16  ;;  %12036 = vmatpush1.bf16.msra.mxu1 %v16420_v17  ;;  %v16518_v16 = vld [vmem:[%s17388_s15 + $0x29a4] ss:$16 sps:$4 sm:$0xff]   ;;  %v16521_v17 = vld [vmem:[%s17388_s15 + $0x29ac] ss:$16 sps:$4 sm:$0xff]  }
 0x598   : > { %10962 = vmatprep.subr.bf16.mxu0 %v16425_v18  ;;  %12037 = vmatprep.subr.bf16.mxu1 %v16428_v19  ;;  %v16516_v18 = vld [vmem:[%s17388_s15 + $0x29a0] ss:$16 sps:$4 sm:$0xff]   ;;  %v16519_v19 = vld [vmem:[%s17388_s15 + $0x29a8] ss:$16 sps:$4 sm:$0xff]  }
 0x59b   : > { %10963 = vmatpush1.bf16.msra.mxu0 %v16423_v20  ;;  %12038 = vmatpush1.bf16.msra.mxu1 %v16426_v21  ;;  %v16524_v20 = vld [vmem:[%s17388_s15 + $0x29c4] ss:$16 sps:$4 sm:$0xff]   ;;  %v16527_v21 = vld [vmem:[%s17388_s15 + $0x29cc] ss:$16 sps:$4 sm:$0xff]  }
 0x59c   : > { %10964 = vmatprep.subr.bf16.mxu0 %v16431_v22  ;;  %12039 = vmatprep.subr.bf16.mxu1 %v16434_v23  ;;  %v16522_v22 = vld [vmem:[%s17388_s15 + $0x29c0] ss:$16 sps:$4 sm:$0xff]   ;;  %v16525_v23 = vld [vmem:[%s17388_s15 + $0x29c8] ss:$16 sps:$4 sm:$0xff]  }
 0x59f   : > { %10965 = vmatpush1.bf16.msra.mxu0 %v16429_v24  ;;  %12040 = vmatpush1.bf16.msra.mxu1 %v16432_v25  ;;  %v16530_v24 = vld [vmem:[%s17388_s15 + $0x29e4] ss:$16 sps:$4 sm:$0xff]   ;;  %v16533_v25 = vld [vmem:[%s17388_s15 + $0x29ec] ss:$16 sps:$4 sm:$0xff]  }
 0x5a0   : > { %10977 = vmatprep.subr.bf16.mxu0 %v16440_v26  ;;  %12052 = vmatprep.subr.bf16.mxu1 %v16443_v27  ;;  %v16528_v26 = vld [vmem:[%s17388_s15 + $0x29e0] ss:$16 sps:$4 sm:$0xff]   ;;  %v16531_v27 = vld [vmem:[%s17388_s15 + $0x29e8] ss:$16 sps:$4 sm:$0xff]  }
 0x5a2   : > { %10967 = vmatmul.mubr.bf16.vlgmr.msra.gmra.mrb[0].mxu0 %v16435_v28  ;;  %12042 = vmatmul.mubr.bf16.vlgmr.msra.gmra.mrb[0].mxu1 %v16435_v28  ;;  %v16539_v28 = vld [vmem:[%s17388_s15 + $0x2a04] ss:$16 sps:$4 sm:$0xff]  }
 0x5a3   : > { %10978 = vmatpush1.bf16.msra.mxu0 %v16438_v29  ;;  %12053 = vmatpush1.bf16.msra.mxu1 %v16441_v30  ;;  %v16542_v29 = vld [vmem:[%s17388_s15 + $0x2a0c] ss:$16 sps:$4 sm:$0xff]  }
 0x5a4   : > { %10979 = vmatprep.subr.bf16.mxu0 %v16446_v31  ;;  %12054 = vmatprep.subr.bf16.mxu1 %v16449_v32  ;;  %v16534_v30 = vld [vmem:[%s17386_s12 + $0xa0] ss:$196 sps:$4 sm:$0xff]  }
 0x5a5   : > { %11009 = vmatprep.mubr.bf16.mxu0 %v16536_v33  ;;  %12084 = vmatprep.mubr.bf16.mxu1 %v16536_v33  ;;  %v16537_v31 = vld [vmem:[%s17388_s15 + $0x2a00] ss:$16 sps:$4 sm:$0xff]   ;;  %v16540_v32 = vld [vmem:[%s17388_s15 + $0x2a08] ss:$16 sps:$4 sm:$0xff]   ;;  %v16545_v33 = vld [vmem:[%s17388_s15 + $0x2a24] ss:$16 sps:$4 sm:$0xff]  }
 0x5a7   : > { %10980 = vmatpush1.bf16.msra.mxu0 %v16444_v34  ;;  %12055 = vmatpush1.bf16.msra.mxu1 %v16447_v35  ;;  %v16548_v34 = vld [vmem:[%s17388_s15 + $0x2a2c] ss:$16 sps:$4 sm:$0xff]  }
 0x5a8   : > { %10981 = vmatprep.subr.bf16.mxu0 %v16452_v36  ;;  %12056 = vmatprep.subr.bf16.mxu1 %v16455_v37  ;;  %v16635_v35 = vld [vmem:[%s17386_s12 + $0xac] ss:$196 sps:$4 sm:$0xff]  }
 0x5a9   : > { %v16543_v36 = vld [vmem:[%s17388_s15 + $0x2a20] ss:$16 sps:$4 sm:$0xff]   ;;  %v16546_v37 = vld [vmem:[%s17388_s15 + $0x2a28] ss:$16 sps:$4 sm:$0xff]  }
 0x5ab   : > { %10982 = vmatpush1.bf16.msra.mxu0 %v16450_v38  ;;  %12057 = vmatpush1.bf16.msra.mxu1 %v16453_v39  ;;  %v16551_v38 = vld [vmem:[%s17388_s15 + $0x2a44] ss:$16 sps:$4 sm:$0xff]   ;;  %v16554_v39 = vld [vmem:[%s17388_s15 + $0x2a4c] ss:$16 sps:$4 sm:$0xff]  }
 0x5ac   : > { %10983 = vmatprep.subr.bf16.mxu0 %v16458_v40  ;;  %12058 = vmatprep.subr.bf16.mxu1 %v16461_v41  ;;  %v16549_v40 = vld [vmem:[%s17388_s15 + $0x2a40] ss:$16 sps:$4 sm:$0xff]   ;;  %v16552_v41 = vld [vmem:[%s17388_s15 + $0x2a48] ss:$16 sps:$4 sm:$0xff]  }
 0x5af   : > { %10984 = vmatpush1.bf16.msra.mxu0 %v16456_v42  ;;  %12059 = vmatpush1.bf16.msra.mxu1 %v16459_v43  ;;  %v16557_v42 = vld [vmem:[%s17388_s15 + $0x2a64] ss:$16 sps:$4 sm:$0xff]   ;;  %v16560_v43 = vld [vmem:[%s17388_s15 + $0x2a6c] ss:$16 sps:$4 sm:$0xff]  }
 0x5b0   : > { %10985 = vmatprep.subr.bf16.mxu0 %v16464_v44  ;;  %12060 = vmatprep.subr.bf16.mxu1 %v16467_v45  ;;  %v16555_v44 = vld [vmem:[%s17388_s15 + $0x2a60] ss:$16 sps:$4 sm:$0xff]   ;;  %v16558_v45 = vld [vmem:[%s17388_s15 + $0x2a68] ss:$16 sps:$4 sm:$0xff]  }
 0x5b3   : > { %10986 = vmatpush1.bf16.msra.mxu0 %v16462_v46  ;;  %12061 = vmatpush1.bf16.msra.mxu1 %v16465_v47  ;;  %v16563_v46 = vld [vmem:[%s17388_s15 + $0x2a84] ss:$16 sps:$4 sm:$0xff]   ;;  %v16566_v47 = vld [vmem:[%s17388_s15 + $0x2a8c] ss:$16 sps:$4 sm:$0xff]  }
 0x5b4   : > { %10987 = vmatprep.subr.bf16.mxu0 %v16470_v48  ;;  %12062 = vmatprep.subr.bf16.mxu1 %v16473_v49  ;;  %v16561_v48 = vld [vmem:[%s17388_s15 + $0x2a80] ss:$16 sps:$4 sm:$0xff]   ;;  %v16564_v49 = vld [vmem:[%s17388_s15 + $0x2a88] ss:$16 sps:$4 sm:$0xff]  }
 0x5b7   : > { %10988 = vmatpush1.bf16.msra.mxu0 %v16468_v50  ;;  %12063 = vmatpush1.bf16.msra.mxu1 %v16471_v51  ;;  %v16569_v50 = vld [vmem:[%s17388_s15 + $0x2aa4] ss:$16 sps:$4 sm:$0xff]   ;;  %v16572_v51 = vld [vmem:[%s17388_s15 + $0x2aac] ss:$16 sps:$4 sm:$0xff]  }
 0x5b8   : > { %10989 = vmatprep.subr.bf16.mxu0 %v16476_v52  ;;  %12064 = vmatprep.subr.bf16.mxu1 %v16479_v53  ;;  %v16567_v52 = vld [vmem:[%s17388_s15 + $0x2aa0] ss:$16 sps:$4 sm:$0xff]   ;;  %v16570_v53 = vld [vmem:[%s17388_s15 + $0x2aa8] ss:$16 sps:$4 sm:$0xff]  }
 0x5bb   : > { %10990 = vmatpush1.bf16.msra.mxu0 %v16474_v54  ;;  %12065 = vmatpush1.bf16.msra.mxu1 %v16477_v55  ;;  %v16575_v54 = vld [vmem:[%s17388_s15 + $0x2ac4] ss:$16 sps:$4 sm:$0xff]   ;;  %v16578_v55 = vld [vmem:[%s17388_s15 + $0x2acc] ss:$16 sps:$4 sm:$0xff]  }
 0x5bc   : > { %10991 = vmatprep.subr.bf16.mxu0 %v16482_v56  ;;  %12066 = vmatprep.subr.bf16.mxu1 %v16485_v57  ;;  %v16573_v56 = vld [vmem:[%s17388_s15 + $0x2ac0] ss:$16 sps:$4 sm:$0xff]   ;;  %v16576_v57 = vld [vmem:[%s17388_s15 + $0x2ac8] ss:$16 sps:$4 sm:$0xff]  }
 0x5bf   : > { %10992 = vmatpush1.bf16.msra.mxu0 %v16480_v58  ;;  %12067 = vmatpush1.bf16.msra.mxu1 %v16483_v59  ;;  %v16581_v58 = vld [vmem:[%s17388_s15 + $0x2ae4] ss:$16 sps:$4 sm:$0xff]   ;;  %v16584_v59 = vld [vmem:[%s17388_s15 + $0x2aec] ss:$16 sps:$4 sm:$0xff]  }
 0x5c0   : > { %10993 = vmatprep.subr.bf16.mxu0 %v16488_v60  ;;  %12068 = vmatprep.subr.bf16.mxu1 %v16491_v61  ;;  %v16579_v60 = vld [vmem:[%s17388_s15 + $0x2ae0] ss:$16 sps:$4 sm:$0xff]   ;;  %v16582_v61 = vld [vmem:[%s17388_s15 + $0x2ae8] ss:$16 sps:$4 sm:$0xff]  }
 0x5c3   : > { %10994 = vmatpush1.bf16.msra.mxu0 %v16486_v62  ;;  %12069 = vmatpush1.bf16.msra.mxu1 %v16489_v63  ;;  %v16587_v62 = vld [vmem:[%s17388_s15 + $0x2b04] ss:$16 sps:$4 sm:$0xff]   ;;  %v16590_v63 = vld [vmem:[%s17388_s15 + $0x2b0c] ss:$16 sps:$4 sm:$0xff]  }
 0x5c4   : > { %10995 = vmatprep.subr.bf16.mxu0 %v16494_v0  ;;  %12070 = vmatprep.subr.bf16.mxu1 %v16497_v1  ;;  %v16585_v0 = vld [vmem:[%s17388_s15 + $0x2b00] ss:$16 sps:$4 sm:$0xff]   ;;  %v16588_v1 = vld [vmem:[%s17388_s15 + $0x2b08] ss:$16 sps:$4 sm:$0xff]  }
 0x5c7   : > { %10996 = vmatpush1.bf16.msra.mxu0 %v16492_v2  ;;  %12071 = vmatpush1.bf16.msra.mxu1 %v16495_v3  ;;  %v16593_v2 = vld [vmem:[%s17388_s15 + $0x2b24] ss:$16 sps:$4 sm:$0xff]   ;;  %v16596_v3 = vld [vmem:[%s17388_s15 + $0x2b2c] ss:$16 sps:$4 sm:$0xff]  }
 0x5c8   : > { %10997 = vmatprep.subr.bf16.mxu0 %v16500_v4  ;;  %12072 = vmatprep.subr.bf16.mxu1 %v16503_v5  ;;  %v16591_v4 = vld [vmem:[%s17388_s15 + $0x2b20] ss:$16 sps:$4 sm:$0xff]   ;;  %v16594_v5 = vld [vmem:[%s17388_s15 + $0x2b28] ss:$16 sps:$4 sm:$0xff]  }
 0x5cb   : > { %10998 = vmatpush1.bf16.msra.mxu0 %v16498_v6  ;;  %12073 = vmatpush1.bf16.msra.mxu1 %v16501_v7  ;;  %v16599_v6 = vld [vmem:[%s17388_s15 + $0x2b44] ss:$16 sps:$4 sm:$0xff]   ;;  %v16602_v7 = vld [vmem:[%s17388_s15 + $0x2b4c] ss:$16 sps:$4 sm:$0xff]  }
 0x5cc   : > { %10999 = vmatprep.subr.bf16.mxu0 %v16506_v8  ;;  %12074 = vmatprep.subr.bf16.mxu1 %v16509_v9  ;;  %v16597_v8 = vld [vmem:[%s17388_s15 + $0x2b40] ss:$16 sps:$4 sm:$0xff]   ;;  %v16600_v9 = vld [vmem:[%s17388_s15 + $0x2b48] ss:$16 sps:$4 sm:$0xff]  }
 0x5cf   : > { %11000 = vmatpush1.bf16.msra.mxu0 %v16504_v10  ;;  %12075 = vmatpush1.bf16.msra.mxu1 %v16507_v11  ;;  %v16605_v10 = vld [vmem:[%s17388_s15 + $0x2b64] ss:$16 sps:$4 sm:$0xff]   ;;  %v16608_v11 = vld [vmem:[%s17388_s15 + $0x2b6c] ss:$16 sps:$4 sm:$0xff]  }
 0x5d0   : > { %11001 = vmatprep.subr.bf16.mxu0 %v16512_v12  ;;  %12076 = vmatprep.subr.bf16.mxu1 %v16515_v13  ;;  %v16603_v12 = vld [vmem:[%s17388_s15 + $0x2b60] ss:$16 sps:$4 sm:$0xff]   ;;  %v16606_v13 = vld [vmem:[%s17388_s15 + $0x2b68] ss:$16 sps:$4 sm:$0xff]  }
 0x5d3   : > { %11002 = vmatpush1.bf16.msra.mxu0 %v16510_v14  ;;  %12077 = vmatpush1.bf16.msra.mxu1 %v16513_v15  ;;  %v16611_v14 = vld [vmem:[%s17388_s15 + $0x2b84] ss:$16 sps:$4 sm:$0xff]   ;;  %v16614_v15 = vld [vmem:[%s17388_s15 + $0x2b8c] ss:$16 sps:$4 sm:$0xff]  }
 0x5d4   : > { %11003 = vmatprep.subr.bf16.mxu0 %v16518_v16  ;;  %12078 = vmatprep.subr.bf16.mxu1 %v16521_v17  ;;  %v16609_v16 = vld [vmem:[%s17388_s15 + $0x2b80] ss:$16 sps:$4 sm:$0xff]   ;;  %v16612_v17 = vld [vmem:[%s17388_s15 + $0x2b88] ss:$16 sps:$4 sm:$0xff]  }
 0x5d7   : > { %11004 = vmatpush1.bf16.msra.mxu0 %v16516_v18  ;;  %12079 = vmatpush1.bf16.msra.mxu1 %v16519_v19  ;;  %v16617_v18 = vld [vmem:[%s17388_s15 + $0x2ba4] ss:$16 sps:$4 sm:$0xff]   ;;  %v16620_v19 = vld [vmem:[%s17388_s15 + $0x2bac] ss:$16 sps:$4 sm:$0xff]  }
 0x5d8   : > { %11005 = vmatprep.subr.bf16.mxu0 %v16524_v20  ;;  %12080 = vmatprep.subr.bf16.mxu1 %v16527_v21  ;;  %v16615_v20 = vld [vmem:[%s17388_s15 + $0x2ba0] ss:$16 sps:$4 sm:$0xff]   ;;  %v16618_v21 = vld [vmem:[%s17388_s15 + $0x2ba8] ss:$16 sps:$4 sm:$0xff]  }
 0x5db   : > { %11006 = vmatpush1.bf16.msra.mxu0 %v16522_v22  ;;  %12081 = vmatpush1.bf16.msra.mxu1 %v16525_v23  ;;  %v16623_v22 = vld [vmem:[%s17388_s15 + $0x2bc4] ss:$16 sps:$4 sm:$0xff]   ;;  %v16626_v23 = vld [vmem:[%s17388_s15 + $0x2bcc] ss:$16 sps:$4 sm:$0xff]  }
 0x5dc   : > { %11007 = vmatprep.subr.bf16.mxu0 %v16530_v24  ;;  %12082 = vmatprep.subr.bf16.mxu1 %v16533_v25  ;;  %v16621_v24 = vld [vmem:[%s17388_s15 + $0x2bc0] ss:$16 sps:$4 sm:$0xff]   ;;  %v16624_v25 = vld [vmem:[%s17388_s15 + $0x2bc8] ss:$16 sps:$4 sm:$0xff]  }
 0x5df   : > { %11008 = vmatpush1.bf16.msra.mxu0 %v16528_v26  ;;  %12083 = vmatpush1.bf16.msra.mxu1 %v16531_v27  ;;  %v16629_v26 = vld [vmem:[%s17388_s15 + $0x2be4] ss:$16 sps:$4 sm:$0xff]   ;;  %v16632_v27 = vld [vmem:[%s17388_s15 + $0x2bec] ss:$16 sps:$4 sm:$0xff]  }
 0x5e0   : > { %11020 = vmatprep.subr.bf16.mxu0 %v16539_v28  ;;  %12095 = vmatprep.subr.bf16.mxu1 %v16542_v29  ;;  %v16627_v28 = vld [vmem:[%s17388_s15 + $0x2be0] ss:$16 sps:$4 sm:$0xff]   ;;  %v16630_v29 = vld [vmem:[%s17388_s15 + $0x2be8] ss:$16 sps:$4 sm:$0xff]  }
 0x5e2   : > { %11010 = vmatmul.mubr.bf16.vlgmr.msra.gmra.mrb[0].mxu0 %v16534_v30  ;;  %12085 = vmatmul.mubr.bf16.vlgmr.msra.gmra.mrb[0].mxu1 %v16534_v30  ;;  %v16638_v30 = vld [vmem:[%s17388_s15 + $0x2c04] ss:$16 sps:$4 sm:$0xff]  }
 0x5e3   : > { %11021 = vmatpush1.bf16.msra.mxu0 %v16537_v31  ;;  %12096 = vmatpush1.bf16.msra.mxu1 %v16540_v32  ;;  %v16641_v31 = vld [vmem:[%s17388_s15 + $0x2c0c] ss:$16 sps:$4 sm:$0xff]  }
 0x5e4   : > { %11022 = vmatprep.subr.bf16.mxu0 %v16545_v33  ;;  %12097 = vmatprep.subr.bf16.mxu1 %v16548_v34  ;;  %v16633_v32 = vld [vmem:[%s17386_s12 + $0xa8] ss:$196 sps:$4 sm:$0xff]  }
 0x5e5   : > { %11052 = vmatprep.mubr.bf16.mxu0 %v16635_v35  ;;  %12127 = vmatprep.mubr.bf16.mxu1 %v16635_v35  ;;  %v16636_v33 = vld [vmem:[%s17388_s15 + $0x2c00] ss:$16 sps:$4 sm:$0xff]   ;;  %v16639_v34 = vld [vmem:[%s17388_s15 + $0x2c08] ss:$16 sps:$4 sm:$0xff]   ;;  %v16644_v35 = vld [vmem:[%s17388_s15 + $0x2c24] ss:$16 sps:$4 sm:$0xff]  }
 0x5e7   : > { %11023 = vmatpush1.bf16.msra.mxu0 %v16543_v36  ;;  %12098 = vmatpush1.bf16.msra.mxu1 %v16546_v37  ;;  %v16647_v36 = vld [vmem:[%s17388_s15 + $0x2c2c] ss:$16 sps:$4 sm:$0xff]  }
 0x5e8   : > { %11024 = vmatprep.subr.bf16.mxu0 %v16551_v38  ;;  %12099 = vmatprep.subr.bf16.mxu1 %v16554_v39  ;;  %v16734_v37 = vld [vmem:[%s17386_s12 + $0xb4] ss:$196 sps:$4 sm:$0xff]  }
 0x5e9   : > { %v16642_v38 = vld [vmem:[%s17388_s15 + $0x2c20] ss:$16 sps:$4 sm:$0xff]   ;;  %v16645_v39 = vld [vmem:[%s17388_s15 + $0x2c28] ss:$16 sps:$4 sm:$0xff]  }
 0x5eb   : > { %11025 = vmatpush1.bf16.msra.mxu0 %v16549_v40  ;;  %12100 = vmatpush1.bf16.msra.mxu1 %v16552_v41  ;;  %v16650_v40 = vld [vmem:[%s17388_s15 + $0x2c44] ss:$16 sps:$4 sm:$0xff]   ;;  %v16653_v41 = vld [vmem:[%s17388_s15 + $0x2c4c] ss:$16 sps:$4 sm:$0xff]  }
 0x5ec   : > { %11026 = vmatprep.subr.bf16.mxu0 %v16557_v42  ;;  %12101 = vmatprep.subr.bf16.mxu1 %v16560_v43  ;;  %v16648_v42 = vld [vmem:[%s17388_s15 + $0x2c40] ss:$16 sps:$4 sm:$0xff]   ;;  %v16651_v43 = vld [vmem:[%s17388_s15 + $0x2c48] ss:$16 sps:$4 sm:$0xff]  }
 0x5ef   : > { %11027 = vmatpush1.bf16.msra.mxu0 %v16555_v44  ;;  %12102 = vmatpush1.bf16.msra.mxu1 %v16558_v45  ;;  %v16656_v44 = vld [vmem:[%s17388_s15 + $0x2c64] ss:$16 sps:$4 sm:$0xff]   ;;  %v16659_v45 = vld [vmem:[%s17388_s15 + $0x2c6c] ss:$16 sps:$4 sm:$0xff]  }
 0x5f0   : > { %11028 = vmatprep.subr.bf16.mxu0 %v16563_v46  ;;  %12103 = vmatprep.subr.bf16.mxu1 %v16566_v47  ;;  %v16654_v46 = vld [vmem:[%s17388_s15 + $0x2c60] ss:$16 sps:$4 sm:$0xff]   ;;  %v16657_v47 = vld [vmem:[%s17388_s15 + $0x2c68] ss:$16 sps:$4 sm:$0xff]  }
 0x5f3   : > { %11029 = vmatpush1.bf16.msra.mxu0 %v16561_v48  ;;  %12104 = vmatpush1.bf16.msra.mxu1 %v16564_v49  ;;  %v16662_v48 = vld [vmem:[%s17388_s15 + $0x2c84] ss:$16 sps:$4 sm:$0xff]   ;;  %v16665_v49 = vld [vmem:[%s17388_s15 + $0x2c8c] ss:$16 sps:$4 sm:$0xff]  }
 0x5f4   : > { %11030 = vmatprep.subr.bf16.mxu0 %v16569_v50  ;;  %12105 = vmatprep.subr.bf16.mxu1 %v16572_v51  ;;  %v16660_v50 = vld [vmem:[%s17388_s15 + $0x2c80] ss:$16 sps:$4 sm:$0xff]   ;;  %v16663_v51 = vld [vmem:[%s17388_s15 + $0x2c88] ss:$16 sps:$4 sm:$0xff]  }
 0x5f7   : > { %11031 = vmatpush1.bf16.msra.mxu0 %v16567_v52  ;;  %12106 = vmatpush1.bf16.msra.mxu1 %v16570_v53  ;;  %v16668_v52 = vld [vmem:[%s17388_s15 + $0x2ca4] ss:$16 sps:$4 sm:$0xff]   ;;  %v16671_v53 = vld [vmem:[%s17388_s15 + $0x2cac] ss:$16 sps:$4 sm:$0xff]  }
 0x5f8   : > { %11032 = vmatprep.subr.bf16.mxu0 %v16575_v54  ;;  %12107 = vmatprep.subr.bf16.mxu1 %v16578_v55  ;;  %v16666_v54 = vld [vmem:[%s17388_s15 + $0x2ca0] ss:$16 sps:$4 sm:$0xff]   ;;  %v16669_v55 = vld [vmem:[%s17388_s15 + $0x2ca8] ss:$16 sps:$4 sm:$0xff]  }
 0x5fb   : > { %11033 = vmatpush1.bf16.msra.mxu0 %v16573_v56  ;;  %12108 = vmatpush1.bf16.msra.mxu1 %v16576_v57  ;;  %v16674_v56 = vld [vmem:[%s17388_s15 + $0x2cc4] ss:$16 sps:$4 sm:$0xff]   ;;  %v16677_v57 = vld [vmem:[%s17388_s15 + $0x2ccc] ss:$16 sps:$4 sm:$0xff]  }
 0x5fc   : > { %11034 = vmatprep.subr.bf16.mxu0 %v16581_v58  ;;  %12109 = vmatprep.subr.bf16.mxu1 %v16584_v59  ;;  %v16672_v58 = vld [vmem:[%s17388_s15 + $0x2cc0] ss:$16 sps:$4 sm:$0xff]   ;;  %v16675_v59 = vld [vmem:[%s17388_s15 + $0x2cc8] ss:$16 sps:$4 sm:$0xff]  }
 0x5ff   : > { %11035 = vmatpush1.bf16.msra.mxu0 %v16579_v60  ;;  %12110 = vmatpush1.bf16.msra.mxu1 %v16582_v61  ;;  %v16680_v60 = vld [vmem:[%s17388_s15 + $0x2ce4] ss:$16 sps:$4 sm:$0xff]   ;;  %v16683_v61 = vld [vmem:[%s17388_s15 + $0x2cec] ss:$16 sps:$4 sm:$0xff]  }
 0x600   : > { %11036 = vmatprep.subr.bf16.mxu0 %v16587_v62  ;;  %12111 = vmatprep.subr.bf16.mxu1 %v16590_v63  ;;  %v16678_v62 = vld [vmem:[%s17388_s15 + $0x2ce0] ss:$16 sps:$4 sm:$0xff]   ;;  %v16681_v63 = vld [vmem:[%s17388_s15 + $0x2ce8] ss:$16 sps:$4 sm:$0xff]  }
 0x603   : > { %11037 = vmatpush1.bf16.msra.mxu0 %v16585_v0  ;;  %12112 = vmatpush1.bf16.msra.mxu1 %v16588_v1  ;;  %v16686_v0 = vld [vmem:[%s17388_s15 + $0x2d04] ss:$16 sps:$4 sm:$0xff]   ;;  %v16689_v1 = vld [vmem:[%s17388_s15 + $0x2d0c] ss:$16 sps:$4 sm:$0xff]  }
 0x604   : > { %11038 = vmatprep.subr.bf16.mxu0 %v16593_v2  ;;  %12113 = vmatprep.subr.bf16.mxu1 %v16596_v3  ;;  %v16684_v2 = vld [vmem:[%s17388_s15 + $0x2d00] ss:$16 sps:$4 sm:$0xff]   ;;  %v16687_v3 = vld [vmem:[%s17388_s15 + $0x2d08] ss:$16 sps:$4 sm:$0xff]  }
 0x607   : > { %11039 = vmatpush1.bf16.msra.mxu0 %v16591_v4  ;;  %12114 = vmatpush1.bf16.msra.mxu1 %v16594_v5  ;;  %v16692_v4 = vld [vmem:[%s17388_s15 + $0x2d24] ss:$16 sps:$4 sm:$0xff]   ;;  %v16695_v5 = vld [vmem:[%s17388_s15 + $0x2d2c] ss:$16 sps:$4 sm:$0xff]  }
 0x608   : > { %11040 = vmatprep.subr.bf16.mxu0 %v16599_v6  ;;  %12115 = vmatprep.subr.bf16.mxu1 %v16602_v7  ;;  %v16690_v6 = vld [vmem:[%s17388_s15 + $0x2d20] ss:$16 sps:$4 sm:$0xff]   ;;  %v16693_v7 = vld [vmem:[%s17388_s15 + $0x2d28] ss:$16 sps:$4 sm:$0xff]  }
 0x60b   : > { %11041 = vmatpush1.bf16.msra.mxu0 %v16597_v8  ;;  %12116 = vmatpush1.bf16.msra.mxu1 %v16600_v9  ;;  %v16698_v8 = vld [vmem:[%s17388_s15 + $0x2d44] ss:$16 sps:$4 sm:$0xff]   ;;  %v16701_v9 = vld [vmem:[%s17388_s15 + $0x2d4c] ss:$16 sps:$4 sm:$0xff]  }
 0x60c   : > { %11042 = vmatprep.subr.bf16.mxu0 %v16605_v10  ;;  %12117 = vmatprep.subr.bf16.mxu1 %v16608_v11  ;;  %v16696_v10 = vld [vmem:[%s17388_s15 + $0x2d40] ss:$16 sps:$4 sm:$0xff]   ;;  %v16699_v11 = vld [vmem:[%s17388_s15 + $0x2d48] ss:$16 sps:$4 sm:$0xff]  }
 0x60f   : > { %11043 = vmatpush1.bf16.msra.mxu0 %v16603_v12  ;;  %12118 = vmatpush1.bf16.msra.mxu1 %v16606_v13  ;;  %v16704_v12 = vld [vmem:[%s17388_s15 + $0x2d64] ss:$16 sps:$4 sm:$0xff]   ;;  %v16707_v13 = vld [vmem:[%s17388_s15 + $0x2d6c] ss:$16 sps:$4 sm:$0xff]  }
 0x610   : > { %11044 = vmatprep.subr.bf16.mxu0 %v16611_v14  ;;  %12119 = vmatprep.subr.bf16.mxu1 %v16614_v15  ;;  %v16702_v14 = vld [vmem:[%s17388_s15 + $0x2d60] ss:$16 sps:$4 sm:$0xff]   ;;  %v16705_v15 = vld [vmem:[%s17388_s15 + $0x2d68] ss:$16 sps:$4 sm:$0xff]  }
 0x613   : > { %11045 = vmatpush1.bf16.msra.mxu0 %v16609_v16  ;;  %12120 = vmatpush1.bf16.msra.mxu1 %v16612_v17  ;;  %v16710_v16 = vld [vmem:[%s17388_s15 + $0x2d84] ss:$16 sps:$4 sm:$0xff]   ;;  %v16713_v17 = vld [vmem:[%s17388_s15 + $0x2d8c] ss:$16 sps:$4 sm:$0xff]  }
 0x614   : > { %11046 = vmatprep.subr.bf16.mxu0 %v16617_v18  ;;  %12121 = vmatprep.subr.bf16.mxu1 %v16620_v19  ;;  %v16708_v18 = vld [vmem:[%s17388_s15 + $0x2d80] ss:$16 sps:$4 sm:$0xff]   ;;  %v16711_v19 = vld [vmem:[%s17388_s15 + $0x2d88] ss:$16 sps:$4 sm:$0xff]  }
 0x617   : > { %11047 = vmatpush1.bf16.msra.mxu0 %v16615_v20  ;;  %12122 = vmatpush1.bf16.msra.mxu1 %v16618_v21  ;;  %v16716_v20 = vld [vmem:[%s17388_s15 + $0x2da4] ss:$16 sps:$4 sm:$0xff]   ;;  %v16719_v21 = vld [vmem:[%s17388_s15 + $0x2dac] ss:$16 sps:$4 sm:$0xff]  }
 0x618   : > { %11048 = vmatprep.subr.bf16.mxu0 %v16623_v22  ;;  %12123 = vmatprep.subr.bf16.mxu1 %v16626_v23  ;;  %v16714_v22 = vld [vmem:[%s17388_s15 + $0x2da0] ss:$16 sps:$4 sm:$0xff]   ;;  %v16717_v23 = vld [vmem:[%s17388_s15 + $0x2da8] ss:$16 sps:$4 sm:$0xff]  }
 0x61b   : > { %11049 = vmatpush1.bf16.msra.mxu0 %v16621_v24  ;;  %12124 = vmatpush1.bf16.msra.mxu1 %v16624_v25  ;;  %v16722_v24 = vld [vmem:[%s17388_s15 + $0x2dc4] ss:$16 sps:$4 sm:$0xff]   ;;  %v16725_v25 = vld [vmem:[%s17388_s15 + $0x2dcc] ss:$16 sps:$4 sm:$0xff]  }
 0x61c   : > { %11050 = vmatprep.subr.bf16.mxu0 %v16629_v26  ;;  %12125 = vmatprep.subr.bf16.mxu1 %v16632_v27  ;;  %v16720_v26 = vld [vmem:[%s17388_s15 + $0x2dc0] ss:$16 sps:$4 sm:$0xff]   ;;  %v16723_v27 = vld [vmem:[%s17388_s15 + $0x2dc8] ss:$16 sps:$4 sm:$0xff]  }
 0x61f   : > { %11051 = vmatpush1.bf16.msra.mxu0 %v16627_v28  ;;  %12126 = vmatpush1.bf16.msra.mxu1 %v16630_v29  ;;  %v16728_v28 = vld [vmem:[%s17388_s15 + $0x2de4] ss:$16 sps:$4 sm:$0xff]   ;;  %v16731_v29 = vld [vmem:[%s17388_s15 + $0x2dec] ss:$16 sps:$4 sm:$0xff]  }
 0x620   : > { %11063 = vmatprep.subr.bf16.mxu0 %v16638_v30  ;;  %12138 = vmatprep.subr.bf16.mxu1 %v16641_v31  ;;  %v16726_v30 = vld [vmem:[%s17388_s15 + $0x2de0] ss:$16 sps:$4 sm:$0xff]   ;;  %v16729_v31 = vld [vmem:[%s17388_s15 + $0x2de8] ss:$16 sps:$4 sm:$0xff]  }
 0x622   : > { %11053 = vmatmul.mubr.bf16.vlgmr.msra.gmra.mrb[0].mxu0 %v16633_v32  ;;  %12128 = vmatmul.mubr.bf16.vlgmr.msra.gmra.mrb[0].mxu1 %v16633_v32  ;;  %v16737_v32 = vld [vmem:[%s17388_s15 + $0x2e04] ss:$16 sps:$4 sm:$0xff]  }
 0x623   : > { %11064 = vmatpush1.bf16.msra.mxu0 %v16636_v33  ;;  %12139 = vmatpush1.bf16.msra.mxu1 %v16639_v34  ;;  %v16740_v33 = vld [vmem:[%s17388_s15 + $0x2e0c] ss:$16 sps:$4 sm:$0xff]  }
 0x624   : > { %11065 = vmatprep.subr.bf16.mxu0 %v16644_v35  ;;  %12140 = vmatprep.subr.bf16.mxu1 %v16647_v36  ;;  %v16732_v34 = vld [vmem:[%s17386_s12 + $0xb0] ss:$196 sps:$4 sm:$0xff]  }
 0x625   : > { %11095 = vmatprep.mubr.bf16.mxu0 %v16734_v37  ;;  %12170 = vmatprep.mubr.bf16.mxu1 %v16734_v37  ;;  %v16735_v35 = vld [vmem:[%s17388_s15 + $0x2e00] ss:$16 sps:$4 sm:$0xff]   ;;  %v16738_v36 = vld [vmem:[%s17388_s15 + $0x2e08] ss:$16 sps:$4 sm:$0xff]   ;;  %v16743_v37 = vld [vmem:[%s17388_s15 + $0x2e24] ss:$16 sps:$4 sm:$0xff]  }
 0x627   : > { %11066 = vmatpush1.bf16.msra.mxu0 %v16642_v38  ;;  %12141 = vmatpush1.bf16.msra.mxu1 %v16645_v39  ;;  %v16746_v38 = vld [vmem:[%s17388_s15 + $0x2e2c] ss:$16 sps:$4 sm:$0xff]  }
 0x628   : > { %11067 = vmatprep.subr.bf16.mxu0 %v16650_v40  ;;  %12142 = vmatprep.subr.bf16.mxu1 %v16653_v41  ;;  %v16833_v39 = vld [vmem:[%s17386_s12 + $0xbc] ss:$196 sps:$4 sm:$0xff]  }
 0x629   : > { %v16741_v40 = vld [vmem:[%s17388_s15 + $0x2e20] ss:$16 sps:$4 sm:$0xff]   ;;  %v16744_v41 = vld [vmem:[%s17388_s15 + $0x2e28] ss:$16 sps:$4 sm:$0xff]  }
 0x62b   : > { %11068 = vmatpush1.bf16.msra.mxu0 %v16648_v42  ;;  %12143 = vmatpush1.bf16.msra.mxu1 %v16651_v43  ;;  %v16749_v42 = vld [vmem:[%s17388_s15 + $0x2e44] ss:$16 sps:$4 sm:$0xff]   ;;  %v16752_v43 = vld [vmem:[%s17388_s15 + $0x2e4c] ss:$16 sps:$4 sm:$0xff]  }
 0x62c   : > { %11069 = vmatprep.subr.bf16.mxu0 %v16656_v44  ;;  %12144 = vmatprep.subr.bf16.mxu1 %v16659_v45  ;;  %v16747_v44 = vld [vmem:[%s17388_s15 + $0x2e40] ss:$16 sps:$4 sm:$0xff]   ;;  %v16750_v45 = vld [vmem:[%s17388_s15 + $0x2e48] ss:$16 sps:$4 sm:$0xff]  }
 0x62f   : > { %11070 = vmatpush1.bf16.msra.mxu0 %v16654_v46  ;;  %12145 = vmatpush1.bf16.msra.mxu1 %v16657_v47  ;;  %v16755_v46 = vld [vmem:[%s17388_s15 + $0x2e64] ss:$16 sps:$4 sm:$0xff]   ;;  %v16758_v47 = vld [vmem:[%s17388_s15 + $0x2e6c] ss:$16 sps:$4 sm:$0xff]  }
 0x630   : > { %11071 = vmatprep.subr.bf16.mxu0 %v16662_v48  ;;  %12146 = vmatprep.subr.bf16.mxu1 %v16665_v49  ;;  %v16753_v48 = vld [vmem:[%s17388_s15 + $0x2e60] ss:$16 sps:$4 sm:$0xff]   ;;  %v16756_v49 = vld [vmem:[%s17388_s15 + $0x2e68] ss:$16 sps:$4 sm:$0xff]  }
 0x633   : > { %11072 = vmatpush1.bf16.msra.mxu0 %v16660_v50  ;;  %12147 = vmatpush1.bf16.msra.mxu1 %v16663_v51  ;;  %v16761_v50 = vld [vmem:[%s17388_s15 + $0x2e84] ss:$16 sps:$4 sm:$0xff]   ;;  %v16764_v51 = vld [vmem:[%s17388_s15 + $0x2e8c] ss:$16 sps:$4 sm:$0xff]  }
 0x634   : > { %11073 = vmatprep.subr.bf16.mxu0 %v16668_v52  ;;  %12148 = vmatprep.subr.bf16.mxu1 %v16671_v53  ;;  %v16759_v52 = vld [vmem:[%s17388_s15 + $0x2e80] ss:$16 sps:$4 sm:$0xff]   ;;  %v16762_v53 = vld [vmem:[%s17388_s15 + $0x2e88] ss:$16 sps:$4 sm:$0xff]  }
 0x637   : > { %11074 = vmatpush1.bf16.msra.mxu0 %v16666_v54  ;;  %12149 = vmatpush1.bf16.msra.mxu1 %v16669_v55  ;;  %v16767_v54 = vld [vmem:[%s17388_s15 + $0x2ea4] ss:$16 sps:$4 sm:$0xff]   ;;  %v16770_v55 = vld [vmem:[%s17388_s15 + $0x2eac] ss:$16 sps:$4 sm:$0xff]  }
 0x638   : > { %11075 = vmatprep.subr.bf16.mxu0 %v16674_v56  ;;  %12150 = vmatprep.subr.bf16.mxu1 %v16677_v57  ;;  %v16765_v56 = vld [vmem:[%s17388_s15 + $0x2ea0] ss:$16 sps:$4 sm:$0xff]   ;;  %v16768_v57 = vld [vmem:[%s17388_s15 + $0x2ea8] ss:$16 sps:$4 sm:$0xff]  }
 0x63b   : > { %11076 = vmatpush1.bf16.msra.mxu0 %v16672_v58  ;;  %12151 = vmatpush1.bf16.msra.mxu1 %v16675_v59  ;;  %v16773_v58 = vld [vmem:[%s17388_s15 + $0x2ec4] ss:$16 sps:$4 sm:$0xff]   ;;  %v16776_v59 = vld [vmem:[%s17388_s15 + $0x2ecc] ss:$16 sps:$4 sm:$0xff]  }
 0x63c   : > { %11077 = vmatprep.subr.bf16.mxu0 %v16680_v60  ;;  %12152 = vmatprep.subr.bf16.mxu1 %v16683_v61  ;;  %v16771_v60 = vld [vmem:[%s17388_s15 + $0x2ec0] ss:$16 sps:$4 sm:$0xff]   ;;  %v16774_v61 = vld [vmem:[%s17388_s15 + $0x2ec8] ss:$16 sps:$4 sm:$0xff]  }
 0x63f   : > { %11078 = vmatpush1.bf16.msra.mxu0 %v16678_v62  ;;  %12153 = vmatpush1.bf16.msra.mxu1 %v16681_v63  ;;  %v16779_v62 = vld [vmem:[%s17388_s15 + $0x2ee4] ss:$16 sps:$4 sm:$0xff]   ;;  %v16782_v63 = vld [vmem:[%s17388_s15 + $0x2eec] ss:$16 sps:$4 sm:$0xff]  }
 0x640   : > { %11079 = vmatprep.subr.bf16.mxu0 %v16686_v0  ;;  %12154 = vmatprep.subr.bf16.mxu1 %v16689_v1  ;;  %v16777_v0 = vld [vmem:[%s17388_s15 + $0x2ee0] ss:$16 sps:$4 sm:$0xff]   ;;  %v16780_v1 = vld [vmem:[%s17388_s15 + $0x2ee8] ss:$16 sps:$4 sm:$0xff]  }
 0x643   : > { %11080 = vmatpush1.bf16.msra.mxu0 %v16684_v2  ;;  %12155 = vmatpush1.bf16.msra.mxu1 %v16687_v3  ;;  %v16785_v2 = vld [vmem:[%s17388_s15 + $0x2f04] ss:$16 sps:$4 sm:$0xff]   ;;  %v16788_v3 = vld [vmem:[%s17388_s15 + $0x2f0c] ss:$16 sps:$4 sm:$0xff]  }
 0x644   : > { %11081 = vmatprep.subr.bf16.mxu0 %v16692_v4  ;;  %12156 = vmatprep.subr.bf16.mxu1 %v16695_v5  ;;  %v16783_v4 = vld [vmem:[%s17388_s15 + $0x2f00] ss:$16 sps:$4 sm:$0xff]   ;;  %v16786_v5 = vld [vmem:[%s17388_s15 + $0x2f08] ss:$16 sps:$4 sm:$0xff]  }
 0x647   : > { %11082 = vmatpush1.bf16.msra.mxu0 %v16690_v6  ;;  %12157 = vmatpush1.bf16.msra.mxu1 %v16693_v7  ;;  %v16791_v6 = vld [vmem:[%s17388_s15 + $0x2f24] ss:$16 sps:$4 sm:$0xff]   ;;  %v16794_v7 = vld [vmem:[%s17388_s15 + $0x2f2c] ss:$16 sps:$4 sm:$0xff]  }
 0x648   : > { %11083 = vmatprep.subr.bf16.mxu0 %v16698_v8  ;;  %12158 = vmatprep.subr.bf16.mxu1 %v16701_v9  ;;  %v16789_v8 = vld [vmem:[%s17388_s15 + $0x2f20] ss:$16 sps:$4 sm:$0xff]   ;;  %v16792_v9 = vld [vmem:[%s17388_s15 + $0x2f28] ss:$16 sps:$4 sm:$0xff]  }
 0x64b   : > { %11084 = vmatpush1.bf16.msra.mxu0 %v16696_v10  ;;  %12159 = vmatpush1.bf16.msra.mxu1 %v16699_v11  ;;  %v16797_v10 = vld [vmem:[%s17388_s15 + $0x2f44] ss:$16 sps:$4 sm:$0xff]   ;;  %v16800_v11 = vld [vmem:[%s17388_s15 + $0x2f4c] ss:$16 sps:$4 sm:$0xff]  }
 0x64c   : > { %11085 = vmatprep.subr.bf16.mxu0 %v16704_v12  ;;  %12160 = vmatprep.subr.bf16.mxu1 %v16707_v13  ;;  %v16795_v12 = vld [vmem:[%s17388_s15 + $0x2f40] ss:$16 sps:$4 sm:$0xff]   ;;  %v16798_v13 = vld [vmem:[%s17388_s15 + $0x2f48] ss:$16 sps:$4 sm:$0xff]  }
 0x64f   : > { %11086 = vmatpush1.bf16.msra.mxu0 %v16702_v14  ;;  %12161 = vmatpush1.bf16.msra.mxu1 %v16705_v15  ;;  %v16803_v14 = vld [vmem:[%s17388_s15 + $0x2f64] ss:$16 sps:$4 sm:$0xff]   ;;  %v16806_v15 = vld [vmem:[%s17388_s15 + $0x2f6c] ss:$16 sps:$4 sm:$0xff]  }
 0x650   : > { %11087 = vmatprep.subr.bf16.mxu0 %v16710_v16  ;;  %12162 = vmatprep.subr.bf16.mxu1 %v16713_v17  ;;  %v16801_v16 = vld [vmem:[%s17388_s15 + $0x2f60] ss:$16 sps:$4 sm:$0xff]   ;;  %v16804_v17 = vld [vmem:[%s17388_s15 + $0x2f68] ss:$16 sps:$4 sm:$0xff]  }
 0x653   : > { %11088 = vmatpush1.bf16.msra.mxu0 %v16708_v18  ;;  %12163 = vmatpush1.bf16.msra.mxu1 %v16711_v19  ;;  %v16809_v18 = vld [vmem:[%s17388_s15 + $0x2f84] ss:$16 sps:$4 sm:$0xff]   ;;  %v16812_v19 = vld [vmem:[%s17388_s15 + $0x2f8c] ss:$16 sps:$4 sm:$0xff]  }
 0x654   : > { %11089 = vmatprep.subr.bf16.mxu0 %v16716_v20  ;;  %12164 = vmatprep.subr.bf16.mxu1 %v16719_v21  ;;  %v16807_v20 = vld [vmem:[%s17388_s15 + $0x2f80] ss:$16 sps:$4 sm:$0xff]   ;;  %v16810_v21 = vld [vmem:[%s17388_s15 + $0x2f88] ss:$16 sps:$4 sm:$0xff]  }
 0x657   : > { %11090 = vmatpush1.bf16.msra.mxu0 %v16714_v22  ;;  %12165 = vmatpush1.bf16.msra.mxu1 %v16717_v23  ;;  %v16815_v22 = vld [vmem:[%s17388_s15 + $0x2fa4] ss:$16 sps:$4 sm:$0xff]   ;;  %v16818_v23 = vld [vmem:[%s17388_s15 + $0x2fac] ss:$16 sps:$4 sm:$0xff]  }
 0x658   : > { %11091 = vmatprep.subr.bf16.mxu0 %v16722_v24  ;;  %12166 = vmatprep.subr.bf16.mxu1 %v16725_v25  ;;  %v16813_v24 = vld [vmem:[%s17388_s15 + $0x2fa0] ss:$16 sps:$4 sm:$0xff]   ;;  %v16816_v25 = vld [vmem:[%s17388_s15 + $0x2fa8] ss:$16 sps:$4 sm:$0xff]  }
 0x65b   : > { %11092 = vmatpush1.bf16.msra.mxu0 %v16720_v26  ;;  %12167 = vmatpush1.bf16.msra.mxu1 %v16723_v27  ;;  %v16821_v26 = vld [vmem:[%s17388_s15 + $0x2fc4] ss:$16 sps:$4 sm:$0xff]   ;;  %v16824_v27 = vld [vmem:[%s17388_s15 + $0x2fcc] ss:$16 sps:$4 sm:$0xff]  }
 0x65c   : > { %11093 = vmatprep.subr.bf16.mxu0 %v16728_v28  ;;  %12168 = vmatprep.subr.bf16.mxu1 %v16731_v29  ;;  %v16819_v28 = vld [vmem:[%s17388_s15 + $0x2fc0] ss:$16 sps:$4 sm:$0xff]   ;;  %v16822_v29 = vld [vmem:[%s17388_s15 + $0x2fc8] ss:$16 sps:$4 sm:$0xff]  }
 0x65f   : > { %11094 = vmatpush1.bf16.msra.mxu0 %v16726_v30  ;;  %12169 = vmatpush1.bf16.msra.mxu1 %v16729_v31  ;;  %v16827_v30 = vld [vmem:[%s17388_s15 + $0x2fe4] ss:$16 sps:$4 sm:$0xff]   ;;  %v16830_v31 = vld [vmem:[%s17388_s15 + $0x2fec] ss:$16 sps:$4 sm:$0xff]  }
 0x660   : > { %11106 = vmatprep.subr.bf16.mxu0 %v16737_v32  ;;  %12181 = vmatprep.subr.bf16.mxu1 %v16740_v33  ;;  %v16825_v32 = vld [vmem:[%s17388_s15 + $0x2fe0] ss:$16 sps:$4 sm:$0xff]   ;;  %v16828_v33 = vld [vmem:[%s17388_s15 + $0x2fe8] ss:$16 sps:$4 sm:$0xff]  }
 0x662   : > { %11096 = vmatmul.mubr.bf16.vlgmr.msra.gmra.mrb[0].mxu0 %v16732_v34  ;;  %12171 = vmatmul.mubr.bf16.vlgmr.msra.gmra.mrb[0].mxu1 %v16732_v34  ;;  %v16836_v34 = vld [vmem:[%s17388_s15 + $0x3004] ss:$16 sps:$4 sm:$0xff]  }
 0x663   : > { %11107 = vmatpush1.bf16.msra.mxu0 %v16735_v35  ;;  %12182 = vmatpush1.bf16.msra.mxu1 %v16738_v36  ;;  %v16839_v35 = vld [vmem:[%s17388_s15 + $0x300c] ss:$16 sps:$4 sm:$0xff]  }
 0x664   : > { %11108 = vmatprep.subr.bf16.mxu0 %v16743_v37  ;;  %12183 = vmatprep.subr.bf16.mxu1 %v16746_v38  ;;  %v16831_v36 = vld [vmem:[%s17386_s12 + $0xb8] ss:$196 sps:$4 sm:$0xff]  }
 0x665   : > { %11138 = vmatprep.mubr.bf16.mxu0 %v16833_v39  ;;  %12213 = vmatprep.mubr.bf16.mxu1 %v16833_v39  ;;  %v16834_v37 = vld [vmem:[%s17388_s15 + $0x3000] ss:$16 sps:$4 sm:$0xff]   ;;  %v16837_v38 = vld [vmem:[%s17388_s15 + $0x3008] ss:$16 sps:$4 sm:$0xff]   ;;  %v16842_v39 = vld [vmem:[%s17388_s15 + $0x3024] ss:$16 sps:$4 sm:$0xff]  }
 0x667   : > { %11109 = vmatpush1.bf16.msra.mxu0 %v16741_v40  ;;  %12184 = vmatpush1.bf16.msra.mxu1 %v16744_v41  ;;  %v16845_v40 = vld [vmem:[%s17388_s15 + $0x302c] ss:$16 sps:$4 sm:$0xff]   ;;  %v16840_v41 = vld [vmem:[%s17388_s15 + $0x3020] ss:$16 sps:$4 sm:$0xff]  }
 0x668   : > { %11110 = vmatprep.subr.bf16.mxu0 %v16749_v42  ;;  %12185 = vmatprep.subr.bf16.mxu1 %v16752_v43  ;;  %v16843_v42 = vld [vmem:[%s17388_s15 + $0x3028] ss:$16 sps:$4 sm:$0xff]   ;;  %v16848_v43 = vld [vmem:[%s17388_s15 + $0x3044] ss:$16 sps:$4 sm:$0xff]  }
 0x66b   : > { %11111 = vmatpush1.bf16.msra.mxu0 %v16747_v44  ;;  %12186 = vmatpush1.bf16.msra.mxu1 %v16750_v45  ;;  %v16851_v44 = vld [vmem:[%s17388_s15 + $0x304c] ss:$16 sps:$4 sm:$0xff]   ;;  %v17057_v45 = vmov 0  }
 0x66c   : > { %11112 = vmatprep.subr.bf16.mxu0 %v16755_v46  ;;  %12187 = vmatprep.subr.bf16.mxu1 %v16758_v47  ;;  %v16846_v46 = vld [vmem:[%s17388_s15 + $0x3040] ss:$16 sps:$4 sm:$0xff]   ;;  %v16849_v47 = vld [vmem:[%s17388_s15 + $0x3048] ss:$16 sps:$4 sm:$0xff]  }
 0x66f   : > { %11113 = vmatpush1.bf16.msra.mxu0 %v16753_v48  ;;  %12188 = vmatpush1.bf16.msra.mxu1 %v16756_v49  ;;  %v16854_v48 = vld [vmem:[%s17388_s15 + $0x3064] ss:$16 sps:$4 sm:$0xff]   ;;  %v16857_v49 = vld [vmem:[%s17388_s15 + $0x306c] ss:$16 sps:$4 sm:$0xff]  }
 0x670   : > { %11114 = vmatprep.subr.bf16.mxu0 %v16761_v50  ;;  %12189 = vmatprep.subr.bf16.mxu1 %v16764_v51  ;;  %v16852_v50 = vld [vmem:[%s17388_s15 + $0x3060] ss:$16 sps:$4 sm:$0xff]   ;;  %v16855_v51 = vld [vmem:[%s17388_s15 + $0x3068] ss:$16 sps:$4 sm:$0xff]  }
 0x673   : > { %11115 = vmatpush1.bf16.msra.mxu0 %v16759_v52  ;;  %12190 = vmatpush1.bf16.msra.mxu1 %v16762_v53  ;;  %v16860_v52 = vld [vmem:[%s17388_s15 + $0x3084] ss:$16 sps:$4 sm:$0xff]   ;;  %v16863_v53 = vld [vmem:[%s17388_s15 + $0x308c] ss:$16 sps:$4 sm:$0xff]  }
 0x674   : > { %11116 = vmatprep.subr.bf16.mxu0 %v16767_v54  ;;  %12191 = vmatprep.subr.bf16.mxu1 %v16770_v55  ;;  %v16858_v54 = vld [vmem:[%s17388_s15 + $0x3080] ss:$16 sps:$4 sm:$0xff]   ;;  %v16861_v55 = vld [vmem:[%s17388_s15 + $0x3088] ss:$16 sps:$4 sm:$0xff]  }
 0x677   : > { %11117 = vmatpush1.bf16.msra.mxu0 %v16765_v56  ;;  %12192 = vmatpush1.bf16.msra.mxu1 %v16768_v57  ;;  %v16866_v56 = vld [vmem:[%s17388_s15 + $0x30a4] ss:$16 sps:$4 sm:$0xff]   ;;  %v16869_v57 = vld [vmem:[%s17388_s15 + $0x30ac] ss:$16 sps:$4 sm:$0xff]  }
 0x678   : > { %11118 = vmatprep.subr.bf16.mxu0 %v16773_v58  ;;  %12193 = vmatprep.subr.bf16.mxu1 %v16776_v59  ;;  %v16864_v58 = vld [vmem:[%s17388_s15 + $0x30a0] ss:$16 sps:$4 sm:$0xff]   ;;  %v16867_v59 = vld [vmem:[%s17388_s15 + $0x30a8] ss:$16 sps:$4 sm:$0xff]  }
 0x67b   : > { %11119 = vmatpush1.bf16.msra.mxu0 %v16771_v60  ;;  %12194 = vmatpush1.bf16.msra.mxu1 %v16774_v61  ;;  %v16872_v60 = vld [vmem:[%s17388_s15 + $0x30c4] ss:$16 sps:$4 sm:$0xff]   ;;  %v16875_v61 = vld [vmem:[%s17388_s15 + $0x30cc] ss:$16 sps:$4 sm:$0xff]  }
 0x67c   : > { %11120 = vmatprep.subr.bf16.mxu0 %v16779_v62  ;;  %12195 = vmatprep.subr.bf16.mxu1 %v16782_v63  ;;  %v16870_v62 = vld [vmem:[%s17388_s15 + $0x30c0] ss:$16 sps:$4 sm:$0xff]   ;;  %v16873_v63 = vld [vmem:[%s17388_s15 + $0x30c8] ss:$16 sps:$4 sm:$0xff]  }
 0x67f   : > { %11121 = vmatpush1.bf16.msra.mxu0 %v16777_v0  ;;  %12196 = vmatpush1.bf16.msra.mxu1 %v16780_v1  ;;  %v16878_v0 = vld [vmem:[%s17388_s15 + $0x30e4] ss:$16 sps:$4 sm:$0xff]   ;;  %v16881_v1 = vld [vmem:[%s17388_s15 + $0x30ec] ss:$16 sps:$4 sm:$0xff]  }
 0x680   : > { %11122 = vmatprep.subr.bf16.mxu0 %v16785_v2  ;;  %12197 = vmatprep.subr.bf16.mxu1 %v16788_v3  ;;  %v16876_v2 = vld [vmem:[%s17388_s15 + $0x30e0] ss:$16 sps:$4 sm:$0xff]   ;;  %v16879_v3 = vld [vmem:[%s17388_s15 + $0x30e8] ss:$16 sps:$4 sm:$0xff]  }
 0x683   : > { %11123 = vmatpush1.bf16.msra.mxu0 %v16783_v4  ;;  %12198 = vmatpush1.bf16.msra.mxu1 %v16786_v5  ;;  %v16882_v4 = vld [vmem:[%s17386_s12 + $0xc0] ss:$196 sps:$4 sm:$0xff]   ;;  %v405_v5 = vld [vmem:[%s17401_s27] sm:$0xff] }
 0x684   : > { %11124 = vmatprep.subr.bf16.mxu0 %v16791_v6  ;;  %12199 = vmatprep.subr.bf16.mxu1 %v16794_v7  ;;  %v407_v6 = vld [vmem:[%s17401_s27 + $0x10] sm:$0xff]  ;;  %v406_v7 = vld [vmem:[%s17401_s27 + $0x8] sm:$0xff] }
 0x687   : > { %11125 = vmatpush1.bf16.msra.mxu0 %v16789_v8  ;;  %12200 = vmatpush1.bf16.msra.mxu1 %v16792_v9  ;;  %v408_v8 = vld [vmem:[%s17401_s27 + $0x18] sm:$0xff] }
 0x688   : > { %11126 = vmatprep.subr.bf16.mxu0 %v16797_v10  ;;  %12201 = vmatprep.subr.bf16.mxu1 %v16800_v11  ;;  %v409_v11 = vld [vmem:[%s17401_s27 + $0x20] sm:$0xff] }
 0x68b   : > { %11127 = vmatpush1.bf16.msra.mxu0 %v16795_v12  ;;  %12202 = vmatpush1.bf16.msra.mxu1 %v16798_v13  ;;  %v411_v12 = vld [vmem:[%s17401_s27 + $0x30] sm:$0xff] }
 0x68c   : > { %11128 = vmatprep.subr.bf16.mxu0 %v16803_v14  ;;  %12203 = vmatprep.subr.bf16.mxu1 %v16806_v15 }
 0x68f   : > { %11129 = vmatpush1.bf16.msra.mxu0 %v16801_v16  ;;  %12204 = vmatpush1.bf16.msra.mxu1 %v16804_v17  ;;  %v410_v17 = vld [vmem:[%s17401_s27 + $0x28] sm:$0xff] }
 0x690   : > { %11130 = vmatprep.subr.bf16.mxu0 %v16809_v18  ;;  %12205 = vmatprep.subr.bf16.mxu1 %v16812_v19  ;;  %v412_v18 = vld [vmem:[%s17401_s27 + $0x38] sm:$0xff] }
 0x693   : > { %11131 = vmatpush1.bf16.msra.mxu0 %v16807_v20  ;;  %12206 = vmatpush1.bf16.msra.mxu1 %v16810_v21 }
 0x694   : > { %11132 = vmatprep.subr.bf16.mxu0 %v16815_v22  ;;  %12207 = vmatprep.subr.bf16.mxu1 %v16818_v23 }
 0x697   : > { %11133 = vmatpush1.bf16.msra.mxu0 %v16813_v24  ;;  %12208 = vmatpush1.bf16.msra.mxu1 %v16816_v25 }
 0x698   : > { %11134 = vmatprep.subr.bf16.mxu0 %v16821_v26  ;;  %12209 = vmatprep.subr.bf16.mxu1 %v16824_v27 }
 0x69b   : > { %11135 = vmatpush1.bf16.msra.mxu0 %v16819_v28  ;;  %12210 = vmatpush1.bf16.msra.mxu1 %v16822_v29  ;;  %v12297_v29 = vlaneseq (!%p14139_p7) }
 0x69c   : > { %11136 = vmatprep.subr.bf16.mxu0 %v16827_v30  ;;  %12211 = vmatprep.subr.bf16.mxu1 %v16830_v31  ;;  %v12295_v31 = vld [vmem:[%s17395_s8] sm:$0xf] (!%p14139_p7) }
 0x69d   : > { %v12298_v30 = vshrl.u32 (!%p14139_p7), %v12297_v29, 7 }
 0x69f   : > { %11137 = vmatpush1.bf16.msra.mxu0 %v16825_v32  ;;  %12212 = vmatpush1.bf16.msra.mxu1 %v16828_v33  ;;  %v12299_v33 = vsub.s32 (!%p14139_p7), 0, %v12298_v30 }
 0x6a0   : > { %11149 = vmatprep.subr.bf16.mxu0 %v16836_v34  ;;  %12224 = vmatprep.subr.bf16.mxu1 %v16839_v35  ;;  %v12303_v35 = vsub.s32 (!%p14139_p7), 1, %v12298_v30 }
 0x6a2   : > { %11139 = vmatmul.mubr.bf16.vlgmr.msra.gmra.mrb[0].mxu0 %v16831_v36  ;;  %12214 = vmatmul.mubr.bf16.vlgmr.msra.gmra.mrb[0].mxu1 %v16831_v36  ;;  %v12307_v36 = vsub.s32 (!%p14139_p7), 2, %v12298_v30 }
 0x6a3   : > { %11150 = vmatpush1.bf16.msra.mxu0 %v16834_v37  ;;  %12225 = vmatpush1.bf16.msra.mxu1 %v16837_v38  ;;  %v12311_v37 = vsub.s32 (!%p14139_p7), 3, %v12298_v30 }
 0x6a4   : > { %11151 = vmatprep.subr.bf16.mxu0 %v16842_v39  ;;  %12226 = vmatprep.subr.bf16.mxu1 %v16845_v40 }
 0x6a5   : > { %11181 = vmatprep.mubr.bf16.mxu0 %v17057_v45  ;;  %12256 = vmatprep.mubr.bf16.mxu1 %v17057_v45 }
 0x6a7   : > { %11152 = vmatpush1.bf16.msra.mxu0 %v16840_v41  ;;  %12227 = vmatpush1.bf16.msra.mxu1 %v16843_v42  ;;  %v12300_v41 = vrot.slane (!%p14139_p7), %v12295_v31, %v12299_v33  ;;  %v12304_v42 = vrot.slane (!%p14139_p7), %v12295_v31, %v12303_v35 }
 0x6a8   : > { %11153 = vmatprep.subr.bf16.mxu0 %v16848_v43  ;;  %12228 = vmatprep.subr.bf16.mxu1 %v16851_v44  ;;  %v12308_v43 = vrot.slane (!%p14139_p7), %v12295_v31, %v12307_v36  ;;  %v12312_v44 = vrot.slane (!%p14139_p7), %v12295_v31, %v12311_v37 }
 0x6ab   : > { %11154 = vmatpush1.bf16.msra.mxu0 %v16846_v46  ;;  %12229 = vmatpush1.bf16.msra.mxu1 %v16849_v47 }
 0x6ac   : > { %11155 = vmatprep.subr.bf16.mxu0 %v16854_v48  ;;  %12230 = vmatprep.subr.bf16.mxu1 %v16857_v49 }
 0x6af   : > { %11156 = vmatpush1.bf16.msra.mxu0 %v16852_v50  ;;  %12231 = vmatpush1.bf16.msra.mxu1 %v16855_v51 }
 0x6b0   : > { %11157 = vmatprep.subr.bf16.mxu0 %v16860_v52  ;;  %12232 = vmatprep.subr.bf16.mxu1 %v16863_v53 }
 0x6b3   : > { %11158 = vmatpush1.bf16.msra.mxu0 %v16858_v54  ;;  %12233 = vmatpush1.bf16.msra.mxu1 %v16861_v55 }
 0x6b4   : > { %11159 = vmatprep.subr.bf16.mxu0 %v16866_v56  ;;  %12234 = vmatprep.subr.bf16.mxu1 %v16869_v57 }
 0x6b7   : > { %11160 = vmatpush1.bf16.msra.mxu0 %v16864_v58  ;;  %12235 = vmatpush1.bf16.msra.mxu1 %v16867_v59 }
 0x6b8   : > { %11161 = vmatprep.subr.bf16.mxu0 %v16872_v60  ;;  %12236 = vmatprep.subr.bf16.mxu1 %v16875_v61 }
 0x6bb   : > { %11162 = vmatpush1.bf16.msra.mxu0 %v16870_v62  ;;  %12237 = vmatpush1.bf16.msra.mxu1 %v16873_v63 }
 0x6bc   : > { %11163 = vmatprep.subr.bf16.mxu0 %v16878_v0  ;;  %12238 = vmatprep.subr.bf16.mxu1 %v16881_v1 }
 0x6bf   : > { %11164 = vmatpush1.bf16.msra.mxu0 %v16876_v2  ;;  %12239 = vmatpush1.bf16.msra.mxu1 %v16879_v3 }
 0x6c2   : > { %11182 = vmatmul.mubr.bf16.vlgmr.msra.gmra.mrb[0].mxu0 %v16882_v4  ;;  %12257 = vmatmul.mubr.bf16.vlgmr.msra.gmra.mrb[0].mxu1 %v16882_v4 }
 0x795   : > { %v11183_v9 = vpop.f32.mrb[0].mxu0  ;;  %v12258_v10 = vpop.f32.mrb[0].mxu1  ;;  %12286 = sbr.rel (%p14139_p7) target bundleno = 1960 (0x7a8), region = 74 }
 0x796   : > { %v12267_v13 = vadd.f32 %v11183_v9, %v405_v5  ;;  %v12269_v14 = vadd.f32 %v12258_v10, %v407_v6  ;;  %v11185_v15 = vpop.f32.mrb[1].mxu0  ;;  %v12260_v16 = vpop.f32.mrb[1].mxu1 }
 0x797   : > { %v12268_v19 = vadd.f32 %v11185_v15, %v406_v7  ;;  %v12270_v20 = vadd.f32 %v12260_v16, %v408_v8  ;;  %v11187_v21 = vpop.f32.mrb[2].mxu0  ;;  %v12262_v22 = vpop.f32.mrb[2].mxu1 }
 0x798   : > { %12275 = vst [vmem:[%s17401_s27] sm:$0xff] %v12267_v13  ;;  %12277 = vst [vmem:[%s17401_s27 + $0x10] sm:$0xff] %v12269_v14  ;;  %v12271_v23 = vadd.f32 %v11187_v21, %v409_v11  ;;  %v12273_v24 = vadd.f32 %v12262_v22, %v411_v12  ;;  %v11189_v25 = vpop.f32.mrb[3].mxu0  ;;  %v12264_v26 = vpop.f32.mrb[3].mxu1 }
 0x799   : > { %12276 = vst [vmem:[%s17401_s27 + $0x8] sm:$0xff] %v12268_v19  ;;  %12278 = vst [vmem:[%s17401_s27 + $0x18] sm:$0xff] %v12270_v20  ;;  %v12272_v27 = vadd.f32 %v11189_v25, %v410_v17  ;;  %v12274_v28 = vadd.f32 %v12264_v26, %v412_v18 }
 0x79a   : > { %12279 = vst [vmem:[%s17401_s27 + $0x20] sm:$0xff] %v12271_v23  ;;  %12281 = vst [vmem:[%s17401_s27 + $0x30] sm:$0xff] %v12273_v24 }
 0x79b   : > { %12280 = vst [vmem:[%s17401_s27 + $0x28] sm:$0xff] %v12272_v27  ;;  %12282 = vst [vmem:[%s17401_s27 + $0x38] sm:$0xff] %v12274_v28 }
 0x79f   : > { %v12287_v32 = vld [vmem:[%s17401_s27] sm:$0xff]  ;;  %v12289_v38 = vld [vmem:[%s17401_s27 + $0x10] sm:$0xff] }
 0x7a0   : > { %v12288_v34 = vld [vmem:[%s17401_s27 + $0x8] sm:$0xff]  ;;  %v12290_v39 = vld [vmem:[%s17401_s27 + $0x18] sm:$0xff]  ;;  %v12317_v48 = vadd.f32 %v12300_v41, %v12287_v32  ;;  %v12319_v50 = vadd.f32 %v12308_v43, %v12289_v38 }
 0x7a1   : > { %v12291_v40 = vld [vmem:[%s17401_s27 + $0x20] sm:$0xff]  ;;  %v12293_v46 = vld [vmem:[%s17401_s27 + $0x30] sm:$0xff]  ;;  %v12318_v49 = vadd.f32 %v12304_v42, %v12288_v34  ;;  %v12320_v51 = vadd.f32 %v12312_v44, %v12290_v39 }
 0x7a2   : > { %v12292_v45 = vld [vmem:[%s17401_s27 + $0x28] sm:$0xff]  ;;  %v12294_v47 = vld [vmem:[%s17401_s27 + $0x38] sm:$0xff]  ;;  %v12321_v52 = vadd.f32 %v12300_v41, %v12291_v40  ;;  %v12323_v54 = vadd.f32 %v12308_v43, %v12293_v46  ;;  %v12325_v56 = vmax.f32 %v12317_v48, 0.0  ;;  %v12327_v58 = vmax.f32 %v12319_v50, 0.0 }
 0x7a3   : > { %v12322_v53 = vadd.f32 %v12304_v42, %v12292_v45  ;;  %v12324_v55 = vadd.f32 %v12312_v44, %v12294_v47  ;;  %v12326_v57 = vmax.f32 %v12318_v49, 0.0  ;;  %v12328_v59 = vmax.f32 %v12320_v51, 0.0 }
 0x7a4   : > { %v12329_v60 = vmax.f32 %v12321_v52, 0.0  ;;  %v12331_v62 = vmax.f32 %v12323_v54, 0.0  ;;  %12333 = vst [vmem:[%s17401_s27] sm:$0xff] %v12325_v56  ;;  %12335 = vst [vmem:[%s17401_s27 + $0x10] sm:$0xff] %v12327_v58 }
 0x7a5   : > { %v12330_v61 = vmax.f32 %v12322_v53, 0.0  ;;  %v12332_v63 = vmax.f32 %v12324_v55, 0.0  ;;  %12334 = vst [vmem:[%s17401_s27 + $0x8] sm:$0xff] %v12326_v57  ;;  %12336 = vst [vmem:[%s17401_s27 + $0x18] sm:$0xff] %v12328_v59 }
 0x7a6   : > { %12337 = vst [vmem:[%s17401_s27 + $0x20] sm:$0xff] %v12329_v60  ;;  %12339 = vst [vmem:[%s17401_s27 + $0x30] sm:$0xff] %v12331_v62 }
 0x7a7   : > { %12338 = vst [vmem:[%s17401_s27 + $0x28] sm:$0xff] %v12330_v61  ;;  %12340 = vst [vmem:[%s17401_s27 + $0x38] sm:$0xff] %v12332_v63 }
 0x7a8 PF: > { %p19153_p2 = scmp.ne.s32.totalorder %s19148_s4, 0 }
 0x7a9   : > { %s14148_s20 = sshll.u32 (%p19153_p2), %s17037_s21, 5 }
 0x7aa   : > { %12347 = sbr.rel (!%p19153_p2) target bundleno = 1969 (0x7b1), region = 78  ;;  %s12350_s30 = scalar_lea.vmem (%p19153_p2), %s19125_s3, %s14148_s20 }
 0x7ab   : > { %v12363_v0 = vld [vmem:[%s17401_s27] sm:$0xff] (%p19153_p2)  ;;  %v12367_v2 = vld [vmem:[%s17401_s27 + $0x10] sm:$0xff] (%p19153_p2) }
 0x7ac   : > { %v12365_v1 = vld [vmem:[%s17401_s27 + $0x8] sm:$0xff] (%p19153_p2)  ;;  %v12369_v3 = vld [vmem:[%s17401_s27 + $0x18] sm:$0xff] (%p19153_p2)  ;;  %12364 = vst [vmem:[%s12350_s30] sm:$0xff] (%p19153_p2), %v12363_v0  ;;  %12368 = vst [vmem:[%s12350_s30 + $0x10] sm:$0xff] (%p19153_p2), %v12367_v2 }
 0x7ad   : > { %v12371_v4 = vld [vmem:[%s17401_s27 + $0x20] sm:$0xff] (%p19153_p2)  ;;  %12366 = vst [vmem:[%s12350_s30 + $0x8] sm:$0xff] (%p19153_p2), %v12365_v1  ;;  %12370 = vst [vmem:[%s12350_s30 + $0x18] sm:$0xff] (%p19153_p2), %v12369_v3  ;;  %v12375_v6 = vld [vmem:[%s17401_s27 + $0x30] sm:$0xff] (%p19153_p2) }
 0x7ae   : > { %v12373_v5 = vld [vmem:[%s17401_s27 + $0x28] sm:$0xff] (%p19153_p2)  ;;  %12372 = vst [vmem:[%s12350_s30 + $0x40] sm:$0xff] (%p19153_p2), %v12371_v4  ;;  %v12377_v7 = vld [vmem:[%s17401_s27 + $0x38] sm:$0xff] (%p19153_p2)  ;;  %12376 = vst [vmem:[%s12350_s30 + $0x50] sm:$0xff] (%p19153_p2), %v12375_v6 }
 0x7af   : > { %12374 = vst [vmem:[%s12350_s30 + $0x48] sm:$0xff] (%p19153_p2), %v12373_v5  ;;  %12378 = vst [vmem:[%s12350_s30 + $0x58] sm:$0xff] (%p19153_p2), %v12377_v7 }
 0x7b1 PF: > { %s19_s24 = sadd.s32 1, %s17049_s24   ;;  %s19155_s4 = sld [smem:[#allocation17_spill]] }
 0x7b2   : > { %p19078_p5 = scmp.ge.s32.totalorder %s19_s24, 6   ;;  %s19156_s17 = sld [smem:[#allocation10_spill]] }
 0x7b3   : > { %s19157_s0 = sld [smem:[#allocation16_spill]]  ;;  %s19158_s18 = sld [smem:[#allocation11_spill]] }
 0x7b4   : > { %s19159_s19 = sld [smem:[#allocation15_spill]]  ;;  %s19160_s20 = sld [smem:[#allocation12_spill]] }
 0x7b5   : > { %s19161_s22 = sld [smem:[#allocation13_spill]]  ;;  %s19162_s25 = sld [smem:[#allocation14_spill]] }
 0x7b6   : > { %s19164_s12 = smov %s17005_s13  ;;  %s19165_s13 = smov %s17009_s14 }
 0x7b7   : > { %s19166_s14 = smov %s19155_s4  ;;  %s19167_s15 = smov %s17017_s16 }
 0x7b8   : > { %s19168_s16 = smov %s19156_s17  ;;  %s19170_s21 = smov %s17045_s23 }
 0x7b9   : > { %s19169_s17 = smov %s19157_s0  ;;  %18 = sbr.rel (!%p19078_p5) target bundleno = 13 (0xd), region = 156 }
 0x7bb   : > { %s19171_s23 = smov %s19162_s25 }
 0x7c0   :  { %12394 = vsyncpa [#allocation4], 1 }
 0x7c1   :  { %12396 = vsyncpa [#allocation4 + $0x1], 1 }
 0x7c2   :  { %12397 = vsyncpa [#allocation6], 1 }
 0x7c3   :  { %12399 = vsyncpa [#allocation6 + $0x1], 1 }

</bundles_post_ra>
